<compile_context>
chip_gen: v6e
topology: v6e:2x2x1
jax: 0.10.0
libtpu: 0.0.40
codegen_flags: <defaults>
</compile_context>

<pallas_src>
import functools

import jax
import jax.numpy as jnp
from jax.experimental import pallas as pl
from jax.experimental.pallas import tpu as pltpu


# ---------------------------------------------------------------------------
# Fused kernel: conv7 + relu7 + fc8 + relu8 + drop8(eval) + fc9 + bias
# ---------------------------------------------------------------------------

def _placenavnet_kernel(p_ref, wc_ref, bc_ref, w8_ref, b8_ref, w9_ref, b9_ref,
                        o_ref, acc_ref, *, sp_per_step):
    """One grid step owns `sp_per_step` conv output positions and the matching
    fc8 weight rows; the fc8 contraction accumulates into a resident f32
    scratch, and fc9 (+bias) runs in the last-step epilogue."""
    k = pl.program_id(0)

    @pl.when(k == 0)
    def _():
        acc_ref[...] = jnp.zeros_like(acc_ref)

    # conv7 + relu7 for this step's spatial positions, immediately contracted
    # against the matching fc8 weight slab (static unrolled loop).
    for j in range(sp_per_step):
        conv_j = jnp.dot(p_ref[j].astype(jnp.bfloat16), wc_ref[...],
                         preferred_element_type=jnp.float32)            # (B, 512)
        h_j = jnp.maximum(conv_j + bc_ref[...], 0.0).astype(jnp.bfloat16)
        acc_ref[...] += jnp.dot(h_j, w8_ref[j],
                                preferred_element_type=jnp.float32)     # (B, 1024)

    @pl.when(k == pl.num_programs(0) - 1)
    def _():
        h8 = jnp.maximum(acc_ref[...] + b8_ref[...], 0.0)
        # drop8: Dropout(p=0.5) is identity in eval mode.
        o_ref[...] = (jnp.dot(h8.astype(jnp.bfloat16), w9_ref[...],
                              preferred_element_type=jnp.float32)
                      + b9_ref[...])


def placenavnet_fused(p, wc, bc, w8, b8, w9p, b9p, *, sp_per_step=3):
    """p: (9, B, 2048) f32 im2col patches (spatial-major),
    wc: (2048, 512) bf16, bc: (1, 512) f32,
    w8: (9, 512, 1024) bf16 (rows permuted to the NCHW flatten), b8: (1, 1024),
    w9p: (1024, NCP) bf16 lane-padded, b9p: (1, NCP) f32.
    Returns padded logits (B, NCP) f32."""
    S, B, KC = p.shape
    Sw, OC, N8 = w8.shape
    N8w, NCP = w9p.shape
    assert Sw == S and wc.shape == (KC, OC) and N8w == N8
    assert bc.shape == (1, OC) and b8.shape == (1, N8) and b9p.shape == (1, NCP)
    if S % sp_per_step != 0:
        sp_per_step = S
    nsteps = S // sp_per_step

    kernel = functools.partial(_placenavnet_kernel, sp_per_step=sp_per_step)
    return pl.pallas_call(
        kernel,
        out_shape=jax.ShapeDtypeStruct((B, NCP), jnp.float32),
        grid_spec=pltpu.PrefetchScalarGridSpec(
            num_scalar_prefetch=0,
            grid=(nsteps,),
            in_specs=[
                pl.BlockSpec((sp_per_step, B, KC), lambda k: (k, 0, 0)),   # patches
                pl.BlockSpec((KC, OC), lambda k: (0, 0)),                  # conv7 w (resident)
                pl.BlockSpec((1, OC), lambda k: (0, 0)),                   # conv7 b
                pl.BlockSpec((sp_per_step, OC, N8), lambda k: (k, 0, 0)),  # fc8 w (streamed)
                pl.BlockSpec((1, N8), lambda k: (0, 0)),                   # fc8 b
                pl.BlockSpec((N8, NCP), lambda k: (0, 0)),                 # fc9 w (resident)
                pl.BlockSpec((1, NCP), lambda k: (0, 0)),                  # fc9 b
            ],
            out_specs=pl.BlockSpec((B, NCP), lambda k: (0, 0)),
            scratch_shapes=[pltpu.VMEM((B, N8), jnp.float32)],
        ),
        compiler_params=pltpu.CompilerParams(
            # Single K-reduction axis; the resident accumulator / output make
            # it order-dependent, so it must stay "arbitrary".
            dimension_semantics=("arbitrary",),
        ),
    )(p, wc, bc, w8, b8, w9p, b9p)


# ---------------------------------------------------------------------------
# Parameters
# ---------------------------------------------------------------------------

def init_params(key, num_classes=6):
    """Deterministic synthetic parameters in the PyTorch (reference) layout."""
    ks = jax.random.split(key, 6)
    scale = 0.02
    return {
        # conv7: Conv2d(512, 512, kernel=(2,2), stride=(2,2))
        "conv7_w": scale * jax.random.normal(ks[0], (512, 512, 2, 2), jnp.float32),
        "conv7_b": scale * jax.random.normal(ks[1], (512,), jnp.float32),
        # fc8: Linear(512*3*3 -> 1024)
        "fc8_w": scale * jax.random.normal(ks[2], (1024, 512 * 3 * 3), jnp.float32),
        "fc8_b": scale * jax.random.normal(ks[3], (1024,), jnp.float32),
        # fc9: Linear(1024 -> num_classes)
        "fc9_w": scale * jax.random.normal(ks[4], (num_classes, 1024), jnp.float32),
        "fc9_b": scale * jax.random.normal(ks[5], (num_classes,), jnp.float32),
    }


def prepare_kernel_params(params):
    """One-time layout + dtype prep (outside the forward hot path).

    * conv7_w -> (IC*KH*KW, OC) bf16, matching the im2col patch column order.
    * fc8_w   -> (9, 512, 1024) bf16 with fc8_w_prep[s, c, o] = fc8_w[o, c*9+s],
                 i.e. the NCHW flatten of the conv output is folded into the
                 weight layout; slab s is consumed with conv output position s.
    * fc9_w/b -> lane-padded to a multiple of 128 output columns, bf16 / f32.
    * biases stay f32, reshaped 2-D where the kernel broadcasts them.
    """
    OC, IC, KH, KW = params["conv7_w"].shape            # (512, 512, 2, 2)
    NC, N8 = params["fc9_w"].shape                      # (num_classes, 1024)
    OHW = 9                                             # 3 x 3 output positions
    ncp = ((NC + 127) // 128) * 128                     # lane-dense fc9 output

    wc = params["conv7_w"].reshape(OC, IC * KH * KW).T              # (2048, 512)
    w8 = params["fc8_w"].reshape(N8, OC, OHW)                       # [o, c, s]
    w8 = jnp.transpose(w8, (2, 1, 0))                               # (9, 512, 1024)
    w9 = jnp.zeros((N8, ncp), jnp.float32).at[:, :NC].set(params["fc9_w"].T)
    b9 = jnp.zeros((1, ncp), jnp.float32).at[0, :NC].set(params["fc9_b"])

    return {
        "conv7_w": wc.astype(jnp.bfloat16),
        "conv7_b": params["conv7_b"].reshape(1, OC).astype(jnp.float32),
        "fc8_w": w8.astype(jnp.bfloat16),
        "fc8_b": params["fc8_b"].reshape(1, N8).astype(jnp.float32),
        "fc9_w": w9.astype(jnp.bfloat16),
        "fc9_b": b9.astype(jnp.float32),
    }


# ---------------------------------------------------------------------------
# Forward pass
# ---------------------------------------------------------------------------

def placenavnet_forward(x, kparams, *, num_classes=6):
    """x: (B, 512, 6, 6) NCHW float32 -> (B, num_classes) float32."""
    B, C, H, W = x.shape
    assert (C, H, W) == (512, 6, 6), "conv7 + fc8 imply a (B, 512, 6, 6) input"
    OH, OW, KH, KW = 3, 3, 2, 2

    # im2col for the 2x2/stride-2 conv (stride == kernel -> pure block
    # reshape + transpose of the 144 KB activation), laid out spatial-major
    # (s, b, c*kh*kw) so the kernel needs no in-kernel relayout.
    # TODO(synk): this is the only remaining non-Pallas op in the hot path.
    p = x.reshape(B, C, OH, KH, OW, KW)
    p = jnp.transpose(p, (2, 4, 0, 1, 3, 5))             # (OH, OW, B, C, KH, KW)
    p = p.reshape(OH * OW, B, C * KH * KW)               # (9, B, 2048)

    out_pad = placenavnet_fused(
        p,
        kparams["conv7_w"], kparams["conv7_b"],
        kparams["fc8_w"], kparams["fc8_b"],
        kparams["fc9_w"], kparams["fc9_b"],
    )
    return out_pad[:, :num_classes]


# ---------------------------------------------------------------------------
# Pure-JAX references
# ---------------------------------------------------------------------------

def placenavnet_reference(x, params, *, emulate_bf16=False):
    """PyTorch-layout reference.  With emulate_bf16=True, inputs to every
    matmul are rounded to bf16 (accumulation stays f32), matching the kernel's
    numerics for a tight comparison."""
    def q(a):
        return a.astype(jnp.bfloat16).astype(jnp.float32) if emulate_bf16 else a

    hp = jax.lax.Precision.HIGHEST
    B = x.shape[0]
    y = jax.lax.conv_general_dilated(
        q(x), q(params["conv7_w"]), window_strides=(2, 2), padding="VALID",
        dimension_numbers=("NCHW", "OIHW", "NCHW"), precision=hp,
    ) + params["conv7_b"][None, :, None, None]
    y = jnp.maximum(y, 0.0).reshape(B, 512 * 3 * 3)
    y = jnp.maximum(
        jnp.dot(q(y), q(params["fc8_w"].T), precision=hp) + params["fc8_b"], 0.0)
    return jnp.dot(q(y), q(params["fc9_w"].T), precision=hp) + params["fc9_b"]


if __name__ == "__main__":
    key = jax.random.PRNGKey(0)
    k_in, k_p = jax.random.split(key)

    B, num_classes = 2, 6
    x = jax.random.normal(k_in, (B, 512, 6, 6), jnp.float32)
    params = init_params(k_p, num_classes=num_classes)
    kparams = prepare_kernel_params(params)

    fwd = jax.jit(placenavnet_forward, static_argnames=("num_classes",))
    out = jax.block_until_ready(fwd(x, kparams, num_classes=num_classes))
    assert out.shape == (B, num_classes), out.shape

    # Tight check vs a reference emulating the kernel's bf16-in / f32-accum math.
    ref_q = placenavnet_reference(x, params, emulate_bf16=True)
    err_q = float(jnp.max(jnp.abs(out - ref_q)))
    assert jnp.allclose(out, ref_q, atol=1e-3, rtol=1e-3), err_q

    # Loose check vs the full-f32 PyTorch-equivalent reference (difference is
    # the deliberate bf16 weight quantization).
    ref = placenavnet_reference(x, params, emulate_bf16=False)
    err = float(jnp.max(jnp.abs(out - ref)))
    assert jnp.allclose(out, ref, atol=5e-2, rtol=5e-2), err

    print("KERNEL_OK")
</pallas_src>

<mosaic_0001>
module attributes {stable_mosaic.version = 11 : i64} {
  func.func @_placenavnet_kernel(%arg0: i32, %arg1: memref<3x2x2048xf32, #tpu.memory_space<vmem>>, %arg2: memref<2048x512xbf16, #tpu.memory_space<vmem>>, %arg3: memref<1x512xf32, #tpu.memory_space<vmem>>, %arg4: memref<3x512x1024xbf16, #tpu.memory_space<vmem>>, %arg5: memref<1x1024xf32, #tpu.memory_space<vmem>>, %arg6: memref<1024x128xbf16, #tpu.memory_space<vmem>>, %arg7: memref<1x128xf32, #tpu.memory_space<vmem>>, %arg8: memref<2x128xf32, #tpu.memory_space<vmem>>, %arg9: memref<2x1024xf32, #tpu.memory_space<vmem>>) attributes {dimension_semantics = [#tpu.dimension_semantics<arbitrary>], iteration_bounds = array<i64: 3>, scalar_prefetch = 0 : i64, scratch_operands = 1 : i64, tpu.core_type = #tpu.core_type<tc>, window_params = [{transform_indices = @transform_0, window_bounds = array<i64: 3, 2, 2048>}, {pipeline_mode = #tpu.pipeline_mode<synchronous>, transform_indices = @transform_1, window_bounds = array<i64: 2048, 512>}, {pipeline_mode = #tpu.pipeline_mode<synchronous>, transform_indices = @transform_2, window_bounds = array<i64: 1, 512>}, {transform_indices = @transform_3, window_bounds = array<i64: 3, 512, 1024>}, {pipeline_mode = #tpu.pipeline_mode<synchronous>, transform_indices = @transform_4, window_bounds = array<i64: 1, 1024>}, {pipeline_mode = #tpu.pipeline_mode<synchronous>, transform_indices = @transform_5, window_bounds = array<i64: 1024, 128>}, {pipeline_mode = #tpu.pipeline_mode<synchronous>, transform_indices = @transform_6, window_bounds = array<i64: 1, 128>}, {pipeline_mode = #tpu.pipeline_mode<synchronous>, transform_indices = @transform_7, window_bounds = array<i64: 2, 128>}]} {
    %c0_i32 = arith.constant 0 : i32
    %0 = arith.cmpi eq, %arg0, %c0_i32 : i32
    %1 = arith.extui %0 : i1 to i32
    %c0_i32_0 = arith.constant 0 : i32
    %2 = arith.cmpi ne, %1, %c0_i32_0 : i32
    scf.if %2 {
      %cst_49 = arith.constant 0.000000e+00 : f32
      %57 = vector.broadcast %cst_49 : f32 to vector<2x1024xf32>
      %c0_50 = arith.constant 0 : index
      %c0_51 = arith.constant 0 : index
      %58 = vector.load %arg9[%c0_50, %c0_51] : memref<2x1024xf32, #tpu.memory_space<vmem>>, vector<2x1024xf32>
      tpu.vector_store %arg9[%c0_50, %c0_51], %57 {strides = array<i32>} : memref<2x1024xf32, #tpu.memory_space<vmem>>, vector<2x1024xf32>,
    } else {
    }
    %c0 = arith.constant 0 : index
    %c0_1 = arith.constant 0 : index
    %c0_2 = arith.constant 0 : index
    %3 = vector.load %arg1[%c0, %c0_1, %c0_2] : memref<3x2x2048xf32, #tpu.memory_space<vmem>>, vector<1x2x2048xf32>
    %4 = vector.shape_cast %3 : vector<1x2x2048xf32> to vector<2x2048xf32>
    %5 = arith.truncf %4 : vector<2x2048xf32> to vector<2x2048xbf16>
    %c0_3 = arith.constant 0 : index
    %c0_4 = arith.constant 0 : index
    %6 = vector.load %arg2[%c0_3, %c0_4] : memref<2048x512xbf16, #tpu.memory_space<vmem>>, vector<2048x512xbf16>
    %cst = arith.constant dense<0.000000e+00> : vector<2x512xf32>
    %7 = tpu.matmul %5, %6, %cst {dimension_numbers = #tpu.dot_dimension_numbers<[1], [0], [0], [1], [0, 0, 1, 1], [], []>} : vector<2x2048xbf16>, vector<2048x512xbf16>, vector<2x512xf32> -> vector<2x512xf32>
    %c0_5 = arith.constant 0 : index
    %c0_6 = arith.constant 0 : index
    %8 = vector.load %arg3[%c0_5, %c0_6] : memref<1x512xf32, #tpu.memory_space<vmem>>, vector<1x512xf32>
    %9 = vector.broadcast %8 : vector<1x512xf32> to vector<2x512xf32>
    %10 = arith.addf %7, %9 : vector<2x512xf32>
    %cst_7 = arith.constant 0.000000e+00 : f32
    %11 = vector.broadcast %cst_7 : f32 to vector<2x512xf32>
    %12 = arith.maximumf %10, %11 : vector<2x512xf32>
    %13 = arith.truncf %12 : vector<2x512xf32> to vector<2x512xbf16>
    %c0_8 = arith.constant 0 : index
    %c0_9 = arith.constant 0 : index
    %14 = vector.load %arg9[%c0_8, %c0_9] : memref<2x1024xf32, #tpu.memory_space<vmem>>, vector<2x1024xf32>
    %c0_10 = arith.constant 0 : index
    %c0_11 = arith.constant 0 : index
    %c0_12 = arith.constant 0 : index
    %15 = vector.load %arg4[%c0_10, %c0_11, %c0_12] : memref<3x512x1024xbf16, #tpu.memory_space<vmem>>, vector<1x512x1024xbf16>
    %16 = vector.shape_cast %15 : vector<1x512x1024xbf16> to vector<512x1024xbf16>
    %cst_13 = arith.constant dense<0.000000e+00> : vector<2x1024xf32>
    %17 = tpu.matmul %13, %16, %cst_13 {dimension_numbers = #tpu.dot_dimension_numbers<[1], [0], [0], [1], [0, 0, 1, 1], [], []>} : vector<2x512xbf16>, vector<512x1024xbf16>, vector<2x1024xf32> -> vector<2x1024xf32>
    %18 = arith.addf %14, %17 : vector<2x1024xf32>
    %c0_14 = arith.constant 0 : index
    %c0_15 = arith.constant 0 : index
    %19 = vector.load %arg9[%c0_14, %c0_15] : memref<2x1024xf32, #tpu.memory_space<vmem>>, vector<2x1024xf32>
    tpu.vector_store %arg9[%c0_14, %c0_15], %18 {strides = array<i32>} : memref<2x1024xf32, #tpu.memory_space<vmem>>, vector<2x1024xf32>,
    %c1 = arith.constant 1 : index
    %c0_16 = arith.constant 0 : index
    %c0_17 = arith.constant 0 : index
    %20 = vector.load %arg1[%c1, %c0_16, %c0_17] : memref<3x2x2048xf32, #tpu.memory_space<vmem>>, vector<1x2x2048xf32>
    %21 = vector.shape_cast %20 : vector<1x2x2048xf32> to vector<2x2048xf32>
    %22 = arith.truncf %21 : vector<2x2048xf32> to vector<2x2048xbf16>
    %c0_18 = arith.constant 0 : index
    %c0_19 = arith.constant 0 : index
    %23 = vector.load %arg2[%c0_18, %c0_19] : memref<2048x512xbf16, #tpu.memory_space<vmem>>, vector<2048x512xbf16>
    %cst_20 = arith.constant dense<0.000000e+00> : vector<2x512xf32>
    %24 = tpu.matmul %22, %23, %cst_20 {dimension_numbers = #tpu.dot_dimension_numbers<[1], [0], [0], [1], [0, 0, 1, 1], [], []>} : vector<2x2048xbf16>, vector<2048x512xbf16>, vector<2x512xf32> -> vector<2x512xf32>
    %c0_21 = arith.constant 0 : index
    %c0_22 = arith.constant 0 : index
    %25 = vector.load %arg3[%c0_21, %c0_22] : memref<1x512xf32, #tpu.memory_space<vmem>>, vector<1x512xf32>
    %26 = vector.broadcast %25 : vector<1x512xf32> to vector<2x512xf32>
    %27 = arith.addf %24, %26 : vector<2x512xf32>
    %cst_23 = arith.constant 0.000000e+00 : f32
    %28 = vector.broadcast %cst_23 : f32 to vector<2x512xf32>
    %29 = arith.maximumf %27, %28 : vector<2x512xf32>
    %30 = arith.truncf %29 : vector<2x512xf32> to vector<2x512xbf16>
    %c0_24 = arith.constant 0 : index
    %c0_25 = arith.constant 0 : index
    %31 = vector.load %arg9[%c0_24, %c0_25] : memref<2x1024xf32, #tpu.memory_space<vmem>>, vector<2x1024xf32>
    %c1_26 = arith.constant 1 : index
    %c0_27 = arith.constant 0 : index
    %c0_28 = arith.constant 0 : index
    %32 = vector.load %arg4[%c1_26, %c0_27, %c0_28] : memref<3x512x1024xbf16, #tpu.memory_space<vmem>>, vector<1x512x1024xbf16>
    %33 = vector.shape_cast %32 : vector<1x512x1024xbf16> to vector<512x1024xbf16>
    %cst_29 = arith.constant dense<0.000000e+00> : vector<2x1024xf32>
    %34 = tpu.matmul %30, %33, %cst_29 {dimension_numbers = #tpu.dot_dimension_numbers<[1], [0], [0], [1], [0, 0, 1, 1], [], []>} : vector<2x512xbf16>, vector<512x1024xbf16>, vector<2x1024xf32> -> vector<2x1024xf32>
    %35 = arith.addf %31, %34 : vector<2x1024xf32>
    %c0_30 = arith.constant 0 : index
    %c0_31 = arith.constant 0 : index
    %36 = vector.load %arg9[%c0_30, %c0_31] : memref<2x1024xf32, #tpu.memory_space<vmem>>, vector<2x1024xf32>
    tpu.vector_store %arg9[%c0_30, %c0_31], %35 {strides = array<i32>} : memref<2x1024xf32, #tpu.memory_space<vmem>>, vector<2x1024xf32>,
    %c2 = arith.constant 2 : index
    %c0_32 = arith.constant 0 : index
    %c0_33 = arith.constant 0 : index
    %37 = vector.load %arg1[%c2, %c0_32, %c0_33] : memref<3x2x2048xf32, #tpu.memory_space<vmem>>, vector<1x2x2048xf32>
    %38 = vector.shape_cast %37 : vector<1x2x2048xf32> to vector<2x2048xf32>
    %39 = arith.truncf %38 : vector<2x2048xf32> to vector<2x2048xbf16>
    %c0_34 = arith.constant 0 : index
    %c0_35 = arith.constant 0 : index
    %40 = vector.load %arg2[%c0_34, %c0_35] : memref<2048x512xbf16, #tpu.memory_space<vmem>>, vector<2048x512xbf16>
    %cst_36 = arith.constant dense<0.000000e+00> : vector<2x512xf32>
    %41 = tpu.matmul %39, %40, %cst_36 {dimension_numbers = #tpu.dot_dimension_numbers<[1], [0], [0], [1], [0, 0, 1, 1], [], []>} : vector<2x2048xbf16>, vector<2048x512xbf16>, vector<2x512xf32> -> vector<2x512xf32>
    %c0_37 = arith.constant 0 : index
    %c0_38 = arith.constant 0 : index
    %42 = vector.load %arg3[%c0_37, %c0_38] : memref<1x512xf32, #tpu.memory_space<vmem>>, vector<1x512xf32>
    %43 = vector.broadcast %42 : vector<1x512xf32> to vector<2x512xf32>
    %44 = arith.addf %41, %43 : vector<2x512xf32>
    %cst_39 = arith.constant 0.000000e+00 : f32
    %45 = vector.broadcast %cst_39 : f32 to vector<2x512xf32>
    %46 = arith.maximumf %44, %45 : vector<2x512xf32>
    %47 = arith.truncf %46 : vector<2x512xf32> to vector<2x512xbf16>
    %c0_40 = arith.constant 0 : index
    %c0_41 = arith.constant 0 : index
    %48 = vector.load %arg9[%c0_40, %c0_41] : memref<2x1024xf32, #tpu.memory_space<vmem>>, vector<2x1024xf32>
    %c2_42 = arith.constant 2 : index
    %c0_43 = arith.constant 0 : index
    %c0_44 = arith.constant 0 : index
    %49 = vector.load %arg4[%c2_42, %c0_43, %c0_44] : memref<3x512x1024xbf16, #tpu.memory_space<vmem>>, vector<1x512x1024xbf16>
    %50 = vector.shape_cast %49 : vector<1x512x1024xbf16> to vector<512x1024xbf16>
    %cst_45 = arith.constant dense<0.000000e+00> : vector<2x1024xf32>
    %51 = tpu.matmul %47, %50, %cst_45 {dimension_numbers = #tpu.dot_dimension_numbers<[1], [0], [0], [1], [0, 0, 1, 1], [], []>} : vector<2x512xbf16>, vector<512x1024xbf16>, vector<2x1024xf32> -> vector<2x1024xf32>
    %52 = arith.addf %48, %51 : vector<2x1024xf32>
    %c0_46 = arith.constant 0 : index
    %c0_47 = arith.constant 0 : index
    %53 = vector.load %arg9[%c0_46, %c0_47] : memref<2x1024xf32, #tpu.memory_space<vmem>>, vector<2x1024xf32>
    tpu.vector_store %arg9[%c0_46, %c0_47], %52 {strides = array<i32>} : memref<2x1024xf32, #tpu.memory_space<vmem>>, vector<2x1024xf32>,
    %c2_i32 = arith.constant 2 : i32
    %54 = arith.cmpi eq, %arg0, %c2_i32 : i32
    %55 = arith.extui %54 : i1 to i32
    %c0_i32_48 = arith.constant 0 : i32
    %56 = arith.cmpi ne, %55, %c0_i32_48 : i32
    scf.if %56 {
      %c0_49 = arith.constant 0 : index
      %c0_50 = arith.constant 0 : index
      %57 = vector.load %arg9[%c0_49, %c0_50] : memref<2x1024xf32, #tpu.memory_space<vmem>>, vector<2x1024xf32>
      %c0_51 = arith.constant 0 : index
      %c0_52 = arith.constant 0 : index
      %58 = vector.load %arg5[%c0_51, %c0_52] : memref<1x1024xf32, #tpu.memory_space<vmem>>, vector<1x1024xf32>
      %59 = vector.broadcast %58 : vector<1x1024xf32> to vector<2x1024xf32>
      %60 = arith.addf %57, %59 : vector<2x1024xf32>
      %cst_53 = arith.constant 0.000000e+00 : f32
      %61 = vector.broadcast %cst_53 : f32 to vector<2x1024xf32>
      %62 = arith.maximumf %60, %61 : vector<2x1024xf32>
      %63 = arith.truncf %62 : vector<2x1024xf32> to vector<2x1024xbf16>
      %c0_54 = arith.constant 0 : index
      %c0_55 = arith.constant 0 : index
      %64 = vector.load %arg6[%c0_54, %c0_55] : memref<1024x128xbf16, #tpu.memory_space<vmem>>, vector<1024x128xbf16>
      %cst_56 = arith.constant dense<0.000000e+00> : vector<2x128xf32>
      %65 = tpu.matmul %63, %64, %cst_56 {dimension_numbers = #tpu.dot_dimension_numbers<[1], [0], [0], [1], [0, 0, 1, 1], [], []>} : vector<2x1024xbf16>, vector<1024x128xbf16>, vector<2x128xf32> -> vector<2x128xf32>
      %c0_57 = arith.constant 0 : index
      %c0_58 = arith.constant 0 : index
      %66 = vector.load %arg7[%c0_57, %c0_58] : memref<1x128xf32, #tpu.memory_space<vmem>>, vector<1x128xf32>
      %67 = vector.broadcast %66 : vector<1x128xf32> to vector<2x128xf32>
      %68 = arith.addf %65, %67 : vector<2x128xf32>
      %c0_59 = arith.constant 0 : index
      %c0_60 = arith.constant 0 : index
      %69 = vector.load %arg8[%c0_59, %c0_60] : memref<2x128xf32, #tpu.memory_space<vmem>>, vector<2x128xf32>
      tpu.vector_store %arg8[%c0_59, %c0_60], %68 {strides = array<i32>} : memref<2x128xf32, #tpu.memory_space<vmem>>, vector<2x128xf32>,
    } else {
    }
    return
  }
  func.func @transform_0(%arg0: i32) -> (i32, i32, i32) {
    %c0_i32 = arith.constant 0 : i32
    %c0_i32_0 = arith.constant 0 : i32
    %c0_i32_1 = arith.constant 0 : i32
    return %arg0, %c0_i32, %c0_i32_0 : i32, i32, i32
  }
  func.func @transform_1(%arg0: i32) -> (i32, i32) {
    %c0_i32 = arith.constant 0 : i32
    %c0_i32_0 = arith.constant 0 : i32
    %c0_i32_1 = arith.constant 0 : i32
    return %c0_i32, %c0_i32_0 : i32, i32
  }
  func.func @transform_2(%arg0: i32) -> (i32, i32) {
    %c0_i32 = arith.constant 0 : i32
    %c0_i32_0 = arith.constant 0 : i32
    %c0_i32_1 = arith.constant 0 : i32
    return %c0_i32, %c0_i32_0 : i32, i32
  }
  func.func @transform_3(%arg0: i32) -> (i32, i32, i32) {
    %c0_i32 = arith.constant 0 : i32
    %c0_i32_0 = arith.constant 0 : i32
    %c0_i32_1 = arith.constant 0 : i32
    return %arg0, %c0_i32, %c0_i32_0 : i32, i32, i32
  }
  func.func @transform_4(%arg0: i32) -> (i32, i32) {
    %c0_i32 = arith.constant 0 : i32
    %c0_i32_0 = arith.constant 0 : i32
    %c0_i32_1 = arith.constant 0 : i32
    return %c0_i32, %c0_i32_0 : i32, i32
  }
  func.func @transform_5(%arg0: i32) -> (i32, i32) {
    %c0_i32 = arith.constant 0 : i32
    %c0_i32_0 = arith.constant 0 : i32
    %c0_i32_1 = arith.constant 0 : i32
    return %c0_i32, %c0_i32_0 : i32, i32
  }
  func.func @transform_6(%arg0: i32) -> (i32, i32) {
    %c0_i32 = arith.constant 0 : i32
    %c0_i32_0 = arith.constant 0 : i32
    %c0_i32_1 = arith.constant 0 : i32
    return %c0_i32, %c0_i32_0 : i32, i32
  }
  func.func @transform_7(%arg0: i32) -> (i32, i32) {
    %c0_i32 = arith.constant 0 : i32
    %c0_i32_0 = arith.constant 0 : i32
    %c0_i32_1 = arith.constant 0 : i32
    return %c0_i32, %c0_i32_0 : i32, i32
  }
}

</mosaic_0001>

<bundles_post_ra>
// kernel: placenavnet_forward.1
= control target key start
LH: loop header
LB: loop body
LE: loop exit
PB: predicated region body
PF: predicated region fallthrough
CT: control target
= control target key end

     0   :  { %12 = vsyncpa [#allocation4], 0  ;;  %s23988_s24 = smov 0   ;;  %s30487_s0 = inlined_call_operand.vmem [shape: f32[9,2,2048], index: 0, kind: input, shape index: {}]   ;;  %s30488_s1 = inlined_call_operand.vmem [shape: bf16[2048,512], index: 1, kind: input, shape index: {}]   ;;  %s30489_s2 = inlined_call_operand.vmem [shape: f32[1,512], index: 2, kind: input, shape index: {}]   ;;  %s30490_s3 = inlined_call_operand.vmem [shape: bf16[9,512,1024], index: 3, kind: input, shape index: {}]   ;;  %s30491_s4 = inlined_call_operand.vmem [shape: f32[1,1024], index: 4, kind: input, shape index: {}]   ;;  %s30492_s5 = inlined_call_operand.vmem [shape: bf16[1024,128], index: 5, kind: input, shape index: {}]   ;;  %s30493_s6 = inlined_call_operand.vmem [shape: f32[1,128], index: 6, kind: input, shape index: {}]   ;;  %s30494_s7 = inlined_call_operand.hbm [shape: f32[2,128], index: 7, kind: output, shape index: {}]  }
   0x1 LB: > { %s23994_s25 = sadd.s32 4294967295, %s23943_s24   ;;  %p18519_p0 = scmp.ge.s32.totalorder %s23943_s24, 1  ;;  %s23943_s24 = sphi %s23988_s24, %s18_s24  }
   0x2   : > { %p247_p1 = scmp.lt.s32.totalorder %s23943_s24, 4 }
   0x4   : > { %p248_p2 = pnand %p18519_p0, %p247_p1 }
   0x5   : > { %s281_s26 = smul.u32 (!%p248_p2), 3, %s23994_s25  ;;  %p18524_p4 = scmp.ne.s32.totalorder (!%p248_p2), %s23994_s25, 0 }
   0x6   : > { %251 = sbr.rel (%p248_p2) target bundleno = 3228 (0xc9c), region = 48 }
   0x7   : > { %p282_p3 = scmp.lt.s32.totalorder (!%p248_p2), %s281_s26, 8 }
   0xb   : > { %s30496_s26 = smov (!%p282_p3, %s281_s26), 8  ;;  %299 = sbr.rel (%p18524_p4) target bundleno = 18 (0x12), region = 52 }
   0xc   : > { %s21419_s27 = sshll.u32 %s30496_s26, 5  ;;  %s21420_s28 = sshll.u32 %s30496_s26, 11 }
   0xd   : > { %s24002_s8 = scalar_lea.vmem %s30487_s0, %s21419_s27  ;;  %s24007_s11 = scalar_lea.vmem %s30490_s3, %s21420_s28 }
  0x10   : > { %v23945_v0 = vmov 0.0  }
  0x11   : > { %300 = vst [vmem:[#allocation2] sm:$0xff] %v23945_v0  ;;  %301 = vst [vmem:[#allocation2 + $0x8] sm:$0xff] %v23945_v0 }
  0x12 PF: > { %v21526_v1 = vld [vmem:[%s30488_s1 + $0xe4] ss:$16 sps:$4 sm:$0xff]   ;;  %v21530_v3 = vld [vmem:[%s30488_s1 + $0xe0] ss:$16 sps:$4 sm:$0xff]   ;;  %v23946_v37 = vmov 1983009808   ;;  %v314_v39 = vlaneseq }
  0x13   : > { %v21528_v2 = vld [vmem:[%s30488_s1 + $0x2e4] ss:$16 sps:$4 sm:$0xff]   ;;  %3504 = vmatprep.subr.bf16.mxu0 %v21526_v1  ;;  %v21531_v4 = vld [vmem:[%s30488_s1 + $0x2e0] ss:$16 sps:$4 sm:$0xff]   ;;  %v312_v38 = vunpack.c.l.s4 %v23946_v37  ;;  %p21349_p5 = scmp.ne.s32.totalorder %s23994_s25, 2 }
  0x14   : > { %3545 = vmatprep.subr.bf16.mxu1 %v21528_v2  ;;  %v21532_v5 = vld [vmem:[%s30488_s1 + $0xc4] ss:$16 sps:$4 sm:$0xff]   ;;  %3505 = vmatpush1.bf16.msra.mxu0 %v21530_v3  ;;  %v21536_v7 = vld [vmem:[%s30488_s1 + $0xc0] ss:$16 sps:$4 sm:$0xff]   ;;  %v24127_v44 = vshrl.u32 %v314_v39, 7 }
  0x15   : > { %3546 = vmatpush1.bf16.msra.mxu1 %v21531_v4  ;;  %v21534_v6 = vld [vmem:[%s30488_s1 + $0x2c4] ss:$16 sps:$4 sm:$0xff]   ;;  %3506 = vmatprep.subr.bf16.mxu0 %v21532_v5  ;;  %v21537_v8 = vld [vmem:[%s30488_s1 + $0x2c0] ss:$16 sps:$4 sm:$0xff]   ;;  %v313_v43 = vunpack.c.0.s8 %v312_v38 }
  0x16   : > { %3547 = vmatprep.subr.bf16.mxu1 %v21534_v6  ;;  %v21538_v9 = vld [vmem:[%s30488_s1 + $0xa4] ss:$16 sps:$4 sm:$0xff]   ;;  %v21542_v11 = vld [vmem:[%s30488_s1 + $0xa0] ss:$16 sps:$4 sm:$0xff]  }
  0x17   : > { %v21540_v10 = vld [vmem:[%s30488_s1 + $0x2a4] ss:$16 sps:$4 sm:$0xff]   ;;  %v21543_v12 = vld [vmem:[%s30488_s1 + $0x2a0] ss:$16 sps:$4 sm:$0xff]   ;;  %v24145_v50 = vsub.s32 %v313_v43, %v24127_v44  ;;  %v303_v43 = vld [vmem:[%s24002_s8 + $0x8] sm:$0xff] }
  0x18   : > { %3507 = vmatpush1.bf16.msra.mxu0 %v21536_v7  ;;  %v21544_v13 = vld [vmem:[%s30488_s1 + $0x84] ss:$16 sps:$4 sm:$0xff]   ;;  %v21548_v15 = vld [vmem:[%s30488_s1 + $0x80] ss:$16 sps:$4 sm:$0xff]  }
  0x19   : > { %3548 = vmatpush1.bf16.msra.mxu1 %v21537_v8  ;;  %3508 = vmatprep.subr.bf16.mxu0 %v21538_v9  ;;  %v21546_v14 = vld [vmem:[%s30488_s1 + $0x284] ss:$16 sps:$4 sm:$0xff]   ;;  %v21549_v16 = vld [vmem:[%s30488_s1 + $0x280] ss:$16 sps:$4 sm:$0xff]  }
  0x1a   : > { %3549 = vmatprep.subr.bf16.mxu1 %v21540_v10  ;;  %v21550_v17 = vld [vmem:[%s30488_s1 + $0x64] ss:$16 sps:$4 sm:$0xff]   ;;  %v21554_v19 = vld [vmem:[%s30488_s1 + $0x60] ss:$16 sps:$4 sm:$0xff]  }
  0x1b   : > { %v21552_v18 = vld [vmem:[%s30488_s1 + $0x264] ss:$16 sps:$4 sm:$0xff]   ;;  %v21555_v20 = vld [vmem:[%s30488_s1 + $0x260] ss:$16 sps:$4 sm:$0xff]  }
  0x1c   : > { %3509 = vmatpush1.bf16.msra.mxu0 %v21542_v11  ;;  %v21556_v21 = vld [vmem:[%s30488_s1 + $0x44] ss:$16 sps:$4 sm:$0xff]   ;;  %v21560_v23 = vld [vmem:[%s30488_s1 + $0x40] ss:$16 sps:$4 sm:$0xff]  }
  0x1d   : > { %3550 = vmatpush1.bf16.msra.mxu1 %v21543_v12  ;;  %3510 = vmatprep.subr.bf16.mxu0 %v21544_v13  ;;  %v21558_v22 = vld [vmem:[%s30488_s1 + $0x244] ss:$16 sps:$4 sm:$0xff]   ;;  %v21561_v24 = vld [vmem:[%s30488_s1 + $0x240] ss:$16 sps:$4 sm:$0xff]  }
  0x1e   : > { %3551 = vmatprep.subr.bf16.mxu1 %v21546_v14  ;;  %v21562_v25 = vld [vmem:[%s30488_s1 + $0x24] ss:$16 sps:$4 sm:$0xff]   ;;  %v21566_v27 = vld [vmem:[%s30488_s1 + $0x20] ss:$16 sps:$4 sm:$0xff]  }
  0x1f   : > { %v21564_v26 = vld [vmem:[%s30488_s1 + $0x224] ss:$16 sps:$4 sm:$0xff]   ;;  %v21567_v28 = vld [vmem:[%s30488_s1 + $0x220] ss:$16 sps:$4 sm:$0xff]  }
  0x20   : > { %3511 = vmatpush1.bf16.msra.mxu0 %v21548_v15  ;;  %v21568_v29 = vld [vmem:[%s30488_s1 + $0x4] ss:$16 sps:$4 sm:$0xff]   ;;  %v21572_v31 = vld [vmem:[%s30488_s1] ss:$16 sps:$4 sm:$0xff]  }
  0x21   : > { %3552 = vmatpush1.bf16.msra.mxu1 %v21549_v16  ;;  %3512 = vmatprep.subr.bf16.mxu0 %v21550_v17  ;;  %v21570_v30 = vld [vmem:[%s30488_s1 + $0x204] ss:$16 sps:$4 sm:$0xff]   ;;  %v21573_v32 = vld [vmem:[%s30488_s1 + $0x200] ss:$16 sps:$4 sm:$0xff]  }
  0x22   : > { %3553 = vmatprep.subr.bf16.mxu1 %v21552_v18  ;;  %v21574_v33 = vld [vmem:[%s30488_s1 + $0x1e4] ss:$16 sps:$4 sm:$0xff]   ;;  %v21578_v35 = vld [vmem:[%s30488_s1 + $0x1e0] ss:$16 sps:$4 sm:$0xff]  }
  0x23   : > { %v21576_v34 = vld [vmem:[%s30488_s1 + $0x3e4] ss:$16 sps:$4 sm:$0xff]   ;;  %v21579_v36 = vld [vmem:[%s30488_s1 + $0x3e0] ss:$16 sps:$4 sm:$0xff]  }
  0x24   : > { %3513 = vmatpush1.bf16.msra.mxu0 %v21554_v19  ;;  %v21580_v40 = vld [vmem:[%s30488_s1 + $0x1c4] ss:$16 sps:$4 sm:$0xff]   ;;  %v21584_v42 = vld [vmem:[%s30488_s1 + $0x1c0] ss:$16 sps:$4 sm:$0xff]  }
  0x25   : > { %3554 = vmatpush1.bf16.msra.mxu1 %v21555_v20  ;;  %3514 = vmatprep.subr.bf16.mxu0 %v21556_v21  ;;  %v21582_v41 = vld [vmem:[%s30488_s1 + $0x3c4] ss:$16 sps:$4 sm:$0xff]   ;;  %v21585_v45 = vld [vmem:[%s30488_s1 + $0x3c0] ss:$16 sps:$4 sm:$0xff]  }
  0x26   : > { %3555 = vmatprep.subr.bf16.mxu1 %v21558_v22  ;;  %v21586_v46 = vld [vmem:[%s30488_s1 + $0x1a4] ss:$16 sps:$4 sm:$0xff]   ;;  %v21590_v48 = vld [vmem:[%s30488_s1 + $0x1a0] ss:$16 sps:$4 sm:$0xff]  }
  0x27   : > { %v21588_v47 = vld [vmem:[%s30488_s1 + $0x3a4] ss:$16 sps:$4 sm:$0xff]   ;;  %v21591_v49 = vld [vmem:[%s30488_s1 + $0x3a0] ss:$16 sps:$4 sm:$0xff]  }
  0x28   : > { %3515 = vmatpush1.bf16.msra.mxu0 %v21560_v23  ;;  %v21592_v51 = vld [vmem:[%s30488_s1 + $0x184] ss:$16 sps:$4 sm:$0xff]   ;;  %v21596_v54 = vld [vmem:[%s30488_s1 + $0x180] ss:$16 sps:$4 sm:$0xff]  }
  0x29   : > { %3556 = vmatpush1.bf16.msra.mxu1 %v21561_v24  ;;  %3516 = vmatprep.subr.bf16.mxu0 %v21562_v25  ;;  %v21594_v52 = vld [vmem:[%s30488_s1 + $0x384] ss:$16 sps:$4 sm:$0xff]   ;;  %v21597_v57 = vld [vmem:[%s30488_s1 + $0x380] ss:$16 sps:$4 sm:$0xff]  }
  0x2a   : > { %3557 = vmatprep.subr.bf16.mxu1 %v21564_v26  ;;  %v302_v53 = vld [vmem:[%s24002_s8] sm:$0xff] }
  0x2b   : > { %v317_v55 = vrot.slane %v302_v53, %v24145_v50  ;;  %v310_v56 = vcombine.high %v302_v53, %v302_v53  ;;  %v21598_v58 = vld [vmem:[%s30488_s1 + $0x164] ss:$16 sps:$4 sm:$0xff]   ;;  %v21602_v62 = vld [vmem:[%s30488_s1 + $0x160] ss:$16 sps:$4 sm:$0xff]  }
  0x2c   : > { %3517 = vmatpush1.bf16.msra.mxu0 %v21566_v27  ;;  %v21600_v59 = vld [vmem:[%s30488_s1 + $0x364] ss:$16 sps:$4 sm:$0xff]   ;;  %v21603_v1 = vld [vmem:[%s30488_s1 + $0x360] ss:$16 sps:$4 sm:$0xff]  }
  0x2d   : > { %3558 = vmatpush1.bf16.msra.mxu1 %v21567_v28  ;;  %3518 = vmatprep.subr.bf16.mxu0 %v21568_v29  ;;  %v325_v60 = vcombine.high %v317_v55, %v317_v55  ;;  %v324_v61 = vrot.slane %v310_v56, %v24145_v50  ;;  %v21604_v2 = vld [vmem:[%s30488_s1 + $0x144] ss:$16 sps:$4 sm:$0xff]   ;;  %v21608_v5 = vld [vmem:[%s30488_s1 + $0x140] ss:$16 sps:$4 sm:$0xff]   ;;  %v24222_v17 = vpack.c.bf16 %v317_v55, %v317_v55 }
  0x2e   : > { %3559 = vmatprep.subr.bf16.mxu1 %v21570_v30  ;;  %v21606_v3 = vld [vmem:[%s30488_s1 + $0x344] ss:$16 sps:$4 sm:$0xff]   ;;  %v21609_v6 = vld [vmem:[%s30488_s1 + $0x340] ss:$16 sps:$4 sm:$0xff]  }
  0x2f   : > { %v24171_v63 = vpack.c.bf16 %v325_v60, %v325_v60  ;;  %v326_v0 = vcombine.high %v324_v61, %v324_v61  ;;  %v21610_v7 = vld [vmem:[%s30488_s1 + $0x124] ss:$16 sps:$4 sm:$0xff]   ;;  %v21614_v9 = vld [vmem:[%s30488_s1 + $0x120] ss:$16 sps:$4 sm:$0xff]   ;;  %v24224_v18 = vpack.c.bf16 %v324_v61, %v324_v61 }
  0x30   : > { %3519 = vmatpush1.bf16.msra.mxu0 %v21572_v31  ;;  %v21612_v8 = vld [vmem:[%s30488_s1 + $0x324] ss:$16 sps:$4 sm:$0xff]   ;;  %v21615_v10 = vld [vmem:[%s30488_s1 + $0x320] ss:$16 sps:$4 sm:$0xff]  }
  0x31   : > { %3560 = vmatpush1.bf16.msra.mxu1 %v21573_v32  ;;  %3520 = vmatprep.subr.bf16.mxu0 %v21574_v33  ;;  %v24182_v4 = vpack.c.bf16 %v326_v0, %v326_v0  ;;  %v21616_v11 = vld [vmem:[%s30488_s1 + $0x104] ss:$16 sps:$4 sm:$0xff]   ;;  %v21620_v13 = vld [vmem:[%s30488_s1 + $0x100] ss:$16 sps:$4 sm:$0xff]  }
  0x32   : > { %3561 = vmatprep.subr.bf16.mxu1 %v21576_v34  ;;  %3536 = vmatprep.mubr.bf16.mxu0 %v24171_v63  ;;  %v21618_v12 = vld [vmem:[%s30488_s1 + $0x304] ss:$16 sps:$4 sm:$0xff]   ;;  %v21621_v14 = vld [vmem:[%s30488_s1 + $0x300] ss:$16 sps:$4 sm:$0xff]  }
  0x33   : > { %3577 = vmatprep.mubr.bf16.mxu1 %v24182_v4  ;;  %v21625_v15 = vld [vmem:[%s30488_s1 + $0x4e4] ss:$16 sps:$4 sm:$0xff]   ;;  %v21623_v19 = vld [vmem:[%s30488_s1 + $0x4e0] ss:$16 sps:$4 sm:$0xff]  }
  0x34   : > { %3521 = vmatpush2.bf16.msra.mxu0 %v21578_v35  ;;  %v21628_v16 = vld [vmem:[%s30488_s1 + $0x6e4] ss:$16 sps:$4 sm:$0xff]   ;;  %v21626_v20 = vld [vmem:[%s30488_s1 + $0x6e0] ss:$16 sps:$4 sm:$0xff]  }
  0x35   : > { %3562 = vmatpush2.bf16.msra.mxu1 %v21579_v36  ;;  %3522 = vmatprep.subr.bf16.mxu0 %v21580_v40  ;;  %v21631_v21 = vld [vmem:[%s30488_s1 + $0x4c4] ss:$16 sps:$4 sm:$0xff]   ;;  %v21629_v23 = vld [vmem:[%s30488_s1 + $0x4c0] ss:$16 sps:$4 sm:$0xff]  }
  0x36   : > { %3563 = vmatprep.subr.bf16.mxu1 %v21582_v41  ;;  %v21634_v22 = vld [vmem:[%s30488_s1 + $0x6c4] ss:$16 sps:$4 sm:$0xff]   ;;  %v21632_v24 = vld [vmem:[%s30488_s1 + $0x6c0] ss:$16 sps:$4 sm:$0xff]  }
  0x37   : > { %v21637_v25 = vld [vmem:[%s30488_s1 + $0x4a4] ss:$16 sps:$4 sm:$0xff]   ;;  %v21635_v27 = vld [vmem:[%s30488_s1 + $0x4a0] ss:$16 sps:$4 sm:$0xff]  }
  0x38   : > { %3523 = vmatpush2.bf16.msra.mxu0 %v21584_v42  ;;  %v21640_v26 = vld [vmem:[%s30488_s1 + $0x6a4] ss:$16 sps:$4 sm:$0xff]   ;;  %v21638_v28 = vld [vmem:[%s30488_s1 + $0x6a0] ss:$16 sps:$4 sm:$0xff]  }
  0x39   : > { %3564 = vmatpush2.bf16.msra.mxu1 %v21585_v45  ;;  %3524 = vmatprep.subr.bf16.mxu0 %v21586_v46  ;;  %v21643_v29 = vld [vmem:[%s30488_s1 + $0x484] ss:$16 sps:$4 sm:$0xff]   ;;  %v21641_v31 = vld [vmem:[%s30488_s1 + $0x480] ss:$16 sps:$4 sm:$0xff]   ;;  %v24302_v45 = vrot.slane %v303_v43, %v24145_v50  ;;  %v327_v46 = vcombine.high %v303_v43, %v303_v43 }
  0x3a   : > { %3565 = vmatprep.subr.bf16.mxu1 %v21588_v47  ;;  %v21646_v30 = vld [vmem:[%s30488_s1 + $0x684] ss:$16 sps:$4 sm:$0xff]   ;;  %v21644_v32 = vld [vmem:[%s30488_s1 + $0x680] ss:$16 sps:$4 sm:$0xff]  }
  0x3b   : > { %v21649_v33 = vld [vmem:[%s30488_s1 + $0x464] ss:$16 sps:$4 sm:$0xff]   ;;  %v21647_v35 = vld [vmem:[%s30488_s1 + $0x460] ss:$16 sps:$4 sm:$0xff]  }
  0x3c   : > { %3525 = vmatpush2.bf16.msra.mxu0 %v21590_v48  ;;  %v21652_v34 = vld [vmem:[%s30488_s1 + $0x664] ss:$16 sps:$4 sm:$0xff]   ;;  %v21650_v36 = vld [vmem:[%s30488_s1 + $0x660] ss:$16 sps:$4 sm:$0xff]  }
  0x3d   : > { %3566 = vmatpush2.bf16.msra.mxu1 %v21591_v49  ;;  %3526 = vmatprep.subr.bf16.mxu0 %v21592_v51  ;;  %v21655_v37 = vld [vmem:[%s30488_s1 + $0x444] ss:$16 sps:$4 sm:$0xff]   ;;  %v21653_v39 = vld [vmem:[%s30488_s1 + $0x440] ss:$16 sps:$4 sm:$0xff]   ;;  %v342_v49 = vcombine.high %v24302_v45, %v24302_v45  ;;  %v24313_v51 = vrot.slane %v327_v46, %v24145_v50 }
  0x3e   : > { %3567 = vmatprep.subr.bf16.mxu1 %v21594_v52  ;;  %v21658_v38 = vld [vmem:[%s30488_s1 + $0x644] ss:$16 sps:$4 sm:$0xff]   ;;  %v21656_v40 = vld [vmem:[%s30488_s1 + $0x640] ss:$16 sps:$4 sm:$0xff]  }
  0x3f   : > { %v21661_v41 = vld [vmem:[%s30488_s1 + $0x424] ss:$16 sps:$4 sm:$0xff]   ;;  %v21659_v47 = vld [vmem:[%s30488_s1 + $0x420] ss:$16 sps:$4 sm:$0xff]   ;;  %v343_v55 = vcombine.high %v24313_v51, %v24313_v51 }
  0x40   : > { %3527 = vmatpush2.bf16.msra.mxu0 %v21596_v54  ;;  %v21664_v42 = vld [vmem:[%s30488_s1 + $0x624] ss:$16 sps:$4 sm:$0xff]   ;;  %v21662_v48 = vld [vmem:[%s30488_s1 + $0x620] ss:$16 sps:$4 sm:$0xff]   ;;  %v24321_v54 = vpack.c.bf16 %v342_v49, %v342_v49 }
  0x41   : > { %3568 = vmatpush2.bf16.msra.mxu1 %v21597_v57  ;;  %3528 = vmatprep.subr.bf16.mxu0 %v21598_v58  ;;  %v21667_v52 = vld [vmem:[%s30488_s1 + $0x404] ss:$16 sps:$4 sm:$0xff]   ;;  %v21665_v56 = vld [vmem:[%s30488_s1 + $0x400] ss:$16 sps:$4 sm:$0xff]   ;;  %v24331_v58 = vpack.c.bf16 %v343_v55, %v343_v55 }
  0x42   : > { %3569 = vmatprep.subr.bf16.mxu1 %v21600_v59  ;;  %v21670_v53 = vld [vmem:[%s30488_s1 + $0x604] ss:$16 sps:$4 sm:$0xff]   ;;  %v21668_v57 = vld [vmem:[%s30488_s1 + $0x600] ss:$16 sps:$4 sm:$0xff]  }
  0x43   : > { %v21673_v59 = vld [vmem:[%s30488_s1 + $0x5e4] ss:$16 sps:$4 sm:$0xff]   ;;  %v21671_v61 = vld [vmem:[%s30488_s1 + $0x5e0] ss:$16 sps:$4 sm:$0xff]  }
  0x44   : > { %3529 = vmatpush2.bf16.msra.mxu0 %v21602_v62  ;;  %v21676_v60 = vld [vmem:[%s30488_s1 + $0x7e4] ss:$16 sps:$4 sm:$0xff]   ;;  %v21674_v62 = vld [vmem:[%s30488_s1 + $0x7e0] ss:$16 sps:$4 sm:$0xff]  }
  0x45   : > { %3570 = vmatpush2.bf16.msra.mxu1 %v21603_v1  ;;  %3530 = vmatprep.subr.bf16.mxu0 %v21604_v2  ;;  %v21679_v0 = vld [vmem:[%s30488_s1 + $0x5c4] ss:$16 sps:$4 sm:$0xff]   ;;  %v21677_v2 = vld [vmem:[%s30488_s1 + $0x5c0] ss:$16 sps:$4 sm:$0xff]  }
  0x46   : > { %3571 = vmatprep.subr.bf16.mxu1 %v21606_v3  ;;  %v21682_v1 = vld [vmem:[%s30488_s1 + $0x7c4] ss:$16 sps:$4 sm:$0xff]   ;;  %v21680_v3 = vld [vmem:[%s30488_s1 + $0x7c0] ss:$16 sps:$4 sm:$0xff]  }
  0x47   : > { %v21729_v46 = vld [vmem:[%s30488_s1 + $0xac0] ss:$16 sps:$4 sm:$0xff]  }
  0x48   : > { %3531 = vmatpush2.bf16.msra.mxu0 %v21608_v5  ;;  %v21685_v5 = vld [vmem:[%s30488_s1 + $0x5a4] ss:$16 sps:$4 sm:$0xff]   ;;  %v21735_v55 = vld [vmem:[%s30488_s1 + $0xaa0] ss:$16 sps:$4 sm:$0xff]  }
  0x49   : > { %3572 = vmatpush2.bf16.msra.mxu1 %v21609_v6  ;;  %3532 = vmatprep.subr.bf16.mxu0 %v21610_v7  ;;  %v21688_v6 = vld [vmem:[%s30488_s1 + $0x7a4] ss:$16 sps:$4 sm:$0xff]   ;;  %v21683_v7 = vld [vmem:[%s30488_s1 + $0x5a0] ss:$16 sps:$4 sm:$0xff]  }
  0x4a   : > { %3573 = vmatprep.subr.bf16.mxu1 %v21612_v8  ;;  %v21686_v8 = vld [vmem:[%s30488_s1 + $0x7a0] ss:$16 sps:$4 sm:$0xff]  }
  0x4c   : > { %3533 = vmatpush2.bf16.msra.mxu0 %v21614_v9  ;;  %v21691_v9 = vld [vmem:[%s30488_s1 + $0x584] ss:$16 sps:$4 sm:$0xff]  }
  0x4d   : > { %3574 = vmatpush2.bf16.msra.mxu1 %v21615_v10  ;;  %3534 = vmatprep.subr.bf16.mxu0 %v21616_v11  ;;  %v21694_v10 = vld [vmem:[%s30488_s1 + $0x784] ss:$16 sps:$4 sm:$0xff]   ;;  %v21689_v11 = vld [vmem:[%s30488_s1 + $0x580] ss:$16 sps:$4 sm:$0xff]  }
  0x4e   : > { %3575 = vmatprep.subr.bf16.mxu1 %v21618_v12  ;;  %v21692_v12 = vld [vmem:[%s30488_s1 + $0x780] ss:$16 sps:$4 sm:$0xff]  }
  0x50   : > { %3535 = vmatpush2.bf16.msra.mxu0 %v21620_v13  ;;  %v21697_v13 = vld [vmem:[%s30488_s1 + $0x564] ss:$16 sps:$4 sm:$0xff]  }
  0x51   : > { %3576 = vmatpush2.bf16.msra.mxu1 %v21621_v14  ;;  %3586 = vmatprep.subr.bf16.mxu0 %v21625_v15  ;;  %v21700_v14 = vld [vmem:[%s30488_s1 + $0x764] ss:$16 sps:$4 sm:$0xff]   ;;  %v21695_v15 = vld [vmem:[%s30488_s1 + $0x560] ss:$16 sps:$4 sm:$0xff]  }
  0x52   : > { %3627 = vmatprep.subr.bf16.mxu1 %v21628_v16  ;;  %v21698_v16 = vld [vmem:[%s30488_s1 + $0x760] ss:$16 sps:$4 sm:$0xff]  }
  0x53   : > { %3537 = vmatmul.mubr.bf16.vlgmr.msra.gmra.mxu0 %v24222_v17 }
  0x54   : > { %3578 = vmatmul.mubr.bf16.vlgmr.msra.gmra.mxu1 %v24224_v18  ;;  %3587 = vmatpush1.bf16.msra.mxu0 %v21623_v19  ;;  %v21703_v19 = vld [vmem:[%s30488_s1 + $0x544] ss:$16 sps:$4 sm:$0xff]  }
  0x55   : > { %3628 = vmatpush1.bf16.msra.mxu1 %v21626_v20  ;;  %3588 = vmatprep.subr.bf16.mxu0 %v21631_v21  ;;  %v21706_v20 = vld [vmem:[%s30488_s1 + $0x744] ss:$16 sps:$4 sm:$0xff]   ;;  %v21701_v21 = vld [vmem:[%s30488_s1 + $0x540] ss:$16 sps:$4 sm:$0xff]  }
  0x56   : > { %3629 = vmatprep.subr.bf16.mxu1 %v21634_v22  ;;  %3618 = vmatprep.mubr.bf16.mxu0 %v24321_v54  ;;  %v21704_v22 = vld [vmem:[%s30488_s1 + $0x740] ss:$16 sps:$4 sm:$0xff]  }
  0x57   : > { %3659 = vmatprep.mubr.bf16.mxu1 %v24331_v58 }
  0x58   : > { %3589 = vmatpush1.bf16.msra.mxu0 %v21629_v23  ;;  %v21709_v23 = vld [vmem:[%s30488_s1 + $0x524] ss:$16 sps:$4 sm:$0xff]  }
  0x59   : > { %3630 = vmatpush1.bf16.msra.mxu1 %v21632_v24  ;;  %3590 = vmatprep.subr.bf16.mxu0 %v21637_v25  ;;  %v21712_v24 = vld [vmem:[%s30488_s1 + $0x724] ss:$16 sps:$4 sm:$0xff]   ;;  %v21707_v25 = vld [vmem:[%s30488_s1 + $0x520] ss:$16 sps:$4 sm:$0xff]  }
  0x5a   : > { %3631 = vmatprep.subr.bf16.mxu1 %v21640_v26  ;;  %v21710_v26 = vld [vmem:[%s30488_s1 + $0x720] ss:$16 sps:$4 sm:$0xff]  }
  0x5c   : > { %3591 = vmatpush1.bf16.msra.mxu0 %v21635_v27  ;;  %v21715_v27 = vld [vmem:[%s30488_s1 + $0x504] ss:$16 sps:$4 sm:$0xff]  }
  0x5d   : > { %3632 = vmatpush1.bf16.msra.mxu1 %v21638_v28  ;;  %3592 = vmatprep.subr.bf16.mxu0 %v21643_v29  ;;  %v21718_v28 = vld [vmem:[%s30488_s1 + $0x704] ss:$16 sps:$4 sm:$0xff]   ;;  %v21713_v29 = vld [vmem:[%s30488_s1 + $0x500] ss:$16 sps:$4 sm:$0xff]  }
  0x5e   : > { %3633 = vmatprep.subr.bf16.mxu1 %v21646_v30  ;;  %v21716_v30 = vld [vmem:[%s30488_s1 + $0x700] ss:$16 sps:$4 sm:$0xff]  }
  0x60   : > { %3593 = vmatpush1.bf16.msra.mxu0 %v21641_v31  ;;  %v21722_v31 = vld [vmem:[%s30488_s1 + $0x8e4] ss:$16 sps:$4 sm:$0xff]  }
  0x61   : > { %3634 = vmatpush1.bf16.msra.mxu1 %v21644_v32  ;;  %3594 = vmatprep.subr.bf16.mxu0 %v21649_v33  ;;  %v21725_v32 = vld [vmem:[%s30488_s1 + $0xae4] ss:$16 sps:$4 sm:$0xff]   ;;  %v24439_v33 = vpack.c.bf16 %v24302_v45, %v24302_v45 }
  0x62   : > { %3635 = vmatprep.subr.bf16.mxu1 %v21652_v34  ;;  %v24443_v34 = vpack.c.bf16 %v24313_v51, %v24313_v51 }
  0x64   : > { %3595 = vmatpush1.bf16.msra.mxu0 %v21647_v35  ;;  %v21720_v35 = vld [vmem:[%s30488_s1 + $0x8e0] ss:$16 sps:$4 sm:$0xff]  }
  0x65   : > { %3636 = vmatpush1.bf16.msra.mxu1 %v21650_v36  ;;  %3596 = vmatprep.subr.bf16.mxu0 %v21655_v37  ;;  %v21723_v36 = vld [vmem:[%s30488_s1 + $0xae0] ss:$16 sps:$4 sm:$0xff]   ;;  %v21728_v37 = vld [vmem:[%s30488_s1 + $0x8c4] ss:$16 sps:$4 sm:$0xff]  }
  0x66   : > { %3637 = vmatprep.subr.bf16.mxu1 %v21658_v38  ;;  %v304_v38 = vld [vmem:[%s24002_s8 + $0x10] sm:$0xff] }
  0x68   : > { %3597 = vmatpush1.bf16.msra.mxu0 %v21653_v39  ;;  %v21731_v39 = vld [vmem:[%s30488_s1 + $0xac4] ss:$16 sps:$4 sm:$0xff]  }
  0x69   : > { %3638 = vmatpush1.bf16.msra.mxu1 %v21656_v40  ;;  %3598 = vmatprep.subr.bf16.mxu0 %v21661_v41  ;;  %v24459_v40 = vrot.slane %v304_v38, %v24145_v50  ;;  %v344_v41 = vcombine.high %v304_v38, %v304_v38  ;;  %v21795_v38 = vld [vmem:[%s30488_s1 + $0xb60] ss:$16 sps:$4 sm:$0xff]  }
  0x6a   : > { %3639 = vmatprep.subr.bf16.mxu1 %v21664_v42  ;;  %v21726_v42 = vld [vmem:[%s30488_s1 + $0x8c0] ss:$16 sps:$4 sm:$0xff]  }
  0x6b   : > { %v359_v43 = vcombine.high %v24459_v40, %v24459_v40  ;;  %v24469_v45 = vrot.slane %v344_v41, %v24145_v50  ;;  %v21803_v41 = vld [vmem:[%s30488_s1 + $0xb44] ss:$16 sps:$4 sm:$0xff]  }
  0x6c   : > { %3599 = vmatpush1.bf16.msra.mxu0 %v21659_v47  ;;  %v21734_v47 = vld [vmem:[%s30488_s1 + $0x8a4] ss:$16 sps:$4 sm:$0xff]  }
  0x6d   : > { %3640 = vmatpush1.bf16.msra.mxu1 %v21662_v48  ;;  %3600 = vmatprep.subr.bf16.mxu0 %v21667_v52  ;;  %v21737_v48 = vld [vmem:[%s30488_s1 + $0xaa4] ss:$16 sps:$4 sm:$0xff]   ;;  %v24480_v49 = vpack.c.bf16 %v359_v43, %v359_v43  ;;  %v360_v51 = vcombine.high %v24469_v45, %v24469_v45  ;;  %v21732_v52 = vld [vmem:[%s30488_s1 + $0x8a0] ss:$16 sps:$4 sm:$0xff]   ;;  %v305_v43 = vld [vmem:[%s24002_s8 + $0x18] sm:$0xff] }
  0x6e   : > { %3641 = vmatprep.subr.bf16.mxu1 %v21670_v53 }
  0x6f   : > { %v24488_v53 = vpack.c.bf16 %v360_v51, %v360_v51  ;;  %v361_v51 = vcombine.high %v305_v43, %v305_v43 }
  0x70   : > { %3601 = vmatpush1.bf16.msra.mxu0 %v21665_v56  ;;  %v21740_v56 = vld [vmem:[%s30488_s1 + $0x884] ss:$16 sps:$4 sm:$0xff]  }
  0x71   : > { %3642 = vmatpush1.bf16.msra.mxu1 %v21668_v57  ;;  %3602 = vmatprep.subr.bf16.mxu0 %v21673_v59  ;;  %v21743_v57 = vld [vmem:[%s30488_s1 + $0xa84] ss:$16 sps:$4 sm:$0xff]   ;;  %v21738_v59 = vld [vmem:[%s30488_s1 + $0x880] ss:$16 sps:$4 sm:$0xff]  }
  0x72   : > { %3643 = vmatprep.subr.bf16.mxu1 %v21676_v60  ;;  %v21741_v60 = vld [vmem:[%s30488_s1 + $0xa80] ss:$16 sps:$4 sm:$0xff]  }
  0x74   : > { %3603 = vmatpush2.bf16.msra.mxu0 %v21671_v61  ;;  %v21746_v61 = vld [vmem:[%s30488_s1 + $0x864] ss:$16 sps:$4 sm:$0xff]  }
  0x75   : > { %3644 = vmatpush2.bf16.msra.mxu1 %v21674_v62  ;;  %3604 = vmatprep.subr.bf16.mxu0 %v21679_v0  ;;  %v21749_v62 = vld [vmem:[%s30488_s1 + $0xa64] ss:$16 sps:$4 sm:$0xff]   ;;  %v21744_v0 = vld [vmem:[%s30488_s1 + $0x860] ss:$16 sps:$4 sm:$0xff]  }
  0x76   : > { %3645 = vmatprep.subr.bf16.mxu1 %v21682_v1  ;;  %v21747_v1 = vld [vmem:[%s30488_s1 + $0xa60] ss:$16 sps:$4 sm:$0xff]  }
  0x78   : > { %3605 = vmatpush2.bf16.msra.mxu0 %v21677_v2  ;;  %v21752_v2 = vld [vmem:[%s30488_s1 + $0x844] ss:$16 sps:$4 sm:$0xff]  }
  0x79   : > { %3646 = vmatpush2.bf16.msra.mxu1 %v21680_v3  ;;  %3606 = vmatprep.subr.bf16.mxu0 %v21685_v5  ;;  %v21755_v3 = vld [vmem:[%s30488_s1 + $0xa44] ss:$16 sps:$4 sm:$0xff]   ;;  %v21750_v5 = vld [vmem:[%s30488_s1 + $0x840] ss:$16 sps:$4 sm:$0xff]  }
  0x7a   : > { %3647 = vmatprep.subr.bf16.mxu1 %v21688_v6  ;;  %v21753_v6 = vld [vmem:[%s30488_s1 + $0xa40] ss:$16 sps:$4 sm:$0xff]  }
  0x7c   : > { %3607 = vmatpush2.bf16.msra.mxu0 %v21683_v7  ;;  %v21758_v7 = vld [vmem:[%s30488_s1 + $0x824] ss:$16 sps:$4 sm:$0xff]  }
  0x7d   : > { %3648 = vmatpush2.bf16.msra.mxu1 %v21686_v8  ;;  %3608 = vmatprep.subr.bf16.mxu0 %v21691_v9  ;;  %v21761_v8 = vld [vmem:[%s30488_s1 + $0xa24] ss:$16 sps:$4 sm:$0xff]   ;;  %v21756_v9 = vld [vmem:[%s30488_s1 + $0x820] ss:$16 sps:$4 sm:$0xff]  }
  0x7e   : > { %3649 = vmatprep.subr.bf16.mxu1 %v21694_v10  ;;  %v21759_v10 = vld [vmem:[%s30488_s1 + $0xa20] ss:$16 sps:$4 sm:$0xff]  }
  0x80   : > { %3609 = vmatpush2.bf16.msra.mxu0 %v21689_v11  ;;  %v21764_v11 = vld [vmem:[%s30488_s1 + $0x804] ss:$16 sps:$4 sm:$0xff]  }
  0x81   : > { %3650 = vmatpush2.bf16.msra.mxu1 %v21692_v12  ;;  %3610 = vmatprep.subr.bf16.mxu0 %v21697_v13  ;;  %v21767_v12 = vld [vmem:[%s30488_s1 + $0xa04] ss:$16 sps:$4 sm:$0xff]   ;;  %v21762_v13 = vld [vmem:[%s30488_s1 + $0x800] ss:$16 sps:$4 sm:$0xff]  }
  0x82   : > { %3651 = vmatprep.subr.bf16.mxu1 %v21700_v14  ;;  %v21765_v14 = vld [vmem:[%s30488_s1 + $0xa00] ss:$16 sps:$4 sm:$0xff]  }
  0x84   : > { %3611 = vmatpush2.bf16.msra.mxu0 %v21695_v15  ;;  %v21770_v15 = vld [vmem:[%s30488_s1 + $0x9e4] ss:$16 sps:$4 sm:$0xff]  }
  0x85   : > { %3652 = vmatpush2.bf16.msra.mxu1 %v21698_v16  ;;  %3612 = vmatprep.subr.bf16.mxu0 %v21703_v19  ;;  %v21773_v16 = vld [vmem:[%s30488_s1 + $0xbe4] ss:$16 sps:$4 sm:$0xff]   ;;  %v21768_v19 = vld [vmem:[%s30488_s1 + $0x9e0] ss:$16 sps:$4 sm:$0xff]  }
  0x86   : > { %3653 = vmatprep.subr.bf16.mxu1 %v21706_v20  ;;  %v21771_v20 = vld [vmem:[%s30488_s1 + $0xbe0] ss:$16 sps:$4 sm:$0xff]  }
  0x88   : > { %3613 = vmatpush2.bf16.msra.mxu0 %v21701_v21  ;;  %v21776_v21 = vld [vmem:[%s30488_s1 + $0x9c4] ss:$16 sps:$4 sm:$0xff]  }
  0x89   : > { %3654 = vmatpush2.bf16.msra.mxu1 %v21704_v22  ;;  %3614 = vmatprep.subr.bf16.mxu0 %v21709_v23  ;;  %v21779_v22 = vld [vmem:[%s30488_s1 + $0xbc4] ss:$16 sps:$4 sm:$0xff]   ;;  %v21774_v23 = vld [vmem:[%s30488_s1 + $0x9c0] ss:$16 sps:$4 sm:$0xff]  }
  0x8a   : > { %3655 = vmatprep.subr.bf16.mxu1 %v21712_v24  ;;  %v21777_v24 = vld [vmem:[%s30488_s1 + $0xbc0] ss:$16 sps:$4 sm:$0xff]  }
  0x8c   : > { %3615 = vmatpush2.bf16.msra.mxu0 %v21707_v25  ;;  %v21782_v25 = vld [vmem:[%s30488_s1 + $0x9a4] ss:$16 sps:$4 sm:$0xff]  }
  0x8d   : > { %3656 = vmatpush2.bf16.msra.mxu1 %v21710_v26  ;;  %3616 = vmatprep.subr.bf16.mxu0 %v21715_v27  ;;  %v21785_v26 = vld [vmem:[%s30488_s1 + $0xba4] ss:$16 sps:$4 sm:$0xff]   ;;  %v21780_v27 = vld [vmem:[%s30488_s1 + $0x9a0] ss:$16 sps:$4 sm:$0xff]  }
  0x8e   : > { %3657 = vmatprep.subr.bf16.mxu1 %v21718_v28  ;;  %v21783_v28 = vld [vmem:[%s30488_s1 + $0xba0] ss:$16 sps:$4 sm:$0xff]  }
  0x90   : > { %3617 = vmatpush2.bf16.msra.mxu0 %v21713_v29  ;;  %v21788_v29 = vld [vmem:[%s30488_s1 + $0x984] ss:$16 sps:$4 sm:$0xff]  }
  0x91   : > { %3658 = vmatpush2.bf16.msra.mxu1 %v21716_v30  ;;  %3668 = vmatprep.subr.bf16.mxu0 %v21722_v31  ;;  %v21791_v30 = vld [vmem:[%s30488_s1 + $0xb84] ss:$16 sps:$4 sm:$0xff]   ;;  %v21786_v31 = vld [vmem:[%s30488_s1 + $0x980] ss:$16 sps:$4 sm:$0xff]  }
  0x92   : > { %3709 = vmatprep.subr.bf16.mxu1 %v21725_v32  ;;  %v21789_v32 = vld [vmem:[%s30488_s1 + $0xb80] ss:$16 sps:$4 sm:$0xff]  }
  0x93   : > { %3619 = vmatmul.mubr.bf16.vlgmr.msra.gmra.mxu0 %v24439_v33 }
  0x94   : > { %3660 = vmatmul.mubr.bf16.vlgmr.msra.gmra.mxu1 %v24443_v34  ;;  %3669 = vmatpush1.bf16.msra.mxu0 %v21720_v35  ;;  %v21794_v35 = vld [vmem:[%s30488_s1 + $0x964] ss:$16 sps:$4 sm:$0xff]  }
  0x95   : > { %3710 = vmatpush1.bf16.msra.mxu1 %v21723_v36  ;;  %3670 = vmatprep.subr.bf16.mxu0 %v21728_v37  ;;  %v21797_v36 = vld [vmem:[%s30488_s1 + $0xb64] ss:$16 sps:$4 sm:$0xff]   ;;  %v21792_v37 = vld [vmem:[%s30488_s1 + $0x960] ss:$16 sps:$4 sm:$0xff]  }
  0x96   : > { %3711 = vmatprep.subr.bf16.mxu1 %v21731_v39  ;;  %3700 = vmatprep.mubr.bf16.mxu0 %v24480_v49  ;;  %v21800_v39 = vld [vmem:[%s30488_s1 + $0x944] ss:$16 sps:$4 sm:$0xff]  }
  0x97   : > { %3741 = vmatprep.mubr.bf16.mxu1 %v24488_v53 }
  0x98   : > { %3671 = vmatpush1.bf16.msra.mxu0 %v21726_v42  ;;  %v21798_v42 = vld [vmem:[%s30488_s1 + $0x940] ss:$16 sps:$4 sm:$0xff]  }
  0x99   : > { %3712 = vmatpush1.bf16.msra.mxu1 %v21729_v46  ;;  %3672 = vmatprep.subr.bf16.mxu0 %v21734_v47  ;;  %v21801_v46 = vld [vmem:[%s30488_s1 + $0xb40] ss:$16 sps:$4 sm:$0xff]   ;;  %v21806_v47 = vld [vmem:[%s30488_s1 + $0x924] ss:$16 sps:$4 sm:$0xff]  }
  0x9a   : > { %3713 = vmatprep.subr.bf16.mxu1 %v21737_v48  ;;  %v21809_v48 = vld [vmem:[%s30488_s1 + $0xb24] ss:$16 sps:$4 sm:$0xff]  }
  0x9c   : > { %3673 = vmatpush1.bf16.msra.mxu0 %v21732_v52  ;;  %v21804_v52 = vld [vmem:[%s30488_s1 + $0x920] ss:$16 sps:$4 sm:$0xff]  }
  0x9d   : > { %3714 = vmatpush1.bf16.msra.mxu1 %v21735_v55  ;;  %3674 = vmatprep.subr.bf16.mxu0 %v21740_v56  ;;  %v21807_v55 = vld [vmem:[%s30488_s1 + $0xb20] ss:$16 sps:$4 sm:$0xff]   ;;  %v21812_v56 = vld [vmem:[%s30488_s1 + $0x904] ss:$16 sps:$4 sm:$0xff]  }
  0x9e   : > { %3715 = vmatprep.subr.bf16.mxu1 %v21743_v57  ;;  %v21815_v57 = vld [vmem:[%s30488_s1 + $0xb04] ss:$16 sps:$4 sm:$0xff]  }
  0xa0   : > { %3675 = vmatpush1.bf16.msra.mxu0 %v21738_v59  ;;  %v24646_v59 = vrot.slane %v305_v43, %v24145_v50  ;;  %v21870_v43 = vld [vmem:[%s30488_s1 + $0xfe4] ss:$16 sps:$4 sm:$0xff]  }
  0xa1   : > { %3716 = vmatpush1.bf16.msra.mxu1 %v21741_v60  ;;  %3676 = vmatprep.subr.bf16.mxu0 %v21746_v61  ;;  %v24649_v60 = vrot.slane %v361_v51, %v24145_v50  ;;  %v21810_v61 = vld [vmem:[%s30488_s1 + $0x900] ss:$16 sps:$4 sm:$0xff]   ;;  %v21876_v51 = vld [vmem:[%s30488_s1 + $0xfc4] ss:$16 sps:$4 sm:$0xff]  }
  0xa2   : > { %3717 = vmatprep.subr.bf16.mxu1 %v21749_v62  ;;  %v21813_v62 = vld [vmem:[%s30488_s1 + $0xb00] ss:$16 sps:$4 sm:$0xff]  }
  0xa4   : > { %3677 = vmatpush1.bf16.msra.mxu0 %v21744_v0  ;;  %v21819_v0 = vld [vmem:[%s30488_s1 + $0xce4] ss:$16 sps:$4 sm:$0xff]  }
  0xa5   : > { %3718 = vmatpush1.bf16.msra.mxu1 %v21747_v1  ;;  %3678 = vmatprep.subr.bf16.mxu0 %v21752_v2  ;;  %v21822_v1 = vld [vmem:[%s30488_s1 + $0xee4] ss:$16 sps:$4 sm:$0xff]   ;;  %v376_v2 = vcombine.high %v24646_v59, %v24646_v59 }
  0xa6   : > { %3719 = vmatprep.subr.bf16.mxu1 %v21755_v3  ;;  %v377_v3 = vcombine.high %v24649_v60, %v24649_v60 }
  0xa8   : > { %3679 = vmatpush1.bf16.msra.mxu0 %v21750_v5  ;;  %v24669_v5 = vpack.c.bf16 %v24459_v40, %v24459_v40  ;;  %v21825_v40 = vld [vmem:[%s30488_s1 + $0xcc4] ss:$16 sps:$4 sm:$0xff]  }
  0xa9   : > { %3720 = vmatpush1.bf16.msra.mxu1 %v21753_v6  ;;  %3680 = vmatprep.subr.bf16.mxu0 %v21758_v7  ;;  %v24673_v6 = vpack.c.bf16 %v24469_v45, %v24469_v45  ;;  %v21817_v7 = vld [vmem:[%s30488_s1 + $0xce0] ss:$16 sps:$4 sm:$0xff]   ;;  %v21828_v45 = vld [vmem:[%s30488_s1 + $0xec4] ss:$16 sps:$4 sm:$0xff]  }
  0xaa   : > { %3721 = vmatprep.subr.bf16.mxu1 %v21761_v8  ;;  %v21820_v8 = vld [vmem:[%s30488_s1 + $0xee0] ss:$16 sps:$4 sm:$0xff]  }
  0xac   : > { %3681 = vmatpush1.bf16.msra.mxu0 %v21756_v9  ;;  %v24687_v9 = vpack.c.bf16 %v376_v2, %v376_v2  ;;  %v21883_v2 = vld [vmem:[%s30488_s1 + $0xd80] ss:$16 sps:$4 sm:$0xff]  }
  0xad   : > { %3722 = vmatpush1.bf16.msra.mxu1 %v21759_v10  ;;  %3682 = vmatprep.subr.bf16.mxu0 %v21764_v11  ;;  %v24689_v10 = vpack.c.bf16 %v377_v3, %v377_v3  ;;  %v21823_v11 = vld [vmem:[%s30488_s1 + $0xcc0] ss:$16 sps:$4 sm:$0xff]  }
  0xae   : > { %3723 = vmatprep.subr.bf16.mxu1 %v21767_v12  ;;  %v21826_v12 = vld [vmem:[%s30488_s1 + $0xec0] ss:$16 sps:$4 sm:$0xff]  }
  0xaf   : > { %v21886_v3 = vld [vmem:[%s30488_s1 + $0xf80] ss:$16 sps:$4 sm:$0xff]  }
  0xb0   : > { %3683 = vmatpush1.bf16.msra.mxu0 %v21762_v13  ;;  %v21831_v13 = vld [vmem:[%s30488_s1 + $0xca4] ss:$16 sps:$4 sm:$0xff]  }
  0xb1   : > { %3724 = vmatpush1.bf16.msra.mxu1 %v21765_v14  ;;  %3684 = vmatprep.subr.bf16.mxu0 %v21770_v15  ;;  %v21834_v14 = vld [vmem:[%s30488_s1 + $0xea4] ss:$16 sps:$4 sm:$0xff]   ;;  %v21829_v15 = vld [vmem:[%s30488_s1 + $0xca0] ss:$16 sps:$4 sm:$0xff]  }
  0xb2   : > { %3725 = vmatprep.subr.bf16.mxu1 %v21773_v16  ;;  %v21832_v16 = vld [vmem:[%s30488_s1 + $0xea0] ss:$16 sps:$4 sm:$0xff]  }
  0xb4   : > { %3685 = vmatpush2.bf16.msra.mxu0 %v21768_v19  ;;  %v21837_v19 = vld [vmem:[%s30488_s1 + $0xc84] ss:$16 sps:$4 sm:$0xff]  }
  0xb5   : > { %3726 = vmatpush2.bf16.msra.mxu1 %v21771_v20  ;;  %3686 = vmatprep.subr.bf16.mxu0 %v21776_v21  ;;  %v21840_v20 = vld [vmem:[%s30488_s1 + $0xe84] ss:$16 sps:$4 sm:$0xff]   ;;  %v21835_v21 = vld [vmem:[%s30488_s1 + $0xc80] ss:$16 sps:$4 sm:$0xff]  }
  0xb6   : > { %3727 = vmatprep.subr.bf16.mxu1 %v21779_v22  ;;  %v21838_v22 = vld [vmem:[%s30488_s1 + $0xe80] ss:$16 sps:$4 sm:$0xff]  }
  0xb8   : > { %3687 = vmatpush2.bf16.msra.mxu0 %v21774_v23  ;;  %v21843_v23 = vld [vmem:[%s30488_s1 + $0xc64] ss:$16 sps:$4 sm:$0xff]  }
  0xb9   : > { %3728 = vmatpush2.bf16.msra.mxu1 %v21777_v24  ;;  %3688 = vmatprep.subr.bf16.mxu0 %v21782_v25  ;;  %v21846_v24 = vld [vmem:[%s30488_s1 + $0xe64] ss:$16 sps:$4 sm:$0xff]   ;;  %v21841_v25 = vld [vmem:[%s30488_s1 + $0xc60] ss:$16 sps:$4 sm:$0xff]  }
  0xba   : > { %3729 = vmatprep.subr.bf16.mxu1 %v21785_v26  ;;  %v21844_v26 = vld [vmem:[%s30488_s1 + $0xe60] ss:$16 sps:$4 sm:$0xff]  }
  0xbc   : > { %3689 = vmatpush2.bf16.msra.mxu0 %v21780_v27  ;;  %v21849_v27 = vld [vmem:[%s30488_s1 + $0xc44] ss:$16 sps:$4 sm:$0xff]  }
  0xbd   : > { %3730 = vmatpush2.bf16.msra.mxu1 %v21783_v28  ;;  %3690 = vmatprep.subr.bf16.mxu0 %v21788_v29  ;;  %v21852_v28 = vld [vmem:[%s30488_s1 + $0xe44] ss:$16 sps:$4 sm:$0xff]   ;;  %v21847_v29 = vld [vmem:[%s30488_s1 + $0xc40] ss:$16 sps:$4 sm:$0xff]  }
  0xbe   : > { %3731 = vmatprep.subr.bf16.mxu1 %v21791_v30  ;;  %v21850_v30 = vld [vmem:[%s30488_s1 + $0xe40] ss:$16 sps:$4 sm:$0xff]  }
  0xc0   : > { %3691 = vmatpush2.bf16.msra.mxu0 %v21786_v31  ;;  %v21855_v31 = vld [vmem:[%s30488_s1 + $0xc24] ss:$16 sps:$4 sm:$0xff]  }
  0xc1   : > { %3732 = vmatpush2.bf16.msra.mxu1 %v21789_v32  ;;  %3692 = vmatprep.subr.bf16.mxu0 %v21794_v35  ;;  %v21858_v32 = vld [vmem:[%s30488_s1 + $0xe24] ss:$16 sps:$4 sm:$0xff]   ;;  %v21853_v35 = vld [vmem:[%s30488_s1 + $0xc20] ss:$16 sps:$4 sm:$0xff]  }
  0xc2   : > { %3733 = vmatprep.subr.bf16.mxu1 %v21797_v36  ;;  %v21856_v36 = vld [vmem:[%s30488_s1 + $0xe20] ss:$16 sps:$4 sm:$0xff]  }
  0xc4   : > { %3693 = vmatpush2.bf16.msra.mxu0 %v21792_v37  ;;  %v21861_v37 = vld [vmem:[%s30488_s1 + $0xc04] ss:$16 sps:$4 sm:$0xff]  }
  0xc5   : > { %3734 = vmatpush2.bf16.msra.mxu1 %v21795_v38  ;;  %3694 = vmatprep.subr.bf16.mxu0 %v21800_v39  ;;  %v21864_v38 = vld [vmem:[%s30488_s1 + $0xe04] ss:$16 sps:$4 sm:$0xff]   ;;  %v21859_v39 = vld [vmem:[%s30488_s1 + $0xc00] ss:$16 sps:$4 sm:$0xff]  }
  0xc6   : > { %3735 = vmatprep.subr.bf16.mxu1 %v21803_v41  ;;  %v21862_v41 = vld [vmem:[%s30488_s1 + $0xe00] ss:$16 sps:$4 sm:$0xff]  }
  0xc8   : > { %3695 = vmatpush2.bf16.msra.mxu0 %v21798_v42  ;;  %v21867_v42 = vld [vmem:[%s30488_s1 + $0xde4] ss:$16 sps:$4 sm:$0xff]  }
  0xc9   : > { %3736 = vmatpush2.bf16.msra.mxu1 %v21801_v46  ;;  %3696 = vmatprep.subr.bf16.mxu0 %v21806_v47  ;;  %v21865_v46 = vld [vmem:[%s30488_s1 + $0xde0] ss:$16 sps:$4 sm:$0xff]  }
  0xca   : > { %3737 = vmatprep.subr.bf16.mxu1 %v21809_v48  ;;  %v21868_v47 = vld [vmem:[%s30488_s1 + $0xfe0] ss:$16 sps:$4 sm:$0xff]   ;;  %v21873_v48 = vld [vmem:[%s30488_s1 + $0xdc4] ss:$16 sps:$4 sm:$0xff]  }
  0xcc   : > { %3697 = vmatpush2.bf16.msra.mxu0 %v21804_v52  ;;  %v21871_v52 = vld [vmem:[%s30488_s1 + $0xdc0] ss:$16 sps:$4 sm:$0xff]  }
  0xcd   : > { %3738 = vmatpush2.bf16.msra.mxu1 %v21807_v55  ;;  %3698 = vmatprep.subr.bf16.mxu0 %v21812_v56  ;;  %v21874_v55 = vld [vmem:[%s30488_s1 + $0xfc0] ss:$16 sps:$4 sm:$0xff]   ;;  %v21879_v56 = vld [vmem:[%s30488_s1 + $0xda4] ss:$16 sps:$4 sm:$0xff]  }
  0xce   : > { %3739 = vmatprep.subr.bf16.mxu1 %v21815_v57  ;;  %v21882_v57 = vld [vmem:[%s30488_s1 + $0xfa4] ss:$16 sps:$4 sm:$0xff]  }
  0xd0   : > { %3699 = vmatpush2.bf16.msra.mxu0 %v21810_v61  ;;  %v21877_v61 = vld [vmem:[%s30488_s1 + $0xda0] ss:$16 sps:$4 sm:$0xff]  }
  0xd1   : > { %3740 = vmatpush2.bf16.msra.mxu1 %v21813_v62  ;;  %3750 = vmatprep.subr.bf16.mxu0 %v21819_v0  ;;  %v21880_v62 = vld [vmem:[%s30488_s1 + $0xfa0] ss:$16 sps:$4 sm:$0xff]   ;;  %v21885_v0 = vld [vmem:[%s30488_s1 + $0xd84] ss:$16 sps:$4 sm:$0xff]  }
  0xd2   : > { %3791 = vmatprep.subr.bf16.mxu1 %v21822_v1  ;;  %v21888_v1 = vld [vmem:[%s30488_s1 + $0xf84] ss:$16 sps:$4 sm:$0xff]  }
  0xd3   : > { %3701 = vmatmul.mubr.bf16.vlgmr.msra.gmra.mxu0 %v24669_v5 }
  0xd4   : > { %3742 = vmatmul.mubr.bf16.vlgmr.msra.gmra.mxu1 %v24673_v6  ;;  %3751 = vmatpush1.bf16.msra.mxu0 %v21817_v7  ;;  %v21891_v7 = vld [vmem:[%s30488_s1 + $0xd64] ss:$16 sps:$4 sm:$0xff]  }
  0xd5   : > { %3792 = vmatpush1.bf16.msra.mxu1 %v21820_v8  ;;  %3752 = vmatprep.subr.bf16.mxu0 %v21825_v40  ;;  %v21894_v8 = vld [vmem:[%s30488_s1 + $0xf64] ss:$16 sps:$4 sm:$0xff]   ;;  %v21889_v40 = vld [vmem:[%s30488_s1 + $0xd60] ss:$16 sps:$4 sm:$0xff]  }
  0xd6   : > { %3793 = vmatprep.subr.bf16.mxu1 %v21828_v45  ;;  %3782 = vmatprep.mubr.bf16.mxu0 %v24687_v9  ;;  %v21892_v45 = vld [vmem:[%s30488_s1 + $0xf60] ss:$16 sps:$4 sm:$0xff]  }
  0xd7   : > { %3823 = vmatprep.mubr.bf16.mxu1 %v24689_v10 }
  0xd8   : > { %3753 = vmatpush1.bf16.msra.mxu0 %v21823_v11  ;;  %v21897_v11 = vld [vmem:[%s30488_s1 + $0xd44] ss:$16 sps:$4 sm:$0xff]  }
  0xd9   : > { %3794 = vmatpush1.bf16.msra.mxu1 %v21826_v12  ;;  %3754 = vmatprep.subr.bf16.mxu0 %v21831_v13  ;;  %v21900_v12 = vld [vmem:[%s30488_s1 + $0xf44] ss:$16 sps:$4 sm:$0xff]   ;;  %v21895_v13 = vld [vmem:[%s30488_s1 + $0xd40] ss:$16 sps:$4 sm:$0xff]  }
  0xda   : > { %3795 = vmatprep.subr.bf16.mxu1 %v21834_v14  ;;  %v21898_v14 = vld [vmem:[%s30488_s1 + $0xf40] ss:$16 sps:$4 sm:$0xff]  }
  0xdc   : > { %3755 = vmatpush1.bf16.msra.mxu0 %v21829_v15  ;;  %v21903_v15 = vld [vmem:[%s30488_s1 + $0xd24] ss:$16 sps:$4 sm:$0xff]  }
  0xdd   : > { %3796 = vmatpush1.bf16.msra.mxu1 %v21832_v16  ;;  %3756 = vmatprep.subr.bf16.mxu0 %v21837_v19  ;;  %v21906_v16 = vld [vmem:[%s30488_s1 + $0xf24] ss:$16 sps:$4 sm:$0xff]   ;;  %v21901_v19 = vld [vmem:[%s30488_s1 + $0xd20] ss:$16 sps:$4 sm:$0xff]  }
  0xde   : > { %3797 = vmatprep.subr.bf16.mxu1 %v21840_v20  ;;  %v21904_v20 = vld [vmem:[%s30488_s1 + $0xf20] ss:$16 sps:$4 sm:$0xff]  }
  0xe0   : > { %3757 = vmatpush1.bf16.msra.mxu0 %v21835_v21  ;;  %v21909_v21 = vld [vmem:[%s30488_s1 + $0xd04] ss:$16 sps:$4 sm:$0xff]  }
  0xe1   : > { %3798 = vmatpush1.bf16.msra.mxu1 %v21838_v22  ;;  %3758 = vmatprep.subr.bf16.mxu0 %v21843_v23  ;;  %v21912_v22 = vld [vmem:[%s30488_s1 + $0xf04] ss:$16 sps:$4 sm:$0xff]   ;;  %v21907_v23 = vld [vmem:[%s30488_s1 + $0xd00] ss:$16 sps:$4 sm:$0xff]  }
  0xe2   : > { %3799 = vmatprep.subr.bf16.mxu1 %v21846_v24  ;;  %v21910_v24 = vld [vmem:[%s30488_s1 + $0xf00] ss:$16 sps:$4 sm:$0xff]  }
  0xe4   : > { %3759 = vmatpush1.bf16.msra.mxu0 %v21841_v25  ;;  %v922_v25 = vld [vmem:[%s30489_s2] sm:$0xf] }
  0xe5   : > { %3800 = vmatpush1.bf16.msra.mxu1 %v21844_v26  ;;  %3760 = vmatprep.subr.bf16.mxu0 %v21849_v27  ;;  %v24873_v26 = vsub.s32 0, %v24127_v44  ;;  %v21916_v27 = vld [vmem:[%s30488_s1 + $0xec] ss:$16 sps:$4 sm:$0xff]  }
  0xe6   : > { %3801 = vmatprep.subr.bf16.mxu1 %v21852_v28  ;;  %v21919_v28 = vld [vmem:[%s30488_s1 + $0x2ec] ss:$16 sps:$4 sm:$0xff]  }
  0xe8   : > { %3761 = vmatpush1.bf16.msra.mxu0 %v21847_v29  ;;  %v24882_v29 = vsub.s32 1, %v24127_v44 }
  0xe9   : > { %3802 = vmatpush1.bf16.msra.mxu1 %v21850_v30  ;;  %3762 = vmatprep.subr.bf16.mxu0 %v21855_v31  ;;  %v24886_v30 = vpack.c.bf16 %v24646_v59, %v24646_v59  ;;  %v24890_v31 = vpack.c.bf16 %v24649_v60, %v24649_v60  ;;  %v21922_v59 = vld [vmem:[%s30488_s1 + $0xcc] ss:$16 sps:$4 sm:$0xff]  }
  0xea   : > { %3803 = vmatprep.subr.bf16.mxu1 %v21858_v32  ;;  %v21914_v32 = vld [vmem:[%s30488_s1 + $0xe8] ss:$16 sps:$4 sm:$0xff]   ;;  %v21925_v60 = vld [vmem:[%s30488_s1 + $0x2cc] ss:$16 sps:$4 sm:$0xff]  }
  0xec   : > { %3763 = vmatpush1.bf16.msra.mxu0 %v21853_v35  ;;  %v927_v35 = vrot.slane %v922_v25, %v24873_v26 }
  0xed   : > { %3804 = vmatpush1.bf16.msra.mxu1 %v21856_v36  ;;  %3764 = vmatprep.subr.bf16.mxu0 %v21861_v37  ;;  %v21917_v36 = vld [vmem:[%s30488_s1 + $0x2e8] ss:$16 sps:$4 sm:$0xff]   ;;  %v931_v37 = vrot.slane %v922_v25, %v24882_v29 }
  0xee   : > { %3805 = vmatprep.subr.bf16.mxu1 %v21864_v38  ;;  %v21920_v38 = vld [vmem:[%s30488_s1 + $0xc8] ss:$16 sps:$4 sm:$0xff]  }
  0xef   : > { %v21959_v25 = vld [vmem:[%s30488_s1 + $0x208] ss:$16 sps:$4 sm:$0xff]  }
  0xf0   : > { %3765 = vmatpush1.bf16.msra.mxu0 %v21859_v39 }
  0xf1   : > { %3806 = vmatpush1.bf16.msra.mxu1 %v21862_v41  ;;  %3766 = vmatprep.subr.bf16.mxu0 %v21867_v42  ;;  %v21923_v42 = vld [vmem:[%s30488_s1 + $0x2c8] ss:$16 sps:$4 sm:$0xff]  }
  0xf2   : > { %3807 = vmatprep.subr.bf16.mxu1 %v21870_v43 }
  0xf4   : > { %3767 = vmatpush2.bf16.msra.mxu0 %v21865_v46  ;;  %v21928_v46 = vld [vmem:[%s30488_s1 + $0xac] ss:$16 sps:$4 sm:$0xff]  }
  0xf5   : > { %3808 = vmatpush2.bf16.msra.mxu1 %v21868_v47  ;;  %3768 = vmatprep.subr.bf16.mxu0 %v21873_v48 }
  0xf6   : > { %3809 = vmatprep.subr.bf16.mxu1 %v21876_v51  ;;  %v21931_v51 = vld [vmem:[%s30488_s1 + $0x2ac] ss:$16 sps:$4 sm:$0xff]  }
  0xf8   : > { %3769 = vmatpush2.bf16.msra.mxu0 %v21871_v52 }
  0xf9   : > { %3810 = vmatpush2.bf16.msra.mxu1 %v21874_v55  ;;  %3770 = vmatprep.subr.bf16.mxu0 %v21879_v56  ;;  %v21926_v56 = vld [vmem:[%s30488_s1 + $0xa8] ss:$16 sps:$4 sm:$0xff]  }
  0xfa   : > { %3811 = vmatprep.subr.bf16.mxu1 %v21882_v57  ;;  %v21929_v57 = vld [vmem:[%s30488_s1 + $0x2a8] ss:$16 sps:$4 sm:$0xff]  }
  0xfc   : > { %3771 = vmatpush2.bf16.msra.mxu0 %v21877_v61 }
  0xfd   : > { %3812 = vmatpush2.bf16.msra.mxu1 %v21880_v62  ;;  %3772 = vmatprep.subr.bf16.mxu0 %v21885_v0 }
  0xfe   : > { %3813 = vmatprep.subr.bf16.mxu1 %v21888_v1 }
 0x100   : > { %3773 = vmatpush2.bf16.msra.mxu0 %v21883_v2 }
 0x101   : > { %3814 = vmatpush2.bf16.msra.mxu1 %v21886_v3  ;;  %3774 = vmatprep.subr.bf16.mxu0 %v21891_v7  ;;  %v21934_v3 = vld [vmem:[%s30488_s1 + $0x8c] ss:$16 sps:$4 sm:$0xff]   ;;  %v21935_v7 = vld [vmem:[%s30488_s1 + $0x288] ss:$16 sps:$4 sm:$0xff]  }
 0x102   : > { %3815 = vmatprep.subr.bf16.mxu1 %v21894_v8  ;;  %v21940_v8 = vld [vmem:[%s30488_s1 + $0x6c] ss:$16 sps:$4 sm:$0xff]  }
 0x104   : > { %3775 = vmatpush2.bf16.msra.mxu0 %v21889_v40  ;;  %v21943_v40 = vld [vmem:[%s30488_s1 + $0x26c] ss:$16 sps:$4 sm:$0xff]  }
 0x105   : > { %3816 = vmatpush2.bf16.msra.mxu1 %v21892_v45  ;;  %3776 = vmatprep.subr.bf16.mxu0 %v21897_v11  ;;  %v21938_v45 = vld [vmem:[%s30488_s1 + $0x68] ss:$16 sps:$4 sm:$0xff]  }
 0x106   : > { %3817 = vmatprep.subr.bf16.mxu1 %v21900_v12  ;;  %v21941_v11 = vld [vmem:[%s30488_s1 + $0x268] ss:$16 sps:$4 sm:$0xff]   ;;  %v21946_v12 = vld [vmem:[%s30488_s1 + $0x4c] ss:$16 sps:$4 sm:$0xff]  }
 0x108   : > { %3777 = vmatpush2.bf16.msra.mxu0 %v21895_v13  ;;  %v21949_v13 = vld [vmem:[%s30488_s1 + $0x24c] ss:$16 sps:$4 sm:$0xff]  }
 0x109   : > { %3818 = vmatpush2.bf16.msra.mxu1 %v21898_v14  ;;  %3778 = vmatprep.subr.bf16.mxu0 %v21903_v15  ;;  %v21944_v14 = vld [vmem:[%s30488_s1 + $0x48] ss:$16 sps:$4 sm:$0xff]  }
 0x10a   : > { %3819 = vmatprep.subr.bf16.mxu1 %v21906_v16  ;;  %v21947_v15 = vld [vmem:[%s30488_s1 + $0x248] ss:$16 sps:$4 sm:$0xff]   ;;  %v21952_v16 = vld [vmem:[%s30488_s1 + $0x2c] ss:$16 sps:$4 sm:$0xff]  }
 0x10c   : > { %3779 = vmatpush2.bf16.msra.mxu0 %v21901_v19  ;;  %v21955_v19 = vld [vmem:[%s30488_s1 + $0x22c] ss:$16 sps:$4 sm:$0xff]  }
 0x10d   : > { %3820 = vmatpush2.bf16.msra.mxu1 %v21904_v20  ;;  %3780 = vmatprep.subr.bf16.mxu0 %v21909_v21  ;;  %v21950_v20 = vld [vmem:[%s30488_s1 + $0x28] ss:$16 sps:$4 sm:$0xff]  }
 0x10e   : > { %3821 = vmatprep.subr.bf16.mxu1 %v21912_v22  ;;  %v21953_v21 = vld [vmem:[%s30488_s1 + $0x228] ss:$16 sps:$4 sm:$0xff]   ;;  %v21958_v22 = vld [vmem:[%s30488_s1 + $0xc] ss:$16 sps:$4 sm:$0xff]  }
 0x110   : > { %3781 = vmatpush2.bf16.msra.mxu0 %v21907_v23  ;;  %v21961_v23 = vld [vmem:[%s30488_s1 + $0x20c] ss:$16 sps:$4 sm:$0xff]  }
 0x111   : > { %3822 = vmatpush2.bf16.msra.mxu1 %v21910_v24  ;;  %3832 = vmatprep.subr.bf16.mxu0 %v21916_v27  ;;  %v21956_v24 = vld [vmem:[%s30488_s1 + $0x8] ss:$16 sps:$4 sm:$0xff]   ;;  %v21964_v27 = vld [vmem:[%s30488_s1 + $0x1ec] ss:$16 sps:$4 sm:$0xff]  }
 0x112   : > { %3873 = vmatprep.subr.bf16.mxu1 %v21919_v28  ;;  %v21967_v28 = vld [vmem:[%s30488_s1 + $0x3ec] ss:$16 sps:$4 sm:$0xff]  }
 0x113   : > { %v3538_v39 = vpop.f32.mrf.mxu0  ;;  %3783 = vmatmul.mubr.bf16.vlgmr.msra.gmra.mxu0 %v24886_v30 }
 0x114   : > { %v3579_v41 = vpop.f32.mrf.mxu1  ;;  %3824 = vmatmul.mubr.bf16.vlgmr.msra.gmra.mxu1 %v24890_v31  ;;  %v3539_v43 = vadd.f32 %v3538_v39, %v927_v35  ;;  %3833 = vmatpush1.bf16.msra.mxu0 %v21914_v32  ;;  %v21962_v32 = vld [vmem:[%s30488_s1 + $0x1e8] ss:$16 sps:$4 sm:$0xff]   ;;  %v21979_v39 = vld [vmem:[%s30488_s1 + $0x3ac] ss:$16 sps:$4 sm:$0xff]  }
 0x115   : > { %3874 = vmatpush1.bf16.msra.mxu1 %v21917_v36  ;;  %v3540_v47 = vpop.f32.mrf.mxu0  ;;  %3834 = vmatprep.subr.bf16.mxu0 %v21922_v59  ;;  %v21965_v35 = vld [vmem:[%s30488_s1 + $0x3e8] ss:$16 sps:$4 sm:$0xff]   ;;  %v21970_v36 = vld [vmem:[%s30488_s1 + $0x1cc] ss:$16 sps:$4 sm:$0xff]  }
 0x116   : > { %v3581_v48 = vpop.f32.mrf.mxu1  ;;  %3875 = vmatprep.subr.bf16.mxu1 %v21925_v60  ;;  %v24920_v52 = vadd.f32 %v3579_v41, %v3539_v43  ;;  %v3541_v55 = vadd.f32 %v3540_v47, %v931_v37  ;;  %3864 = vmatprep.mubr.bf16.mxu0 %v24171_v63  ;;  %v21937_v63 = vld [vmem:[%s30488_s1 + $0x28c] ss:$16 sps:$4 sm:$0xff]   ;;  %v21968_v60 = vld [vmem:[%s30488_s1 + $0x1c8] ss:$16 sps:$4 sm:$0xff]  }
 0x117   : > { %3905 = vmatprep.mubr.bf16.mxu1 %v24182_v4  ;;  %v3542_v61 = vpop.f32.mrf.mxu0  ;;  %v21932_v4 = vld [vmem:[%s30488_s1 + $0x88] ss:$16 sps:$4 sm:$0xff]   ;;  %v21973_v59 = vld [vmem:[%s30488_s1 + $0x3cc] ss:$16 sps:$4 sm:$0xff]  }
 0x118   : > { %v3583_v62 = vpop.f32.mrf.mxu1  ;;  %v24930_v0 = vadd.f32 %v3581_v48, %v3541_v55  ;;  %3835 = vmatpush1.bf16.msra.mxu0 %v21920_v38  ;;  %v21971_v37 = vld [vmem:[%s30488_s1 + $0x3c8] ss:$16 sps:$4 sm:$0xff]   ;;  %v21976_v38 = vld [vmem:[%s30488_s1 + $0x1ac] ss:$16 sps:$4 sm:$0xff]  }
 0x119   : > { %3876 = vmatpush1.bf16.msra.mxu1 %v21923_v42  ;;  %v3543_v1 = vpop.f32.mrf.mxu0  ;;  %3836 = vmatprep.subr.bf16.mxu0 %v21928_v46  ;;  %v21974_v41 = vld [vmem:[%s30488_s1 + $0x1a8] ss:$16 sps:$4 sm:$0xff]   ;;  %v21982_v43 = vld [vmem:[%s30488_s1 + $0x18c] ss:$16 sps:$4 sm:$0xff]  }
 0x11a   : > { %v3584_v2 = vpop.f32.mrf.mxu1  ;;  %3877 = vmatprep.subr.bf16.mxu1 %v21931_v51  ;;  %v21977_v42 = vld [vmem:[%s30488_s1 + $0x3a8] ss:$16 sps:$4 sm:$0xff]   ;;  %v21985_v46 = vld [vmem:[%s30488_s1 + $0x38c] ss:$16 sps:$4 sm:$0xff]  }
 0x11b   : > { %v21980_v47 = vld [vmem:[%s30488_s1 + $0x188] ss:$16 sps:$4 sm:$0xff]   ;;  %v21988_v51 = vld [vmem:[%s30488_s1 + $0x16c] ss:$16 sps:$4 sm:$0xff]  }
 0x11c   : > { %3837 = vmatpush1.bf16.msra.mxu0 %v21926_v56  ;;  %v21983_v48 = vld [vmem:[%s30488_s1 + $0x388] ss:$16 sps:$4 sm:$0xff]   ;;  %v21991_v55 = vld [vmem:[%s30488_s1 + $0x36c] ss:$16 sps:$4 sm:$0xff]  }
 0x11d   : > { %3878 = vmatpush1.bf16.msra.mxu1 %v21929_v57  ;;  %3838 = vmatprep.subr.bf16.mxu0 %v21934_v3  ;;  %v21986_v56 = vld [vmem:[%s30488_s1 + $0x168] ss:$16 sps:$4 sm:$0xff]   ;;  %v21994_v61 = vld [vmem:[%s30488_s1 + $0x14c] ss:$16 sps:$4 sm:$0xff]  }
 0x11e   : > { %3879 = vmatprep.subr.bf16.mxu1 %v21937_v63  ;;  %v21989_v57 = vld [vmem:[%s30488_s1 + $0x368] ss:$16 sps:$4 sm:$0xff]   ;;  %v21997_v62 = vld [vmem:[%s30488_s1 + $0x34c] ss:$16 sps:$4 sm:$0xff]  }
 0x11f   : > { %v21992_v1 = vld [vmem:[%s30488_s1 + $0x148] ss:$16 sps:$4 sm:$0xff]   ;;  %v22000_v3 = vld [vmem:[%s30488_s1 + $0x12c] ss:$16 sps:$4 sm:$0xff]  }
 0x120   : > { %3839 = vmatpush1.bf16.msra.mxu0 %v21932_v4  ;;  %v21995_v2 = vld [vmem:[%s30488_s1 + $0x348] ss:$16 sps:$4 sm:$0xff]   ;;  %v22003_v63 = vld [vmem:[%s30488_s1 + $0x32c] ss:$16 sps:$4 sm:$0xff]  }
 0x121   : > { %3880 = vmatpush1.bf16.msra.mxu1 %v21935_v7  ;;  %3840 = vmatprep.subr.bf16.mxu0 %v21940_v8  ;;  %v21998_v4 = vld [vmem:[%s30488_s1 + $0x128] ss:$16 sps:$4 sm:$0xff]   ;;  %v22006_v8 = vld [vmem:[%s30488_s1 + $0x10c] ss:$16 sps:$4 sm:$0xff]  }
 0x122   : > { %3881 = vmatprep.subr.bf16.mxu1 %v21943_v40  ;;  %v22001_v7 = vld [vmem:[%s30488_s1 + $0x328] ss:$16 sps:$4 sm:$0xff]   ;;  %v22009_v40 = vld [vmem:[%s30488_s1 + $0x30c] ss:$16 sps:$4 sm:$0xff]  }
 0x124   : > { %3841 = vmatpush1.bf16.msra.mxu0 %v21938_v45  ;;  %v22004_v45 = vld [vmem:[%s30488_s1 + $0x108] ss:$16 sps:$4 sm:$0xff]  }
 0x125   : > { %3882 = vmatpush1.bf16.msra.mxu1 %v21941_v11  ;;  %3842 = vmatprep.subr.bf16.mxu0 %v21946_v12  ;;  %v22007_v11 = vld [vmem:[%s30488_s1 + $0x308] ss:$16 sps:$4 sm:$0xff]   ;;  %v22012_v12 = vld [vmem:[%s30488_s1 + $0x4ec] ss:$16 sps:$4 sm:$0xff]  }
 0x126   : > { %3883 = vmatprep.subr.bf16.mxu1 %v21949_v13  ;;  %v22015_v13 = vld [vmem:[%s30488_s1 + $0x6ec] ss:$16 sps:$4 sm:$0xff]  }
 0x128   : > { %3843 = vmatpush1.bf16.msra.mxu0 %v21944_v14  ;;  %v22010_v14 = vld [vmem:[%s30488_s1 + $0x4e8] ss:$16 sps:$4 sm:$0xff]  }
 0x129   : > { %3884 = vmatpush1.bf16.msra.mxu1 %v21947_v15  ;;  %3844 = vmatprep.subr.bf16.mxu0 %v21952_v16  ;;  %v22013_v15 = vld [vmem:[%s30488_s1 + $0x6e8] ss:$16 sps:$4 sm:$0xff]   ;;  %v22018_v16 = vld [vmem:[%s30488_s1 + $0x4cc] ss:$16 sps:$4 sm:$0xff]  }
 0x12a   : > { %3885 = vmatprep.subr.bf16.mxu1 %v21955_v19  ;;  %v22021_v19 = vld [vmem:[%s30488_s1 + $0x6cc] ss:$16 sps:$4 sm:$0xff]  }
 0x12c   : > { %3845 = vmatpush1.bf16.msra.mxu0 %v21950_v20  ;;  %v22016_v20 = vld [vmem:[%s30488_s1 + $0x4c8] ss:$16 sps:$4 sm:$0xff]  }
 0x12d   : > { %3886 = vmatpush1.bf16.msra.mxu1 %v21953_v21  ;;  %3846 = vmatprep.subr.bf16.mxu0 %v21958_v22  ;;  %v22019_v21 = vld [vmem:[%s30488_s1 + $0x6c8] ss:$16 sps:$4 sm:$0xff]  }
 0x12e   : > { %3887 = vmatprep.subr.bf16.mxu1 %v21961_v23 }
 0x130   : > { %3847 = vmatpush1.bf16.msra.mxu0 %v21956_v24 }
 0x131   : > { %3888 = vmatpush1.bf16.msra.mxu1 %v21959_v25  ;;  %3848 = vmatprep.subr.bf16.mxu0 %v21964_v27 }
 0x132   : > { %3889 = vmatprep.subr.bf16.mxu1 %v21967_v28  ;;  %v22024_v28 = vld [vmem:[%s30488_s1 + $0x4ac] ss:$16 sps:$4 sm:$0xff]  }
 0x134   : > { %3849 = vmatpush2.bf16.msra.mxu0 %v21962_v32  ;;  %v22027_v32 = vld [vmem:[%s30488_s1 + $0x6ac] ss:$16 sps:$4 sm:$0xff]  }
 0x135   : > { %3890 = vmatpush2.bf16.msra.mxu1 %v21965_v35  ;;  %3850 = vmatprep.subr.bf16.mxu0 %v21970_v36 }
 0x136   : > { %3891 = vmatprep.subr.bf16.mxu1 %v21973_v59 }
 0x138   : > { %3851 = vmatpush2.bf16.msra.mxu0 %v21968_v60 }
 0x139   : > { %3892 = vmatpush2.bf16.msra.mxu1 %v21971_v37  ;;  %3852 = vmatprep.subr.bf16.mxu0 %v21976_v38  ;;  %v22030_v38 = vld [vmem:[%s30488_s1 + $0x48c] ss:$16 sps:$4 sm:$0xff]  }
 0x13a   : > { %3893 = vmatprep.subr.bf16.mxu1 %v21979_v39  ;;  %v22031_v39 = vld [vmem:[%s30488_s1 + $0x688] ss:$16 sps:$4 sm:$0xff]  }
 0x13c   : > { %3853 = vmatpush2.bf16.msra.mxu0 %v21974_v41  ;;  %v22036_v41 = vld [vmem:[%s30488_s1 + $0x46c] ss:$16 sps:$4 sm:$0xff]  }
 0x13d   : > { %3894 = vmatpush2.bf16.msra.mxu1 %v21977_v42  ;;  %3854 = vmatprep.subr.bf16.mxu0 %v21982_v43  ;;  %v22039_v42 = vld [vmem:[%s30488_s1 + $0x66c] ss:$16 sps:$4 sm:$0xff]   ;;  %v22034_v43 = vld [vmem:[%s30488_s1 + $0x468] ss:$16 sps:$4 sm:$0xff]  }
 0x13e   : > { %3895 = vmatprep.subr.bf16.mxu1 %v21985_v46  ;;  %v22037_v46 = vld [vmem:[%s30488_s1 + $0x668] ss:$16 sps:$4 sm:$0xff]  }
 0x140   : > { %3855 = vmatpush2.bf16.msra.mxu0 %v21980_v47  ;;  %v22042_v47 = vld [vmem:[%s30488_s1 + $0x44c] ss:$16 sps:$4 sm:$0xff]  }
 0x141   : > { %3896 = vmatpush2.bf16.msra.mxu1 %v21983_v48  ;;  %3856 = vmatprep.subr.bf16.mxu0 %v21988_v51  ;;  %v22045_v48 = vld [vmem:[%s30488_s1 + $0x64c] ss:$16 sps:$4 sm:$0xff]   ;;  %v22040_v51 = vld [vmem:[%s30488_s1 + $0x448] ss:$16 sps:$4 sm:$0xff]  }
 0x142   : > { %3897 = vmatprep.subr.bf16.mxu1 %v21991_v55  ;;  %v22043_v55 = vld [vmem:[%s30488_s1 + $0x648] ss:$16 sps:$4 sm:$0xff]  }
 0x144   : > { %3857 = vmatpush2.bf16.msra.mxu0 %v21986_v56  ;;  %v22048_v56 = vld [vmem:[%s30488_s1 + $0x42c] ss:$16 sps:$4 sm:$0xff]  }
 0x145   : > { %3898 = vmatpush2.bf16.msra.mxu1 %v21989_v57  ;;  %3858 = vmatprep.subr.bf16.mxu0 %v21994_v61  ;;  %v22051_v57 = vld [vmem:[%s30488_s1 + $0x62c] ss:$16 sps:$4 sm:$0xff]   ;;  %v22046_v61 = vld [vmem:[%s30488_s1 + $0x428] ss:$16 sps:$4 sm:$0xff]  }
 0x146   : > { %3899 = vmatprep.subr.bf16.mxu1 %v21997_v62  ;;  %v22049_v62 = vld [vmem:[%s30488_s1 + $0x628] ss:$16 sps:$4 sm:$0xff]  }
 0x148   : > { %3859 = vmatpush2.bf16.msra.mxu0 %v21992_v1  ;;  %v22054_v1 = vld [vmem:[%s30488_s1 + $0x40c] ss:$16 sps:$4 sm:$0xff]  }
 0x149   : > { %3900 = vmatpush2.bf16.msra.mxu1 %v21995_v2  ;;  %3860 = vmatprep.subr.bf16.mxu0 %v22000_v3  ;;  %v22057_v2 = vld [vmem:[%s30488_s1 + $0x60c] ss:$16 sps:$4 sm:$0xff]   ;;  %v22052_v3 = vld [vmem:[%s30488_s1 + $0x408] ss:$16 sps:$4 sm:$0xff]  }
 0x14a   : > { %3901 = vmatprep.subr.bf16.mxu1 %v22003_v63  ;;  %v22055_v63 = vld [vmem:[%s30488_s1 + $0x608] ss:$16 sps:$4 sm:$0xff]  }
 0x14c   : > { %3861 = vmatpush2.bf16.msra.mxu0 %v21998_v4  ;;  %v22060_v4 = vld [vmem:[%s30488_s1 + $0x5ec] ss:$16 sps:$4 sm:$0xff]  }
 0x14d   : > { %3902 = vmatpush2.bf16.msra.mxu1 %v22001_v7  ;;  %3862 = vmatprep.subr.bf16.mxu0 %v22006_v8  ;;  %v22063_v7 = vld [vmem:[%s30488_s1 + $0x7ec] ss:$16 sps:$4 sm:$0xff]   ;;  %v22058_v8 = vld [vmem:[%s30488_s1 + $0x5e8] ss:$16 sps:$4 sm:$0xff]  }
 0x14e   : > { %3903 = vmatprep.subr.bf16.mxu1 %v22009_v40  ;;  %v22061_v40 = vld [vmem:[%s30488_s1 + $0x7e8] ss:$16 sps:$4 sm:$0xff]  }
 0x150   : > { %3863 = vmatpush2.bf16.msra.mxu0 %v22004_v45  ;;  %v22066_v45 = vld [vmem:[%s30488_s1 + $0x5cc] ss:$16 sps:$4 sm:$0xff]  }
 0x151   : > { %3904 = vmatpush2.bf16.msra.mxu1 %v22007_v11  ;;  %3914 = vmatprep.subr.bf16.mxu0 %v22012_v12  ;;  %v22069_v11 = vld [vmem:[%s30488_s1 + $0x7cc] ss:$16 sps:$4 sm:$0xff]   ;;  %v22064_v12 = vld [vmem:[%s30488_s1 + $0x5c8] ss:$16 sps:$4 sm:$0xff]  }
 0x152   : > { %3955 = vmatprep.subr.bf16.mxu1 %v22015_v13  ;;  %v22067_v13 = vld [vmem:[%s30488_s1 + $0x7c8] ss:$16 sps:$4 sm:$0xff]  }
 0x153   : > { %v3620_v22 = vpop.f32.mrf.mxu0  ;;  %3865 = vmatmul.mubr.bf16.vlgmr.msra.gmra.mxu0 %v24222_v17 }
 0x154   : > { %v3661_v23 = vpop.f32.mrf.mxu1  ;;  %3906 = vmatmul.mubr.bf16.vlgmr.msra.gmra.mxu1 %v24224_v18  ;;  %v3621_v24 = vadd.f32 %v3620_v22, %v24920_v52  ;;  %3915 = vmatpush1.bf16.msra.mxu0 %v22010_v14  ;;  %v22022_v18 = vld [vmem:[%s30488_s1 + $0x4a8] ss:$16 sps:$4 sm:$0xff]   ;;  %v22072_v14 = vld [vmem:[%s30488_s1 + $0x5ac] ss:$16 sps:$4 sm:$0xff]  }
 0x155   : > { %3956 = vmatpush1.bf16.msra.mxu1 %v22013_v15  ;;  %v3622_v25 = vpop.f32.mrf.mxu0  ;;  %3916 = vmatprep.subr.bf16.mxu0 %v22018_v16  ;;  %v22025_v52 = vld [vmem:[%s30488_s1 + $0x6a8] ss:$16 sps:$4 sm:$0xff]   ;;  %v22075_v15 = vld [vmem:[%s30488_s1 + $0x7ac] ss:$16 sps:$4 sm:$0xff]  }
 0x156   : > { %v3663_v27 = vpop.f32.mrf.mxu1  ;;  %3957 = vmatprep.subr.bf16.mxu1 %v22021_v19  ;;  %v25121_v35 = vadd.f32 %v3661_v23, %v3621_v24  ;;  %v3623_v17 = vadd.f32 %v3622_v25, %v24930_v0  ;;  %3946 = vmatprep.mubr.bf16.mxu0 %v24321_v54  ;;  %v22033_v54 = vld [vmem:[%s30488_s1 + $0x68c] ss:$16 sps:$4 sm:$0xff]   ;;  %v22070_v16 = vld [vmem:[%s30488_s1 + $0x5a8] ss:$16 sps:$4 sm:$0xff]  }
 0x157   : > { %3987 = vmatprep.mubr.bf16.mxu1 %v24331_v58  ;;  %v3624_v36 = vpop.f32.mrf.mxu0  ;;  %v22028_v58 = vld [vmem:[%s30488_s1 + $0x488] ss:$16 sps:$4 sm:$0xff]   ;;  %v22084_v24 = vld [vmem:[%s30488_s1 + $0x56c] ss:$16 sps:$4 sm:$0xff]  }
 0x158   : > { %v3665_v59 = vpop.f32.mrf.mxu1  ;;  %v25132_v60 = vadd.f32 %v3663_v27, %v3623_v17  ;;  %3917 = vmatpush1.bf16.msra.mxu0 %v22016_v20  ;;  %v22073_v19 = vld [vmem:[%s30488_s1 + $0x7a8] ss:$16 sps:$4 sm:$0xff]   ;;  %v22078_v20 = vld [vmem:[%s30488_s1 + $0x58c] ss:$16 sps:$4 sm:$0xff]  }
 0x159   : > { %3958 = vmatpush1.bf16.msra.mxu1 %v22019_v21  ;;  %v3625_v37 = vpop.f32.mrf.mxu0  ;;  %3918 = vmatprep.subr.bf16.mxu0 %v22024_v28  ;;  %v22081_v21 = vld [vmem:[%s30488_s1 + $0x78c] ss:$16 sps:$4 sm:$0xff]   ;;  %v22076_v22 = vld [vmem:[%s30488_s1 + $0x588] ss:$16 sps:$4 sm:$0xff]  }
 0x15a   : > { %v3666_v0 = vpop.f32.mrf.mxu1  ;;  %3959 = vmatprep.subr.bf16.mxu1 %v22027_v32  ;;  %v22079_v23 = vld [vmem:[%s30488_s1 + $0x788] ss:$16 sps:$4 sm:$0xff]   ;;  %v22087_v25 = vld [vmem:[%s30488_s1 + $0x76c] ss:$16 sps:$4 sm:$0xff]  }
 0x15b   : > { %v22082_v27 = vld [vmem:[%s30488_s1 + $0x568] ss:$16 sps:$4 sm:$0xff]   ;;  %v22090_v32 = vld [vmem:[%s30488_s1 + $0x54c] ss:$16 sps:$4 sm:$0xff]  }
 0x15c   : > { %3919 = vmatpush1.bf16.msra.mxu0 %v22022_v18  ;;  %v22085_v28 = vld [vmem:[%s30488_s1 + $0x768] ss:$16 sps:$4 sm:$0xff]   ;;  %v22093_v17 = vld [vmem:[%s30488_s1 + $0x74c] ss:$16 sps:$4 sm:$0xff]  }
 0x15d   : > { %3960 = vmatpush1.bf16.msra.mxu1 %v22025_v52  ;;  %3920 = vmatprep.subr.bf16.mxu0 %v22030_v38  ;;  %v22088_v18 = vld [vmem:[%s30488_s1 + $0x548] ss:$16 sps:$4 sm:$0xff]   ;;  %v22096_v36 = vld [vmem:[%s30488_s1 + $0x52c] ss:$16 sps:$4 sm:$0xff]  }
 0x15e   : > { %3961 = vmatprep.subr.bf16.mxu1 %v22033_v54  ;;  %v22091_v52 = vld [vmem:[%s30488_s1 + $0x748] ss:$16 sps:$4 sm:$0xff]   ;;  %v22099_v59 = vld [vmem:[%s30488_s1 + $0x72c] ss:$16 sps:$4 sm:$0xff]  }
 0x15f   : > { %v22094_v37 = vld [vmem:[%s30488_s1 + $0x528] ss:$16 sps:$4 sm:$0xff]   ;;  %v22102_v38 = vld [vmem:[%s30488_s1 + $0x50c] ss:$16 sps:$4 sm:$0xff]  }
 0x160   : > { %3921 = vmatpush1.bf16.msra.mxu0 %v22028_v58  ;;  %v22097_v0 = vld [vmem:[%s30488_s1 + $0x728] ss:$16 sps:$4 sm:$0xff]   ;;  %v22105_v54 = vld [vmem:[%s30488_s1 + $0x70c] ss:$16 sps:$4 sm:$0xff]  }
 0x161   : > { %3962 = vmatpush1.bf16.msra.mxu1 %v22031_v39  ;;  %3922 = vmatprep.subr.bf16.mxu0 %v22036_v41  ;;  %v22100_v58 = vld [vmem:[%s30488_s1 + $0x508] ss:$16 sps:$4 sm:$0xff]   ;;  %v22108_v41 = vld [vmem:[%s30488_s1 + $0x8ec] ss:$16 sps:$4 sm:$0xff]  }
 0x162   : > { %3963 = vmatprep.subr.bf16.mxu1 %v22039_v42  ;;  %v22103_v39 = vld [vmem:[%s30488_s1 + $0x708] ss:$16 sps:$4 sm:$0xff]   ;;  %v22111_v42 = vld [vmem:[%s30488_s1 + $0xaec] ss:$16 sps:$4 sm:$0xff]  }
 0x164   : > { %3923 = vmatpush1.bf16.msra.mxu0 %v22034_v43  ;;  %v22106_v43 = vld [vmem:[%s30488_s1 + $0x8e8] ss:$16 sps:$4 sm:$0xff]  }
 0x165   : > { %3964 = vmatpush1.bf16.msra.mxu1 %v22037_v46  ;;  %3924 = vmatprep.subr.bf16.mxu0 %v22042_v47  ;;  %v22109_v46 = vld [vmem:[%s30488_s1 + $0xae8] ss:$16 sps:$4 sm:$0xff]   ;;  %v22114_v47 = vld [vmem:[%s30488_s1 + $0x8cc] ss:$16 sps:$4 sm:$0xff]  }
 0x166   : > { %3965 = vmatprep.subr.bf16.mxu1 %v22045_v48  ;;  %v22117_v48 = vld [vmem:[%s30488_s1 + $0xacc] ss:$16 sps:$4 sm:$0xff]  }
 0x168   : > { %3925 = vmatpush1.bf16.msra.mxu0 %v22040_v51  ;;  %v22112_v51 = vld [vmem:[%s30488_s1 + $0x8c8] ss:$16 sps:$4 sm:$0xff]  }
 0x169   : > { %3966 = vmatpush1.bf16.msra.mxu1 %v22043_v55  ;;  %3926 = vmatprep.subr.bf16.mxu0 %v22048_v56  ;;  %v22115_v55 = vld [vmem:[%s30488_s1 + $0xac8] ss:$16 sps:$4 sm:$0xff]  }
 0x16a   : > { %3967 = vmatprep.subr.bf16.mxu1 %v22051_v57 }
 0x16c   : > { %3927 = vmatpush1.bf16.msra.mxu0 %v22046_v61 }
 0x16d   : > { %3968 = vmatpush1.bf16.msra.mxu1 %v22049_v62  ;;  %3928 = vmatprep.subr.bf16.mxu0 %v22054_v1  ;;  %v22120_v62 = vld [vmem:[%s30488_s1 + $0x8ac] ss:$16 sps:$4 sm:$0xff]  }
 0x16e   : > { %3969 = vmatprep.subr.bf16.mxu1 %v22057_v2  ;;  %v22123_v1 = vld [vmem:[%s30488_s1 + $0xaac] ss:$16 sps:$4 sm:$0xff]  }
 0x170   : > { %3929 = vmatpush1.bf16.msra.mxu0 %v22052_v3 }
 0x171   : > { %3970 = vmatpush1.bf16.msra.mxu1 %v22055_v63  ;;  %3930 = vmatprep.subr.bf16.mxu0 %v22060_v4 }
 0x172   : > { %3971 = vmatprep.subr.bf16.mxu1 %v22063_v7 }
 0x174   : > { %3931 = vmatpush2.bf16.msra.mxu0 %v22058_v8 }
 0x175   : > { %3972 = vmatpush2.bf16.msra.mxu1 %v22061_v40  ;;  %3932 = vmatprep.subr.bf16.mxu0 %v22066_v45  ;;  %v22129_v40 = vld [vmem:[%s30488_s1 + $0xa8c] ss:$16 sps:$4 sm:$0xff]  }
 0x176   : > { %3973 = vmatprep.subr.bf16.mxu1 %v22069_v11 }
 0x178   : > { %3933 = vmatpush2.bf16.msra.mxu0 %v22064_v12  ;;  %v22132_v12 = vld [vmem:[%s30488_s1 + $0x86c] ss:$16 sps:$4 sm:$0xff]  }
 0x179   : > { %3974 = vmatpush2.bf16.msra.mxu1 %v22067_v13  ;;  %3934 = vmatprep.subr.bf16.mxu0 %v22072_v14  ;;  %v22135_v13 = vld [vmem:[%s30488_s1 + $0xa6c] ss:$16 sps:$4 sm:$0xff]   ;;  %v22130_v14 = vld [vmem:[%s30488_s1 + $0x868] ss:$16 sps:$4 sm:$0xff]  }
 0x17a   : > { %3975 = vmatprep.subr.bf16.mxu1 %v22075_v15  ;;  %v22133_v15 = vld [vmem:[%s30488_s1 + $0xa68] ss:$16 sps:$4 sm:$0xff]  }
 0x17c   : > { %3935 = vmatpush2.bf16.msra.mxu0 %v22070_v16  ;;  %v22138_v16 = vld [vmem:[%s30488_s1 + $0x84c] ss:$16 sps:$4 sm:$0xff]  }
 0x17d   : > { %3976 = vmatpush2.bf16.msra.mxu1 %v22073_v19  ;;  %3936 = vmatprep.subr.bf16.mxu0 %v22078_v20  ;;  %v22141_v19 = vld [vmem:[%s30488_s1 + $0xa4c] ss:$16 sps:$4 sm:$0xff]   ;;  %v22136_v20 = vld [vmem:[%s30488_s1 + $0x848] ss:$16 sps:$4 sm:$0xff]  }
 0x17e   : > { %3977 = vmatprep.subr.bf16.mxu1 %v22081_v21  ;;  %v22139_v21 = vld [vmem:[%s30488_s1 + $0xa48] ss:$16 sps:$4 sm:$0xff]  }
 0x180   : > { %3937 = vmatpush2.bf16.msra.mxu0 %v22076_v22  ;;  %v22144_v22 = vld [vmem:[%s30488_s1 + $0x82c] ss:$16 sps:$4 sm:$0xff]  }
 0x181   : > { %3978 = vmatpush2.bf16.msra.mxu1 %v22079_v23  ;;  %3938 = vmatprep.subr.bf16.mxu0 %v22084_v24  ;;  %v22147_v23 = vld [vmem:[%s30488_s1 + $0xa2c] ss:$16 sps:$4 sm:$0xff]   ;;  %v22142_v24 = vld [vmem:[%s30488_s1 + $0x828] ss:$16 sps:$4 sm:$0xff]  }
 0x182   : > { %3979 = vmatprep.subr.bf16.mxu1 %v22087_v25  ;;  %v22145_v25 = vld [vmem:[%s30488_s1 + $0xa28] ss:$16 sps:$4 sm:$0xff]  }
 0x184   : > { %3939 = vmatpush2.bf16.msra.mxu0 %v22082_v27  ;;  %v22150_v27 = vld [vmem:[%s30488_s1 + $0x80c] ss:$16 sps:$4 sm:$0xff]  }
 0x185   : > { %3980 = vmatpush2.bf16.msra.mxu1 %v22085_v28  ;;  %3940 = vmatprep.subr.bf16.mxu0 %v22090_v32  ;;  %v22153_v28 = vld [vmem:[%s30488_s1 + $0xa0c] ss:$16 sps:$4 sm:$0xff]   ;;  %v22148_v32 = vld [vmem:[%s30488_s1 + $0x808] ss:$16 sps:$4 sm:$0xff]  }
 0x186   : > { %3981 = vmatprep.subr.bf16.mxu1 %v22093_v17  ;;  %v22151_v17 = vld [vmem:[%s30488_s1 + $0xa08] ss:$16 sps:$4 sm:$0xff]  }
 0x188   : > { %3941 = vmatpush2.bf16.msra.mxu0 %v22088_v18  ;;  %v22156_v18 = vld [vmem:[%s30488_s1 + $0x9ec] ss:$16 sps:$4 sm:$0xff]  }
 0x189   : > { %3982 = vmatpush2.bf16.msra.mxu1 %v22091_v52  ;;  %3942 = vmatprep.subr.bf16.mxu0 %v22096_v36  ;;  %v22159_v52 = vld [vmem:[%s30488_s1 + $0xbec] ss:$16 sps:$4 sm:$0xff]   ;;  %v22154_v36 = vld [vmem:[%s30488_s1 + $0x9e8] ss:$16 sps:$4 sm:$0xff]  }
 0x18a   : > { %3983 = vmatprep.subr.bf16.mxu1 %v22099_v59  ;;  %v22157_v59 = vld [vmem:[%s30488_s1 + $0xbe8] ss:$16 sps:$4 sm:$0xff]  }
 0x18c   : > { %3943 = vmatpush2.bf16.msra.mxu0 %v22094_v37  ;;  %v22162_v37 = vld [vmem:[%s30488_s1 + $0x9cc] ss:$16 sps:$4 sm:$0xff]  }
 0x18d   : > { %3984 = vmatpush2.bf16.msra.mxu1 %v22097_v0  ;;  %3944 = vmatprep.subr.bf16.mxu0 %v22102_v38  ;;  %v22165_v0 = vld [vmem:[%s30488_s1 + $0xbcc] ss:$16 sps:$4 sm:$0xff]   ;;  %v22160_v38 = vld [vmem:[%s30488_s1 + $0x9c8] ss:$16 sps:$4 sm:$0xff]  }
 0x18e   : > { %3985 = vmatprep.subr.bf16.mxu1 %v22105_v54  ;;  %v22163_v54 = vld [vmem:[%s30488_s1 + $0xbc8] ss:$16 sps:$4 sm:$0xff]  }
 0x190   : > { %3945 = vmatpush2.bf16.msra.mxu0 %v22100_v58  ;;  %v22168_v58 = vld [vmem:[%s30488_s1 + $0x9ac] ss:$16 sps:$4 sm:$0xff]  }
 0x191   : > { %3986 = vmatpush2.bf16.msra.mxu1 %v22103_v39  ;;  %3996 = vmatprep.subr.bf16.mxu0 %v22108_v41  ;;  %v22171_v39 = vld [vmem:[%s30488_s1 + $0xbac] ss:$16 sps:$4 sm:$0xff]   ;;  %v22166_v41 = vld [vmem:[%s30488_s1 + $0x9a8] ss:$16 sps:$4 sm:$0xff]  }
 0x192   : > { %4037 = vmatprep.subr.bf16.mxu1 %v22111_v42  ;;  %v22169_v42 = vld [vmem:[%s30488_s1 + $0xba8] ss:$16 sps:$4 sm:$0xff]  }
 0x193   : > { %v3702_v56 = vpop.f32.mrf.mxu0  ;;  %3947 = vmatmul.mubr.bf16.vlgmr.msra.gmra.mxu0 %v24439_v33 }
 0x194   : > { %v3743_v57 = vpop.f32.mrf.mxu1  ;;  %3988 = vmatmul.mubr.bf16.vlgmr.msra.gmra.mxu1 %v24443_v34  ;;  %v3703_v61 = vadd.f32 %v3702_v56, %v25121_v35  ;;  %3997 = vmatpush1.bf16.msra.mxu0 %v22106_v43  ;;  %v22118_v34 = vld [vmem:[%s30488_s1 + $0x8a8] ss:$16 sps:$4 sm:$0xff]   ;;  %v22174_v43 = vld [vmem:[%s30488_s1 + $0x98c] ss:$16 sps:$4 sm:$0xff]  }
 0x195   : > { %4038 = vmatpush1.bf16.msra.mxu1 %v22109_v46  ;;  %v3704_v2 = vpop.f32.mrf.mxu0  ;;  %3998 = vmatprep.subr.bf16.mxu0 %v22114_v47  ;;  %v22121_v35 = vld [vmem:[%s30488_s1 + $0xaa8] ss:$16 sps:$4 sm:$0xff]   ;;  %v22177_v46 = vld [vmem:[%s30488_s1 + $0xb8c] ss:$16 sps:$4 sm:$0xff]  }
 0x196   : > { %v3745_v3 = vpop.f32.mrf.mxu1  ;;  %4039 = vmatprep.subr.bf16.mxu1 %v22117_v48  ;;  %v25323_v63 = vadd.f32 %v3743_v57, %v3703_v61  ;;  %v3705_v33 = vadd.f32 %v3704_v2, %v25132_v60  ;;  %4028 = vmatprep.mubr.bf16.mxu0 %v24480_v49  ;;  %v22126_v60 = vld [vmem:[%s30488_s1 + $0x88c] ss:$16 sps:$4 sm:$0xff]   ;;  %v22124_v49 = vld [vmem:[%s30488_s1 + $0x888] ss:$16 sps:$4 sm:$0xff]  }
 0x197   : > { %4069 = vmatprep.mubr.bf16.mxu1 %v24488_v53  ;;  %v3706_v4 = vpop.f32.mrf.mxu0  ;;  %v22127_v53 = vld [vmem:[%s30488_s1 + $0xa88] ss:$16 sps:$4 sm:$0xff]   ;;  %v22186_v61 = vld [vmem:[%s30488_s1 + $0x94c] ss:$16 sps:$4 sm:$0xff]  }
 0x198   : > { %v3747_v7 = vpop.f32.mrf.mxu1  ;;  %v25334_v8 = vadd.f32 %v3745_v3, %v3705_v33  ;;  %3999 = vmatpush1.bf16.msra.mxu0 %v22112_v51  ;;  %v22172_v47 = vld [vmem:[%s30488_s1 + $0x988] ss:$16 sps:$4 sm:$0xff]   ;;  %v22180_v51 = vld [vmem:[%s30488_s1 + $0x96c] ss:$16 sps:$4 sm:$0xff]  }
 0x199   : > { %4040 = vmatpush1.bf16.msra.mxu1 %v22115_v55  ;;  %v3707_v45 = vpop.f32.mrf.mxu0  ;;  %4000 = vmatprep.subr.bf16.mxu0 %v22120_v62  ;;  %v22175_v48 = vld [vmem:[%s30488_s1 + $0xb88] ss:$16 sps:$4 sm:$0xff]   ;;  %v22183_v55 = vld [vmem:[%s30488_s1 + $0xb6c] ss:$16 sps:$4 sm:$0xff]  }
 0x19a   : > { %v3748_v11 = vpop.f32.mrf.mxu1  ;;  %4041 = vmatprep.subr.bf16.mxu1 %v22123_v1  ;;  %v22178_v56 = vld [vmem:[%s30488_s1 + $0x968] ss:$16 sps:$4 sm:$0xff]   ;;  %v22189_v62 = vld [vmem:[%s30488_s1 + $0xb4c] ss:$16 sps:$4 sm:$0xff]  }
 0x19b   : > { %v22181_v57 = vld [vmem:[%s30488_s1 + $0xb68] ss:$16 sps:$4 sm:$0xff]   ;;  %v22192_v3 = vld [vmem:[%s30488_s1 + $0x92c] ss:$16 sps:$4 sm:$0xff]  }
 0x19c   : > { %4001 = vmatpush1.bf16.msra.mxu0 %v22118_v34  ;;  %v22184_v1 = vld [vmem:[%s30488_s1 + $0x948] ss:$16 sps:$4 sm:$0xff]   ;;  %v22195_v33 = vld [vmem:[%s30488_s1 + $0xb2c] ss:$16 sps:$4 sm:$0xff]  }
 0x19d   : > { %4042 = vmatpush1.bf16.msra.mxu1 %v22121_v35  ;;  %4002 = vmatprep.subr.bf16.mxu0 %v22126_v60  ;;  %v22187_v2 = vld [vmem:[%s30488_s1 + $0xb48] ss:$16 sps:$4 sm:$0xff]   ;;  %v22198_v4 = vld [vmem:[%s30488_s1 + $0x90c] ss:$16 sps:$4 sm:$0xff]  }
 0x19e   : > { %4043 = vmatprep.subr.bf16.mxu1 %v22129_v40  ;;  %v22190_v34 = vld [vmem:[%s30488_s1 + $0x928] ss:$16 sps:$4 sm:$0xff]   ;;  %v22201_v7 = vld [vmem:[%s30488_s1 + $0xb0c] ss:$16 sps:$4 sm:$0xff]  }
 0x19f   : > { %v22193_v35 = vld [vmem:[%s30488_s1 + $0xb28] ss:$16 sps:$4 sm:$0xff]   ;;  %v22204_v45 = vld [vmem:[%s30488_s1 + $0xcec] ss:$16 sps:$4 sm:$0xff]  }
 0x1a0   : > { %4003 = vmatpush1.bf16.msra.mxu0 %v22124_v49  ;;  %v22196_v60 = vld [vmem:[%s30488_s1 + $0x908] ss:$16 sps:$4 sm:$0xff]   ;;  %v22207_v11 = vld [vmem:[%s30488_s1 + $0xeec] ss:$16 sps:$4 sm:$0xff]  }
 0x1a1   : > { %4044 = vmatpush1.bf16.msra.mxu1 %v22127_v53  ;;  %4004 = vmatprep.subr.bf16.mxu0 %v22132_v12  ;;  %v22199_v40 = vld [vmem:[%s30488_s1 + $0xb08] ss:$16 sps:$4 sm:$0xff]   ;;  %v22210_v12 = vld [vmem:[%s30488_s1 + $0xccc] ss:$16 sps:$4 sm:$0xff]  }
 0x1a2   : > { %4045 = vmatprep.subr.bf16.mxu1 %v22135_v13  ;;  %v22202_v49 = vld [vmem:[%s30488_s1 + $0xce8] ss:$16 sps:$4 sm:$0xff]   ;;  %v22213_v13 = vld [vmem:[%s30488_s1 + $0xecc] ss:$16 sps:$4 sm:$0xff]  }
 0x1a3   : > { %v22205_v53 = vld [vmem:[%s30488_s1 + $0xee8] ss:$16 sps:$4 sm:$0xff]  }
 0x1a4   : > { %4005 = vmatpush1.bf16.msra.mxu0 %v22130_v14  ;;  %v22208_v14 = vld [vmem:[%s30488_s1 + $0xcc8] ss:$16 sps:$4 sm:$0xff]  }
 0x1a5   : > { %4046 = vmatpush1.bf16.msra.mxu1 %v22133_v15  ;;  %4006 = vmatprep.subr.bf16.mxu0 %v22138_v16  ;;  %v22211_v15 = vld [vmem:[%s30488_s1 + $0xec8] ss:$16 sps:$4 sm:$0xff]  }
 0x1a6   : > { %4047 = vmatprep.subr.bf16.mxu1 %v22141_v19 }
 0x1a8   : > { %4007 = vmatpush1.bf16.msra.mxu0 %v22136_v20 }
 0x1a9   : > { %4048 = vmatpush1.bf16.msra.mxu1 %v22139_v21  ;;  %4008 = vmatprep.subr.bf16.mxu0 %v22144_v22  ;;  %v22216_v21 = vld [vmem:[%s30488_s1 + $0xcac] ss:$16 sps:$4 sm:$0xff]  }
 0x1aa   : > { %4049 = vmatprep.subr.bf16.mxu1 %v22147_v23  ;;  %v22219_v22 = vld [vmem:[%s30488_s1 + $0xeac] ss:$16 sps:$4 sm:$0xff]  }
 0x1ac   : > { %4009 = vmatpush1.bf16.msra.mxu0 %v22142_v24 }
 0x1ad   : > { %4050 = vmatpush1.bf16.msra.mxu1 %v22145_v25  ;;  %4010 = vmatprep.subr.bf16.mxu0 %v22150_v27 }
 0x1ae   : > { %4051 = vmatprep.subr.bf16.mxu1 %v22153_v28  ;;  %v22222_v28 = vld [vmem:[%s30488_s1 + $0xc8c] ss:$16 sps:$4 sm:$0xff]  }
 0x1b0   : > { %4011 = vmatpush1.bf16.msra.mxu0 %v22148_v32  ;;  %v22225_v32 = vld [vmem:[%s30488_s1 + $0xe8c] ss:$16 sps:$4 sm:$0xff]  }
 0x1b1   : > { %4052 = vmatpush1.bf16.msra.mxu1 %v22151_v17  ;;  %4012 = vmatprep.subr.bf16.mxu0 %v22156_v18 }
 0x1b2   : > { %4053 = vmatprep.subr.bf16.mxu1 %v22159_v52  ;;  %v22228_v52 = vld [vmem:[%s30488_s1 + $0xc6c] ss:$16 sps:$4 sm:$0xff]  }
 0x1b4   : > { %4013 = vmatpush2.bf16.msra.mxu0 %v22154_v36  ;;  %v22231_v36 = vld [vmem:[%s30488_s1 + $0xe6c] ss:$16 sps:$4 sm:$0xff]  }
 0x1b5   : > { %4054 = vmatpush2.bf16.msra.mxu1 %v22157_v59  ;;  %4014 = vmatprep.subr.bf16.mxu0 %v22162_v37  ;;  %v22226_v59 = vld [vmem:[%s30488_s1 + $0xc68] ss:$16 sps:$4 sm:$0xff]  }
 0x1b6   : > { %4055 = vmatprep.subr.bf16.mxu1 %v22165_v0  ;;  %v22229_v37 = vld [vmem:[%s30488_s1 + $0xe68] ss:$16 sps:$4 sm:$0xff]   ;;  %v22234_v0 = vld [vmem:[%s30488_s1 + $0xc4c] ss:$16 sps:$4 sm:$0xff]  }
 0x1b8   : > { %4015 = vmatpush2.bf16.msra.mxu0 %v22160_v38  ;;  %v22237_v38 = vld [vmem:[%s30488_s1 + $0xe4c] ss:$16 sps:$4 sm:$0xff]  }
 0x1b9   : > { %4056 = vmatpush2.bf16.msra.mxu1 %v22163_v54  ;;  %4016 = vmatprep.subr.bf16.mxu0 %v22168_v58  ;;  %v22232_v54 = vld [vmem:[%s30488_s1 + $0xc48] ss:$16 sps:$4 sm:$0xff]  }
 0x1ba   : > { %4057 = vmatprep.subr.bf16.mxu1 %v22171_v39  ;;  %v22235_v58 = vld [vmem:[%s30488_s1 + $0xe48] ss:$16 sps:$4 sm:$0xff]   ;;  %v22240_v39 = vld [vmem:[%s30488_s1 + $0xc2c] ss:$16 sps:$4 sm:$0xff]  }
 0x1bc   : > { %4017 = vmatpush2.bf16.msra.mxu0 %v22166_v41  ;;  %v22243_v41 = vld [vmem:[%s30488_s1 + $0xe2c] ss:$16 sps:$4 sm:$0xff]  }
 0x1bd   : > { %4058 = vmatpush2.bf16.msra.mxu1 %v22169_v42  ;;  %4018 = vmatprep.subr.bf16.mxu0 %v22174_v43  ;;  %v22238_v42 = vld [vmem:[%s30488_s1 + $0xc28] ss:$16 sps:$4 sm:$0xff]  }
 0x1be   : > { %4059 = vmatprep.subr.bf16.mxu1 %v22177_v46  ;;  %v22241_v43 = vld [vmem:[%s30488_s1 + $0xe28] ss:$16 sps:$4 sm:$0xff]   ;;  %v22246_v46 = vld [vmem:[%s30488_s1 + $0xc0c] ss:$16 sps:$4 sm:$0xff]  }
 0x1c0   : > { %4019 = vmatpush2.bf16.msra.mxu0 %v22172_v47  ;;  %v22249_v47 = vld [vmem:[%s30488_s1 + $0xe0c] ss:$16 sps:$4 sm:$0xff]  }
 0x1c1   : > { %4060 = vmatpush2.bf16.msra.mxu1 %v22175_v48  ;;  %4020 = vmatprep.subr.bf16.mxu0 %v22180_v51  ;;  %v22244_v48 = vld [vmem:[%s30488_s1 + $0xc08] ss:$16 sps:$4 sm:$0xff]  }
 0x1c2   : > { %4061 = vmatprep.subr.bf16.mxu1 %v22183_v55  ;;  %v22247_v51 = vld [vmem:[%s30488_s1 + $0xe08] ss:$16 sps:$4 sm:$0xff]   ;;  %v22252_v55 = vld [vmem:[%s30488_s1 + $0xdec] ss:$16 sps:$4 sm:$0xff]  }
 0x1c4   : > { %4021 = vmatpush2.bf16.msra.mxu0 %v22178_v56  ;;  %v22255_v56 = vld [vmem:[%s30488_s1 + $0xfec] ss:$16 sps:$4 sm:$0xff]  }
 0x1c5   : > { %4062 = vmatpush2.bf16.msra.mxu1 %v22181_v57  ;;  %4022 = vmatprep.subr.bf16.mxu0 %v22186_v61  ;;  %v22250_v57 = vld [vmem:[%s30488_s1 + $0xde8] ss:$16 sps:$4 sm:$0xff]  }
 0x1c6   : > { %4063 = vmatprep.subr.bf16.mxu1 %v22189_v62  ;;  %v22253_v61 = vld [vmem:[%s30488_s1 + $0xfe8] ss:$16 sps:$4 sm:$0xff]   ;;  %v22258_v62 = vld [vmem:[%s30488_s1 + $0xdcc] ss:$16 sps:$4 sm:$0xff]  }
 0x1c8   : > { %4023 = vmatpush2.bf16.msra.mxu0 %v22184_v1  ;;  %v22261_v1 = vld [vmem:[%s30488_s1 + $0xfcc] ss:$16 sps:$4 sm:$0xff]  }
 0x1c9   : > { %4064 = vmatpush2.bf16.msra.mxu1 %v22187_v2  ;;  %4024 = vmatprep.subr.bf16.mxu0 %v22192_v3  ;;  %v22256_v2 = vld [vmem:[%s30488_s1 + $0xdc8] ss:$16 sps:$4 sm:$0xff]  }
 0x1ca   : > { %4065 = vmatprep.subr.bf16.mxu1 %v22195_v33  ;;  %v22259_v3 = vld [vmem:[%s30488_s1 + $0xfc8] ss:$16 sps:$4 sm:$0xff]   ;;  %v22264_v33 = vld [vmem:[%s30488_s1 + $0xdac] ss:$16 sps:$4 sm:$0xff]  }
 0x1cc   : > { %4025 = vmatpush2.bf16.msra.mxu0 %v22190_v34  ;;  %v22267_v34 = vld [vmem:[%s30488_s1 + $0xfac] ss:$16 sps:$4 sm:$0xff]  }
 0x1cd   : > { %4066 = vmatpush2.bf16.msra.mxu1 %v22193_v35  ;;  %4026 = vmatprep.subr.bf16.mxu0 %v22198_v4  ;;  %v22262_v35 = vld [vmem:[%s30488_s1 + $0xda8] ss:$16 sps:$4 sm:$0xff]  }
 0x1ce   : > { %4067 = vmatprep.subr.bf16.mxu1 %v22201_v7  ;;  %v22265_v4 = vld [vmem:[%s30488_s1 + $0xfa8] ss:$16 sps:$4 sm:$0xff]   ;;  %v22270_v7 = vld [vmem:[%s30488_s1 + $0xd8c] ss:$16 sps:$4 sm:$0xff]  }
 0x1d0   : > { %4027 = vmatpush2.bf16.msra.mxu0 %v22196_v60  ;;  %v22273_v60 = vld [vmem:[%s30488_s1 + $0xf8c] ss:$16 sps:$4 sm:$0xff]  }
 0x1d1   : > { %4068 = vmatpush2.bf16.msra.mxu1 %v22199_v40  ;;  %4078 = vmatprep.subr.bf16.mxu0 %v22204_v45  ;;  %v22268_v40 = vld [vmem:[%s30488_s1 + $0xd88] ss:$16 sps:$4 sm:$0xff]  }
 0x1d2   : > { %4119 = vmatprep.subr.bf16.mxu1 %v22207_v11  ;;  %v22271_v45 = vld [vmem:[%s30488_s1 + $0xf88] ss:$16 sps:$4 sm:$0xff]   ;;  %v22276_v11 = vld [vmem:[%s30488_s1 + $0xd6c] ss:$16 sps:$4 sm:$0xff]  }
 0x1d3   : > { %v3784_v16 = vpop.f32.mrf.mxu0  ;;  %4029 = vmatmul.mubr.bf16.vlgmr.msra.gmra.mxu0 %v24669_v5 }
 0x1d4   : > { %v3825_v19 = vpop.f32.mrf.mxu1  ;;  %4070 = vmatmul.mubr.bf16.vlgmr.msra.gmra.mxu1 %v24673_v6  ;;  %v3785_v20 = vadd.f32 %v3784_v16, %v25323_v63  ;;  %4079 = vmatpush1.bf16.msra.mxu0 %v22202_v49  ;;  %v22214_v6 = vld [vmem:[%s30488_s1 + $0xca8] ss:$16 sps:$4 sm:$0xff]   ;;  %v22279_v49 = vld [vmem:[%s30488_s1 + $0xf6c] ss:$16 sps:$4 sm:$0xff]  }
 0x1d5   : > { %4120 = vmatpush1.bf16.msra.mxu1 %v22205_v53  ;;  %v25525_v23 = vpop.f32.mrf.mxu0  ;;  %4080 = vmatprep.subr.bf16.mxu0 %v22210_v12  ;;  %v22217_v63 = vld [vmem:[%s30488_s1 + $0xea8] ss:$16 sps:$4 sm:$0xff]  }
 0x1d6   : > { %v25527_v24 = vpop.f32.mrf.mxu1  ;;  %4121 = vmatprep.subr.bf16.mxu1 %v22213_v13  ;;  %v25529_v5 = vadd.f32 %v3825_v19, %v3785_v20  ;;  %4110 = vmatprep.mubr.bf16.mxu0 %v24687_v9  ;;  %v22220_v9 = vld [vmem:[%s30488_s1 + $0xc88] ss:$16 sps:$4 sm:$0xff]   ;;  %v22282_v13 = vld [vmem:[%s30488_s1 + $0xd4c] ss:$16 sps:$4 sm:$0xff]  }
 0x1d7   : > { %4151 = vmatprep.mubr.bf16.mxu1 %v24689_v10  ;;  %v3788_v25 = vpop.f32.mrf.mxu0  ;;  %v22223_v10 = vld [vmem:[%s30488_s1 + $0xe88] ss:$16 sps:$4 sm:$0xff]   ;;  %v22288_v19 = vld [vmem:[%s30488_s1 + $0xd2c] ss:$16 sps:$4 sm:$0xff]  }
 0x1d8   : > { %v3829_v27 = vpop.f32.mrf.mxu1  ;;  %4081 = vmatpush1.bf16.msra.mxu0 %v22208_v14  ;;  %v22274_v53 = vld [vmem:[%s30488_s1 + $0xd68] ss:$16 sps:$4 sm:$0xff]   ;;  %v22285_v14 = vld [vmem:[%s30488_s1 + $0xf4c] ss:$16 sps:$4 sm:$0xff]  }
 0x1d9   : > { %4122 = vmatpush1.bf16.msra.mxu1 %v22211_v15  ;;  %v3789_v17 = vpop.f32.mrf.mxu0  ;;  %4082 = vmatprep.subr.bf16.mxu0 %v22216_v21  ;;  %v22277_v12 = vld [vmem:[%s30488_s1 + $0xf68] ss:$16 sps:$4 sm:$0xff]   ;;  %v22291_v20 = vld [vmem:[%s30488_s1 + $0xf2c] ss:$16 sps:$4 sm:$0xff]   ;;  %v3787_v21 = vadd.f32 %v25525_v23, %v25334_v8  ;;  %v4226_v8 = vld [vmem:[%s24007_s11 + $0x1c0] sm:$0xff] }
 0x1da   : > { %v3830_v18 = vpop.f32.mrf.mxu1  ;;  %4123 = vmatprep.subr.bf16.mxu1 %v22219_v22  ;;  %v22280_v15 = vld [vmem:[%s30488_s1 + $0xd48] ss:$16 sps:$4 sm:$0xff]   ;;  %v22297_v25 = vld [vmem:[%s30488_s1 + $0xf0c] ss:$16 sps:$4 sm:$0xff]   ;;  %v4230_v23 = vld [vmem:[%s24007_s11 + $0x1e0] sm:$0xff]  ;;  %v25701_v17 = vsub.s32 2, %v24127_v44 }
 0x1db   : > { %v22283_v16 = vld [vmem:[%s30488_s1 + $0xf48] ss:$16 sps:$4 sm:$0xff]   ;;  %v3828_v27 = vadd.f32 %v25527_v24, %v3787_v21  ;;  %v4218_v18 = vld [vmem:[%s24007_s11 + $0x180] sm:$0xff]  ;;  %v19094_v24 = vcombine.high %v4226_v8, %v4230_v23 }
 0x1dc   : > { %4083 = vmatpush1.bf16.msra.mxu0 %v22214_v6  ;;  %v22286_v22 = vld [vmem:[%s30488_s1 + $0xd28] ss:$16 sps:$4 sm:$0xff]  }
 0x1dd   : > { %4124 = vmatpush1.bf16.msra.mxu1 %v22217_v63  ;;  %4084 = vmatprep.subr.bf16.mxu0 %v22222_v28  ;;  %v22289_v6 = vld [vmem:[%s30488_s1 + $0xf28] ss:$16 sps:$4 sm:$0xff]   ;;  %v22294_v63 = vld [vmem:[%s30488_s1 + $0xd0c] ss:$16 sps:$4 sm:$0xff]  }
 0x1de   : > { %4125 = vmatprep.subr.bf16.mxu1 %v22225_v32  ;;  %v22292_v28 = vld [vmem:[%s30488_s1 + $0xd08] ss:$16 sps:$4 sm:$0xff]  }
 0x1df   : > { %v22295_v32 = vld [vmem:[%s30488_s1 + $0xf08] ss:$16 sps:$4 sm:$0xff]  }
 0x1e0   : > { %4085 = vmatpush1.bf16.msra.mxu0 %v22220_v9  ;;  %v4222_v9 = vld [vmem:[%s24007_s11 + $0x1a0] sm:$0xff] }
 0x1e1   : > { %4126 = vmatpush1.bf16.msra.mxu1 %v22223_v10  ;;  %4086 = vmatprep.subr.bf16.mxu0 %v22228_v52  ;;  %v4161_v10 = vmax.f32 %v3828_v27, 0.0  ;;  %v25706_v52 = vsub.s32 3, %v24127_v44 }
 0x1e2   : > { %4127 = vmatprep.subr.bf16.mxu1 %v22231_v36  ;;  %v23842_v36 = vld [vmem:[%s30489_s2] sm:$0xf] }
 0x1e4   : > { %4087 = vmatpush1.bf16.msra.mxu0 %v22226_v59  ;;  %v935_v59 = vrot.slane %v23842_v36, %v25701_v17 }
 0x1e5   : > { %4128 = vmatpush1.bf16.msra.mxu1 %v22229_v37  ;;  %4088 = vmatprep.subr.bf16.mxu0 %v22234_v0  ;;  %v19093_v37 = vcombine.low %v4226_v8, %v4230_v23  ;;  %v4210_v0 = vld [vmem:[%s24007_s11 + $0x140] sm:$0xff] }
 0x1e6   : > { %4129 = vmatprep.subr.bf16.mxu1 %v22237_v38  ;;  %v4214_v38 = vld [vmem:[%s24007_s11 + $0x160] sm:$0xff] }
 0x1e7   : > { %v4174_v8 = vld [vmem:[%s24007_s11 + $0x20] sm:$0xff] }
 0x1e8   : > { %4089 = vmatpush1.bf16.msra.mxu0 %v22232_v54  ;;  %v19086_v54 = vcombine.high %v4218_v18, %v4222_v9 }
 0x1e9   : > { %4130 = vmatpush1.bf16.msra.mxu1 %v22235_v58  ;;  %4090 = vmatprep.subr.bf16.mxu0 %v22240_v39  ;;  %v25714_v58 = vpack.c.bf16 %v4161_v10, %v4161_v10  ;;  %v939_v39 = vrot.slane %v23842_v36, %v25706_v52  ;;  %v4294_v10 = vld [vmem:[%s24007_s11 + $0x3e0] sm:$0xff] }
 0x1ea   : > { %4131 = vmatprep.subr.bf16.mxu1 %v22243_v41 }
 0x1ec   : > { %4091 = vmatpush1.bf16.msra.mxu0 %v22238_v42 }
 0x1ed   : > { %4132 = vmatpush1.bf16.msra.mxu1 %v22241_v43  ;;  %4092 = vmatprep.subr.bf16.mxu0 %v22246_v46  ;;  %v19085_v46 = vcombine.low %v4218_v18, %v4222_v9  ;;  %v4334_v18 = vld [vmem:[%s24007_s11 + $0x520] sm:$0xff] }
 0x1ee   : > { %4133 = vmatprep.subr.bf16.mxu1 %v22249_v47  ;;  %v4202_v47 = vld [vmem:[%s24007_s11 + $0x100] sm:$0xff] }
 0x1f0   : > { %4093 = vmatpush1.bf16.msra.mxu0 %v22244_v48  ;;  %v4206_v48 = vld [vmem:[%s24007_s11 + $0x120] sm:$0xff] }
 0x1f1   : > { %4134 = vmatpush1.bf16.msra.mxu1 %v22247_v51  ;;  %4094 = vmatprep.subr.bf16.mxu0 %v22252_v55 }
 0x1f2   : > { %4135 = vmatprep.subr.bf16.mxu1 %v22255_v56  ;;  %v19078_v56 = vcombine.high %v4210_v0, %v4214_v38 }
 0x1f4   : > { %4095 = vmatpush2.bf16.msra.mxu0 %v22250_v57 }
 0x1f5   : > { %4136 = vmatpush2.bf16.msra.mxu1 %v22253_v61  ;;  %4096 = vmatprep.subr.bf16.mxu0 %v22258_v62 }
 0x1f6   : > { %4137 = vmatprep.subr.bf16.mxu1 %v22261_v1  ;;  %v19077_v1 = vcombine.low %v4210_v0, %v4214_v38  ;;  %v4322_v0 = vld [vmem:[%s24007_s11 + $0x4c0] sm:$0xff] }
 0x1f7   : > { %v4326_v38 = vld [vmem:[%s24007_s11 + $0x4e0] sm:$0xff] }
 0x1f8   : > { %4097 = vmatpush2.bf16.msra.mxu0 %v22256_v2  ;;  %v4194_v2 = vld [vmem:[%s24007_s11 + $0xc0] sm:$0xff] }
 0x1f9   : > { %4138 = vmatpush2.bf16.msra.mxu1 %v22259_v3  ;;  %4098 = vmatprep.subr.bf16.mxu0 %v22264_v33  ;;  %v4198_v3 = vld [vmem:[%s24007_s11 + $0xe0] sm:$0xff] }
 0x1fa   : > { %4139 = vmatprep.subr.bf16.mxu1 %v22267_v34 }
 0x1fc   : > { %4099 = vmatpush2.bf16.msra.mxu0 %v22262_v35  ;;  %v19070_v35 = vcombine.high %v4202_v47, %v4206_v48 }
 0x1fd   : > { %4140 = vmatpush2.bf16.msra.mxu1 %v22265_v4  ;;  %4100 = vmatprep.subr.bf16.mxu0 %v22270_v7  ;;  %v4354_v4 = vld [vmem:[%s24007_s11 + $0x5c0] sm:$0xff] }
 0x1fe   : > { %4141 = vmatprep.subr.bf16.mxu1 %v22273_v60  ;;  %v4358_v7 = vld [vmem:[%s24007_s11 + $0x5e0] sm:$0xff]  ;;  %v19069_v60 = vcombine.low %v4202_v47, %v4206_v48 }
 0x1ff   : > { %v4314_v47 = vld [vmem:[%s24007_s11 + $0x480] sm:$0xff] }
 0x200   : > { %4101 = vmatpush2.bf16.msra.mxu0 %v22268_v40  ;;  %v4186_v40 = vld [vmem:[%s24007_s11 + $0x80] sm:$0xff] }
 0x201   : > { %4142 = vmatpush2.bf16.msra.mxu1 %v22271_v45  ;;  %4102 = vmatprep.subr.bf16.mxu0 %v22276_v11  ;;  %v4190_v45 = vld [vmem:[%s24007_s11 + $0xa0] sm:$0xff]  ;;  %v19221_v11 = vcombine.low %v4354_v4, %v4358_v7 }
 0x202   : > { %4143 = vmatprep.subr.bf16.mxu1 %v22279_v49  ;;  %v19222_v49 = vcombine.high %v4354_v4, %v4358_v7  ;;  %v19054_v21 = vcombine.high %v4186_v40, %v4190_v45  ;;  %v4318_v48 = vld [vmem:[%s24007_s11 + $0x4a0] sm:$0xff] }
 0x204   : > { %4103 = vmatpush2.bf16.msra.mxu0 %v22274_v53  ;;  %v19062_v53 = vcombine.high %v4194_v2, %v4198_v3 }
 0x205   : > { %4144 = vmatpush2.bf16.msra.mxu1 %v22277_v12  ;;  %4104 = vmatprep.subr.bf16.mxu0 %v22282_v13  ;;  %v4346_v12 = vld [vmem:[%s24007_s11 + $0x580] sm:$0xff] }
 0x206   : > { %4145 = vmatprep.subr.bf16.mxu1 %v22285_v14  ;;  %v4350_v13 = vld [vmem:[%s24007_s11 + $0x5a0] sm:$0xff]  ;;  %v19061_v14 = vcombine.low %v4194_v2, %v4198_v3 }
 0x207   : > { %v4310_v2 = vld [vmem:[%s24007_s11 + $0x460] sm:$0xff] }
 0x208   : > { %4105 = vmatpush2.bf16.msra.mxu0 %v22280_v15  ;;  %v4178_v15 = vld [vmem:[%s24007_s11 + $0x40] sm:$0xff] }
 0x209   : > { %4146 = vmatpush2.bf16.msra.mxu1 %v22283_v16  ;;  %4106 = vmatprep.subr.bf16.mxu0 %v22288_v19  ;;  %v4182_v16 = vld [vmem:[%s24007_s11 + $0x60] sm:$0xff]  ;;  %v19213_v19 = vcombine.low %v4346_v12, %v4350_v13 }
 0x20a   : > { %4147 = vmatprep.subr.bf16.mxu1 %v22291_v20  ;;  %v19214_v20 = vcombine.high %v4346_v12, %v4350_v13  ;;  %v19045_v9 = vcombine.low %v4178_v15, %v4182_v16 }
 0x20c   : > { %4107 = vmatpush2.bf16.msra.mxu0 %v22286_v22  ;;  %v4338_v22 = vld [vmem:[%s24007_s11 + $0x540] sm:$0xff] }
 0x20d   : > { %4148 = vmatpush2.bf16.msra.mxu1 %v22289_v6  ;;  %4108 = vmatprep.subr.bf16.mxu0 %v22294_v63  ;;  %v4342_v6 = vld [vmem:[%s24007_s11 + $0x560] sm:$0xff]  ;;  %v19053_v63 = vcombine.low %v4186_v40, %v4190_v45 }
 0x20e   : > { %4149 = vmatprep.subr.bf16.mxu1 %v22297_v25  ;;  %v4170_v25 = vld [vmem:[%s24007_s11] sm:$0xff]  ;;  %v19205_v23 = vcombine.low %v4338_v22, %v4342_v6  ;;  %v19206_v27 = vcombine.high %v4338_v22, %v4342_v6 }
 0x20f   : > { %v4302_v40 = vld [vmem:[%s24007_s11 + $0x420] sm:$0xff] }
 0x210   : > { %4109 = vmatpush2.bf16.msra.mxu0 %v22292_v28  ;;  %v19046_v28 = vcombine.high %v4178_v15, %v4182_v16  ;;  %v4422_v15 = vld [vmem:[%s24007_s11 + $0x7e0] sm:$0xff] }
 0x211   : > { %4150 = vmatpush2.bf16.msra.mxu1 %v22295_v32  ;;  %5706 = vmatprep.subr.bf16.mxu0 %v19094_v24  ;;  %v4330_v32 = vld [vmem:[%s24007_s11 + $0x500] sm:$0xff] }
 0x212   : > { %5747 = vmatprep.subr.bf16.mxu1 %v19222_v49  ;;  %v4290_v24 = vld [vmem:[%s24007_s11 + $0x3c0] sm:$0xff]  ;;  %v19197_v36 = vcombine.low %v4330_v32, %v4334_v18 }
 0x213   : > { %v3866_v41 = vpop.f32.mrf.mxu0  ;;  %4111 = vmatmul.mubr.bf16.vlgmr.msra.gmra.mxu0 %v24886_v30  ;;  %v4262_v49 = vld [vmem:[%s24007_s11 + $0x2e0] sm:$0xff] }
 0x214   : > { %v3907_v42 = vpop.f32.mrf.mxu1  ;;  %4152 = vmatmul.mubr.bf16.vlgmr.msra.gmra.mxu1 %v24890_v31  ;;  %v3867_v43 = vadd.f32 %v3866_v41, %v935_v59  ;;  %5707 = vmatpush1.bf16.msra.mxu0 %v19093_v37  ;;  %v19198_v59 = vcombine.high %v4330_v32, %v4334_v18  ;;  %v19038_v37 = vcombine.high %v4170_v25, %v4174_v8  ;;  %v4286_v41 = vld [vmem:[%s24007_s11 + $0x3a0] sm:$0xff] }
 0x215   : > { %5738 = vmatprep.mubr.bf16.mxu0 %v25714_v58  ;;  %v3868_v51 = vpop.f32.mrf.mxu0  ;;  %5708 = vmatprep.subr.bf16.mxu0 %v19086_v54  ;;  %v19037_v54 = vcombine.low %v4170_v25, %v4174_v8  ;;  %v4414_v25 = vld [vmem:[%s24007_s11 + $0x7a0] sm:$0xff] }
 0x216   : > { %v3909_v55 = vpop.f32.mrf.mxu1  ;;  %v25722_v57 = vadd.f32 %v3907_v42, %v3867_v43  ;;  %v3869_v30 = vadd.f32 %v3868_v51, %v939_v39  ;;  %5748 = vmatpush1.bf16.msra.mxu1 %v19221_v11  ;;  %v4282_v39 = vld [vmem:[%s24007_s11 + $0x380] sm:$0xff]  ;;  %v19189_v42 = vcombine.low %v4322_v0, %v4326_v38  ;;  %v19190_v43 = vcombine.high %v4322_v0, %v4326_v38 }
 0x217   : > { %v3870_v31 = vpop.f32.mrf.mxu0  ;;  %5749 = vmatprep.subr.bf16.mxu1 %v19214_v20  ;;  %v19157_v51 = vcombine.low %v4290_v24, %v4294_v10  ;;  %v19149_v3 = vcombine.low %v4282_v39, %v4286_v41  ;;  %v4258_v11 = vld [vmem:[%s24007_s11 + $0x2c0] sm:$0xff] }
 0x218   : > { %v3911_v61 = vpop.f32.mrf.mxu1  ;;  %v25724_v62 = vadd.f32 %v3909_v55, %v3869_v30  ;;  %5709 = vmatpush1.bf16.msra.mxu0 %v19085_v46  ;;  %v19158_v46 = vcombine.high %v4290_v24, %v4294_v10  ;;  %v4274_v55 = vld [vmem:[%s24007_s11 + $0x340] sm:$0xff]  ;;  %v19181_v30 = vcombine.low %v4314_v47, %v4318_v48  ;;  %v19182_v31 = vcombine.high %v4314_v47, %v4318_v48 }
 0x219   : > { %v3871_v33 = vpop.f32.mrf.mxu0  ;;  %5710 = vmatprep.subr.bf16.mxu0 %v19078_v56  ;;  %v4278_v56 = vld [vmem:[%s24007_s11 + $0x360] sm:$0xff]  ;;  %v19150_v61 = vcombine.high %v4282_v39, %v4286_v41  ;;  %v19126_v6 = vcombine.high %v4258_v11, %v4262_v49  ;;  %v19125_v8 = vcombine.low %v4258_v11, %v4262_v49 }
 0x21a   : > { %v3912_v34 = vpop.f32.mrf.mxu1  ;;  %5750 = vmatpush1.bf16.msra.mxu1 %v19213_v19  ;;  %v4266_v33 = vld [vmem:[%s24007_s11 + $0x300] sm:$0xff]  ;;  %v19142_v7 = vcombine.high %v4274_v55, %v4278_v56  ;;  %v19141_v45 = vcombine.low %v4274_v55, %v4278_v56 }
 0x21b   : > { %5751 = vmatprep.subr.bf16.mxu1 %v19206_v27  ;;  %v4270_v34 = vld [vmem:[%s24007_s11 + $0x320] sm:$0xff] }
 0x21c   : > { %5711 = vmatpush1.bf16.msra.mxu0 %v19077_v1  ;;  %v4306_v1 = vld [vmem:[%s24007_s11 + $0x440] sm:$0xff]  ;;  %v19134_v13 = vcombine.high %v4266_v33, %v4270_v34  ;;  %v19133_v16 = vcombine.low %v4266_v33, %v4270_v34 }
 0x21d   : > { %5712 = vmatprep.subr.bf16.mxu0 %v19070_v35  ;;  %v19173_v35 = vcombine.low %v4306_v1, %v4310_v2  ;;  %v19174_v4 = vcombine.high %v4306_v1, %v4310_v2  ;;  %v4250_v19 = vld [vmem:[%s24007_s11 + $0x280] sm:$0xff]  ;;  %v4160_v2 = vmax.f32 %v25529_v5, 0.0 }
 0x21e   : > { %5752 = vmatpush1.bf16.msra.mxu1 %v19205_v23  ;;  %v4254_v20 = vld [vmem:[%s24007_s11 + $0x2a0] sm:$0xff] }
 0x21f   : > { %5753 = vmatprep.subr.bf16.mxu1 %v19198_v59  ;;  %v4242_v23 = vld [vmem:[%s24007_s11 + $0x240] sm:$0xff]  ;;  %v19118_v18 = vcombine.high %v4250_v19, %v4254_v20  ;;  %v19117_v10 = vcombine.low %v4250_v19, %v4254_v20 }
 0x220   : > { %5713 = vmatpush1.bf16.msra.mxu0 %v19069_v60  ;;  %v4298_v60 = vld [vmem:[%s24007_s11 + $0x400] sm:$0xff] }
 0x221   : > { %5714 = vmatprep.subr.bf16.mxu0 %v19062_v53  ;;  %v19165_v53 = vcombine.low %v4298_v60, %v4302_v40  ;;  %v19166_v12 = vcombine.high %v4298_v60, %v4302_v40  ;;  %v4246_v27 = vld [vmem:[%s24007_s11 + $0x260] sm:$0xff] }
 0x222   : > { %5754 = vmatpush1.bf16.msra.mxu1 %v19197_v36  ;;  %v4406_v24 = vld [vmem:[%s24007_s11 + $0x760] sm:$0xff]  ;;  %v19110_v38 = vcombine.high %v4242_v23, %v4246_v27  ;;  %v19109_v41 = vcombine.low %v4242_v23, %v4246_v27 }
 0x223   : > { %5755 = vmatprep.subr.bf16.mxu1 %v19190_v43  ;;  %v4234_v36 = vld [vmem:[%s24007_s11 + $0x200] sm:$0xff]  ;;  %v4231_v43 = vld [vmem:[%s24007_s11 + $0x1e8] sm:$0xff] }
 0x224   : > { %5715 = vmatpush1.bf16.msra.mxu0 %v19061_v14  ;;  %v4418_v14 = vld [vmem:[%s24007_s11 + $0x7c0] sm:$0xff] }
 0x225   : > { %5716 = vmatprep.subr.bf16.mxu0 %v19054_v21  ;;  %v19285_v21 = vcombine.low %v4418_v14, %v4422_v15  ;;  %v19286_v22 = vcombine.high %v4418_v14, %v4422_v15  ;;  %v4238_v59 = vld [vmem:[%s24007_s11 + $0x220] sm:$0xff]  ;;  %v4203_v15 = vld [vmem:[%s24007_s11 + $0x108] sm:$0xff] }
 0x226   : > { %5756 = vmatpush1.bf16.msra.mxu1 %v19189_v42  ;;  %v4398_v39 = vld [vmem:[%s24007_s11 + $0x720] sm:$0xff]  ;;  %v4227_v42 = vld [vmem:[%s24007_s11 + $0x1c8] sm:$0xff]  ;;  %v19102_v48 = vcombine.high %v4234_v36, %v4238_v59  ;;  %v19101_v56 = vcombine.low %v4234_v36, %v4238_v59 }
 0x227   : > { %5757 = vmatprep.subr.bf16.mxu1 %v19182_v31  ;;  %v4390_v55 = vld [vmem:[%s24007_s11 + $0x6e0] sm:$0xff]  ;;  %v4223_v31 = vld [vmem:[%s24007_s11 + $0x1a8] sm:$0xff] }
 0x228   : > { %5717 = vmatpush1.bf16.msra.mxu0 %v19053_v63  ;;  %v4410_v63 = vld [vmem:[%s24007_s11 + $0x780] sm:$0xff] }
 0x229   : > { %5718 = vmatprep.subr.bf16.mxu0 %v19046_v28  ;;  %v19277_v28 = vcombine.low %v4410_v63, %v4414_v25  ;;  %v19278_v32 = vcombine.high %v4410_v63, %v4414_v25  ;;  %v4378_v33 = vld [vmem:[%s24007_s11 + $0x680] sm:$0xff] }
 0x22a   : > { %5758 = vmatpush1.bf16.msra.mxu1 %v19181_v30  ;;  %v4219_v30 = vld [vmem:[%s24007_s11 + $0x188] sm:$0xff]  ;;  %v4382_v34 = vld [vmem:[%s24007_s11 + $0x6a0] sm:$0xff] }
 0x22b   : > { %5759 = vmatprep.subr.bf16.mxu1 %v19174_v4  ;;  %v4211_v4 = vld [vmem:[%s24007_s11 + $0x148] sm:$0xff]  ;;  %v19245_v60 = vcombine.low %v4378_v33, %v4382_v34  ;;  %v19246_v40 = vcombine.high %v4378_v33, %v4382_v34  ;;  %v19088_v5 = vcombine.high %v4219_v30, %v4223_v31  ;;  %v19087_v14 = vcombine.low %v4219_v30, %v4223_v31  ;;  %v4362_v23 = vld [vmem:[%s24007_s11 + $0x600] sm:$0xff] }
 0x22c   : > { %5719 = vmatpush1.bf16.msra.mxu0 %v19045_v9  ;;  %v4402_v9 = vld [vmem:[%s24007_s11 + $0x740] sm:$0xff]  ;;  %v4171_v30 = vld [vmem:[%s24007_s11 + $0x8] sm:$0xff] }
 0x22d   : > { %5720 = vmatprep.subr.bf16.mxu0 %v19038_v37  ;;  %v19269_v37 = vcombine.low %v4402_v9, %v4406_v24  ;;  %v19270_v0 = vcombine.high %v4402_v9, %v4406_v24  ;;  %v4366_v27 = vld [vmem:[%s24007_s11 + $0x620] sm:$0xff]  ;;  %v4199_v9 = vld [vmem:[%s24007_s11 + $0xe8] sm:$0xff] }
 0x22e   : > { %5760 = vmatpush1.bf16.msra.mxu1 %v19173_v35  ;;  %v19095_v35 = vcombine.low %v4227_v42, %v4231_v43  ;;  %v19230_v24 = vcombine.high %v4362_v23, %v4366_v27  ;;  %v19229_v59 = vcombine.low %v4362_v23, %v4366_v27  ;;  %v4175_v31 = vld [vmem:[%s24007_s11 + $0x28] sm:$0xff] }
 0x22f   : > { %5761 = vmatprep.subr.bf16.mxu1 %v19166_v12  ;;  %v4374_v12 = vld [vmem:[%s24007_s11 + $0x660] sm:$0xff]  ;;  %v19039_v33 = vcombine.low %v4171_v30, %v4175_v31 }
 0x230   : > { %5721 = vmatpush1.bf16.msra.mxu0 %v19037_v54  ;;  %v4394_v54 = vld [vmem:[%s24007_s11 + $0x700] sm:$0xff] }
 0x231   : > { %5722 = vmatprep.subr.bf16.mxu0 %v19158_v46  ;;  %v19261_v46 = vcombine.low %v4394_v54, %v4398_v39  ;;  %v19262_v47 = vcombine.high %v4394_v54, %v4398_v39 }
 0x232   : > { %5762 = vmatpush1.bf16.msra.mxu1 %v19165_v53  ;;  %v4370_v53 = vld [vmem:[%s24007_s11 + $0x640] sm:$0xff] }
 0x233   : > { %5763 = vmatprep.subr.bf16.mxu1 %v19286_v22  ;;  %v19238_v19 = vcombine.high %v4370_v53, %v4374_v12 }
 0x234   : > { %5723 = vmatpush2.bf16.msra.mxu0 %v19157_v51  ;;  %v4386_v51 = vld [vmem:[%s24007_s11 + $0x6c0] sm:$0xff] }
 0x235   : > { %5724 = vmatprep.subr.bf16.mxu0 %v19150_v61  ;;  %v19253_v61 = vcombine.low %v4386_v51, %v4390_v55  ;;  %v19254_v1 = vcombine.high %v4386_v51, %v4390_v55  ;;  %v4183_v51 = vld [vmem:[%s24007_s11 + $0x68] sm:$0xff] }
 0x236   : > { %5764 = vmatpush2.bf16.msra.mxu1 %v19285_v21 }
 0x237   : > { %5765 = vmatprep.subr.bf16.mxu1 %v19278_v32 }
 0x238   : > { %5725 = vmatpush2.bf16.msra.mxu0 %v19149_v3  ;;  %v19096_v3 = vcombine.high %v4227_v42, %v4231_v43  ;;  %v4191_v42 = vld [vmem:[%s24007_s11 + $0xa8] sm:$0xff] }
 0x239   : > { %5726 = vmatprep.subr.bf16.mxu0 %v19142_v7  ;;  %v4215_v7 = vld [vmem:[%s24007_s11 + $0x168] sm:$0xff] }
 0x23a   : > { %5766 = vmatpush2.bf16.msra.mxu1 %v19277_v28  ;;  %v19080_v22 = vcombine.high %v4211_v4, %v4215_v7  ;;  %v19079_v32 = vcombine.low %v4211_v4, %v4215_v7  ;;  %v4287_v4 = vld [vmem:[%s24007_s11 + $0x3a8] sm:$0xff] }
 0x23b   : > { %5767 = vmatprep.subr.bf16.mxu1 %v19270_v0  ;;  %v25807_v0 = vld [vmem:[%s24007_s11 + $0x5e8] sm:$0xff] }
 0x23c   : > { %5727 = vmatpush2.bf16.msra.mxu0 %v19141_v45  ;;  %v25785_v45 = vpack.c.bf16 %v4160_v2, %v4160_v2  ;;  %v4291_v2 = vld [vmem:[%s24007_s11 + $0x3c8] sm:$0xff] }
 0x23d   : > { %5728 = vmatprep.subr.bf16.mxu0 %v19134_v13 }
 0x23e   : > { %5768 = vmatpush2.bf16.msra.mxu1 %v19269_v37  ;;  %v25804_v37 = vld [vmem:[%s24007_s11 + $0x5c8] sm:$0xff] }
 0x23f   : > { %5769 = vmatprep.subr.bf16.mxu1 %v19262_v47  ;;  %v19224_v54 = vcombine.high %v25804_v37, %v25807_v0  ;;  %v19223_v43 = vcombine.low %v25804_v37, %v25807_v0  ;;  %v4323_v0 = vld [vmem:[%s24007_s11 + $0x4c8] sm:$0xff] }
 0x240   : > { %5729 = vmatpush2.bf16.msra.mxu0 %v19133_v16  ;;  %v4207_v16 = vld [vmem:[%s24007_s11 + $0x128] sm:$0xff] }
 0x241   : > { %5730 = vmatprep.subr.bf16.mxu0 %v19126_v6  ;;  %v19237_v6 = vcombine.low %v4370_v53, %v4374_v12  ;;  %v4267_v53 = vld [vmem:[%s24007_s11 + $0x308] sm:$0xff] }
 0x242   : > { %5770 = vmatpush2.bf16.msra.mxu1 %v19261_v46  ;;  %v4271_v12 = vld [vmem:[%s24007_s11 + $0x328] sm:$0xff] }
 0x243   : > { %5771 = vmatprep.subr.bf16.mxu1 %v19254_v1  ;;  %v19040_v1 = vcombine.high %v4171_v30, %v4175_v31  ;;  %v4208_v30 = vld [vmem:[%s24007_s11 + $0x130] sm:$0xff] }
 0x244   : > { %5731 = vmatpush2.bf16.msra.mxu0 %v19125_v8 }
 0x245   : > { %5732 = vmatprep.subr.bf16.mxu0 %v19118_v18  ;;  %v4195_v18 = vld [vmem:[%s24007_s11 + $0xc8] sm:$0xff] }
 0x246   : > { %5772 = vmatpush2.bf16.msra.mxu1 %v19253_v61  ;;  %v19064_v39 = vcombine.high %v4195_v18, %v4199_v9  ;;  %v19063_v46 = vcombine.low %v4195_v18, %v4199_v9  ;;  %v4239_v18 = vld [vmem:[%s24007_s11 + $0x228] sm:$0xff] }
 0x247   : > { %5773 = vmatprep.subr.bf16.mxu1 %v19246_v40  ;;  %v4275_v40 = vld [vmem:[%s24007_s11 + $0x348] sm:$0xff] }
 0x248   : > { %5733 = vmatpush2.bf16.msra.mxu0 %v19117_v10 }
 0x249   : > { %5734 = vmatprep.subr.bf16.mxu0 %v19110_v38  ;;  %v19071_v38 = vcombine.low %v4203_v15, %v4207_v16 }
 0x24a   : > { %5774 = vmatpush2.bf16.msra.mxu1 %v19245_v60 }
 0x24b   : > { %5775 = vmatprep.subr.bf16.mxu1 %v19238_v19  ;;  %v19135_v19 = vcombine.low %v4267_v53, %v4271_v12 }
 0x24c   : > { %5735 = vmatpush2.bf16.msra.mxu0 %v19109_v41  ;;  %v4187_v41 = vld [vmem:[%s24007_s11 + $0x88] sm:$0xff] }
 0x24d   : > { %5736 = vmatprep.subr.bf16.mxu0 %v19102_v48  ;;  %v19056_v47 = vcombine.high %v4187_v41, %v4191_v42  ;;  %v4179_v48 = vld [vmem:[%s24007_s11 + $0x48] sm:$0xff]  ;;  %v19055_v55 = vcombine.low %v4187_v41, %v4191_v42  ;;  %v4212_v41 = vld [vmem:[%s24007_s11 + $0x150] sm:$0xff] }
 0x24e   : > { %5776 = vmatpush2.bf16.msra.mxu1 %v19237_v6  ;;  %v19047_v61 = vcombine.low %v4179_v48, %v4183_v51  ;;  %v4216_v42 = vld [vmem:[%s24007_s11 + $0x170] sm:$0xff] }
 0x24f   : > { %5777 = vmatprep.subr.bf16.mxu1 %v19230_v24 }
 0x250   : > { %5737 = vmatpush2.bf16.msra.mxu0 %v19101_v56  ;;  %v19048_v56 = vcombine.high %v4179_v48, %v4183_v51 }
 0x251   : > { %5788 = vmatprep.subr.bf16.mxu0 %v19096_v3  ;;  %v4295_v3 = vld [vmem:[%s24007_s11 + $0x3e8] sm:$0xff] }
 0x252   : > { %5778 = vmatpush2.bf16.msra.mxu1 %v19229_v59  ;;  %v19160_v34 = vcombine.high %v4291_v2, %v4295_v3  ;;  %v19159_v7 = vcombine.low %v4291_v2, %v4295_v3 }
 0x253   : > { %v3948_v11 = vpop.f32.mrf.mxu0  ;;  %5739 = vmatmul.mubr.bf16.vlgmr.msra.gmra.mxu0 %v25785_v45  ;;  %5829 = vmatprep.subr.bf16.mxu1 %v19224_v54  ;;  %v4224_v54 = vld [vmem:[%s24007_s11 + $0x1b0] sm:$0xff] }
 0x254   : > { %v3989_v49 = vpop.f32.mrf.mxu1  ;;  %v3949_v13 = vadd.f32 %v3948_v11, %v25722_v57  ;;  %5789 = vmatpush1.bf16.msra.mxu0 %v19095_v35  ;;  %5820 = vmatprep.mubr.bf16.mxu0 %v25714_v58  ;;  %v4283_v35 = vld [vmem:[%s24007_s11 + $0x388] sm:$0xff] }
 0x255   : > { %v3950_v20 = vpop.f32.mrf.mxu0  ;;  %5790 = vmatprep.subr.bf16.mxu0 %v19088_v5  ;;  %v19152_v60 = vcombine.high %v4283_v35, %v4287_v4  ;;  %v4279_v5 = vld [vmem:[%s24007_s11 + $0x368] sm:$0xff]  ;;  %v19151_v11 = vcombine.low %v4283_v35, %v4287_v4  ;;  %v4200_v35 = vld [vmem:[%s24007_s11 + $0xf0] sm:$0xff] }
 0x256   : > { %v3991_v21 = vpop.f32.mrf.mxu1  ;;  %v25794_v63 = vadd.f32 %v3989_v49, %v3949_v13  ;;  %v3951_v57 = vadd.f32 %v3950_v20, %v25724_v62  ;;  %v19072_v62 = vcombine.high %v4203_v15, %v4207_v16  ;;  %v19144_v49 = vcombine.high %v4275_v40, %v4279_v5  ;;  %v4259_v15 = vld [vmem:[%s24007_s11 + $0x2c8] sm:$0xff] }
 0x257   : > { %v3952_v25 = vpop.f32.mrf.mxu0  ;;  %v19143_v13 = vcombine.low %v4275_v40, %v4279_v5  ;;  %v4263_v16 = vld [vmem:[%s24007_s11 + $0x2e8] sm:$0xff]  ;;  %v4188_v5 = vld [vmem:[%s24007_s11 + $0x90] sm:$0xff] }
 0x258   : > { %v3993_v8 = vpop.f32.mrf.mxu1  ;;  %v25799_v28 = vadd.f32 %v3991_v21, %v3951_v57  ;;  %5791 = vmatpush1.bf16.msra.mxu0 %v19087_v14  ;;  %v19136_v14 = vcombine.high %v4267_v53, %v4271_v12  ;;  %v19128_v20 = vcombine.high %v4259_v15, %v4263_v16  ;;  %v4251_v21 = vld [vmem:[%s24007_s11 + $0x288] sm:$0xff]  ;;  %v19127_v6 = vcombine.low %v4259_v15, %v4263_v16  ;;  %v4180_v12 = vld [vmem:[%s24007_s11 + $0x50] sm:$0xff] }
 0x259   : > { %v3953_v10 = vpop.f32.mrf.mxu0  ;;  %5792 = vmatprep.subr.bf16.mxu0 %v19080_v22  ;;  %v4255_v22 = vld [vmem:[%s24007_s11 + $0x2a8] sm:$0xff]  ;;  %v4172_v16 = vld [vmem:[%s24007_s11 + $0x10] sm:$0xff] }
 0x25a   : > { %v3994_v36 = vpop.f32.mrf.mxu1  ;;  %v19120_v57 = vcombine.high %v4251_v21, %v4255_v22  ;;  %v4243_v25 = vld [vmem:[%s24007_s11 + $0x248] sm:$0xff]  ;;  %v19119_v23 = vcombine.low %v4251_v21, %v4255_v22  ;;  %v4228_v10 = vld [vmem:[%s24007_s11 + $0x1d0] sm:$0xff] }
 0x25b   : > { %v4247_v8 = vld [vmem:[%s24007_s11 + $0x268] sm:$0xff]  ;;  %v4232_v36 = vld [vmem:[%s24007_s11 + $0x1f0] sm:$0xff] }
 0x25c   : > { %5793 = vmatpush1.bf16.msra.mxu0 %v19079_v32  ;;  %v19112_v27 = vcombine.high %v4243_v25, %v4247_v8  ;;  %v4235_v32 = vld [vmem:[%s24007_s11 + $0x208] sm:$0xff]  ;;  %v19111_v9 = vcombine.low %v4243_v25, %v4247_v8  ;;  %v19098_v59 = vcombine.high %v4228_v10, %v4232_v36  ;;  %v4292_v22 = vld [vmem:[%s24007_s11 + $0x3d0] sm:$0xff] }
 0x25d   : > { %5794 = vmatprep.subr.bf16.mxu0 %v19072_v62  ;;  %v19104_v24 = vcombine.high %v4235_v32, %v4239_v18  ;;  %v19103_v62 = vcombine.low %v4235_v32, %v4239_v18  ;;  %v4284_v8 = vld [vmem:[%s24007_s11 + $0x390] sm:$0xff] }
 0x25e   : > { %v4276_v18 = vld [vmem:[%s24007_s11 + $0x350] sm:$0xff] }
 0x260   : > { %5795 = vmatpush1.bf16.msra.mxu0 %v19071_v38  ;;  %v4220_v38 = vld [vmem:[%s24007_s11 + $0x190] sm:$0xff] }
 0x261   : > { %5796 = vmatprep.subr.bf16.mxu0 %v19064_v39  ;;  %v19097_v39 = vcombine.low %v4228_v10, %v4232_v36  ;;  %v4268_v36 = vld [vmem:[%s24007_s11 + $0x310] sm:$0xff] }
 0x264   : > { %5797 = vmatpush1.bf16.msra.mxu0 %v19063_v46  ;;  %v19090_v46 = vcombine.high %v4220_v38, %v4224_v54 }
 0x265   : > { %5798 = vmatprep.subr.bf16.mxu0 %v19056_v47 }
 0x268   : > { %5799 = vmatpush1.bf16.msra.mxu0 %v19055_v55  ;;  %v19089_v55 = vcombine.low %v4220_v38, %v4224_v54  ;;  %v4260_v54 = vld [vmem:[%s24007_s11 + $0x2d0] sm:$0xff] }
 0x269   : > { %5800 = vmatprep.subr.bf16.mxu0 %v19048_v56  ;;  %v4204_v56 = vld [vmem:[%s24007_s11 + $0x110] sm:$0xff] }
 0x26a   : > { %v19073_v40 = vcombine.low %v4204_v56, %v4208_v30 }
 0x26c   : > { %5801 = vmatpush1.bf16.msra.mxu0 %v19047_v61 }
 0x26d   : > { %5802 = vmatprep.subr.bf16.mxu0 %v19040_v1  ;;  %v19082_v1 = vcombine.high %v4212_v41, %v4216_v42 }
 0x270   : > { %5803 = vmatpush1.bf16.msra.mxu0 %v19039_v33 }
 0x271   : > { %5804 = vmatprep.subr.bf16.mxu0 %v19160_v34  ;;  %v4196_v34 = vld [vmem:[%s24007_s11 + $0xd0] sm:$0xff] }
 0x272   : > { %v19065_v53 = vcombine.low %v4196_v34, %v4200_v35 }
 0x274   : > { %5805 = vmatpush2.bf16.msra.mxu0 %v19159_v7 }
 0x275   : > { %5806 = vmatprep.subr.bf16.mxu0 %v19152_v60  ;;  %v19074_v60 = vcombine.high %v4204_v56, %v4208_v30  ;;  %v4248_v30 = vld [vmem:[%s24007_s11 + $0x270] sm:$0xff] }
 0x278   : > { %5807 = vmatpush2.bf16.msra.mxu0 %v19151_v11  ;;  %v4192_v11 = vld [vmem:[%s24007_s11 + $0xb0] sm:$0xff] }
 0x279   : > { %5808 = vmatprep.subr.bf16.mxu0 %v19144_v49  ;;  %v19066_v49 = vcombine.high %v4196_v34, %v4200_v35  ;;  %v19057_v15 = vcombine.low %v4188_v5, %v4192_v11  ;;  %v4229_v35 = vld [vmem:[%s24007_s11 + $0x1d8] sm:$0xff] }
 0x27c   : > { %5809 = vmatpush2.bf16.msra.mxu0 %v19143_v13  ;;  %v4184_v13 = vld [vmem:[%s24007_s11 + $0x70] sm:$0xff] }
 0x27d   : > { %5810 = vmatprep.subr.bf16.mxu0 %v19136_v14  ;;  %v19058_v14 = vcombine.high %v4188_v5, %v4192_v11  ;;  %v19049_v21 = vcombine.low %v4180_v12, %v4184_v13  ;;  %v4225_v11 = vld [vmem:[%s24007_s11 + $0x1b8] sm:$0xff] }
 0x280   : > { %5811 = vmatpush2.bf16.msra.mxu0 %v19135_v19  ;;  %v19050_v19 = vcombine.high %v4180_v12, %v4184_v13  ;;  %v4213_v12 = vld [vmem:[%s24007_s11 + $0x158] sm:$0xff] }
 0x281   : > { %5812 = vmatprep.subr.bf16.mxu0 %v19128_v20  ;;  %v4176_v20 = vld [vmem:[%s24007_s11 + $0x30] sm:$0xff] }
 0x282   : > { %v19041_v25 = vcombine.low %v4172_v16, %v4176_v20 }
 0x284   : > { %5813 = vmatpush2.bf16.msra.mxu0 %v19127_v6  ;;  %v19042_v6 = vcombine.high %v4172_v16, %v4176_v20 }
 0x285   : > { %5814 = vmatprep.subr.bf16.mxu0 %v19120_v57  ;;  %v4296_v57 = vld [vmem:[%s24007_s11 + $0x3f0] sm:$0xff] }
 0x286   : > { %v19161_v32 = vcombine.low %v4292_v22, %v4296_v57 }
 0x288   : > { %5815 = vmatpush2.bf16.msra.mxu0 %v19119_v23  ;;  %v19162_v23 = vcombine.high %v4292_v22, %v4296_v57 }
 0x289   : > { %5816 = vmatprep.subr.bf16.mxu0 %v19112_v27  ;;  %v4288_v27 = vld [vmem:[%s24007_s11 + $0x3b0] sm:$0xff] }
 0x28a   : > { %v19153_v10 = vcombine.low %v4284_v8, %v4288_v27 }
 0x28c   : > { %5817 = vmatpush2.bf16.msra.mxu0 %v19111_v9  ;;  %v19154_v9 = vcombine.high %v4284_v8, %v4288_v27  ;;  %v4209_v8 = vld [vmem:[%s24007_s11 + $0x138] sm:$0xff] }
 0x28d   : > { %5818 = vmatprep.subr.bf16.mxu0 %v19104_v24  ;;  %v4280_v24 = vld [vmem:[%s24007_s11 + $0x370] sm:$0xff] }
 0x28e   : > { %v19145_v38 = vcombine.low %v4276_v18, %v4280_v24 }
 0x290   : > { %5819 = vmatpush2.bf16.msra.mxu0 %v19103_v62  ;;  %v19146_v62 = vcombine.high %v4276_v18, %v4280_v24 }
 0x291   : > { %5870 = vmatprep.subr.bf16.mxu0 %v19098_v59  ;;  %v4272_v59 = vld [vmem:[%s24007_s11 + $0x330] sm:$0xff] }
 0x293   : > { %v4030_v47 = vpop.f32.mrf.mxu0  ;;  %5821 = vmatmul.mubr.bf16.vlgmr.msra.gmra.mxu0 %v25785_v45 }
 0x294   : > { %v4071_v48 = vpop.f32.mrf.mxu1  ;;  %v4031_v51 = vadd.f32 %v4030_v47, %v25794_v63  ;;  %5871 = vmatpush1.bf16.msra.mxu0 %v19097_v39  ;;  %5902 = vmatprep.mubr.bf16.mxu0 %v25714_v58  ;;  %v19081_v63 = vcombine.low %v4212_v41, %v4216_v42  ;;  %v19138_v39 = vcombine.high %v4268_v36, %v4272_v59  ;;  %v4264_v41 = vld [vmem:[%s24007_s11 + $0x2f0] sm:$0xff] }
 0x295   : > { %v25846_v31 = vpop.f32.mrf.mxu0  ;;  %5872 = vmatprep.subr.bf16.mxu0 %v19090_v46  ;;  %v19137_v42 = vcombine.low %v4268_v36, %v4272_v59  ;;  %v4252_v46 = vld [vmem:[%s24007_s11 + $0x290] sm:$0xff]  ;;  %v19130_v47 = vcombine.high %v4260_v54, %v4264_v41  ;;  %v4201_v59 = vld [vmem:[%s24007_s11 + $0xf8] sm:$0xff] }
 0x296   : > { %v25848_v61 = vpop.f32.mrf.mxu1  ;;  %v25850_v2 = vadd.f32 %v4071_v48, %v4031_v51  ;;  %v4256_v48 = vld [vmem:[%s24007_s11 + $0x2b0] sm:$0xff]  ;;  %v19129_v51 = vcombine.low %v4260_v54, %v4264_v41  ;;  %v4339_v54 = vld [vmem:[%s24007_s11 + $0x548] sm:$0xff] }
 0x297   : > { %v4034_v3 = vpop.f32.mrf.mxu0  ;;  %v19122_v56 = vcombine.high %v4252_v46, %v4256_v48 }
 0x298   : > { %v4075_v33 = vpop.f32.mrf.mxu1  ;;  %5873 = vmatpush1.bf16.msra.mxu0 %v19089_v55  ;;  %v4244_v55 = vld [vmem:[%s24007_s11 + $0x250] sm:$0xff] }
 0x299   : > { %v4035_v4 = vpop.f32.mrf.mxu0  ;;  %5874 = vmatprep.subr.bf16.mxu0 %v19082_v1  ;;  %v19121_v1 = vcombine.low %v4252_v46, %v4256_v48  ;;  %v4236_v3 = vld [vmem:[%s24007_s11 + $0x210] sm:$0xff]  ;;  %v19114_v33 = vcombine.high %v4244_v55, %v4248_v30  ;;  %v19113_v34 = vcombine.low %v4244_v55, %v4248_v30  ;;  %v4189_v48 = vld [vmem:[%s24007_s11 + $0x98] sm:$0xff] }
 0x29a   : > { %v4076_v7 = vpop.f32.mrf.mxu1 }
 0x29b   : > { %v4233_v7 = vld [vmem:[%s24007_s11 + $0x1f8] sm:$0xff] }
 0x29c   : > { %5875 = vmatpush1.bf16.msra.mxu0 %v19081_v63  ;;  %v4240_v63 = vld [vmem:[%s24007_s11 + $0x230] sm:$0xff]  ;;  %v19100_v5 = vcombine.high %v4229_v35, %v4233_v7 }
 0x29d   : > { %5876 = vmatprep.subr.bf16.mxu0 %v19074_v60  ;;  %v19106_v4 = vcombine.high %v4236_v3, %v4240_v63  ;;  %v19105_v60 = vcombine.low %v4236_v3, %v4240_v63  ;;  %v4335_v3 = vld [vmem:[%s24007_s11 + $0x528] sm:$0xff]  ;;  %v4181_v63 = vld [vmem:[%s24007_s11 + $0x58] sm:$0xff] }
 0x2a0   : > { %5877 = vmatpush1.bf16.msra.mxu0 %v19073_v40  ;;  %v4221_v40 = vld [vmem:[%s24007_s11 + $0x198] sm:$0xff] }
 0x2a1   : > { %5878 = vmatprep.subr.bf16.mxu0 %v19066_v49  ;;  %v4033_v49 = vadd.f32 %v25846_v31, %v25799_v28  ;;  %v19092_v13 = vcombine.high %v4221_v40, %v4225_v11  ;;  %v19091_v28 = vcombine.low %v4221_v40, %v4225_v11  ;;  %v4205_v31 = vld [vmem:[%s24007_s11 + $0x118] sm:$0xff]  ;;  %v4315_v11 = vld [vmem:[%s24007_s11 + $0x488] sm:$0xff] }
 0x2a2   : > { %v4177_v40 = vld [vmem:[%s24007_s11 + $0x38] sm:$0xff] }
 0x2a4   : > { %5879 = vmatpush1.bf16.msra.mxu0 %v19065_v53  ;;  %v19099_v53 = vcombine.low %v4229_v35, %v4233_v7 }
 0x2a5   : > { %5880 = vmatprep.subr.bf16.mxu0 %v19058_v14  ;;  %v4217_v14 = vld [vmem:[%s24007_s11 + $0x178] sm:$0xff] }
 0x2a6   : > { %v19083_v27 = vcombine.low %v4213_v12, %v4217_v14 }
 0x2a8   : > { %5881 = vmatpush1.bf16.msra.mxu0 %v19057_v15 }
 0x2a9   : > { %5882 = vmatprep.subr.bf16.mxu0 %v19050_v19  ;;  %v4074_v19 = vadd.f32 %v25848_v61, %v4033_v49  ;;  %v4319_v49 = vld [vmem:[%s24007_s11 + $0x4a8] sm:$0xff] }
 0x2ac   : > { %5883 = vmatpush1.bf16.msra.mxu0 %v19049_v21 }
 0x2ad   : > { %5884 = vmatprep.subr.bf16.mxu0 %v19042_v6  ;;  %v19084_v6 = vcombine.high %v4213_v12, %v4217_v14  ;;  %v4293_v14 = vld [vmem:[%s24007_s11 + $0x3d8] sm:$0xff] }
 0x2b0   : > { %5885 = vmatpush1.bf16.msra.mxu0 %v19041_v25 }
 0x2b1   : > { %5886 = vmatprep.subr.bf16.mxu0 %v19162_v23 }
 0x2b4   : > { %5887 = vmatpush2.bf16.msra.mxu0 %v19161_v32  ;;  %v4351_v32 = vld [vmem:[%s24007_s11 + $0x5a8] sm:$0xff] }
 0x2b5   : > { %5888 = vmatprep.subr.bf16.mxu0 %v19154_v9 }
 0x2b8   : > { %5889 = vmatpush2.bf16.msra.mxu0 %v19153_v10  ;;  %v19076_v10 = vcombine.high %v4205_v31, %v4209_v8 }
 0x2b9   : > { %5890 = vmatprep.subr.bf16.mxu0 %v19146_v62  ;;  %v4197_v62 = vld [vmem:[%s24007_s11 + $0xd8] sm:$0xff] }
 0x2ba   : > { %v19067_v30 = vcombine.low %v4197_v62, %v4201_v59 }
 0x2bc   : > { %5891 = vmatpush2.bf16.msra.mxu0 %v19145_v38 }
 0x2bd   : > { %5892 = vmatprep.subr.bf16.mxu0 %v19138_v39  ;;  %v4343_v39 = vld [vmem:[%s24007_s11 + $0x568] sm:$0xff] }
 0x2be   : > { %v19207_v37 = vcombine.low %v4339_v54, %v4343_v39 }
 0x2c0   : > { %5893 = vmatpush2.bf16.msra.mxu0 %v19137_v42  ;;  %v19075_v42 = vcombine.low %v4205_v31, %v4209_v8  ;;  %v19184_v31 = vcombine.high %v4315_v11, %v4319_v49  ;;  %v4303_v8 = vld [vmem:[%s24007_s11 + $0x428] sm:$0xff] }
 0x2c1   : > { %5894 = vmatprep.subr.bf16.mxu0 %v19130_v47  ;;  %v19068_v47 = vcombine.high %v4197_v62, %v4201_v59  ;;  %v4269_v62 = vld [vmem:[%s24007_s11 + $0x318] sm:$0xff] }
 0x2c2   : > { %v4273_v59 = vld [vmem:[%s24007_s11 + $0x338] sm:$0xff] }
 0x2c4   : > { %5895 = vmatpush2.bf16.msra.mxu0 %v19129_v51  ;;  %v4193_v51 = vld [vmem:[%s24007_s11 + $0xb8] sm:$0xff] }
 0x2c5   : > { %5896 = vmatprep.subr.bf16.mxu0 %v19122_v56  ;;  %v4331_v56 = vld [vmem:[%s24007_s11 + $0x508] sm:$0xff]  ;;  %v19059_v35 = vcombine.low %v4189_v48, %v4193_v51 }
 0x2c8   : > { %5897 = vmatpush2.bf16.msra.mxu0 %v19121_v1  ;;  %v19208_v1 = vcombine.high %v4339_v54, %v4343_v39  ;;  %v4411_v39 = vld [vmem:[%s24007_s11 + $0x788] sm:$0xff] }
 0x2c9   : > { %5898 = vmatprep.subr.bf16.mxu0 %v19114_v33  ;;  %v19060_v33 = vcombine.high %v4189_v48, %v4193_v51  ;;  %v19140_v48 = vcombine.high %v4269_v62, %v4273_v59  ;;  %v4261_v51 = vld [vmem:[%s24007_s11 + $0x2d8] sm:$0xff] }
 0x2cc   : > { %5899 = vmatpush2.bf16.msra.mxu0 %v19113_v34  ;;  %v4185_v34 = vld [vmem:[%s24007_s11 + $0x78] sm:$0xff] }
 0x2cd   : > { %5900 = vmatprep.subr.bf16.mxu0 %v19106_v4  ;;  %v19200_v4 = vcombine.high %v4331_v56, %v4335_v3  ;;  %v19052_v7 = vcombine.high %v4181_v63, %v4185_v34 }
 0x2d0   : > { %5901 = vmatpush2.bf16.msra.mxu0 %v19105_v60  ;;  %v4173_v60 = vld [vmem:[%s24007_s11 + $0x18] sm:$0xff] }
 0x2d1   : > { %5952 = vmatprep.subr.bf16.mxu0 %v19100_v5  ;;  %v19199_v5 = vcombine.low %v4331_v56, %v4335_v3  ;;  %v19139_v3 = vcombine.low %v4269_v62, %v4273_v59 }
 0x2d3   : > { %v4112_v15 = vpop.f32.mrf.mxu0  ;;  %5903 = vmatmul.mubr.bf16.vlgmr.msra.gmra.mxu0 %v25785_v45 }
 0x2d4   : > { %v4153_v16 = vpop.f32.mrf.mxu1  ;;  %v4113_v20 = vadd.f32 %v4112_v15, %v25850_v2  ;;  %5953 = vmatpush1.bf16.msra.mxu0 %v19099_v53  ;;  %5984 = vmatprep.mubr.bf16.mxu0 %v25714_v58  ;;  %v4347_v58 = vld [vmem:[%s24007_s11 + $0x588] sm:$0xff]  ;;  %v19051_v53 = vcombine.low %v4181_v63, %v4185_v34  ;;  %v4297_v15 = vld [vmem:[%s24007_s11 + $0x3f8] sm:$0xff] }
 0x2d5   : > { %v4114_v21 = vpop.f32.mrf.mxu0  ;;  %5954 = vmatprep.subr.bf16.mxu0 %v19092_v13  ;;  %v19216_v46 = vcombine.high %v4347_v58, %v4351_v32  ;;  %v19215_v55 = vcombine.low %v4347_v58, %v4351_v32  ;;  %v19044_v13 = vcombine.high %v4173_v60, %v4177_v40  ;;  %v4281_v58 = vld [vmem:[%s24007_s11 + $0x378] sm:$0xff] }
 0x2d6   : > { %v4155_v22 = vpop.f32.mrf.mxu1  ;;  %v4154_v57 = vadd.f32 %v4153_v16, %v4113_v20  ;;  %v4115_v25 = vadd.f32 %v4114_v21, %v4074_v19  ;;  %v4307_v19 = vld [vmem:[%s24007_s11 + $0x448] sm:$0xff]  ;;  %v19164_v21 = vcombine.high %v4293_v14, %v4297_v15  ;;  %v4253_v34 = vld [vmem:[%s24007_s11 + $0x298] sm:$0xff] }
 0x2d7   : > { %v4116_v23 = vpop.f32.mrf.mxu0  ;;  %v4311_v20 = vld [vmem:[%s24007_s11 + $0x468] sm:$0xff] }
 0x2d8   : > { %v4157_v61 = vpop.f32.mrf.mxu1  ;;  %v4156_v2 = vadd.f32 %v4155_v22, %v4115_v25  ;;  %5955 = vmatpush1.bf16.msra.mxu0 %v19091_v28  ;;  %v4162_v18 = vmax.f32 %v4154_v57, 0.0  ;;  %v19043_v28 = vcombine.low %v4173_v60, %v4177_v40  ;;  %v4285_v22 = vld [vmem:[%s24007_s11 + $0x398] sm:$0xff]  ;;  %v19183_v57 = vcombine.low %v4315_v11, %v4319_v49  ;;  %v4299_v25 = vld [vmem:[%s24007_s11 + $0x408] sm:$0xff] }
 0x2d9   : > { %v4117_v9 = vpop.f32.mrf.mxu0  ;;  %5956 = vmatprep.subr.bf16.mxu0 %v19084_v6  ;;  %v4289_v6 = vld [vmem:[%s24007_s11 + $0x3b8] sm:$0xff]  ;;  %v19163_v23 = vcombine.low %v4293_v14, %v4297_v15  ;;  %v19176_v61 = vcombine.high %v4307_v19, %v4311_v20  ;;  %v19175_v32 = vcombine.low %v4307_v19, %v4311_v20  ;;  %v19167_v54 = vcombine.low %v4299_v25, %v4303_v8  ;;  %v4387_v49 = vld [vmem:[%s24007_s11 + $0x6c8] sm:$0xff]  ;;  %v25949_v19 = vld [vmem:[%s24002_s8 + $0x20] sm:$0xff] }
 0x2da   : > { %v4158_v24 = vpop.f32.mrf.mxu1  ;;  %v4163_v36 = vmax.f32 %v4156_v2, 0.0  ;;  %v25898_v41 = vpack.c.bf16 %v4162_v18, %v4162_v18  ;;  %v19156_v2 = vcombine.high %v4285_v22, %v4289_v6  ;;  %v4419_v18 = vld [vmem:[%s24007_s11 + $0x7c8] sm:$0xff]  ;;  %v4245_v40 = vld [vmem:[%s24007_s11 + $0x258] sm:$0xff] }
 0x2db   : > { %v4423_v9 = vld [vmem:[%s24007_s11 + $0x7e8] sm:$0xff]  ;;  %v19155_v24 = vcombine.low %v4285_v22, %v4289_v6  ;;  %v4237_v14 = vld [vmem:[%s24007_s11 + $0x218] sm:$0xff] }
 0x2dc   : > { %v25894_v38 = vpack.c.bf16 %v4163_v36, %v4163_v36  ;;  %5957 = vmatpush1.bf16.msra.mxu0 %v19083_v27  ;;  %v4277_v27 = vld [vmem:[%s24007_s11 + $0x358] sm:$0xff]  ;;  %v19287_v56 = vcombine.low %v4419_v18, %v4423_v9  ;;  %v4383_v6 = vld [vmem:[%s24007_s11 + $0x6a8] sm:$0xff] }
 0x2dd   : > { %5958 = vmatprep.subr.bf16.mxu0 %v19076_v10  ;;  %v19168_v10 = vcombine.high %v4299_v25, %v4303_v8  ;;  %v19148_v36 = vcombine.high %v4277_v27, %v4281_v58  ;;  %v4371_v8 = vld [vmem:[%s24007_s11 + $0x648] sm:$0xff] }
 0x2de   : > { %5779 = vmatprep.mubr.bf16.mxu1 %v25894_v38 }
 0x2df   : > { %5780 = vmatmul.mubr.bf16.vlgmr.msra.gmra.mxu1 %v25898_v41 }
 0x2e0   : > { %5830 = vmatpush1.bf16.msra.mxu1 %v19223_v43  ;;  %5861 = vmatprep.mubr.bf16.mxu1 %v25894_v38  ;;  %v4327_v43 = vld [vmem:[%s24007_s11 + $0x4e8] sm:$0xff] }
 0x2e1   : > { %5959 = vmatpush1.bf16.msra.mxu0 %v19075_v42  ;;  %5831 = vmatprep.subr.bf16.mxu1 %v19216_v46  ;;  %v19192_v12 = vcombine.high %v4323_v0, %v4327_v43  ;;  %v19191_v16 = vcombine.low %v4323_v0, %v4327_v43  ;;  %v4415_v42 = vld [vmem:[%s24007_s11 + $0x7a8] sm:$0xff]  ;;  %v19147_v46 = vcombine.low %v4277_v27, %v4281_v58  ;;  %v22300_v27 = vld [vmem:[%s30488_s1 + $0xe4] ss:$16 sps:$4 sm:$0xff]  }
 0x2e2   : > { %5960 = vmatprep.subr.bf16.mxu0 %v19068_v47  ;;  %v19288_v47 = vcombine.high %v4419_v18, %v4423_v9  ;;  %v19279_v0 = vcombine.low %v4411_v39, %v4415_v42  ;;  %v4395_v43 = vld [vmem:[%s24007_s11 + $0x708] sm:$0xff] }
 0x2e3   : > { %v4363_v18 = vld [vmem:[%s24007_s11 + $0x608] sm:$0xff] }
 0x2e4   : > { %5832 = vmatpush1.bf16.msra.mxu1 %v19215_v55  ;;  %v4265_v55 = vld [vmem:[%s24007_s11 + $0x2f8] sm:$0xff]  ;;  %v4367_v9 = vld [vmem:[%s24007_s11 + $0x628] sm:$0xff] }
 0x2e5   : > { %5961 = vmatpush1.bf16.msra.mxu0 %v19067_v30  ;;  %5833 = vmatprep.subr.bf16.mxu1 %v19208_v1  ;;  %v4403_v30 = vld [vmem:[%s24007_s11 + $0x748] sm:$0xff]  ;;  %v19132_v63 = vcombine.high %v4261_v51, %v4265_v55 }
 0x2e6   : > { %5962 = vmatprep.subr.bf16.mxu0 %v19060_v33  ;;  %v4407_v1 = vld [vmem:[%s24007_s11 + $0x768] sm:$0xff]  ;;  %v19280_v33 = vcombine.high %v4411_v39, %v4415_v42  ;;  %v4356_v39 = vld [vmem:[%s24007_s11 + $0x5d0] sm:$0xff] }
 0x2e7   : > { %v19271_v11 = vcombine.low %v4403_v30, %v4407_v1  ;;  %v4360_v42 = vld [vmem:[%s24007_s11 + $0x5f0] sm:$0xff] }
 0x2e8   : > { %5834 = vmatpush1.bf16.msra.mxu1 %v19207_v37  ;;  %v4257_v37 = vld [vmem:[%s24007_s11 + $0x2b8] sm:$0xff] }
 0x2e9   : > { %5963 = vmatpush1.bf16.msra.mxu0 %v19059_v35  ;;  %5835 = vmatprep.subr.bf16.mxu1 %v19200_v4  ;;  %v4399_v35 = vld [vmem:[%s24007_s11 + $0x728] sm:$0xff]  ;;  %v19131_v4 = vcombine.low %v4261_v51, %v4265_v55  ;;  %v19124_v60 = vcombine.high %v4253_v34, %v4257_v37  ;;  %v22306_v51 = vld [vmem:[%s30488_s1 + $0xa4] ss:$16 sps:$4 sm:$0xff]   ;;  %v19231_v55 = vcombine.low %v4363_v18, %v4367_v9 }
 0x2ea   : > { %5964 = vmatprep.subr.bf16.mxu0 %v19052_v7  ;;  %v19272_v7 = vcombine.high %v4403_v30, %v4407_v1  ;;  %v19263_v20 = vcombine.low %v4395_v43, %v4399_v35  ;;  %v4352_v30 = vld [vmem:[%s24007_s11 + $0x5b0] sm:$0xff] }
 0x2eb   : > { %v22304_v1 = vld [vmem:[%s30488_s1 + $0xa0] ss:$16 sps:$4 sm:$0xff]  }
 0x2ec   : > { %5836 = vmatpush1.bf16.msra.mxu1 %v19199_v5  ;;  %v4249_v5 = vld [vmem:[%s24007_s11 + $0x278] sm:$0xff] }
 0x2ed   : > { %5965 = vmatpush1.bf16.msra.mxu0 %v19051_v53  ;;  %5837 = vmatprep.subr.bf16.mxu1 %v19192_v12  ;;  %v4391_v53 = vld [vmem:[%s24007_s11 + $0x6e8] sm:$0xff]  ;;  %v19123_v12 = vcombine.low %v4253_v34, %v4257_v37  ;;  %v19116_v15 = vcombine.high %v4245_v40, %v4249_v5  ;;  %v19225_v34 = vcombine.low %v4356_v39, %v4360_v42  ;;  %v4340_v37 = vld [vmem:[%s24007_s11 + $0x550] sm:$0xff] }
 0x2ee   : > { %5966 = vmatprep.subr.bf16.mxu0 %v19044_v13  ;;  %v19264_v13 = vcombine.high %v4395_v43, %v4399_v35  ;;  %v19255_v25 = vcombine.low %v4387_v49, %v4391_v53  ;;  %v22307_v43 = vld [vmem:[%s30488_s1 + $0x80] ss:$16 sps:$4 sm:$0xff]  }
 0x2ef   : > { %v4344_v35 = vld [vmem:[%s24007_s11 + $0x570] sm:$0xff] }
 0x2f0   : > { %5838 = vmatpush1.bf16.msra.mxu1 %v19191_v16  ;;  %v4241_v16 = vld [vmem:[%s24007_s11 + $0x238] sm:$0xff] }
 0x2f1   : > { %5967 = vmatpush1.bf16.msra.mxu0 %v19043_v28  ;;  %5839 = vmatprep.subr.bf16.mxu1 %v19184_v31  ;;  %v4379_v28 = vld [vmem:[%s24007_s11 + $0x688] sm:$0xff]  ;;  %v19115_v31 = vcombine.low %v4245_v40, %v4249_v5  ;;  %v19108_v22 = vcombine.high %v4237_v14, %v4241_v16  ;;  %v4332_v40 = vld [vmem:[%s24007_s11 + $0x510] sm:$0xff] }
 0x2f2   : > { %5968 = vmatprep.subr.bf16.mxu0 %v19164_v21  ;;  %v19256_v21 = vcombine.high %v4387_v49, %v4391_v53  ;;  %v22310_v5 = vld [vmem:[%s30488_s1 + $0x60] ss:$16 sps:$4 sm:$0xff]   ;;  %v22315_v49 = vld [vmem:[%s30488_s1 + $0x44] ss:$16 sps:$4 sm:$0xff]   ;;  %v19209_v53 = vcombine.low %v4340_v37, %v4344_v35 }
 0x2f4   : > { %5840 = vmatpush1.bf16.msra.mxu1 %v19183_v57  ;;  %v25955_v57 = vrot.slane %v25949_v19, %v24145_v50 }
 0x2f5   : > { %5969 = vmatpush2.bf16.msra.mxu0 %v19163_v23  ;;  %5841 = vmatprep.subr.bf16.mxu1 %v19176_v61  ;;  %v4375_v23 = vld [vmem:[%s24007_s11 + $0x668] sm:$0xff]  ;;  %v19107_v61 = vcombine.low %v4237_v14, %v4241_v16  ;;  %v22313_v14 = vld [vmem:[%s30488_s1 + $0x40] ss:$16 sps:$4 sm:$0xff]   ;;  %v22318_v16 = vld [vmem:[%s30488_s1 + $0x24] ss:$16 sps:$4 sm:$0xff]  }
 0x2f6   : > { %5970 = vmatprep.subr.bf16.mxu0 %v19156_v2  ;;  %v19248_v2 = vcombine.high %v4379_v28, %v4383_v6  ;;  %v6106_v58 = vcombine.high %v25955_v57, %v25955_v57 }
 0x2f8   : > { %5842 = vmatpush1.bf16.msra.mxu1 %v19175_v32  ;;  %v19247_v32 = vcombine.low %v4379_v28, %v4383_v6  ;;  %v25972_v62 = vpack.c.bf16 %v6106_v58, %v6106_v58  ;;  %v4316_v28 = vld [vmem:[%s24007_s11 + $0x490] sm:$0xff] }
 0x2f9   : > { %5971 = vmatpush2.bf16.msra.mxu0 %v19155_v24  ;;  %5843 = vmatprep.subr.bf16.mxu1 %v19168_v10  ;;  %v22298_v24 = vld [vmem:[%s30488_s1 + $0xe0] ss:$16 sps:$4 sm:$0xff]   ;;  %v19240_v10 = vcombine.high %v4371_v8, %v4375_v23  ;;  %v22321_v6 = vld [vmem:[%s30488_s1 + $0x4] ss:$16 sps:$4 sm:$0xff]  }
 0x2fa   : > { %5972 = vmatprep.subr.bf16.mxu0 %v19148_v36  ;;  %v22303_v36 = vld [vmem:[%s30488_s1 + $0xc4] ss:$16 sps:$4 sm:$0xff]  }
 0x2fc   : > { %5844 = vmatpush1.bf16.msra.mxu1 %v19167_v54  ;;  %v19239_v54 = vcombine.low %v4371_v8, %v4375_v23  ;;  %v22319_v23 = vld [vmem:[%s30488_s1] ss:$16 sps:$4 sm:$0xff]  }
 0x2fd   : > { %5973 = vmatpush2.bf16.msra.mxu0 %v19147_v46  ;;  %5845 = vmatprep.subr.bf16.mxu1 %v19288_v47  ;;  %v22301_v46 = vld [vmem:[%s30488_s1 + $0xc0] ss:$16 sps:$4 sm:$0xff]  }
 0x2fe   : > { %5974 = vmatprep.subr.bf16.mxu0 %v19140_v48  ;;  %v19232_v48 = vcombine.high %v4363_v18, %v4367_v9  ;;  %v22322_v18 = vld [vmem:[%s30488_s1 + $0x1e0] ss:$16 sps:$4 sm:$0xff]  }
 0x2ff   : > { %v4300_v9 = vld [vmem:[%s24007_s11 + $0x410] sm:$0xff] }
 0x300   : > { %5846 = vmatpush2.bf16.msra.mxu1 %v19287_v56  ;;  %v4348_v56 = vld [vmem:[%s24007_s11 + $0x590] sm:$0xff] }
 0x301   : > { %5975 = vmatpush2.bf16.msra.mxu0 %v19139_v3  ;;  %5847 = vmatprep.subr.bf16.mxu1 %v19280_v33  ;;  %v19226_v33 = vcombine.high %v4356_v39, %v4360_v42  ;;  %v22325_v39 = vld [vmem:[%s30488_s1 + $0x1c0] ss:$16 sps:$4 sm:$0xff]  }
 0x302   : > { %5976 = vmatprep.subr.bf16.mxu0 %v19132_v63  ;;  %v22309_v63 = vld [vmem:[%s30488_s1 + $0x84] ss:$16 sps:$4 sm:$0xff]  }
 0x303   : > { %v4420_v42 = vld [vmem:[%s24007_s11 + $0x7d0] sm:$0xff] }
 0x304   : > { %5848 = vmatpush2.bf16.msra.mxu1 %v19279_v0  ;;  %v19218_v0 = vcombine.high %v4348_v56, %v4352_v30 }
 0x305   : > { %5977 = vmatpush2.bf16.msra.mxu0 %v19131_v4  ;;  %5849 = vmatprep.subr.bf16.mxu1 %v19272_v7  ;;  %v22312_v4 = vld [vmem:[%s30488_s1 + $0x64] ss:$16 sps:$4 sm:$0xff]   ;;  %v19217_v7 = vcombine.low %v4348_v56, %v4352_v30 }
 0x306   : > { %5978 = vmatprep.subr.bf16.mxu0 %v19124_v60  ;;  %v19210_v60 = vcombine.high %v4340_v37, %v4344_v35  ;;  %v4412_v56 = vld [vmem:[%s24007_s11 + $0x790] sm:$0xff] }
 0x307   : > { %v4416_v30 = vld [vmem:[%s24007_s11 + $0x7b0] sm:$0xff] }
 0x308   : > { %5850 = vmatpush2.bf16.msra.mxu1 %v19271_v11  ;;  %v4336_v11 = vld [vmem:[%s24007_s11 + $0x530] sm:$0xff] }
 0x309   : > { %5979 = vmatpush2.bf16.msra.mxu0 %v19123_v12  ;;  %5851 = vmatprep.subr.bf16.mxu1 %v19264_v13  ;;  %v4324_v12 = vld [vmem:[%s24007_s11 + $0x4d0] sm:$0xff]  ;;  %v19202_v13 = vcombine.high %v4332_v40, %v4336_v11 }
 0x30a   : > { %5980 = vmatprep.subr.bf16.mxu0 %v19116_v15  ;;  %v4328_v15 = vld [vmem:[%s24007_s11 + $0x4f0] sm:$0xff] }
 0x30b   : > { %v4408_v37 = vld [vmem:[%s24007_s11 + $0x770] sm:$0xff] }
 0x30c   : > { %5852 = vmatpush2.bf16.msra.mxu1 %v19263_v20  ;;  %v19201_v20 = vcombine.low %v4332_v40, %v4336_v11  ;;  %v22339_v40 = vld [vmem:[%s30488_s1 + $0x144] ss:$16 sps:$4 sm:$0xff]  }
 0x30d   : > { %5981 = vmatpush2.bf16.msra.mxu0 %v19115_v31  ;;  %5853 = vmatprep.subr.bf16.mxu1 %v19256_v21  ;;  %v4320_v31 = vld [vmem:[%s24007_s11 + $0x4b0] sm:$0xff] }
 0x30e   : > { %5982 = vmatprep.subr.bf16.mxu0 %v19108_v22  ;;  %v22316_v21 = vld [vmem:[%s30488_s1 + $0x20] ss:$16 sps:$4 sm:$0xff]   ;;  %v19194_v22 = vcombine.high %v4324_v12, %v4328_v15  ;;  %v19186_v8 = vcombine.high %v4316_v28, %v4320_v31  ;;  %v19185_v58 = vcombine.low %v4316_v28, %v4320_v31 }
 0x30f   : > { %v4380_v28 = vld [vmem:[%s24007_s11 + $0x690] sm:$0xff] }
 0x310   : > { %5854 = vmatpush2.bf16.msra.mxu1 %v19255_v25  ;;  %v19193_v25 = vcombine.low %v4324_v12, %v4328_v15  ;;  %v4392_v12 = vld [vmem:[%s24007_s11 + $0x6f0] sm:$0xff] }
 0x311   : > { %5983 = vmatpush2.bf16.msra.mxu0 %v19107_v61  ;;  %5855 = vmatprep.subr.bf16.mxu1 %v19248_v2  ;;  %v4308_v61 = vld [vmem:[%s24007_s11 + $0x450] sm:$0xff] }
 0x312   : > { %9285 = vmatprep.subr.bf16.mxu0 %v22300_v27  ;;  %v4312_v2 = vld [vmem:[%s24007_s11 + $0x470] sm:$0xff] }
 0x313   : > { %v25974_v59 = vpop.f32.mrf.mxu0  ;;  %v22324_v27 = vld [vmem:[%s30488_s1 + $0x1e4] ss:$16 sps:$4 sm:$0xff]  }
 0x314   : > { %5856 = vmatpush2.bf16.msra.mxu1 %v19247_v32  ;;  %5985 = vmatmul.mubr.bf16.vlgmr.msra.gmra.mxu0 %v25785_v45  ;;  %v19178_v32 = vcombine.high %v4308_v61, %v4312_v2  ;;  %v4384_v31 = vld [vmem:[%s24007_s11 + $0x6b0] sm:$0xff] }
 0x315   : > { %v25982_v47 = vpop.f32.mrf.mxu0  ;;  %5857 = vmatprep.subr.bf16.mxu1 %v19240_v10  ;;  %9286 = vmatpush1.bf16.msra.mxu0 %v22298_v24  ;;  %v4304_v24 = vld [vmem:[%s24007_s11 + $0x430] sm:$0xff] }
 0x316   : > { %9287 = vmatprep.subr.bf16.mxu0 %v22303_v36  ;;  %9317 = vmatprep.mubr.bf16.mxu0 %v25972_v62  ;;  %v22327_v10 = vld [vmem:[%s30488_s1 + $0x1c4] ss:$16 sps:$4 sm:$0xff]   ;;  %v19177_v36 = vcombine.low %v4308_v61, %v4312_v2 }
 0x317   : > { %v5744_v45 = vpop.f32.mrf.mxu0  ;;  %v4376_v61 = vld [vmem:[%s24007_s11 + $0x670] sm:$0xff] }
 0x318   : > { %5858 = vmatpush2.bf16.msra.mxu1 %v19239_v54  ;;  %v19170_v54 = vcombine.high %v4300_v9, %v4304_v24  ;;  %v22348_v2 = vld [vmem:[%s30488_s1 + $0x4e4] ss:$16 sps:$4 sm:$0xff]  }
 0x319   : > { %v5745_v3 = vpop.f32.mrf.mxu0  ;;  %5859 = vmatprep.subr.bf16.mxu1 %v19232_v48  ;;  %9288 = vmatpush1.bf16.msra.mxu0 %v22301_v46  ;;  %v4424_v46 = vld [vmem:[%s24007_s11 + $0x7f0] sm:$0xff] }
 0x31a   : > { %9289 = vmatprep.subr.bf16.mxu0 %v22306_v51  ;;  %v22330_v48 = vld [vmem:[%s30488_s1 + $0x1a4] ss:$16 sps:$4 sm:$0xff]   ;;  %v19169_v51 = vcombine.low %v4300_v9, %v4304_v24  ;;  %v19290_v45 = vcombine.high %v4420_v42, %v4424_v46  ;;  %v19289_v3 = vcombine.low %v4420_v42, %v4424_v46  ;;  %v22346_v9 = vld [vmem:[%s30488_s1 + $0x4e0] ss:$16 sps:$4 sm:$0xff]  }
 0x31b   : > { %v4364_v24 = vld [vmem:[%s24007_s11 + $0x610] sm:$0xff] }
 0x31c   : > { %5860 = vmatpush2.bf16.msra.mxu1 %v19231_v55  ;;  %v22328_v55 = vld [vmem:[%s30488_s1 + $0x1a0] ss:$16 sps:$4 sm:$0xff]  }
 0x31d   : > { %5911 = vmatprep.subr.bf16.mxu1 %v19226_v33  ;;  %9290 = vmatpush1.bf16.msra.mxu0 %v22304_v1  ;;  %v22333_v1 = vld [vmem:[%s30488_s1 + $0x184] ss:$16 sps:$4 sm:$0xff]   ;;  %v19282_v33 = vcombine.high %v4412_v56, %v4416_v30 }
 0x31e   : > { %9291 = vmatprep.subr.bf16.mxu0 %v22309_v63  ;;  %v22331_v63 = vld [vmem:[%s30488_s1 + $0x180] ss:$16 sps:$4 sm:$0xff]  }
 0x31f   : > { %5862 = vmatmul.mubr.bf16.vlgmr.msra.gmra.mxu1 %v25898_v41 }
 0x320   : > { %5912 = vmatpush1.bf16.msra.mxu1 %v19225_v34  ;;  %5943 = vmatprep.mubr.bf16.mxu1 %v25894_v38  ;;  %v4404_v34 = vld [vmem:[%s24007_s11 + $0x750] sm:$0xff] }
 0x321   : > { %5913 = vmatprep.subr.bf16.mxu1 %v19218_v0  ;;  %9292 = vmatpush1.bf16.msra.mxu0 %v22307_v43  ;;  %v22336_v0 = vld [vmem:[%s30488_s1 + $0x164] ss:$16 sps:$4 sm:$0xff]   ;;  %v19281_v43 = vcombine.low %v4412_v56, %v4416_v30  ;;  %v19274_v35 = vcombine.high %v4404_v34, %v4408_v37 }
 0x322   : > { %9293 = vmatprep.subr.bf16.mxu0 %v22312_v4  ;;  %v22334_v4 = vld [vmem:[%s30488_s1 + $0x160] ss:$16 sps:$4 sm:$0xff]  }
 0x324   : > { %5914 = vmatpush1.bf16.msra.mxu1 %v19217_v7  ;;  %v4396_v7 = vld [vmem:[%s24007_s11 + $0x710] sm:$0xff] }
 0x325   : > { %5915 = vmatprep.subr.bf16.mxu1 %v19210_v60  ;;  %9294 = vmatpush1.bf16.msra.mxu0 %v22310_v5  ;;  %v4400_v60 = vld [vmem:[%s24007_s11 + $0x730] sm:$0xff]  ;;  %v19273_v5 = vcombine.low %v4404_v34, %v4408_v37  ;;  %v4353_v34 = vld [vmem:[%s24007_s11 + $0x5b8] sm:$0xff] }
 0x326   : > { %9295 = vmatprep.subr.bf16.mxu0 %v22315_v49  ;;  %v19266_v11 = vcombine.high %v4396_v7, %v4400_v60  ;;  %v22337_v49 = vld [vmem:[%s30488_s1 + $0x140] ss:$16 sps:$4 sm:$0xff]   ;;  %v19265_v15 = vcombine.low %v4396_v7, %v4400_v60  ;;  %v22357_v37 = vld [vmem:[%s30488_s1 + $0x484] ss:$16 sps:$4 sm:$0xff]   ;;  %v4345_v7 = vld [vmem:[%s24007_s11 + $0x578] sm:$0xff] }
 0x327   : > { %v22360_v60 = vld [vmem:[%s30488_s1 + $0x464] ss:$16 sps:$4 sm:$0xff]  }
 0x328   : > { %5916 = vmatpush1.bf16.msra.mxu1 %v19209_v53  ;;  %v4388_v53 = vld [vmem:[%s24007_s11 + $0x6d0] sm:$0xff] }
 0x329   : > { %5917 = vmatprep.subr.bf16.mxu1 %v19202_v13  ;;  %9296 = vmatpush1.bf16.msra.mxu0 %v22313_v14  ;;  %v22342_v13 = vld [vmem:[%s30488_s1 + $0x124] ss:$16 sps:$4 sm:$0xff]   ;;  %v26087_v14 = vld [vmem:[%s24002_s8 + $0x28] sm:$0xff] }
 0x32a   : > { %9297 = vmatprep.subr.bf16.mxu0 %v22318_v16  ;;  %v19258_v16 = vcombine.high %v4388_v53, %v4392_v12 }
 0x32c   : > { %5918 = vmatpush1.bf16.msra.mxu1 %v19201_v20  ;;  %v22340_v20 = vld [vmem:[%s30488_s1 + $0x120] ss:$16 sps:$4 sm:$0xff]  }
 0x32d   : > { %5919 = vmatprep.subr.bf16.mxu1 %v19194_v22  ;;  %9298 = vmatpush1.bf16.msra.mxu0 %v22316_v21  ;;  %v22345_v21 = vld [vmem:[%s30488_s1 + $0x104] ss:$16 sps:$4 sm:$0xff]   ;;  %v26099_v22 = vrot.slane %v26087_v14, %v24145_v50 }
 0x32e   : > { %9299 = vmatprep.subr.bf16.mxu0 %v22321_v6  ;;  %v19257_v6 = vcombine.low %v4388_v53, %v4392_v12  ;;  %v4337_v53 = vld [vmem:[%s24007_s11 + $0x538] sm:$0xff]  ;;  %v22363_v12 = vld [vmem:[%s30488_s1 + $0x444] ss:$16 sps:$4 sm:$0xff]  }
 0x330   : > { %5920 = vmatpush1.bf16.msra.mxu1 %v19193_v25  ;;  %v19250_v25 = vcombine.high %v4380_v28, %v4384_v31 }
 0x331   : > { %5921 = vmatprep.subr.bf16.mxu1 %v19186_v8  ;;  %9300 = vmatpush1.bf16.msra.mxu0 %v22319_v23  ;;  %v22343_v8 = vld [vmem:[%s30488_s1 + $0x100] ss:$16 sps:$4 sm:$0xff]  }
 0x332   : > { %9301 = vmatprep.subr.bf16.mxu0 %v22324_v27  ;;  %v4372_v23 = vld [vmem:[%s24007_s11 + $0x650] sm:$0xff]  ;;  %v6123_v27 = vcombine.high %v26099_v22, %v26099_v22 }
 0x334   : > { %5922 = vmatpush1.bf16.msra.mxu1 %v19185_v58  ;;  %v19249_v58 = vcombine.low %v4380_v28, %v4384_v31  ;;  %v22366_v28 = vld [vmem:[%s30488_s1 + $0x424] ss:$16 sps:$4 sm:$0xff]  }
 0x335   : > { %5923 = vmatprep.subr.bf16.mxu1 %v19178_v32  ;;  %9302 = vmatpush2.bf16.msra.mxu0 %v22322_v18  ;;  %v26113_v32 = vpack.c.bf16 %v25955_v57, %v25955_v57  ;;  %v19242_v18 = vcombine.high %v4372_v23, %v4376_v61 }
 0x336   : > { %9303 = vmatprep.subr.bf16.mxu0 %v22327_v10  ;;  %v4368_v10 = vld [vmem:[%s24007_s11 + $0x630] sm:$0xff] }
 0x337   : > { %v19234_v46 = vcombine.high %v4364_v24, %v4368_v10  ;;  %v19233_v30 = vcombine.low %v4364_v24, %v4368_v10 }
 0x338   : > { %5924 = vmatpush1.bf16.msra.mxu1 %v19177_v36  ;;  %v22351_v36 = vld [vmem:[%s30488_s1 + $0x4c4] ss:$16 sps:$4 sm:$0xff]  }
 0x339   : > { %5925 = vmatprep.subr.bf16.mxu1 %v19170_v54  ;;  %9304 = vmatpush2.bf16.msra.mxu0 %v22325_v39  ;;  %v26123_v54 = vpack.c.bf16 %v6123_v27, %v6123_v27  ;;  %v19241_v39 = vcombine.low %v4372_v23, %v4376_v61  ;;  %v22369_v23 = vld [vmem:[%s30488_s1 + $0x404] ss:$16 sps:$4 sm:$0xff]   ;;  %v22367_v27 = vld [vmem:[%s30488_s1 + $0x400] ss:$16 sps:$4 sm:$0xff]  }
 0x33a   : > { %9305 = vmatprep.subr.bf16.mxu0 %v22330_v48  ;;  %v22349_v48 = vld [vmem:[%s30488_s1 + $0x4c0] ss:$16 sps:$4 sm:$0xff]  }
 0x33c   : > { %5926 = vmatpush1.bf16.msra.mxu1 %v19169_v51  ;;  %v4357_v51 = vld [vmem:[%s24007_s11 + $0x5d8] sm:$0xff] }
 0x33d   : > { %5927 = vmatprep.subr.bf16.mxu1 %v19290_v45  ;;  %9306 = vmatpush2.bf16.msra.mxu0 %v22328_v55  ;;  %v4361_v45 = vld [vmem:[%s24007_s11 + $0x5f8] sm:$0xff]  ;;  %v22354_v55 = vld [vmem:[%s30488_s1 + $0x4a4] ss:$16 sps:$4 sm:$0xff]  }
 0x33e   : > { %9307 = vmatprep.subr.bf16.mxu0 %v22333_v1 }
 0x340   : > { %5928 = vmatpush2.bf16.msra.mxu1 %v19289_v3  ;;  %v19228_v3 = vcombine.high %v4357_v51, %v4361_v45 }
 0x341   : > { %5929 = vmatprep.subr.bf16.mxu1 %v19282_v33  ;;  %9308 = vmatpush2.bf16.msra.mxu0 %v22331_v63  ;;  %v22352_v33 = vld [vmem:[%s30488_s1 + $0x4a0] ss:$16 sps:$4 sm:$0xff]   ;;  %v4349_v63 = vld [vmem:[%s24007_s11 + $0x598] sm:$0xff] }
 0x342   : > { %9309 = vmatprep.subr.bf16.mxu0 %v22336_v0  ;;  %v19227_v0 = vcombine.low %v4357_v51, %v4361_v45 }
 0x344   : > { %5930 = vmatpush2.bf16.msra.mxu1 %v19281_v43  ;;  %v19220_v43 = vcombine.high %v4349_v63, %v4353_v34 }
 0x345   : > { %5931 = vmatprep.subr.bf16.mxu1 %v19274_v35  ;;  %9310 = vmatpush2.bf16.msra.mxu0 %v22334_v4  ;;  %v22355_v35 = vld [vmem:[%s30488_s1 + $0x480] ss:$16 sps:$4 sm:$0xff]   ;;  %v4341_v4 = vld [vmem:[%s24007_s11 + $0x558] sm:$0xff] }
 0x346   : > { %9311 = vmatprep.subr.bf16.mxu0 %v22339_v40  ;;  %v19219_v40 = vcombine.low %v4349_v63, %v4353_v34  ;;  %v22376_v63 = vld [vmem:[%s30488_s1 + $0x5a0] ss:$16 sps:$4 sm:$0xff]   ;;  %v4413_v34 = vld [vmem:[%s24007_s11 + $0x798] sm:$0xff] }
 0x348   : > { %5932 = vmatpush2.bf16.msra.mxu1 %v19273_v5  ;;  %v19212_v5 = vcombine.high %v4341_v4, %v4345_v7 }
 0x349   : > { %5933 = vmatprep.subr.bf16.mxu1 %v19266_v11  ;;  %9312 = vmatpush2.bf16.msra.mxu0 %v22337_v49  ;;  %v22358_v11 = vld [vmem:[%s30488_s1 + $0x460] ss:$16 sps:$4 sm:$0xff]   ;;  %v4333_v49 = vld [vmem:[%s24007_s11 + $0x518] sm:$0xff] }
 0x34a   : > { %9313 = vmatprep.subr.bf16.mxu0 %v22342_v13  ;;  %v19204_v13 = vcombine.high %v4333_v49, %v4337_v53  ;;  %v19203_v31 = vcombine.low %v4333_v49, %v4337_v53  ;;  %v22382_v49 = vld [vmem:[%s30488_s1 + $0x560] ss:$16 sps:$4 sm:$0xff]   ;;  %v4397_v53 = vld [vmem:[%s24007_s11 + $0x718] sm:$0xff] }
 0x34c   : > { %5934 = vmatpush2.bf16.msra.mxu1 %v19265_v15  ;;  %v22361_v15 = vld [vmem:[%s30488_s1 + $0x440] ss:$16 sps:$4 sm:$0xff]  }
 0x34d   : > { %5935 = vmatprep.subr.bf16.mxu1 %v19258_v16  ;;  %9314 = vmatpush2.bf16.msra.mxu0 %v22340_v20  ;;  %v4325_v16 = vld [vmem:[%s24007_s11 + $0x4d8] sm:$0xff] }
 0x34e   : > { %9315 = vmatprep.subr.bf16.mxu0 %v22345_v21  ;;  %v4329_v20 = vld [vmem:[%s24007_s11 + $0x4f8] sm:$0xff] }
 0x34f   : > { %v19196_v21 = vcombine.high %v4325_v16, %v4329_v20  ;;  %v19195_v61 = vcombine.low %v4325_v16, %v4329_v20  ;;  %v22385_v16 = vld [vmem:[%s30488_s1 + $0x540] ss:$16 sps:$4 sm:$0xff]   ;;  %v4389_v20 = vld [vmem:[%s24007_s11 + $0x6d8] sm:$0xff] }
 0x350   : > { %5936 = vmatpush2.bf16.msra.mxu1 %v19257_v6  ;;  %v22364_v6 = vld [vmem:[%s30488_s1 + $0x420] ss:$16 sps:$4 sm:$0xff]  }
 0x351   : > { %5937 = vmatprep.subr.bf16.mxu1 %v19250_v25  ;;  %9316 = vmatpush2.bf16.msra.mxu0 %v22343_v8  ;;  %v4317_v25 = vld [vmem:[%s24007_s11 + $0x498] sm:$0xff] }
 0x352   : > { %9367 = vmatprep.subr.bf16.mxu0 %v22348_v2  ;;  %v4321_v8 = vld [vmem:[%s24007_s11 + $0x4b8] sm:$0xff] }
 0x353   : > { %v26125_v57 = vpop.f32.mrf.mxu0  ;;  %v19188_v2 = vcombine.high %v4317_v25, %v4321_v8  ;;  %v19187_v24 = vcombine.low %v4317_v25, %v4321_v8  ;;  %v22391_v8 = vld [vmem:[%s30488_s1 + $0x520] ss:$16 sps:$4 sm:$0xff]  }
 0x354   : > { %5938 = vmatpush2.bf16.msra.mxu1 %v19249_v58  ;;  %9318 = vmatmul.mubr.bf16.vlgmr.msra.gmra.mxu0 %v26113_v32  ;;  %v4309_v58 = vld [vmem:[%s24007_s11 + $0x458] sm:$0xff] }
 0x355   : > { %v26128_v42 = vpop.f32.mrf.mxu0  ;;  %5939 = vmatprep.subr.bf16.mxu1 %v19242_v18  ;;  %9368 = vmatpush1.bf16.msra.mxu0 %v22346_v9  ;;  %v4313_v18 = vld [vmem:[%s24007_s11 + $0x478] sm:$0xff]  ;;  %v22372_v9 = vld [vmem:[%s30488_s1 + $0x5e4] ss:$16 sps:$4 sm:$0xff]  }
 0x356   : > { %9369 = vmatprep.subr.bf16.mxu0 %v22351_v36  ;;  %9399 = vmatprep.mubr.bf16.mxu0 %v26123_v54  ;;  %v19180_v10 = vcombine.high %v4309_v58, %v4313_v18  ;;  %v22370_v36 = vld [vmem:[%s30488_s1 + $0x5e0] ss:$16 sps:$4 sm:$0xff]   ;;  %v19179_v51 = vcombine.low %v4309_v58, %v4313_v18 }
 0x357   : > { %v5826_v56 = vpop.f32.mrf.mxu0 }
 0x358   : > { %5940 = vmatpush2.bf16.msra.mxu1 %v19241_v39  ;;  %v4301_v39 = vld [vmem:[%s24007_s11 + $0x418] sm:$0xff] }
 0x359   : > { %v5827_v1 = vpop.f32.mrf.mxu0  ;;  %5941 = vmatprep.subr.bf16.mxu1 %v19234_v46  ;;  %9370 = vmatpush1.bf16.msra.mxu0 %v22349_v48  ;;  %v4305_v46 = vld [vmem:[%s24007_s11 + $0x438] sm:$0xff]  ;;  %v22375_v48 = vld [vmem:[%s30488_s1 + $0x5c4] ss:$16 sps:$4 sm:$0xff]  }
 0x35a   : > { %9371 = vmatprep.subr.bf16.mxu0 %v22354_v55  ;;  %v19172_v45 = vcombine.high %v4301_v39, %v4305_v46  ;;  %v22373_v55 = vld [vmem:[%s30488_s1 + $0x5c0] ss:$16 sps:$4 sm:$0xff]   ;;  %v4421_v56 = vld [vmem:[%s24007_s11 + $0x7d8] sm:$0xff]  ;;  %v22378_v1 = vld [vmem:[%s30488_s1 + $0x5a4] ss:$16 sps:$4 sm:$0xff]  }
 0x35c   : > { %5942 = vmatpush2.bf16.msra.mxu1 %v19233_v30  ;;  %v4425_v30 = vld [vmem:[%s24007_s11 + $0x7f8] sm:$0xff] }
 0x35d   : > { %5993 = vmatprep.subr.bf16.mxu1 %v19228_v3  ;;  %9372 = vmatpush1.bf16.msra.mxu0 %v22352_v33  ;;  %v19171_v3 = vcombine.low %v4301_v39, %v4305_v46  ;;  %v19292_v33 = vcombine.high %v4421_v56, %v4425_v30 }
 0x35e   : > { %9373 = vmatprep.subr.bf16.mxu0 %v22357_v37  ;;  %v4417_v37 = vld [vmem:[%s24007_s11 + $0x7b8] sm:$0xff] }
 0x35f   : > { %5944 = vmatmul.mubr.bf16.vlgmr.msra.gmra.mxu1 %v25898_v41 }
 0x360   : > { %5994 = vmatpush1.bf16.msra.mxu1 %v19227_v0  ;;  %6025 = vmatprep.mubr.bf16.mxu1 %v25894_v38  ;;  %v19211_v38 = vcombine.low %v4341_v4, %v4345_v7  ;;  %v22381_v0 = vld [vmem:[%s30488_s1 + $0x584] ss:$16 sps:$4 sm:$0xff]   ;;  %v22379_v4 = vld [vmem:[%s30488_s1 + $0x580] ss:$16 sps:$4 sm:$0xff]   ;;  %v4405_v7 = vld [vmem:[%s24007_s11 + $0x758] sm:$0xff] }
 0x361   : > { %5995 = vmatprep.subr.bf16.mxu1 %v19220_v43  ;;  %9374 = vmatpush1.bf16.msra.mxu0 %v22355_v35  ;;  %v19291_v43 = vcombine.low %v4421_v56, %v4425_v30  ;;  %v19284_v35 = vcombine.high %v4413_v34, %v4417_v37  ;;  %v4365_v56 = vld [vmem:[%s24007_s11 + $0x618] sm:$0xff] }
 0x362   : > { %9375 = vmatprep.subr.bf16.mxu0 %v22360_v60  ;;  %v4409_v60 = vld [vmem:[%s24007_s11 + $0x778] sm:$0xff] }
 0x363   : > { %v4369_v30 = vld [vmem:[%s24007_s11 + $0x638] sm:$0xff] }
 0x364   : > { %5996 = vmatpush1.bf16.msra.mxu1 %v19219_v40  ;;  %v22384_v40 = vld [vmem:[%s30488_s1 + $0x564] ss:$16 sps:$4 sm:$0xff]  }
 0x365   : > { %5997 = vmatprep.subr.bf16.mxu1 %v19212_v5  ;;  %9376 = vmatpush1.bf16.msra.mxu0 %v22358_v11  ;;  %v19283_v5 = vcombine.low %v4413_v34, %v4417_v37  ;;  %v19276_v11 = vcombine.high %v4405_v7, %v4409_v60  ;;  %v19236_v34 = vcombine.high %v4365_v56, %v4369_v30  ;;  %v22409_v37 = vld [vmem:[%s30488_s1 + $0x8c0] ss:$16 sps:$4 sm:$0xff]  }
 0x366   : > { %9377 = vmatprep.subr.bf16.mxu0 %v22363_v12  ;;  %v4401_v12 = vld [vmem:[%s24007_s11 + $0x738] sm:$0xff] }
 0x368   : > { %5998 = vmatpush1.bf16.msra.mxu1 %v19211_v38  ;;  %v22387_v38 = vld [vmem:[%s30488_s1 + $0x544] ss:$16 sps:$4 sm:$0xff]  }
 0x369   : > { %5999 = vmatprep.subr.bf16.mxu1 %v19204_v13  ;;  %9378 = vmatpush1.bf16.msra.mxu0 %v22361_v15  ;;  %v19275_v13 = vcombine.low %v4405_v7, %v4409_v60  ;;  %v19268_v15 = vcombine.high %v4397_v53, %v4401_v12  ;;  %v22390_v60 = vld [vmem:[%s30488_s1 + $0x2e4] ss:$16 sps:$4 sm:$0xff]  }
 0x36a   : > { %9379 = vmatprep.subr.bf16.mxu0 %v22366_v28  ;;  %v4393_v28 = vld [vmem:[%s24007_s11 + $0x6f8] sm:$0xff] }
 0x36b   : > { %v19260_v25 = vcombine.high %v4389_v20, %v4393_v28  ;;  %v19259_v58 = vcombine.low %v4389_v20, %v4393_v28  ;;  %v22402_v20 = vld [vmem:[%s30488_s1 + $0x2a4] ss:$16 sps:$4 sm:$0xff]   ;;  %v22427_v28 = vld [vmem:[%s30488_s1 + $0x860] ss:$16 sps:$4 sm:$0xff]  }
 0x36c   : > { %6000 = vmatpush1.bf16.msra.mxu1 %v19203_v31  ;;  %v22393_v31 = vld [vmem:[%s30488_s1 + $0x524] ss:$16 sps:$4 sm:$0xff]  }
 0x36d   : > { %6001 = vmatprep.subr.bf16.mxu1 %v19196_v21  ;;  %9380 = vmatpush1.bf16.msra.mxu0 %v22364_v6  ;;  %v26238_v21 = vld [vmem:[%s24002_s8 + $0x30] sm:$0xff]  ;;  %v19267_v6 = vcombine.low %v4397_v53, %v4401_v12 }
 0x36e   : > { %9381 = vmatprep.subr.bf16.mxu0 %v22369_v23  ;;  %v4381_v23 = vld [vmem:[%s24007_s11 + $0x698] sm:$0xff]  ;;  %v22396_v53 = vld [vmem:[%s30488_s1 + $0x2c4] ss:$16 sps:$4 sm:$0xff]   ;;  %v22421_v12 = vld [vmem:[%s30488_s1 + $0x880] ss:$16 sps:$4 sm:$0xff]  }
 0x370   : > { %6002 = vmatpush1.bf16.msra.mxu1 %v19195_v61  ;;  %v4385_v61 = vld [vmem:[%s24007_s11 + $0x6b8] sm:$0xff] }
 0x371   : > { %6003 = vmatprep.subr.bf16.mxu1 %v19188_v2  ;;  %9382 = vmatpush1.bf16.msra.mxu0 %v22367_v27  ;;  %v22399_v2 = vld [vmem:[%s30488_s1 + $0x504] ss:$16 sps:$4 sm:$0xff]   ;;  %v26250_v27 = vrot.slane %v26238_v21, %v24145_v50  ;;  %v19252_v18 = vcombine.high %v4381_v23, %v4385_v61  ;;  %v19251_v46 = vcombine.low %v4381_v23, %v4385_v61  ;;  %v22400_v23 = vld [vmem:[%s30488_s1 + $0x2a0] ss:$16 sps:$4 sm:$0xff]  }
 0x372   : > { %9383 = vmatprep.subr.bf16.mxu0 %v22372_v9  ;;  %v22397_v9 = vld [vmem:[%s30488_s1 + $0x500] ss:$16 sps:$4 sm:$0xff]  }
 0x373   : > { %v6140_v39 = vcombine.high %v26250_v27, %v26250_v27 }
 0x374   : > { %6004 = vmatpush1.bf16.msra.mxu1 %v19187_v24  ;;  %v4373_v24 = vld [vmem:[%s24007_s11 + $0x658] sm:$0xff] }
 0x375   : > { %6005 = vmatprep.subr.bf16.mxu1 %v19180_v10  ;;  %9384 = vmatpush2.bf16.msra.mxu0 %v22370_v36  ;;  %v4377_v10 = vld [vmem:[%s24007_s11 + $0x678] sm:$0xff]  ;;  %v22405_v36 = vld [vmem:[%s30488_s1 + $0x8e4] ss:$16 sps:$4 sm:$0xff]  }
 0x376   : > { %9385 = vmatprep.subr.bf16.mxu0 %v22375_v48  ;;  %v26264_v48 = vpack.c.bf16 %v26099_v22, %v26099_v22 }
 0x378   : > { %6006 = vmatpush1.bf16.msra.mxu1 %v19179_v51  ;;  %v6091_v51 = vcombine.high %v25949_v19, %v25949_v19  ;;  %v19243_v19 = vcombine.low %v4373_v24, %v4377_v10 }
 0x379   : > { %6007 = vmatprep.subr.bf16.mxu1 %v19172_v45  ;;  %9386 = vmatpush2.bf16.msra.mxu0 %v22373_v55  ;;  %v19244_v45 = vcombine.high %v4373_v24, %v4377_v10  ;;  %v22403_v55 = vld [vmem:[%s30488_s1 + $0x8e0] ss:$16 sps:$4 sm:$0xff]   ;;  %v22447_v24 = vld [vmem:[%s30488_s1 + $0x804] ss:$16 sps:$4 sm:$0xff]  }
 0x37a   : > { %9387 = vmatprep.subr.bf16.mxu0 %v22378_v1  ;;  %v22411_v1 = vld [vmem:[%s30488_s1 + $0x8c4] ss:$16 sps:$4 sm:$0xff]   ;;  %v22412_v10 = vld [vmem:[%s30488_s1 + $0x260] ss:$16 sps:$4 sm:$0xff]  }
 0x37c   : > { %6008 = vmatpush1.bf16.msra.mxu1 %v19171_v3  ;;  %v26276_v3 = vpack.c.bf16 %v6140_v39, %v6140_v39  ;;  %v22445_v39 = vld [vmem:[%s30488_s1 + $0x800] ss:$16 sps:$4 sm:$0xff]  }
 0x37d   : > { %6009 = vmatprep.subr.bf16.mxu1 %v19292_v33  ;;  %9388 = vmatpush2.bf16.msra.mxu0 %v22376_v63  ;;  %v26282_v33 = vrot.slane %v6091_v51, %v24145_v50  ;;  %v22418_v51 = vld [vmem:[%s30488_s1 + $0x240] ss:$16 sps:$4 sm:$0xff]  }
 0x37e   : > { %9389 = vmatprep.subr.bf16.mxu0 %v22381_v0  ;;  %v22417_v0 = vld [vmem:[%s30488_s1 + $0x8a4] ss:$16 sps:$4 sm:$0xff]  }
 0x380   : > { %6010 = vmatpush2.bf16.msra.mxu1 %v19291_v43 }
 0x381   : > { %6011 = vmatprep.subr.bf16.mxu1 %v19284_v35  ;;  %9390 = vmatpush2.bf16.msra.mxu0 %v22379_v4  ;;  %v19235_v35 = vcombine.low %v4365_v56, %v4369_v30  ;;  %v6107_v4 = vcombine.high %v26282_v33, %v26282_v33  ;;  %v22459_v56 = vld [vmem:[%s30488_s1 + $0x9c4] ss:$16 sps:$4 sm:$0xff]   ;;  %v22424_v30 = vld [vmem:[%s30488_s1 + $0x220] ss:$16 sps:$4 sm:$0xff]  }
 0x382   : > { %9391 = vmatprep.subr.bf16.mxu0 %v22384_v40  ;;  %v22415_v40 = vld [vmem:[%s30488_s1 + $0x8a0] ss:$16 sps:$4 sm:$0xff]  }
 0x384   : > { %6012 = vmatpush2.bf16.msra.mxu1 %v19283_v5  ;;  %v22423_v5 = vld [vmem:[%s30488_s1 + $0x884] ss:$16 sps:$4 sm:$0xff]  }
 0x385   : > { %6013 = vmatprep.subr.bf16.mxu1 %v19276_v11  ;;  %9392 = vmatpush2.bf16.msra.mxu0 %v22382_v49  ;;  %v22388_v11 = vld [vmem:[%s30488_s1 + $0x2e0] ss:$16 sps:$4 sm:$0xff]   ;;  %v26307_v49 = vpack.c.bf16 %v6107_v4, %v6107_v4 }
 0x386   : > { %9393 = vmatprep.subr.bf16.mxu0 %v22387_v38  ;;  %v22429_v38 = vld [vmem:[%s30488_s1 + $0x864] ss:$16 sps:$4 sm:$0xff]   ;;  %v22436_v4 = vld [vmem:[%s30488_s1 + $0x3e0] ss:$16 sps:$4 sm:$0xff]  }
 0x388   : > { %6014 = vmatpush2.bf16.msra.mxu1 %v19275_v13 }
 0x389   : > { %6015 = vmatprep.subr.bf16.mxu1 %v19268_v15  ;;  %9394 = vmatpush2.bf16.msra.mxu0 %v22385_v16  ;;  %v22394_v15 = vld [vmem:[%s30488_s1 + $0x2c0] ss:$16 sps:$4 sm:$0xff]  }
 0x38a   : > { %9395 = vmatprep.subr.bf16.mxu0 %v22393_v31 }
 0x38c   : > { %6016 = vmatpush2.bf16.msra.mxu1 %v19267_v6  ;;  %v22435_v6 = vld [vmem:[%s30488_s1 + $0x844] ss:$16 sps:$4 sm:$0xff]  }
 0x38d   : > { %6017 = vmatprep.subr.bf16.mxu1 %v19260_v25  ;;  %9396 = vmatpush2.bf16.msra.mxu0 %v22391_v8 }
 0x38e   : > { %9397 = vmatprep.subr.bf16.mxu0 %v22399_v2  ;;  %v22441_v2 = vld [vmem:[%s30488_s1 + $0x824] ss:$16 sps:$4 sm:$0xff]  }
 0x390   : > { %6018 = vmatpush2.bf16.msra.mxu1 %v19259_v58  ;;  %v22406_v58 = vld [vmem:[%s30488_s1 + $0x280] ss:$16 sps:$4 sm:$0xff]  }
 0x391   : > { %6019 = vmatprep.subr.bf16.mxu1 %v19252_v18  ;;  %9398 = vmatpush2.bf16.msra.mxu0 %v22397_v9  ;;  %v22414_v18 = vld [vmem:[%s30488_s1 + $0x264] ss:$16 sps:$4 sm:$0xff]   ;;  %v22439_v9 = vld [vmem:[%s30488_s1 + $0x820] ss:$16 sps:$4 sm:$0xff]  }
 0x392   : > { %9449 = vmatprep.subr.bf16.mxu0 %v22405_v36  ;;  %v22420_v36 = vld [vmem:[%s30488_s1 + $0x244] ss:$16 sps:$4 sm:$0xff]  }
 0x393   : > { %v26278_v22 = vpop.f32.mrf.mxu0 }
 0x394   : > { %6020 = vmatpush2.bf16.msra.mxu1 %v19251_v46  ;;  %9400 = vmatmul.mubr.bf16.vlgmr.msra.gmra.mxu0 %v26264_v48  ;;  %v22453_v46 = vld [vmem:[%s30488_s1 + $0x9e4] ss:$16 sps:$4 sm:$0xff]  }
 0x395   : > { %v26284_v63 = vpop.f32.mrf.mxu0  ;;  %6021 = vmatprep.subr.bf16.mxu1 %v19244_v45  ;;  %9450 = vmatpush1.bf16.msra.mxu0 %v22403_v55  ;;  %v22426_v45 = vld [vmem:[%s30488_s1 + $0x224] ss:$16 sps:$4 sm:$0xff]   ;;  %v22451_v55 = vld [vmem:[%s30488_s1 + $0x9e0] ss:$16 sps:$4 sm:$0xff]  }
 0x396   : > { %9451 = vmatprep.subr.bf16.mxu0 %v22411_v1  ;;  %9481 = vmatprep.mubr.bf16.mxu0 %v26276_v3  ;;  %v22432_v1 = vld [vmem:[%s30488_s1 + $0x204] ss:$16 sps:$4 sm:$0xff]  }
 0x397   : > { %v5908_v43 = vpop.f32.mrf.mxu0 }
 0x398   : > { %6022 = vmatpush2.bf16.msra.mxu1 %v19243_v19  ;;  %v22457_v19 = vld [vmem:[%s30488_s1 + $0x9c0] ss:$16 sps:$4 sm:$0xff]  }
 0x399   : > { %v5909_v7 = vpop.f32.mrf.mxu0  ;;  %6023 = vmatprep.subr.bf16.mxu1 %v19236_v34  ;;  %9452 = vmatpush1.bf16.msra.mxu0 %v22409_v37  ;;  %v22465_v34 = vld [vmem:[%s30488_s1 + $0x9a4] ss:$16 sps:$4 sm:$0xff]   ;;  %v22430_v37 = vld [vmem:[%s30488_s1 + $0x200] ss:$16 sps:$4 sm:$0xff]  }
 0x39a   : > { %9453 = vmatprep.subr.bf16.mxu0 %v22417_v0  ;;  %v22438_v0 = vld [vmem:[%s30488_s1 + $0x3e4] ss:$16 sps:$4 sm:$0xff]   ;;  %v22463_v43 = vld [vmem:[%s30488_s1 + $0x9a0] ss:$16 sps:$4 sm:$0xff]  }
 0x39b   : > { %v22444_v7 = vld [vmem:[%s30488_s1 + $0x3c4] ss:$16 sps:$4 sm:$0xff]  }
 0x39c   : > { %6024 = vmatpush2.bf16.msra.mxu1 %v19235_v35  ;;  %v22471_v35 = vld [vmem:[%s30488_s1 + $0x984] ss:$16 sps:$4 sm:$0xff]  }
 0x39d   : > { %9326 = vmatprep.subr.bf16.mxu1 %v22390_v60  ;;  %9454 = vmatpush1.bf16.msra.mxu0 %v22415_v40  ;;  %v22469_v60 = vld [vmem:[%s30488_s1 + $0x980] ss:$16 sps:$4 sm:$0xff]   ;;  %v22477_v40 = vld [vmem:[%s30488_s1 + $0x964] ss:$16 sps:$4 sm:$0xff]  }
 0x39e   : > { %9455 = vmatprep.subr.bf16.mxu0 %v22423_v5  ;;  %v22442_v5 = vld [vmem:[%s30488_s1 + $0x3c0] ss:$16 sps:$4 sm:$0xff]  }
 0x39f   : > { %6026 = vmatmul.mubr.bf16.vlgmr.msra.gmra.mxu1 %v25898_v41  ;;  %v5781_v13 = vpop.f32.mrf.mxu1 }
 0x3a0   : > { %9327 = vmatpush1.bf16.msra.mxu1 %v22388_v11  ;;  %9358 = vmatprep.mubr.bf16.mxu1 %v26307_v49  ;;  %v26330_v41 = vadd.f32 %v5781_v13, %v25974_v59  ;;  %v22408_v59 = vld [vmem:[%s30488_s1 + $0x284] ss:$16 sps:$4 sm:$0xff]  }
 0x3a1   : > { %v5783_v16 = vpop.f32.mrf.mxu1  ;;  %9328 = vmatprep.subr.bf16.mxu1 %v22396_v53  ;;  %9456 = vmatpush1.bf16.msra.mxu0 %v22421_v12  ;;  %v22450_v11 = vld [vmem:[%s30488_s1 + $0x3a4] ss:$16 sps:$4 sm:$0xff]   ;;  %v22475_v53 = vld [vmem:[%s30488_s1 + $0x960] ss:$16 sps:$4 sm:$0xff]  }
 0x3a2   : > { %v26333_v31 = vadd.f32 %v5783_v16, %v25982_v47  ;;  %9457 = vmatprep.subr.bf16.mxu0 %v22429_v38  ;;  %v22433_v47 = vld [vmem:[%s30488_s1 + $0x840] ss:$16 sps:$4 sm:$0xff]   ;;  %v22483_v12 = vld [vmem:[%s30488_s1 + $0x944] ss:$16 sps:$4 sm:$0xff]  }
 0x3a3   : > { %v5785_v25 = vpop.f32.mrf.mxu1  ;;  %v22448_v38 = vld [vmem:[%s30488_s1 + $0x3a0] ss:$16 sps:$4 sm:$0xff]   ;;  %v22456_v13 = vld [vmem:[%s30488_s1 + $0x384] ss:$16 sps:$4 sm:$0xff]  }
 0x3a4   : > { %v6042_v8 = vcombine.low %v26330_v41, %v26333_v31  ;;  %9329 = vmatpush1.bf16.msra.mxu1 %v22394_v15  ;;  %v22481_v15 = vld [vmem:[%s30488_s1 + $0x940] ss:$16 sps:$4 sm:$0xff]   ;;  %v22490_v16 = vld [vmem:[%s30488_s1 + $0x924] ss:$16 sps:$4 sm:$0xff]  }
 0x3a5   : > { %v5786_v61 = vpop.f32.mrf.mxu1  ;;  %9330 = vmatprep.subr.bf16.mxu1 %v22402_v20  ;;  %9458 = vmatpush1.bf16.msra.mxu0 %v22427_v28  ;;  %v26449_v20 = vld [vmem:[%s24002_s8 + $0x38] sm:$0xff]  ;;  %v22454_v28 = vld [vmem:[%s30488_s1 + $0x380] ss:$16 sps:$4 sm:$0xff]   ;;  %v22511_v41 = vld [vmem:[%s30488_s1 + $0x664] ss:$16 sps:$4 sm:$0xff]  }
 0x3a6   : > { %9459 = vmatprep.subr.bf16.mxu0 %v22435_v6  ;;  %v22462_v6 = vld [vmem:[%s30488_s1 + $0x364] ss:$16 sps:$4 sm:$0xff]   ;;  %v22488_v25 = vld [vmem:[%s30488_s1 + $0x920] ss:$16 sps:$4 sm:$0xff]   ;;  %v26465_v61 = vrot.slane %v26449_v20, %v24145_v50 }
 0x3a7   : > { %v22536_v31 = vld [vmem:[%s30488_s1 + $0xc20] ss:$16 sps:$4 sm:$0xff]  }
 0x3a8   : > { %9331 = vmatpush1.bf16.msra.mxu1 %v22400_v23  ;;  %v22496_v23 = vld [vmem:[%s30488_s1 + $0x904] ss:$16 sps:$4 sm:$0xff]  }
 0x3a9   : > { %9332 = vmatprep.subr.bf16.mxu1 %v22408_v59  ;;  %9460 = vmatpush1.bf16.msra.mxu0 %v22433_v47  ;;  %v22460_v59 = vld [vmem:[%s30488_s1 + $0x360] ss:$16 sps:$4 sm:$0xff]   ;;  %v22468_v47 = vld [vmem:[%s30488_s1 + $0x344] ss:$16 sps:$4 sm:$0xff]  }
 0x3aa   : > { %9461 = vmatprep.subr.bf16.mxu0 %v22441_v2  ;;  %v22494_v2 = vld [vmem:[%s30488_s1 + $0x900] ss:$16 sps:$4 sm:$0xff]  }
 0x3ac   : > { %9333 = vmatpush1.bf16.msra.mxu1 %v22406_v58  ;;  %v22502_v58 = vld [vmem:[%s30488_s1 + $0xce4] ss:$16 sps:$4 sm:$0xff]  }
 0x3ad   : > { %9334 = vmatprep.subr.bf16.mxu1 %v22414_v18  ;;  %9462 = vmatpush1.bf16.msra.mxu0 %v22439_v9  ;;  %v6157_v18 = vcombine.high %v26465_v61, %v26465_v61  ;;  %v22466_v9 = vld [vmem:[%s30488_s1 + $0x340] ss:$16 sps:$4 sm:$0xff]  }
 0x3ae   : > { %9463 = vmatprep.subr.bf16.mxu0 %v22447_v24  ;;  %v26486_v24 = vpack.c.bf16 %v26250_v27, %v26250_v27 }
 0x3af   : > { %v26499_v27 = vpack.c.bf16 %v6157_v18, %v6157_v18  ;;  %v22538_v18 = vld [vmem:[%s30488_s1 + $0xc24] ss:$16 sps:$4 sm:$0xff]  }
 0x3b0   : > { %9335 = vmatpush1.bf16.msra.mxu1 %v22412_v10  ;;  %v6108_v10 = vcombine.high %v26087_v14, %v26087_v14  ;;  %v22472_v14 = vld [vmem:[%s30488_s1 + $0x320] ss:$16 sps:$4 sm:$0xff]  }
 0x3b1   : > { %9336 = vmatprep.subr.bf16.mxu1 %v22420_v36  ;;  %9464 = vmatpush1.bf16.msra.mxu0 %v22445_v39  ;;  %v22474_v36 = vld [vmem:[%s30488_s1 + $0x324] ss:$16 sps:$4 sm:$0xff]   ;;  %v22500_v39 = vld [vmem:[%s30488_s1 + $0xce0] ss:$16 sps:$4 sm:$0xff]  }
 0x3b2   : > { %9465 = vmatprep.subr.bf16.mxu0 %v22453_v46  ;;  %v22508_v46 = vld [vmem:[%s30488_s1 + $0xcc4] ss:$16 sps:$4 sm:$0xff]  }
 0x3b4   : > { %9337 = vmatpush1.bf16.msra.mxu1 %v22418_v51 }
 0x3b5   : > { %9338 = vmatprep.subr.bf16.mxu1 %v22426_v45  ;;  %9466 = vmatpush2.bf16.msra.mxu0 %v22451_v55  ;;  %v26508_v45 = vrot.slane %v6108_v10, %v24145_v50  ;;  %v22480_v55 = vld [vmem:[%s30488_s1 + $0x304] ss:$16 sps:$4 sm:$0xff]  }
 0x3b6   : > { %9467 = vmatprep.subr.bf16.mxu0 %v22459_v56  ;;  %v22506_v56 = vld [vmem:[%s30488_s1 + $0xcc0] ss:$16 sps:$4 sm:$0xff]  }
 0x3b8   : > { %9339 = vmatpush1.bf16.msra.mxu1 %v22424_v30 }
 0x3b9   : > { %9340 = vmatprep.subr.bf16.mxu1 %v22432_v1  ;;  %9468 = vmatpush2.bf16.msra.mxu0 %v22457_v19  ;;  %v22514_v1 = vld [vmem:[%s30488_s1 + $0xca4] ss:$16 sps:$4 sm:$0xff]  }
 0x3ba   : > { %9469 = vmatprep.subr.bf16.mxu0 %v22465_v34  ;;  %v22478_v34 = vld [vmem:[%s30488_s1 + $0x300] ss:$16 sps:$4 sm:$0xff]  }
 0x3bc   : > { %9341 = vmatpush1.bf16.msra.mxu1 %v22430_v37  ;;  %v6124_v37 = vcombine.high %v26508_v45, %v26508_v45 }
 0x3bd   : > { %9342 = vmatprep.subr.bf16.mxu1 %v22438_v0  ;;  %9470 = vmatpush2.bf16.msra.mxu0 %v22463_v43  ;;  %v22487_v0 = vld [vmem:[%s30488_s1 + $0x6e4] ss:$16 sps:$4 sm:$0xff]   ;;  %v22512_v43 = vld [vmem:[%s30488_s1 + $0xca0] ss:$16 sps:$4 sm:$0xff]  }
 0x3be   : > { %9471 = vmatprep.subr.bf16.mxu0 %v22471_v35 }
 0x3c0   : > { %9343 = vmatpush2.bf16.msra.mxu1 %v22436_v4  ;;  %v22520_v4 = vld [vmem:[%s30488_s1 + $0xc84] ss:$16 sps:$4 sm:$0xff]  }
 0x3c1   : > { %9344 = vmatprep.subr.bf16.mxu1 %v22444_v7  ;;  %9472 = vmatpush2.bf16.msra.mxu0 %v22469_v60  ;;  %v26538_v7 = vpack.c.bf16 %v26282_v33, %v26282_v33  ;;  %v22485_v60 = vld [vmem:[%s30488_s1 + $0x6e0] ss:$16 sps:$4 sm:$0xff]   ;;  %v22526_v33 = vld [vmem:[%s30488_s1 + $0xc64] ss:$16 sps:$4 sm:$0xff]  }
 0x3c2   : > { %9473 = vmatprep.subr.bf16.mxu0 %v22477_v40  ;;  %v26543_v40 = vpack.c.bf16 %v6124_v37, %v6124_v37  ;;  %v22556_v37 = vld [vmem:[%s30488_s1 + $0xdc4] ss:$16 sps:$4 sm:$0xff]  }
 0x3c4   : > { %9345 = vmatpush2.bf16.msra.mxu1 %v22442_v5  ;;  %v22493_v5 = vld [vmem:[%s30488_s1 + $0x6c4] ss:$16 sps:$4 sm:$0xff]  }
 0x3c5   : > { %9346 = vmatprep.subr.bf16.mxu1 %v22450_v11  ;;  %9474 = vmatpush2.bf16.msra.mxu0 %v22475_v53  ;;  %v22518_v11 = vld [vmem:[%s30488_s1 + $0xc80] ss:$16 sps:$4 sm:$0xff]  }
 0x3c6   : > { %9475 = vmatprep.subr.bf16.mxu0 %v22483_v12  ;;  %v22491_v12 = vld [vmem:[%s30488_s1 + $0x6c0] ss:$16 sps:$4 sm:$0xff]  }
 0x3c8   : > { %9347 = vmatpush2.bf16.msra.mxu1 %v22448_v38 }
 0x3c9   : > { %9348 = vmatprep.subr.bf16.mxu1 %v22456_v13  ;;  %9476 = vmatpush2.bf16.msra.mxu0 %v22481_v15  ;;  %v22499_v13 = vld [vmem:[%s30488_s1 + $0x6a4] ss:$16 sps:$4 sm:$0xff]   ;;  %v22524_v15 = vld [vmem:[%s30488_s1 + $0xc60] ss:$16 sps:$4 sm:$0xff]  }
 0x3ca   : > { %9477 = vmatprep.subr.bf16.mxu0 %v22490_v16 }
 0x3cc   : > { %9349 = vmatpush2.bf16.msra.mxu1 %v22454_v28 }
 0x3cd   : > { %9350 = vmatprep.subr.bf16.mxu1 %v22462_v6  ;;  %9478 = vmatpush2.bf16.msra.mxu0 %v22488_v25  ;;  %v22532_v6 = vld [vmem:[%s30488_s1 + $0xc44] ss:$16 sps:$4 sm:$0xff]  }
 0x3ce   : > { %9479 = vmatprep.subr.bf16.mxu0 %v22496_v23 }
 0x3d0   : > { %9351 = vmatpush2.bf16.msra.mxu1 %v22460_v59  ;;  %v22497_v59 = vld [vmem:[%s30488_s1 + $0x6a0] ss:$16 sps:$4 sm:$0xff]  }
 0x3d1   : > { %9352 = vmatprep.subr.bf16.mxu1 %v22468_v47  ;;  %9480 = vmatpush2.bf16.msra.mxu0 %v22494_v2  ;;  %v6050_v2 = vrot.slane %v6042_v8, %v24145_v50 }
 0x3d2   : > { %9531 = vmatprep.subr.bf16.mxu0 %v22502_v58 }
 0x3d4   : > { %v26501_v51 = vpop.f32.mrf.mxu0  ;;  %9353 = vmatpush2.bf16.msra.mxu1 %v22466_v9  ;;  %9482 = vmatmul.mubr.bf16.vlgmr.msra.gmra.mxu0 %v26486_v24  ;;  %v4168_v9 = vld [vmem:[#allocation2] sm:$0xff] }
 0x3d5   : > { %9354 = vmatprep.subr.bf16.mxu1 %v22474_v36  ;;  %9532 = vmatpush1.bf16.msra.mxu0 %v22500_v39  ;;  %v22503_v36 = vld [vmem:[%s30488_s1 + $0x680] ss:$16 sps:$4 sm:$0xff]   ;;  %v22544_v39 = vld [vmem:[%s30488_s1 + $0xc04] ss:$16 sps:$4 sm:$0xff]  }
 0x3d6   : > { %v26516_v30 = vpop.f32.mrf.mxu0  ;;  %9533 = vmatprep.subr.bf16.mxu0 %v22508_v46  ;;  %9563 = vmatprep.mubr.bf16.mxu0 %v26499_v27  ;;  %v22509_v46 = vld [vmem:[%s30488_s1 + $0x660] ss:$16 sps:$4 sm:$0xff]  }
 0x3d8   : > { %v5990_v19 = vpop.f32.mrf.mxu0  ;;  %9355 = vmatpush2.bf16.msra.mxu1 %v22472_v14  ;;  %v22517_v14 = vld [vmem:[%s30488_s1 + $0x644] ss:$16 sps:$4 sm:$0xff]  }
 0x3d9   : > { %9356 = vmatprep.subr.bf16.mxu1 %v22480_v55  ;;  %9534 = vmatpush1.bf16.msra.mxu0 %v22506_v56  ;;  %v22542_v55 = vld [vmem:[%s30488_s1 + $0xc00] ss:$16 sps:$4 sm:$0xff]   ;;  %v22550_v56 = vld [vmem:[%s30488_s1 + $0xde4] ss:$16 sps:$4 sm:$0xff]  }
 0x3da   : > { %v5991_v35 = vpop.f32.mrf.mxu0  ;;  %9535 = vmatprep.subr.bf16.mxu0 %v22514_v1  ;;  %v22515_v1 = vld [vmem:[%s30488_s1 + $0x640] ss:$16 sps:$4 sm:$0xff]   ;;  %v22523_v19 = vld [vmem:[%s30488_s1 + $0x624] ss:$16 sps:$4 sm:$0xff]  }
 0x3db   : > { %v22554_v35 = vld [vmem:[%s30488_s1 + $0xdc0] ss:$16 sps:$4 sm:$0xff]  }
 0x3dc   : > { %9357 = vmatpush2.bf16.msra.mxu1 %v22478_v34  ;;  %v22548_v34 = vld [vmem:[%s30488_s1 + $0xde0] ss:$16 sps:$4 sm:$0xff]  }
 0x3dd   : > { %9408 = vmatprep.subr.bf16.mxu1 %v22487_v0  ;;  %9536 = vmatpush1.bf16.msra.mxu0 %v22512_v43  ;;  %v22521_v0 = vld [vmem:[%s30488_s1 + $0x620] ss:$16 sps:$4 sm:$0xff]   ;;  %v22529_v43 = vld [vmem:[%s30488_s1 + $0x604] ss:$16 sps:$4 sm:$0xff]  }
 0x3de   : > { %9537 = vmatprep.subr.bf16.mxu0 %v22520_v4  ;;  %v22562_v4 = vld [vmem:[%s30488_s1 + $0xda4] ss:$16 sps:$4 sm:$0xff]  }
 0x3df   : > { %v5863_v53 = vpop.f32.mrf.mxu1  ;;  %9359 = vmatmul.mubr.bf16.vlgmr.msra.gmra.mxu1 %v26538_v7 }
 0x3e0   : > { %9409 = vmatpush1.bf16.msra.mxu1 %v22485_v60  ;;  %9440 = vmatprep.mubr.bf16.mxu1 %v26543_v40  ;;  %v5864_v16 = vadd.f32 %v5863_v53, %v26125_v57  ;;  %v22505_v57 = vld [vmem:[%s30488_s1 + $0x684] ss:$16 sps:$4 sm:$0xff]   ;;  %v22527_v60 = vld [vmem:[%s30488_s1 + $0x600] ss:$16 sps:$4 sm:$0xff]  }
 0x3e1   : > { %v5865_v38 = vpop.f32.mrf.mxu1  ;;  %9410 = vmatprep.subr.bf16.mxu1 %v22493_v5  ;;  %9538 = vmatpush1.bf16.msra.mxu0 %v22518_v11  ;;  %v22535_v5 = vld [vmem:[%s30488_s1 + $0x7e4] ss:$16 sps:$4 sm:$0xff]   ;;  %v22560_v11 = vld [vmem:[%s30488_s1 + $0xda0] ss:$16 sps:$4 sm:$0xff]  }
 0x3e2   : > { %v5866_v28 = vadd.f32 %v5865_v38, %v26128_v42  ;;  %9539 = vmatprep.subr.bf16.mxu0 %v22526_v33  ;;  %v22530_v42 = vld [vmem:[%s30488_s1 + $0xc40] ss:$16 sps:$4 sm:$0xff]   ;;  %v22568_v33 = vld [vmem:[%s30488_s1 + $0xd84] ss:$16 sps:$4 sm:$0xff]  }
 0x3e3   : > { %v5867_v25 = vpop.f32.mrf.mxu1  ;;  %v22533_v53 = vld [vmem:[%s30488_s1 + $0x7e0] ss:$16 sps:$4 sm:$0xff]  }
 0x3e4   : > { %v6043_v23 = vcombine.low %v5864_v16, %v5866_v28  ;;  %9411 = vmatpush1.bf16.msra.mxu1 %v22491_v12  ;;  %v22541_v12 = vld [vmem:[%s30488_s1 + $0x7c4] ss:$16 sps:$4 sm:$0xff]   ;;  %v22566_v38 = vld [vmem:[%s30488_s1 + $0xd80] ss:$16 sps:$4 sm:$0xff]  }
 0x3e5   : > { %v5868_v47 = vpop.f32.mrf.mxu1  ;;  %9412 = vmatprep.subr.bf16.mxu1 %v22499_v13  ;;  %9540 = vmatpush1.bf16.msra.mxu0 %v22524_v15  ;;  %v22574_v13 = vld [vmem:[%s30488_s1 + $0xd64] ss:$16 sps:$4 sm:$0xff]   ;;  %v22539_v15 = vld [vmem:[%s30488_s1 + $0x7c0] ss:$16 sps:$4 sm:$0xff]  }
 0x3e6   : > { %v6057_v58 = vrot.slane %v6043_v23, %v24145_v50  ;;  %9541 = vmatprep.subr.bf16.mxu0 %v22532_v6  ;;  %v22547_v16 = vld [vmem:[%s30488_s1 + $0x7a4] ss:$16 sps:$4 sm:$0xff]   ;;  %v22572_v28 = vld [vmem:[%s30488_s1 + $0xd60] ss:$16 sps:$4 sm:$0xff]  }
 0x3e7   : > { %v22580_v6 = vld [vmem:[%s30488_s1 + $0xd44] ss:$16 sps:$4 sm:$0xff]   ;;  %v22545_v25 = vld [vmem:[%s30488_s1 + $0x7a0] ss:$16 sps:$4 sm:$0xff]  }
 0x3e8   : > { %v6058_v10 = vcombine.low %v6050_v2, %v6057_v58  ;;  %9413 = vmatpush1.bf16.msra.mxu1 %v22497_v59  ;;  %v22553_v23 = vld [vmem:[%s30488_s1 + $0x784] ss:$16 sps:$4 sm:$0xff]   ;;  %v22578_v59 = vld [vmem:[%s30488_s1 + $0xd40] ss:$16 sps:$4 sm:$0xff]  }
 0x3e9   : > { %9414 = vmatprep.subr.bf16.mxu1 %v22505_v57  ;;  %9542 = vmatpush1.bf16.msra.mxu0 %v22530_v42  ;;  %v22587_v47 = vld [vmem:[%s30488_s1 + $0xd24] ss:$16 sps:$4 sm:$0xff]   ;;  %v22551_v57 = vld [vmem:[%s30488_s1 + $0x780] ss:$16 sps:$4 sm:$0xff]  }
 0x3ea   : > { %v6078_v8 = vadd.f32 %v6058_v10, %v4168_v9  ;;  %9543 = vmatprep.subr.bf16.mxu0 %v22538_v18  ;;  %v22559_v42 = vld [vmem:[%s30488_s1 + $0x764] ss:$16 sps:$4 sm:$0xff]   ;;  %v22585_v2 = vld [vmem:[%s30488_s1 + $0xd20] ss:$16 sps:$4 sm:$0xff]  }
 0x3eb   : > { %v22593_v58 = vld [vmem:[%s30488_s1 + $0xd04] ss:$16 sps:$4 sm:$0xff]   ;;  %v22557_v18 = vld [vmem:[%s30488_s1 + $0x760] ss:$16 sps:$4 sm:$0xff]  }
 0x3ec   : > { %6080 = vst [vmem:[#allocation2] sm:$0xff] %v6078_v8  ;;  %9415 = vmatpush1.bf16.msra.mxu1 %v22503_v36  ;;  %v22565_v9 = vld [vmem:[%s30488_s1 + $0x744] ss:$16 sps:$4 sm:$0xff]   ;;  %v22591_v10 = vld [vmem:[%s30488_s1 + $0xd00] ss:$16 sps:$4 sm:$0xff]   ;;  %v6125_v8 = vcombine.high %v26238_v21, %v26238_v21 }
 0x3ed   : > { %9416 = vmatprep.subr.bf16.mxu1 %v22511_v41  ;;  %9544 = vmatpush1.bf16.msra.mxu0 %v22536_v31  ;;  %v22599_v36 = vld [vmem:[%s30488_s1 + $0xec] ss:$16 sps:$4 sm:$0xff]   ;;  %v22563_v41 = vld [vmem:[%s30488_s1 + $0x740] ss:$16 sps:$4 sm:$0xff]   ;;  %v26712_v31 = vpack.c.bf16 %v26465_v61, %v26465_v61 }
 0x3ee   : > { %9545 = vmatprep.subr.bf16.mxu0 %v22544_v39  ;;  %v22571_v39 = vld [vmem:[%s30488_s1 + $0x724] ss:$16 sps:$4 sm:$0xff]   ;;  %v22569_v21 = vld [vmem:[%s30488_s1 + $0x720] ss:$16 sps:$4 sm:$0xff]   ;;  %v26730_v61 = vrot.slane %v6125_v8, %v24145_v50  ;;  %v22639_v8 = vld [vmem:[%s30488_s1 + $0x8] ss:$16 sps:$4 sm:$0xff]  }
 0x3f0   : > { %9417 = vmatpush1.bf16.msra.mxu1 %v22509_v46  ;;  %v22597_v46 = vld [vmem:[%s30488_s1 + $0xe8] ss:$16 sps:$4 sm:$0xff]  }
 0x3f1   : > { %9418 = vmatprep.subr.bf16.mxu1 %v22517_v14  ;;  %9546 = vmatpush1.bf16.msra.mxu0 %v22542_v55  ;;  %v22605_v14 = vld [vmem:[%s30488_s1 + $0xcc] ss:$16 sps:$4 sm:$0xff]   ;;  %v22577_v55 = vld [vmem:[%s30488_s1 + $0x704] ss:$16 sps:$4 sm:$0xff]  }
 0x3f2   : > { %9547 = vmatprep.subr.bf16.mxu0 %v22550_v56  ;;  %v22603_v56 = vld [vmem:[%s30488_s1 + $0xc8] ss:$16 sps:$4 sm:$0xff]  }
 0x3f4   : > { %9419 = vmatpush1.bf16.msra.mxu1 %v22515_v1 }
 0x3f5   : > { %9420 = vmatprep.subr.bf16.mxu1 %v22523_v19  ;;  %9548 = vmatpush2.bf16.msra.mxu0 %v22548_v34  ;;  %v22611_v19 = vld [vmem:[%s30488_s1 + $0xac] ss:$16 sps:$4 sm:$0xff]   ;;  %v22575_v34 = vld [vmem:[%s30488_s1 + $0x700] ss:$16 sps:$4 sm:$0xff]  }
 0x3f6   : > { %9549 = vmatprep.subr.bf16.mxu0 %v22556_v37  ;;  %v6141_v37 = vcombine.high %v26730_v61, %v26730_v61 }
 0x3f8   : > { %9421 = vmatpush1.bf16.msra.mxu1 %v22521_v0 }
 0x3f9   : > { %9422 = vmatprep.subr.bf16.mxu1 %v22529_v43  ;;  %9550 = vmatpush2.bf16.msra.mxu0 %v22554_v35  ;;  %v22584_v43 = vld [vmem:[%s30488_s1 + $0xae4] ss:$16 sps:$4 sm:$0xff]   ;;  %v22617_v35 = vld [vmem:[%s30488_s1 + $0x8c] ss:$16 sps:$4 sm:$0xff]  }
 0x3fa   : > { %9551 = vmatprep.subr.bf16.mxu0 %v22562_v4 }
 0x3fc   : > { %9423 = vmatpush1.bf16.msra.mxu1 %v22527_v60  ;;  %v26762_v60 = vpack.c.bf16 %v26508_v45, %v26508_v45  ;;  %v22623_v45 = vld [vmem:[%s30488_s1 + $0x6c] ss:$16 sps:$4 sm:$0xff]  }
 0x3fd   : > { %9424 = vmatprep.subr.bf16.mxu1 %v22535_v5  ;;  %9552 = vmatpush2.bf16.msra.mxu0 %v22560_v11  ;;  %v22582_v5 = vld [vmem:[%s30488_s1 + $0xae0] ss:$16 sps:$4 sm:$0xff]   ;;  %v26767_v11 = vpack.c.bf16 %v6141_v37, %v6141_v37  ;;  %v22659_v37 = vld [vmem:[%s30488_s1 + $0x1ac] ss:$16 sps:$4 sm:$0xff]  }
 0x3fe   : > { %9553 = vmatprep.subr.bf16.mxu0 %v22568_v33 }
 0x400   : > { %9425 = vmatpush2.bf16.msra.mxu1 %v22533_v53  ;;  %v22590_v53 = vld [vmem:[%s30488_s1 + $0xac4] ss:$16 sps:$4 sm:$0xff]  }
 0x401   : > { %9426 = vmatprep.subr.bf16.mxu1 %v22541_v12  ;;  %9554 = vmatpush2.bf16.msra.mxu0 %v22566_v38  ;;  %v22615_v12 = vld [vmem:[%s30488_s1 + $0x88] ss:$16 sps:$4 sm:$0xff]  }
 0x402   : > { %9555 = vmatprep.subr.bf16.mxu0 %v22574_v13  ;;  %v22588_v13 = vld [vmem:[%s30488_s1 + $0xac0] ss:$16 sps:$4 sm:$0xff]  }
 0x404   : > { %9427 = vmatpush2.bf16.msra.mxu1 %v22539_v15 }
 0x405   : > { %9428 = vmatprep.subr.bf16.mxu1 %v22547_v16  ;;  %9556 = vmatpush2.bf16.msra.mxu0 %v22572_v28  ;;  %v22596_v16 = vld [vmem:[%s30488_s1 + $0xaa4] ss:$16 sps:$4 sm:$0xff]   ;;  %v22621_v28 = vld [vmem:[%s30488_s1 + $0x68] ss:$16 sps:$4 sm:$0xff]  }
 0x406   : > { %9557 = vmatprep.subr.bf16.mxu0 %v22580_v6 }
 0x408   : > { %9429 = vmatpush2.bf16.msra.mxu1 %v22545_v25 }
 0x409   : > { %9430 = vmatprep.subr.bf16.mxu1 %v22553_v23  ;;  %9558 = vmatpush2.bf16.msra.mxu0 %v22578_v59  ;;  %v22629_v23 = vld [vmem:[%s30488_s1 + $0x4c] ss:$16 sps:$4 sm:$0xff]  }
 0x40a   : > { %9559 = vmatprep.subr.bf16.mxu0 %v22587_v47 }
 0x40c   : > { %9431 = vmatpush2.bf16.msra.mxu1 %v22551_v57  ;;  %v22594_v57 = vld [vmem:[%s30488_s1 + $0xaa0] ss:$16 sps:$4 sm:$0xff]  }
 0x40d   : > { %9432 = vmatprep.subr.bf16.mxu1 %v22559_v42  ;;  %9560 = vmatpush2.bf16.msra.mxu0 %v22585_v2  ;;  %v22635_v2 = vld [vmem:[%s30488_s1 + $0x2c] ss:$16 sps:$4 sm:$0xff]  }
 0x40e   : > { %9561 = vmatprep.subr.bf16.mxu0 %v22593_v58  ;;  %v22600_v58 = vld [vmem:[%s30488_s1 + $0xa80] ss:$16 sps:$4 sm:$0xff]  }
 0x410   : > { %9433 = vmatpush2.bf16.msra.mxu1 %v22557_v18  ;;  %v22608_v18 = vld [vmem:[%s30488_s1 + $0xa64] ss:$16 sps:$4 sm:$0xff]  }
 0x411   : > { %9434 = vmatprep.subr.bf16.mxu1 %v22565_v9  ;;  %9562 = vmatpush2.bf16.msra.mxu0 %v22591_v10  ;;  %v22633_v9 = vld [vmem:[%s30488_s1 + $0x28] ss:$16 sps:$4 sm:$0xff]   ;;  %v22641_v10 = vld [vmem:[%s30488_s1 + $0xc] ss:$16 sps:$4 sm:$0xff]  }
 0x412   : > { %9613 = vmatprep.subr.bf16.mxu0 %v22599_v36  ;;  %v22606_v36 = vld [vmem:[%s30488_s1 + $0xa60] ss:$16 sps:$4 sm:$0xff]  }
 0x414   : > { %9435 = vmatpush2.bf16.msra.mxu1 %v22563_v41  ;;  %9564 = vmatmul.mubr.bf16.vlgmr.msra.gmra.mxu0 %v26712_v31  ;;  %v26738_v1 = vpop.f32.mrf.mxu0  ;;  %v22614_v41 = vld [vmem:[%s30488_s1 + $0xa44] ss:$16 sps:$4 sm:$0xff]  }
 0x415   : > { %9436 = vmatprep.subr.bf16.mxu1 %v22571_v39  ;;  %9614 = vmatpush1.bf16.msra.mxu0 %v22597_v46  ;;  %v22647_v39 = vld [vmem:[%s30488_s1 + $0x1ec] ss:$16 sps:$4 sm:$0xff]   ;;  %v22612_v46 = vld [vmem:[%s30488_s1 + $0xa40] ss:$16 sps:$4 sm:$0xff]  }
 0x416   : > { %9615 = vmatprep.subr.bf16.mxu0 %v22605_v14  ;;  %9645 = vmatprep.mubr.bf16.mxu0 %v25972_v62  ;;  %v26749_v0 = vpop.f32.mrf.mxu0  ;;  %v22609_v62 = vld [vmem:[%s30488_s1 + $0xa8] ss:$16 sps:$4 sm:$0xff]   ;;  %v22620_v14 = vld [vmem:[%s30488_s1 + $0xa24] ss:$16 sps:$4 sm:$0xff]  }
 0x418   : > { %9437 = vmatpush2.bf16.msra.mxu1 %v22569_v21  ;;  %v9323_v4 = vpop.f32.mrf.mxu0  ;;  %v22645_v21 = vld [vmem:[%s30488_s1 + $0x1e8] ss:$16 sps:$4 sm:$0xff]  }
 0x419   : > { %9438 = vmatprep.subr.bf16.mxu1 %v22577_v55  ;;  %9616 = vmatpush1.bf16.msra.mxu0 %v22603_v56  ;;  %v22653_v55 = vld [vmem:[%s30488_s1 + $0x1cc] ss:$16 sps:$4 sm:$0xff]   ;;  %v22618_v56 = vld [vmem:[%s30488_s1 + $0xa20] ss:$16 sps:$4 sm:$0xff]  }
 0x41a   : > { %9617 = vmatprep.subr.bf16.mxu0 %v22611_v19  ;;  %v9324_v33 = vpop.f32.mrf.mxu0  ;;  %v22626_v19 = vld [vmem:[%s30488_s1 + $0xa04] ss:$16 sps:$4 sm:$0xff]   ;;  %v22665_v4 = vld [vmem:[%s30488_s1 + $0x18c] ss:$16 sps:$4 sm:$0xff]  }
 0x41b   : > { %v22638_v33 = vld [vmem:[%s30488_s1 + $0xbc4] ss:$16 sps:$4 sm:$0xff]  }
 0x41c   : > { %9439 = vmatpush2.bf16.msra.mxu1 %v22575_v34  ;;  %v22651_v34 = vld [vmem:[%s30488_s1 + $0x1c8] ss:$16 sps:$4 sm:$0xff]  }
 0x41d   : > { %9490 = vmatprep.subr.bf16.mxu1 %v22584_v43  ;;  %9618 = vmatpush1.bf16.msra.mxu0 %v22609_v62  ;;  %v22624_v43 = vld [vmem:[%s30488_s1 + $0xa00] ss:$16 sps:$4 sm:$0xff]   ;;  %v22632_v62 = vld [vmem:[%s30488_s1 + $0xbe4] ss:$16 sps:$4 sm:$0xff]  }
 0x41e   : > { %9619 = vmatprep.subr.bf16.mxu0 %v22617_v35  ;;  %v22657_v35 = vld [vmem:[%s30488_s1 + $0x1a8] ss:$16 sps:$4 sm:$0xff]  }
 0x41f   : > { %v5945_v38 = vpop.f32.mrf.mxu1  ;;  %9441 = vmatmul.mubr.bf16.vlgmr.msra.gmra.mxu1 %v26762_v60 }
 0x420   : > { %9491 = vmatpush1.bf16.msra.mxu1 %v22582_v5  ;;  %9522 = vmatprep.mubr.bf16.mxu1 %v26767_v11  ;;  %v26790_v6 = vadd.f32 %v5945_v38, %v26278_v22  ;;  %v22602_v22 = vld [vmem:[%s30488_s1 + $0xa84] ss:$16 sps:$4 sm:$0xff]   ;;  %v22630_v5 = vld [vmem:[%s30488_s1 + $0xbe0] ss:$16 sps:$4 sm:$0xff]  }
 0x421   : > { %v5947_v15 = vpop.f32.mrf.mxu1  ;;  %9492 = vmatprep.subr.bf16.mxu1 %v22590_v53  ;;  %9620 = vmatpush1.bf16.msra.mxu0 %v22615_v12  ;;  %v22663_v53 = vld [vmem:[%s30488_s1 + $0x188] ss:$16 sps:$4 sm:$0xff]   ;;  %v22671_v12 = vld [vmem:[%s30488_s1 + $0x16c] ss:$16 sps:$4 sm:$0xff]   ;;  %v22644_v38 = vld [vmem:[%s30488_s1 + $0xba4] ss:$16 sps:$4 sm:$0xff]  }
 0x422   : > { %v26793_v25 = vadd.f32 %v5947_v15, %v26284_v63  ;;  %9621 = vmatprep.subr.bf16.mxu0 %v22623_v45  ;;  %v22627_v63 = vld [vmem:[%s30488_s1 + $0x48] ss:$16 sps:$4 sm:$0xff]   ;;  %v22636_v45 = vld [vmem:[%s30488_s1 + $0xbc0] ss:$16 sps:$4 sm:$0xff]   ;;  %v22677_v15 = vld [vmem:[%s30488_s1 + $0x14c] ss:$16 sps:$4 sm:$0xff]  }
 0x423   : > { %v5949_v59 = vpop.f32.mrf.mxu1 }
 0x424   : > { %v6059_v47 = vcombine.low %v26790_v6, %v26793_v25  ;;  %9493 = vmatpush1.bf16.msra.mxu1 %v22588_v13  ;;  %v22669_v13 = vld [vmem:[%s30488_s1 + $0x168] ss:$16 sps:$4 sm:$0xff]   ;;  %v22684_v59 = vld [vmem:[%s30488_s1 + $0x12c] ss:$16 sps:$4 sm:$0xff]   ;;  %v22705_v6 = vld [vmem:[%s30488_s1 + $0xe64] ss:$16 sps:$4 sm:$0xff]  }
 0x425   : > { %v5950_v42 = vpop.f32.mrf.mxu1  ;;  %9494 = vmatprep.subr.bf16.mxu1 %v22596_v16  ;;  %9622 = vmatpush1.bf16.msra.mxu0 %v22621_v28  ;;  %v22642_v16 = vld [vmem:[%s30488_s1 + $0xba0] ss:$16 sps:$4 sm:$0xff]   ;;  %v22650_v28 = vld [vmem:[%s30488_s1 + $0xb84] ss:$16 sps:$4 sm:$0xff]   ;;  %v22730_v25 = vld [vmem:[%s30488_s1 + $0x428] ss:$16 sps:$4 sm:$0xff]  }
 0x426   : > { %9623 = vmatprep.subr.bf16.mxu0 %v22629_v23  ;;  %v22675_v23 = vld [vmem:[%s30488_s1 + $0x148] ss:$16 sps:$4 sm:$0xff]   ;;  %v22656_v42 = vld [vmem:[%s30488_s1 + $0xb64] ss:$16 sps:$4 sm:$0xff]  }
 0x428   : > { %9495 = vmatpush1.bf16.msra.mxu1 %v22594_v57  ;;  %v22648_v57 = vld [vmem:[%s30488_s1 + $0xb80] ss:$16 sps:$4 sm:$0xff]  }
 0x429   : > { %9496 = vmatprep.subr.bf16.mxu1 %v22602_v22  ;;  %9624 = vmatpush1.bf16.msra.mxu0 %v22627_v63  ;;  %v22682_v22 = vld [vmem:[%s30488_s1 + $0x128] ss:$16 sps:$4 sm:$0xff]   ;;  %v22690_v63 = vld [vmem:[%s30488_s1 + $0x10c] ss:$16 sps:$4 sm:$0xff]  }
 0x42a   : > { %9625 = vmatprep.subr.bf16.mxu0 %v22635_v2  ;;  %v22654_v2 = vld [vmem:[%s30488_s1 + $0xb60] ss:$16 sps:$4 sm:$0xff]  }
 0x42c   : > { %9497 = vmatpush1.bf16.msra.mxu1 %v22600_v58  ;;  %v22662_v58 = vld [vmem:[%s30488_s1 + $0xb44] ss:$16 sps:$4 sm:$0xff]  }
 0x42d   : > { %9498 = vmatprep.subr.bf16.mxu1 %v22608_v18  ;;  %9626 = vmatpush1.bf16.msra.mxu0 %v22633_v9  ;;  %v22688_v18 = vld [vmem:[%s30488_s1 + $0x108] ss:$16 sps:$4 sm:$0xff]   ;;  %v22696_v9 = vld [vmem:[%s30488_s1 + $0x4ec] ss:$16 sps:$4 sm:$0xff]  }
 0x42e   : > { %9627 = vmatprep.subr.bf16.mxu0 %v22641_v10  ;;  %v22660_v10 = vld [vmem:[%s30488_s1 + $0xb40] ss:$16 sps:$4 sm:$0xff]  }
 0x430   : > { %9499 = vmatpush1.bf16.msra.mxu1 %v22606_v36  ;;  %v6142_v36 = vcombine.high %v26449_v20, %v26449_v20  ;;  %v22666_v20 = vld [vmem:[%s30488_s1 + $0xb20] ss:$16 sps:$4 sm:$0xff]  }
 0x431   : > { %9500 = vmatprep.subr.bf16.mxu1 %v22614_v41  ;;  %9628 = vmatpush1.bf16.msra.mxu0 %v22639_v8  ;;  %v22668_v41 = vld [vmem:[%s30488_s1 + $0xb24] ss:$16 sps:$4 sm:$0xff]   ;;  %v22694_v8 = vld [vmem:[%s30488_s1 + $0x4e8] ss:$16 sps:$4 sm:$0xff]  }
 0x432   : > { %9629 = vmatprep.subr.bf16.mxu0 %v22647_v39  ;;  %v22702_v39 = vld [vmem:[%s30488_s1 + $0x4cc] ss:$16 sps:$4 sm:$0xff]  }
 0x434   : > { %9501 = vmatpush1.bf16.msra.mxu1 %v22612_v46  ;;  %v26951_v46 = vrot.slane %v6142_v36, %v24145_v50  ;;  %v22697_v36 = vld [vmem:[%s30488_s1 + $0xe80] ss:$16 sps:$4 sm:$0xff]  }
 0x435   : > { %9502 = vmatprep.subr.bf16.mxu1 %v22620_v14  ;;  %9630 = vmatpush2.bf16.msra.mxu0 %v22645_v21  ;;  %v22674_v21 = vld [vmem:[%s30488_s1 + $0xb04] ss:$16 sps:$4 sm:$0xff]  }
 0x436   : > { %9631 = vmatprep.subr.bf16.mxu0 %v22653_v55  ;;  %v22700_v55 = vld [vmem:[%s30488_s1 + $0x4c8] ss:$16 sps:$4 sm:$0xff]  }
 0x438   : > { %9503 = vmatpush1.bf16.msra.mxu1 %v22618_v56 }
 0x439   : > { %9504 = vmatprep.subr.bf16.mxu1 %v22626_v19  ;;  %9632 = vmatpush2.bf16.msra.mxu0 %v22651_v34  ;;  %v22672_v19 = vld [vmem:[%s30488_s1 + $0xb00] ss:$16 sps:$4 sm:$0xff]   ;;  %v6158_v34 = vcombine.high %v26951_v46, %v26951_v46 }
 0x43a   : > { %9633 = vmatprep.subr.bf16.mxu0 %v22659_v37 }
 0x43c   : > { %9505 = vmatpush1.bf16.msra.mxu1 %v22624_v43  ;;  %v22681_v43 = vld [vmem:[%s30488_s1 + $0xee4] ss:$16 sps:$4 sm:$0xff]  }
 0x43d   : > { %9506 = vmatprep.subr.bf16.mxu1 %v22632_v62  ;;  %9634 = vmatpush2.bf16.msra.mxu0 %v22657_v35  ;;  %v22706_v62 = vld [vmem:[%s30488_s1 + $0x4a8] ss:$16 sps:$4 sm:$0xff]  }
 0x43e   : > { %9635 = vmatprep.subr.bf16.mxu0 %v22665_v4  ;;  %v26983_v4 = vpack.c.bf16 %v26730_v61, %v26730_v61  ;;  %v22720_v61 = vld [vmem:[%s30488_s1 + $0x46c] ss:$16 sps:$4 sm:$0xff]  }
 0x440   : > { %9507 = vmatpush2.bf16.msra.mxu1 %v22630_v5  ;;  %v22679_v5 = vld [vmem:[%s30488_s1 + $0xee0] ss:$16 sps:$4 sm:$0xff]  }
 0x441   : > { %9508 = vmatprep.subr.bf16.mxu1 %v22638_v33  ;;  %9636 = vmatpush2.bf16.msra.mxu0 %v22663_v53  ;;  %v26988_v33 = vpack.c.bf16 %v6158_v34, %v6158_v34  ;;  %v22687_v53 = vld [vmem:[%s30488_s1 + $0xec4] ss:$16 sps:$4 sm:$0xff]   ;;  %v22750_v34 = vld [vmem:[%s30488_s1 + $0x5cc] ss:$16 sps:$4 sm:$0xff]  }
 0x442   : > { %9637 = vmatprep.subr.bf16.mxu0 %v22671_v12  ;;  %v22712_v12 = vld [vmem:[%s30488_s1 + $0x488] ss:$16 sps:$4 sm:$0xff]  }
 0x444   : > { %9509 = vmatpush2.bf16.msra.mxu1 %v22636_v45 }
 0x445   : > { %9510 = vmatprep.subr.bf16.mxu1 %v22644_v38  ;;  %9638 = vmatpush2.bf16.msra.mxu0 %v22669_v13  ;;  %v22685_v38 = vld [vmem:[%s30488_s1 + $0xec0] ss:$16 sps:$4 sm:$0xff]  }
 0x446   : > { %9639 = vmatprep.subr.bf16.mxu0 %v22677_v15  ;;  %v22693_v15 = vld [vmem:[%s30488_s1 + $0xea4] ss:$16 sps:$4 sm:$0xff]  }
 0x448   : > { %9511 = vmatpush2.bf16.msra.mxu1 %v22642_v16  ;;  %v22718_v16 = vld [vmem:[%s30488_s1 + $0x468] ss:$16 sps:$4 sm:$0xff]  }
 0x449   : > { %9512 = vmatprep.subr.bf16.mxu1 %v22650_v28  ;;  %9640 = vmatpush2.bf16.msra.mxu0 %v22675_v23 }
 0x44a   : > { %9641 = vmatprep.subr.bf16.mxu0 %v22684_v59  ;;  %v22726_v59 = vld [vmem:[%s30488_s1 + $0x44c] ss:$16 sps:$4 sm:$0xff]  }
 0x44c   : > { %9513 = vmatpush2.bf16.msra.mxu1 %v22648_v57 }
 0x44d   : > { %9514 = vmatprep.subr.bf16.mxu1 %v22656_v42  ;;  %9642 = vmatpush2.bf16.msra.mxu0 %v22682_v22  ;;  %v22691_v22 = vld [vmem:[%s30488_s1 + $0xea0] ss:$16 sps:$4 sm:$0xff]  }
 0x44e   : > { %9643 = vmatprep.subr.bf16.mxu0 %v22690_v63 }
 0x450   : > { %9515 = vmatpush2.bf16.msra.mxu1 %v22654_v2  ;;  %v6067_v2 = vrot.slane %v6059_v47, %v24145_v50 }
 0x451   : > { %9516 = vmatprep.subr.bf16.mxu1 %v22662_v58  ;;  %9644 = vmatpush2.bf16.msra.mxu0 %v22688_v18  ;;  %v22732_v18 = vld [vmem:[%s30488_s1 + $0x42c] ss:$16 sps:$4 sm:$0xff]  }
 0x452   : > { %9695 = vmatprep.subr.bf16.mxu0 %v22696_v9  ;;  %v4169_v9 = vld [vmem:[#allocation2 + $0x8] sm:$0xff] }
 0x454   : > { %9517 = vmatpush2.bf16.msra.mxu1 %v22660_v10  ;;  %9646 = vmatmul.mubr.bf16.vlgmr.msra.gmra.mxu0 %v26113_v32  ;;  %v26953_v14 = vpop.f32.mrf.mxu0  ;;  %v22708_v32 = vld [vmem:[%s30488_s1 + $0x4ac] ss:$16 sps:$4 sm:$0xff]  }
 0x455   : > { %9518 = vmatprep.subr.bf16.mxu1 %v22668_v41  ;;  %9696 = vmatpush1.bf16.msra.mxu0 %v22694_v8  ;;  %v22738_v41 = vld [vmem:[%s30488_s1 + $0x40c] ss:$16 sps:$4 sm:$0xff]   ;;  %v22703_v8 = vld [vmem:[%s30488_s1 + $0xe60] ss:$16 sps:$4 sm:$0xff]  }
 0x456   : > { %9697 = vmatprep.subr.bf16.mxu0 %v22702_v39  ;;  %v26964_v56 = vpop.f32.mrf.mxu0  ;;  %9727 = vmatprep.mubr.bf16.mxu0 %v26123_v54  ;;  %v22714_v54 = vld [vmem:[%s30488_s1 + $0x48c] ss:$16 sps:$4 sm:$0xff]   ;;  %v22711_v39 = vld [vmem:[%s30488_s1 + $0xe44] ss:$16 sps:$4 sm:$0xff]  }
 0x458   : > { %9519 = vmatpush2.bf16.msra.mxu1 %v22666_v20  ;;  %v9405_v37 = vpop.f32.mrf.mxu0  ;;  %v22736_v20 = vld [vmem:[%s30488_s1 + $0x408] ss:$16 sps:$4 sm:$0xff]  }
 0x459   : > { %9520 = vmatprep.subr.bf16.mxu1 %v22674_v21  ;;  %9698 = vmatpush1.bf16.msra.mxu0 %v22700_v55  ;;  %v22744_v21 = vld [vmem:[%s30488_s1 + $0x5ec] ss:$16 sps:$4 sm:$0xff]   ;;  %v22709_v55 = vld [vmem:[%s30488_s1 + $0xe40] ss:$16 sps:$4 sm:$0xff]  }
 0x45a   : > { %9699 = vmatprep.subr.bf16.mxu0 %v22708_v32  ;;  %v9406_v35 = vpop.f32.mrf.mxu0  ;;  %v22717_v32 = vld [vmem:[%s30488_s1 + $0xe24] ss:$16 sps:$4 sm:$0xff]   ;;  %v22715_v37 = vld [vmem:[%s30488_s1 + $0xe20] ss:$16 sps:$4 sm:$0xff]  }
 0x45b   : > { %v22721_v35 = vld [vmem:[%s30488_s1 + $0xe00] ss:$16 sps:$4 sm:$0xff]  }
 0x45c   : > { %9521 = vmatpush2.bf16.msra.mxu1 %v22672_v19  ;;  %v22742_v19 = vld [vmem:[%s30488_s1 + $0x5e8] ss:$16 sps:$4 sm:$0xff]  }
 0x45d   : > { %9572 = vmatprep.subr.bf16.mxu1 %v22681_v43  ;;  %9700 = vmatpush1.bf16.msra.mxu0 %v22706_v62  ;;  %v22723_v43 = vld [vmem:[%s30488_s1 + $0xe04] ss:$16 sps:$4 sm:$0xff]   ;;  %v22748_v62 = vld [vmem:[%s30488_s1 + $0x5c8] ss:$16 sps:$4 sm:$0xff]  }
 0x45e   : > { %9701 = vmatprep.subr.bf16.mxu0 %v22714_v54  ;;  %v22756_v54 = vld [vmem:[%s30488_s1 + $0x5ac] ss:$16 sps:$4 sm:$0xff]  }
 0x45f   : > { %v6027_v45 = vpop.f32.mrf.mxu1  ;;  %9523 = vmatmul.mubr.bf16.vlgmr.msra.gmra.mxu1 %v26983_v4 }
 0x460   : > { %9573 = vmatpush1.bf16.msra.mxu1 %v22679_v5  ;;  %9604 = vmatprep.mubr.bf16.mxu1 %v26988_v33  ;;  %v6028_v28 = vadd.f32 %v6027_v45, %v26501_v51  ;;  %v22699_v51 = vld [vmem:[%s30488_s1 + $0xe84] ss:$16 sps:$4 sm:$0xff]  }
 0x461   : > { %v6029_v13 = vpop.f32.mrf.mxu1  ;;  %9574 = vmatprep.subr.bf16.mxu1 %v22687_v53  ;;  %9702 = vmatpush1.bf16.msra.mxu0 %v22712_v12  ;;  %v22729_v5 = vld [vmem:[%s30488_s1 + $0xfe4] ss:$16 sps:$4 sm:$0xff]   ;;  %v22754_v53 = vld [vmem:[%s30488_s1 + $0x5a8] ss:$16 sps:$4 sm:$0xff]   ;;  %v22762_v12 = vld [vmem:[%s30488_s1 + $0x58c] ss:$16 sps:$4 sm:$0xff]  }
 0x462   : > { %v6030_v23 = vadd.f32 %v6029_v13, %v26516_v30  ;;  %9703 = vmatprep.subr.bf16.mxu0 %v22720_v61  ;;  %v22724_v30 = vld [vmem:[%s30488_s1 + $0x448] ss:$16 sps:$4 sm:$0xff]   ;;  %v22727_v61 = vld [vmem:[%s30488_s1 + $0xfe0] ss:$16 sps:$4 sm:$0xff]   ;;  %v22735_v45 = vld [vmem:[%s30488_s1 + $0xfc4] ss:$16 sps:$4 sm:$0xff]  }
 0x463   : > { %v6031_v57 = vpop.f32.mrf.mxu1  ;;  %v22768_v13 = vld [vmem:[%s30488_s1 + $0x56c] ss:$16 sps:$4 sm:$0xff]  }
 0x464   : > { %v6060_v42 = vcombine.low %v6028_v28, %v6030_v23  ;;  %9575 = vmatpush1.bf16.msra.mxu1 %v22685_v38  ;;  %v22760_v38 = vld [vmem:[%s30488_s1 + $0x588] ss:$16 sps:$4 sm:$0xff]   ;;  %v22774_v23 = vld [vmem:[%s30488_s1 + $0x54c] ss:$16 sps:$4 sm:$0xff]   ;;  %v22747_v57 = vld [vmem:[%s30488_s1 + $0xf84] ss:$16 sps:$4 sm:$0xff]  }
 0x465   : > { %v6032_v63 = vpop.f32.mrf.mxu1  ;;  %9576 = vmatprep.subr.bf16.mxu1 %v22693_v15  ;;  %9704 = vmatpush1.bf16.msra.mxu0 %v22718_v16  ;;  %v22733_v15 = vld [vmem:[%s30488_s1 + $0xfc0] ss:$16 sps:$4 sm:$0xff]   ;;  %v22741_v16 = vld [vmem:[%s30488_s1 + $0xfa4] ss:$16 sps:$4 sm:$0xff]   ;;  %v22766_v28 = vld [vmem:[%s30488_s1 + $0x568] ss:$16 sps:$4 sm:$0xff]  }
 0x466   : > { %v6074_v58 = vrot.slane %v6060_v42, %v24145_v50  ;;  %9705 = vmatprep.subr.bf16.mxu0 %v22726_v59  ;;  %v22739_v59 = vld [vmem:[%s30488_s1 + $0xfa0] ss:$16 sps:$4 sm:$0xff]   ;;  %v22772_v42 = vld [vmem:[%s30488_s1 + $0x548] ss:$16 sps:$4 sm:$0xff]  }
 0x467   : > { %v22745_v63 = vld [vmem:[%s30488_s1 + $0xf80] ss:$16 sps:$4 sm:$0xff]  }
 0x468   : > { %v6075_v10 = vcombine.low %v6067_v2, %v6074_v58  ;;  %9577 = vmatpush1.bf16.msra.mxu1 %v22691_v22  ;;  %v22781_v22 = vld [vmem:[%s30488_s1 + $0x52c] ss:$16 sps:$4 sm:$0xff]   ;;  %v22751_v58 = vld [vmem:[%s30488_s1 + $0xf60] ss:$16 sps:$4 sm:$0xff]  }
 0x469   : > { %9578 = vmatprep.subr.bf16.mxu1 %v22699_v51  ;;  %9706 = vmatpush1.bf16.msra.mxu0 %v22724_v30  ;;  %v22753_v51 = vld [vmem:[%s30488_s1 + $0xf64] ss:$16 sps:$4 sm:$0xff]   ;;  %v22779_v30 = vld [vmem:[%s30488_s1 + $0x528] ss:$16 sps:$4 sm:$0xff]   ;;  %v22787_v2 = vld [vmem:[%s30488_s1 + $0x50c] ss:$16 sps:$4 sm:$0xff]  }
 0x46a   : > { %v6079_v47 = vadd.f32 %v6075_v10, %v4169_v9  ;;  %9707 = vmatprep.subr.bf16.mxu0 %v22732_v18  ;;  %v22759_v18 = vld [vmem:[%s30488_s1 + $0xf44] ss:$16 sps:$4 sm:$0xff]   ;;  %v22785_v9 = vld [vmem:[%s30488_s1 + $0x508] ss:$16 sps:$4 sm:$0xff]   ;;  %v22793_v10 = vld [vmem:[%s30488_s1 + $0x8ec] ss:$16 sps:$4 sm:$0xff]  }
 0x46c   : > { %6081 = vst [vmem:[#allocation2 + $0x8] sm:$0xff] %v6079_v47  ;;  %9579 = vmatpush1.bf16.msra.mxu1 %v22697_v36  ;;  %v22757_v36 = vld [vmem:[%s30488_s1 + $0xf40] ss:$16 sps:$4 sm:$0xff]   ;;  %v22799_v47 = vld [vmem:[%s30488_s1 + $0x8cc] ss:$16 sps:$4 sm:$0xff]  }
 0x46d   : > { %9580 = vmatprep.subr.bf16.mxu1 %v22705_v6  ;;  %9708 = vmatpush1.bf16.msra.mxu0 %v22730_v25  ;;  %v22765_v6 = vld [vmem:[%s30488_s1 + $0xf24] ss:$16 sps:$4 sm:$0xff]   ;;  %v22791_v25 = vld [vmem:[%s30488_s1 + $0x8e8] ss:$16 sps:$4 sm:$0xff]  }
 0x46e   : > { %9709 = vmatprep.subr.bf16.mxu0 %v22738_v41  ;;  %v22763_v41 = vld [vmem:[%s30488_s1 + $0xf20] ss:$16 sps:$4 sm:$0xff]  }
 0x470   : > { %9581 = vmatpush1.bf16.msra.mxu1 %v22703_v8 }
 0x471   : > { %9582 = vmatprep.subr.bf16.mxu1 %v22711_v39  ;;  %9710 = vmatpush1.bf16.msra.mxu0 %v22736_v20  ;;  %v6703_v39 = vld [vmem:[%s30489_s2] sm:$0xf]  ;;  %v22771_v20 = vld [vmem:[%s30488_s1 + $0xf04] ss:$16 sps:$4 sm:$0xff]  }
 0x472   : > { %9711 = vmatprep.subr.bf16.mxu0 %v22744_v21  ;;  %v22797_v21 = vld [vmem:[%s30488_s1 + $0x8c8] ss:$16 sps:$4 sm:$0xff]  }
 0x474   : > { %9583 = vmatpush1.bf16.msra.mxu1 %v22709_v55 }
 0x475   : > { %9584 = vmatprep.subr.bf16.mxu1 %v22717_v32  ;;  %9712 = vmatpush2.bf16.msra.mxu0 %v22742_v19  ;;  %v6708_v32 = vrot.slane %v6703_v39, %v24873_v26  ;;  %v22769_v19 = vld [vmem:[%s30488_s1 + $0xf00] ss:$16 sps:$4 sm:$0xff]  }
 0x476   : > { %9713 = vmatprep.subr.bf16.mxu0 %v22750_v34 }
 0x478   : > { %9585 = vmatpush1.bf16.msra.mxu1 %v22715_v37  ;;  %v22778_v37 = vld [vmem:[%s30488_s1 + $0x2ec] ss:$16 sps:$4 sm:$0xff]  }
 0x479   : > { %9586 = vmatprep.subr.bf16.mxu1 %v22723_v43  ;;  %9714 = vmatpush2.bf16.msra.mxu0 %v22748_v62  ;;  %v22803_v43 = vld [vmem:[%s30488_s1 + $0x8a8] ss:$16 sps:$4 sm:$0xff]   ;;  %v22811_v62 = vld [vmem:[%s30488_s1 + $0x88c] ss:$16 sps:$4 sm:$0xff]  }
 0x47a   : > { %9715 = vmatprep.subr.bf16.mxu0 %v22756_v54 }
 0x47c   : > { %9587 = vmatpush1.bf16.msra.mxu1 %v22721_v35  ;;  %v27201_v35 = vpack.c.bf16 %v26951_v46, %v26951_v46 }
 0x47d   : > { %9588 = vmatprep.subr.bf16.mxu1 %v22729_v5  ;;  %9716 = vmatpush2.bf16.msra.mxu0 %v22754_v53  ;;  %v9320_v5 = vadd.f32 %v26738_v1, %v6708_v32  ;;  %v22776_v53 = vld [vmem:[%s30488_s1 + $0x2e8] ss:$16 sps:$4 sm:$0xff]   ;;  %v22817_v1 = vld [vmem:[%s30488_s1 + $0x86c] ss:$16 sps:$4 sm:$0xff]  }
 0x47e   : > { %9717 = vmatprep.subr.bf16.mxu0 %v22762_v12  ;;  %v22784_v12 = vld [vmem:[%s30488_s1 + $0x2cc] ss:$16 sps:$4 sm:$0xff]   ;;  %v22818_v32 = vld [vmem:[%s30488_s1 + $0x208] ss:$16 sps:$4 sm:$0xff]  }
 0x480   : > { %9589 = vmatpush2.bf16.msra.mxu1 %v22727_v61  ;;  %v22809_v61 = vld [vmem:[%s30488_s1 + $0x888] ss:$16 sps:$4 sm:$0xff]  }
 0x481   : > { %9590 = vmatprep.subr.bf16.mxu1 %v22735_v45  ;;  %9718 = vmatpush2.bf16.msra.mxu0 %v22760_v38 }
 0x482   : > { %9719 = vmatprep.subr.bf16.mxu0 %v22768_v13  ;;  %v22782_v13 = vld [vmem:[%s30488_s1 + $0x2c8] ss:$16 sps:$4 sm:$0xff]  }
 0x484   : > { %9591 = vmatpush2.bf16.msra.mxu1 %v22733_v15 }
 0x485   : > { %9592 = vmatprep.subr.bf16.mxu1 %v22741_v16  ;;  %9720 = vmatpush2.bf16.msra.mxu0 %v22766_v28  ;;  %v22815_v16 = vld [vmem:[%s30488_s1 + $0x868] ss:$16 sps:$4 sm:$0xff]  }
 0x486   : > { %9721 = vmatprep.subr.bf16.mxu0 %v22774_v23  ;;  %v22823_v23 = vld [vmem:[%s30488_s1 + $0x84c] ss:$16 sps:$4 sm:$0xff]  }
 0x488   : > { %9593 = vmatpush2.bf16.msra.mxu1 %v22739_v59 }
 0x489   : > { %9594 = vmatprep.subr.bf16.mxu1 %v22747_v57  ;;  %9722 = vmatpush2.bf16.msra.mxu0 %v22772_v42  ;;  %v22796_v42 = vld [vmem:[%s30488_s1 + $0x28c] ss:$16 sps:$4 sm:$0xff]  }
 0x48a   : > { %9723 = vmatprep.subr.bf16.mxu0 %v22781_v22  ;;  %v22821_v22 = vld [vmem:[%s30488_s1 + $0x848] ss:$16 sps:$4 sm:$0xff]  }
 0x48c   : > { %9595 = vmatpush2.bf16.msra.mxu1 %v22745_v63  ;;  %v22829_v63 = vld [vmem:[%s30488_s1 + $0x82c] ss:$16 sps:$4 sm:$0xff]  }
 0x48d   : > { %9596 = vmatprep.subr.bf16.mxu1 %v22753_v51  ;;  %9724 = vmatpush2.bf16.msra.mxu0 %v22779_v30  ;;  %v22794_v51 = vld [vmem:[%s30488_s1 + $0x288] ss:$16 sps:$4 sm:$0xff]   ;;  %v22802_v30 = vld [vmem:[%s30488_s1 + $0x26c] ss:$16 sps:$4 sm:$0xff]  }
 0x48e   : > { %9725 = vmatprep.subr.bf16.mxu0 %v22787_v2  ;;  %v22827_v2 = vld [vmem:[%s30488_s1 + $0x828] ss:$16 sps:$4 sm:$0xff]  }
 0x490   : > { %9597 = vmatpush2.bf16.msra.mxu1 %v22751_v58  ;;  %v22835_v58 = vld [vmem:[%s30488_s1 + $0x80c] ss:$16 sps:$4 sm:$0xff]  }
 0x491   : > { %9598 = vmatprep.subr.bf16.mxu1 %v22759_v18  ;;  %9726 = vmatpush2.bf16.msra.mxu0 %v22785_v9  ;;  %v22800_v18 = vld [vmem:[%s30488_s1 + $0x268] ss:$16 sps:$4 sm:$0xff]   ;;  %v22808_v9 = vld [vmem:[%s30488_s1 + $0x24c] ss:$16 sps:$4 sm:$0xff]  }
 0x492   : > { %9777 = vmatprep.subr.bf16.mxu0 %v22793_v10  ;;  %v22833_v10 = vld [vmem:[%s30488_s1 + $0x808] ss:$16 sps:$4 sm:$0xff]  }
 0x494   : > { %9599 = vmatpush2.bf16.msra.mxu1 %v22757_v36  ;;  %9728 = vmatmul.mubr.bf16.vlgmr.msra.gmra.mxu0 %v26264_v48  ;;  %v27168_v8 = vpop.f32.mrf.mxu0  ;;  %v22805_v48 = vld [vmem:[%s30488_s1 + $0x8ac] ss:$16 sps:$4 sm:$0xff]  }
 0x495   : > { %9600 = vmatprep.subr.bf16.mxu1 %v22765_v6  ;;  %9778 = vmatpush1.bf16.msra.mxu0 %v22791_v25  ;;  %v22841_v36 = vld [vmem:[%s30488_s1 + $0x9ec] ss:$16 sps:$4 sm:$0xff]   ;;  %v22806_v6 = vld [vmem:[%s30488_s1 + $0x248] ss:$16 sps:$4 sm:$0xff]  }
 0x496   : > { %9779 = vmatprep.subr.bf16.mxu0 %v22799_v47  ;;  %v27182_v55 = vpop.f32.mrf.mxu0  ;;  %9809 = vmatprep.mubr.bf16.mxu0 %v26276_v3  ;;  %v6712_v3 = vrot.slane %v6703_v39, %v24882_v29  ;;  %v22814_v25 = vld [vmem:[%s30488_s1 + $0x22c] ss:$16 sps:$4 sm:$0xff]   ;;  %v22839_v47 = vld [vmem:[%s30488_s1 + $0x9e8] ss:$16 sps:$4 sm:$0xff]  }
 0x497   : > { %v22812_v39 = vld [vmem:[%s30488_s1 + $0x228] ss:$16 sps:$4 sm:$0xff]  }
 0x498   : > { %9601 = vmatpush2.bf16.msra.mxu1 %v22763_v41  ;;  %v9487_v34 = vpop.f32.mrf.mxu0  ;;  %v9322_v46 = vadd.f32 %v26749_v0, %v6712_v3  ;;  %v22790_v0 = vld [vmem:[%s30488_s1 + $0x2ac] ss:$16 sps:$4 sm:$0xff]  }
 0x499   : > { %9602 = vmatprep.subr.bf16.mxu1 %v22771_v20  ;;  %9780 = vmatpush1.bf16.msra.mxu0 %v22797_v21  ;;  %v22847_v41 = vld [vmem:[%s30488_s1 + $0x9cc] ss:$16 sps:$4 sm:$0xff]   ;;  %v22845_v21 = vld [vmem:[%s30488_s1 + $0x9c8] ss:$16 sps:$4 sm:$0xff]  }
 0x49a   : > { %9781 = vmatprep.subr.bf16.mxu0 %v22805_v48  ;;  %v9488_v54 = vpop.f32.mrf.mxu0  ;;  %v22820_v20 = vld [vmem:[%s30488_s1 + $0x20c] ss:$16 sps:$4 sm:$0xff]   ;;  %v22851_v34 = vld [vmem:[%s30488_s1 + $0x9a8] ss:$16 sps:$4 sm:$0xff]  }
 0x49b   : > { %v22853_v48 = vld [vmem:[%s30488_s1 + $0x9ac] ss:$16 sps:$4 sm:$0xff]  }
 0x49c   : > { %9603 = vmatpush2.bf16.msra.mxu1 %v22769_v19  ;;  %v22826_v19 = vld [vmem:[%s30488_s1 + $0x3ec] ss:$16 sps:$4 sm:$0xff]  }
 0x49d   : > { %9654 = vmatprep.subr.bf16.mxu1 %v22778_v37  ;;  %9782 = vmatpush1.bf16.msra.mxu0 %v22803_v43  ;;  %v22859_v37 = vld [vmem:[%s30488_s1 + $0x98c] ss:$16 sps:$4 sm:$0xff]   ;;  %v22824_v43 = vld [vmem:[%s30488_s1 + $0x3e8] ss:$16 sps:$4 sm:$0xff]  }
 0x49e   : > { %9783 = vmatprep.subr.bf16.mxu0 %v22811_v62  ;;  %v22832_v3 = vld [vmem:[%s30488_s1 + $0x3cc] ss:$16 sps:$4 sm:$0xff]   ;;  %v22857_v62 = vld [vmem:[%s30488_s1 + $0x988] ss:$16 sps:$4 sm:$0xff]  }
 0x49f   : > { %v9360_v45 = vpop.f32.mrf.mxu1  ;;  %9605 = vmatmul.mubr.bf16.vlgmr.msra.gmra.mxu1 %v27201_v35  ;;  %v22865_v54 = vld [vmem:[%s30488_s1 + $0x96c] ss:$16 sps:$4 sm:$0xff]  }
 0x4a0   : > { %v27218_v38 = vadd.f32 %v9360_v45, %v9320_v5  ;;  %9655 = vmatpush1.bf16.msra.mxu1 %v22776_v53  ;;  %9686 = vmatprep.mubr.bf16.mxu1 %v26307_v49  ;;  %v22788_v49 = vld [vmem:[%s30488_s1 + $0x2a8] ss:$16 sps:$4 sm:$0xff]   ;;  %v22838_v53 = vld [vmem:[%s30488_s1 + $0x3ac] ss:$16 sps:$4 sm:$0xff]  }
 0x4a1   : > { %v9362_v15 = vpop.f32.mrf.mxu1  ;;  %9656 = vmatprep.subr.bf16.mxu1 %v22784_v12  ;;  %9784 = vmatpush1.bf16.msra.mxu0 %v22809_v61  ;;  %v22830_v5 = vld [vmem:[%s30488_s1 + $0x3c8] ss:$16 sps:$4 sm:$0xff]   ;;  %v22871_v61 = vld [vmem:[%s30488_s1 + $0x94c] ss:$16 sps:$4 sm:$0xff]  }
 0x4a2   : > { %v27230_v28 = vadd.f32 %v9362_v15, %v9322_v46  ;;  %9785 = vmatprep.subr.bf16.mxu0 %v22817_v1  ;;  %v22863_v12 = vld [vmem:[%s30488_s1 + $0x968] ss:$16 sps:$4 sm:$0xff]   ;;  %v22844_v1 = vld [vmem:[%s30488_s1 + $0x38c] ss:$16 sps:$4 sm:$0xff]  }
 0x4a3   : > { %v9364_v59 = vpop.f32.mrf.mxu1  ;;  %v22836_v46 = vld [vmem:[%s30488_s1 + $0x3a8] ss:$16 sps:$4 sm:$0xff]  }
 0x4a4   : > { %9657 = vmatpush1.bf16.msra.mxu1 %v22782_v13  ;;  %v22869_v45 = vld [vmem:[%s30488_s1 + $0x948] ss:$16 sps:$4 sm:$0xff]   ;;  %v22877_v13 = vld [vmem:[%s30488_s1 + $0x92c] ss:$16 sps:$4 sm:$0xff]  }
 0x4a5   : > { %v9365_v57 = vpop.f32.mrf.mxu1  ;;  %9658 = vmatprep.subr.bf16.mxu1 %v22790_v0  ;;  %9786 = vmatpush1.bf16.msra.mxu0 %v22815_v16  ;;  %v22842_v15 = vld [vmem:[%s30488_s1 + $0x388] ss:$16 sps:$4 sm:$0xff]   ;;  %v22850_v0 = vld [vmem:[%s30488_s1 + $0x36c] ss:$16 sps:$4 sm:$0xff]  }
 0x4a6   : > { %9787 = vmatprep.subr.bf16.mxu0 %v22823_v23  ;;  %v22875_v16 = vld [vmem:[%s30488_s1 + $0x928] ss:$16 sps:$4 sm:$0xff]   ;;  %v22883_v23 = vld [vmem:[%s30488_s1 + $0x90c] ss:$16 sps:$4 sm:$0xff]  }
 0x4a7   : > { %v22848_v59 = vld [vmem:[%s30488_s1 + $0x368] ss:$16 sps:$4 sm:$0xff]  }
 0x4a8   : > { %9659 = vmatpush1.bf16.msra.mxu1 %v22788_v49  ;;  %v22856_v49 = vld [vmem:[%s30488_s1 + $0x34c] ss:$16 sps:$4 sm:$0xff]   ;;  %v22881_v57 = vld [vmem:[%s30488_s1 + $0x908] ss:$16 sps:$4 sm:$0xff]  }
 0x4a9   : > { %9660 = vmatprep.subr.bf16.mxu1 %v22796_v42  ;;  %9788 = vmatpush1.bf16.msra.mxu0 %v22821_v22  ;;  %v22889_v42 = vld [vmem:[%s30488_s1 + $0xcec] ss:$16 sps:$4 sm:$0xff]   ;;  %v22854_v22 = vld [vmem:[%s30488_s1 + $0x348] ss:$16 sps:$4 sm:$0xff]  }
 0x4aa   : > { %9789 = vmatprep.subr.bf16.mxu0 %v22829_v63  ;;  %v22862_v63 = vld [vmem:[%s30488_s1 + $0x32c] ss:$16 sps:$4 sm:$0xff]  }
 0x4ac   : > { %9661 = vmatpush1.bf16.msra.mxu1 %v22794_v51  ;;  %v22887_v51 = vld [vmem:[%s30488_s1 + $0xce8] ss:$16 sps:$4 sm:$0xff]  }
 0x4ad   : > { %9662 = vmatprep.subr.bf16.mxu1 %v22802_v30  ;;  %9790 = vmatpush1.bf16.msra.mxu0 %v22827_v2  ;;  %v22895_v30 = vld [vmem:[%s30488_s1 + $0xccc] ss:$16 sps:$4 sm:$0xff]   ;;  %v22860_v2 = vld [vmem:[%s30488_s1 + $0x328] ss:$16 sps:$4 sm:$0xff]  }
 0x4ae   : > { %9791 = vmatprep.subr.bf16.mxu0 %v22835_v58 }
 0x4b0   : > { %9663 = vmatpush1.bf16.msra.mxu1 %v22800_v18  ;;  %v22868_v18 = vld [vmem:[%s30488_s1 + $0x30c] ss:$16 sps:$4 sm:$0xff]  }
 0x4b1   : > { %9664 = vmatprep.subr.bf16.mxu1 %v22808_v9  ;;  %9792 = vmatpush1.bf16.msra.mxu0 %v22833_v10  ;;  %v22893_v9 = vld [vmem:[%s30488_s1 + $0xcc8] ss:$16 sps:$4 sm:$0xff]   ;;  %v22901_v10 = vld [vmem:[%s30488_s1 + $0xcac] ss:$16 sps:$4 sm:$0xff]  }
 0x4b2   : > { %9793 = vmatprep.subr.bf16.mxu0 %v22841_v36 }
 0x4b4   : > { %9665 = vmatpush1.bf16.msra.mxu1 %v22806_v6 }
 0x4b5   : > { %9666 = vmatprep.subr.bf16.mxu1 %v22814_v25  ;;  %9794 = vmatpush2.bf16.msra.mxu0 %v22839_v47  ;;  %v22874_v25 = vld [vmem:[%s30488_s1 + $0x6ec] ss:$16 sps:$4 sm:$0xff]   ;;  %v22899_v47 = vld [vmem:[%s30488_s1 + $0xca8] ss:$16 sps:$4 sm:$0xff]  }
 0x4b6   : > { %9795 = vmatprep.subr.bf16.mxu0 %v22847_v41 }
 0x4b8   : > { %9667 = vmatpush1.bf16.msra.mxu1 %v22812_v39  ;;  %v22872_v39 = vld [vmem:[%s30488_s1 + $0x6e8] ss:$16 sps:$4 sm:$0xff]  }
 0x4b9   : > { %9668 = vmatprep.subr.bf16.mxu1 %v22820_v20  ;;  %9796 = vmatpush2.bf16.msra.mxu0 %v22845_v21  ;;  %v22880_v20 = vld [vmem:[%s30488_s1 + $0x6cc] ss:$16 sps:$4 sm:$0xff]   ;;  %v22905_v21 = vld [vmem:[%s30488_s1 + $0xc88] ss:$16 sps:$4 sm:$0xff]  }
 0x4ba   : > { %9797 = vmatprep.subr.bf16.mxu0 %v22853_v48  ;;  %v9402_v48 = vadd.f32 %v26953_v14, %v27218_v38  ;;  %v22886_v38 = vld [vmem:[%s30488_s1 + $0x6ac] ss:$16 sps:$4 sm:$0xff]  }
 0x4bc   : > { %9669 = vmatpush1.bf16.msra.mxu1 %v22818_v32  ;;  %v22913_v32 = vld [vmem:[%s30488_s1 + $0xc6c] ss:$16 sps:$4 sm:$0xff]  }
 0x4bd   : > { %9670 = vmatprep.subr.bf16.mxu1 %v22826_v19  ;;  %9798 = vmatpush2.bf16.msra.mxu0 %v22851_v34  ;;  %v9404_v34 = vadd.f32 %v26964_v56, %v27230_v28  ;;  %v22919_v28 = vld [vmem:[%s30488_s1 + $0xc4c] ss:$16 sps:$4 sm:$0xff]  }
 0x4be   : > { %9799 = vmatprep.subr.bf16.mxu0 %v22859_v37 }
 0x4c0   : > { %9671 = vmatpush2.bf16.msra.mxu1 %v22824_v43  ;;  %v22878_v43 = vld [vmem:[%s30488_s1 + $0x6c8] ss:$16 sps:$4 sm:$0xff]  }
 0x4c1   : > { %9672 = vmatprep.subr.bf16.mxu1 %v22832_v3  ;;  %9800 = vmatpush2.bf16.msra.mxu0 %v22857_v62 }
 0x4c2   : > { %9801 = vmatprep.subr.bf16.mxu0 %v22865_v54  ;;  %v22892_v54 = vld [vmem:[%s30488_s1 + $0x68c] ss:$16 sps:$4 sm:$0xff]  }
 0x4c4   : > { %9673 = vmatpush2.bf16.msra.mxu1 %v22830_v5  ;;  %v22917_v5 = vld [vmem:[%s30488_s1 + $0xc48] ss:$16 sps:$4 sm:$0xff]  }
 0x4c5   : > { %9674 = vmatprep.subr.bf16.mxu1 %v22838_v53  ;;  %9802 = vmatpush2.bf16.msra.mxu0 %v22863_v12  ;;  %v22925_v53 = vld [vmem:[%s30488_s1 + $0xc2c] ss:$16 sps:$4 sm:$0xff]   ;;  %v22890_v12 = vld [vmem:[%s30488_s1 + $0x688] ss:$16 sps:$4 sm:$0xff]  }
 0x4c6   : > { %9803 = vmatprep.subr.bf16.mxu0 %v22871_v61  ;;  %v22898_v61 = vld [vmem:[%s30488_s1 + $0x66c] ss:$16 sps:$4 sm:$0xff]  }
 0x4c8   : > { %9675 = vmatpush2.bf16.msra.mxu1 %v22836_v46  ;;  %v22923_v46 = vld [vmem:[%s30488_s1 + $0xc28] ss:$16 sps:$4 sm:$0xff]  }
 0x4c9   : > { %9676 = vmatprep.subr.bf16.mxu1 %v22844_v1  ;;  %9804 = vmatpush2.bf16.msra.mxu0 %v22869_v45  ;;  %v22931_v1 = vld [vmem:[%s30488_s1 + $0xc0c] ss:$16 sps:$4 sm:$0xff]   ;;  %v22896_v45 = vld [vmem:[%s30488_s1 + $0x668] ss:$16 sps:$4 sm:$0xff]  }
 0x4ca   : > { %9805 = vmatprep.subr.bf16.mxu0 %v22877_v13  ;;  %v22904_v13 = vld [vmem:[%s30488_s1 + $0x64c] ss:$16 sps:$4 sm:$0xff]  }
 0x4cc   : > { %9677 = vmatpush2.bf16.msra.mxu1 %v22842_v15  ;;  %v22929_v15 = vld [vmem:[%s30488_s1 + $0xc08] ss:$16 sps:$4 sm:$0xff]  }
 0x4cd   : > { %9678 = vmatprep.subr.bf16.mxu1 %v22850_v0  ;;  %9806 = vmatpush2.bf16.msra.mxu0 %v22875_v16  ;;  %v22937_v0 = vld [vmem:[%s30488_s1 + $0xdec] ss:$16 sps:$4 sm:$0xff]   ;;  %v22902_v16 = vld [vmem:[%s30488_s1 + $0x648] ss:$16 sps:$4 sm:$0xff]  }
 0x4ce   : > { %9807 = vmatprep.subr.bf16.mxu0 %v22883_v23  ;;  %v22910_v23 = vld [vmem:[%s30488_s1 + $0x62c] ss:$16 sps:$4 sm:$0xff]  }
 0x4d0   : > { %9679 = vmatpush2.bf16.msra.mxu1 %v22848_v59  ;;  %v22935_v59 = vld [vmem:[%s30488_s1 + $0xde8] ss:$16 sps:$4 sm:$0xff]  }
 0x4d1   : > { %9680 = vmatprep.subr.bf16.mxu1 %v22856_v49  ;;  %9808 = vmatpush2.bf16.msra.mxu0 %v22881_v57  ;;  %v22943_v49 = vld [vmem:[%s30488_s1 + $0xdcc] ss:$16 sps:$4 sm:$0xff]   ;;  %v22908_v57 = vld [vmem:[%s30488_s1 + $0x628] ss:$16 sps:$4 sm:$0xff]  }
 0x4d2   : > { %9859 = vmatprep.subr.bf16.mxu0 %v22889_v42  ;;  %v22916_v42 = vld [vmem:[%s30488_s1 + $0x60c] ss:$16 sps:$4 sm:$0xff]  }
 0x4d4   : > { %9681 = vmatpush2.bf16.msra.mxu1 %v22854_v22  ;;  %9810 = vmatmul.mubr.bf16.vlgmr.msra.gmra.mxu0 %v26486_v24  ;;  %v27383_v58 = vpop.f32.mrf.mxu0  ;;  %v22866_v24 = vld [vmem:[%s30488_s1 + $0x308] ss:$16 sps:$4 sm:$0xff]  }
 0x4d5   : > { %9682 = vmatprep.subr.bf16.mxu1 %v22862_v63  ;;  %9860 = vmatpush1.bf16.msra.mxu0 %v22887_v51  ;;  %v22941_v22 = vld [vmem:[%s30488_s1 + $0xdc8] ss:$16 sps:$4 sm:$0xff]   ;;  %v22949_v63 = vld [vmem:[%s30488_s1 + $0xdac] ss:$16 sps:$4 sm:$0xff]  }
 0x4d6   : > { %9861 = vmatprep.subr.bf16.mxu0 %v22895_v30  ;;  %v27394_v36 = vpop.f32.mrf.mxu0  ;;  %9891 = vmatprep.mubr.bf16.mxu0 %v26499_v27  ;;  %v22907_v27 = vld [vmem:[%s30488_s1 + $0xc8c] ss:$16 sps:$4 sm:$0xff]   ;;  %v22914_v51 = vld [vmem:[%s30488_s1 + $0x608] ss:$16 sps:$4 sm:$0xff]  }
 0x4d7   : > { %v22922_v30 = vld [vmem:[%s30488_s1 + $0x7ec] ss:$16 sps:$4 sm:$0xff]  }
 0x4d8   : > { %9683 = vmatpush2.bf16.msra.mxu1 %v22860_v2  ;;  %v9569_v6 = vpop.f32.mrf.mxu0  ;;  %v22947_v2 = vld [vmem:[%s30488_s1 + $0xda8] ss:$16 sps:$4 sm:$0xff]  }
 0x4d9   : > { %9684 = vmatprep.subr.bf16.mxu1 %v22868_v18  ;;  %9862 = vmatpush1.bf16.msra.mxu0 %v22893_v9  ;;  %v22955_v18 = vld [vmem:[%s30488_s1 + $0xd8c] ss:$16 sps:$4 sm:$0xff]   ;;  %v22920_v9 = vld [vmem:[%s30488_s1 + $0x7e8] ss:$16 sps:$4 sm:$0xff]  }
 0x4da   : > { %9863 = vmatprep.subr.bf16.mxu0 %v22901_v10  ;;  %v9570_v41 = vpop.f32.mrf.mxu0  ;;  %v22928_v10 = vld [vmem:[%s30488_s1 + $0x7cc] ss:$16 sps:$4 sm:$0xff]  }
 0x4db   : > { %v22961_v6 = vld [vmem:[%s30488_s1 + $0xd6c] ss:$16 sps:$4 sm:$0xff]  }
 0x4dc   : > { %9685 = vmatpush2.bf16.msra.mxu1 %v22866_v24  ;;  %v22953_v24 = vld [vmem:[%s30488_s1 + $0xd88] ss:$16 sps:$4 sm:$0xff]   ;;  %v22967_v41 = vld [vmem:[%s30488_s1 + $0xd4c] ss:$16 sps:$4 sm:$0xff]  }
 0x4dd   : > { %9736 = vmatprep.subr.bf16.mxu1 %v22874_v25  ;;  %9864 = vmatpush1.bf16.msra.mxu0 %v22899_v47  ;;  %v22926_v25 = vld [vmem:[%s30488_s1 + $0x7c8] ss:$16 sps:$4 sm:$0xff]   ;;  %v22934_v47 = vld [vmem:[%s30488_s1 + $0x7ac] ss:$16 sps:$4 sm:$0xff]  }
 0x4de   : > { %9865 = vmatprep.subr.bf16.mxu0 %v22907_v27  ;;  %v22959_v27 = vld [vmem:[%s30488_s1 + $0xd68] ss:$16 sps:$4 sm:$0xff]  }
 0x4df   : > { %v9442_v19 = vpop.f32.mrf.mxu1  ;;  %9687 = vmatmul.mubr.bf16.vlgmr.msra.gmra.mxu1 %v26538_v7  ;;  %v22911_v7 = vld [vmem:[%s30488_s1 + $0xc68] ss:$16 sps:$4 sm:$0xff]  }
 0x4e0   : > { %v27426_v37 = vadd.f32 %v9442_v19, %v9402_v48  ;;  %9737 = vmatpush1.bf16.msra.mxu1 %v22872_v39  ;;  %9768 = vmatprep.mubr.bf16.mxu1 %v26543_v40  ;;  %v22884_v40 = vld [vmem:[%s30488_s1 + $0x6a8] ss:$16 sps:$4 sm:$0xff]   ;;  %v22973_v48 = vld [vmem:[%s30488_s1 + $0xd2c] ss:$16 sps:$4 sm:$0xff]  }
 0x4e1   : > { %v9444_v14 = vpop.f32.mrf.mxu1  ;;  %9738 = vmatprep.subr.bf16.mxu1 %v22880_v20  ;;  %9866 = vmatpush1.bf16.msra.mxu0 %v22905_v21  ;;  %v22932_v39 = vld [vmem:[%s30488_s1 + $0x7a8] ss:$16 sps:$4 sm:$0xff]   ;;  %v22940_v20 = vld [vmem:[%s30488_s1 + $0x78c] ss:$16 sps:$4 sm:$0xff]  }
 0x4e2   : > { %v27438_v56 = vadd.f32 %v9444_v14, %v9404_v34  ;;  %9867 = vmatprep.subr.bf16.mxu0 %v22913_v32  ;;  %v22965_v21 = vld [vmem:[%s30488_s1 + $0xd48] ss:$16 sps:$4 sm:$0xff]   ;;  %v22946_v19 = vld [vmem:[%s30488_s1 + $0x76c] ss:$16 sps:$4 sm:$0xff]   ;;  %v19865_v14 = vld [vmem:[%s24007_s11 + $0x9c0] sm:$0xff] }
 0x4e3   : > { %v9446_v3 = vpop.f32.mrf.mxu1  ;;  %v22938_v32 = vld [vmem:[%s30488_s1 + $0x788] ss:$16 sps:$4 sm:$0xff]  }
 0x4e4   : > { %9739 = vmatpush1.bf16.msra.mxu1 %v22878_v43  ;;  %v22971_v34 = vld [vmem:[%s30488_s1 + $0xd28] ss:$16 sps:$4 sm:$0xff]   ;;  %v22979_v43 = vld [vmem:[%s30488_s1 + $0xd0c] ss:$16 sps:$4 sm:$0xff]  }
 0x4e5   : > { %v9447_v62 = vpop.f32.mrf.mxu1  ;;  %9740 = vmatprep.subr.bf16.mxu1 %v22886_v38  ;;  %9868 = vmatpush1.bf16.msra.mxu0 %v22911_v7  ;;  %v19869_v38 = vld [vmem:[%s24007_s11 + $0x9e0] sm:$0xff]  ;;  %v22944_v7 = vld [vmem:[%s30488_s1 + $0x768] ss:$16 sps:$4 sm:$0xff]  }
 0x4e6   : > { %9869 = vmatprep.subr.bf16.mxu0 %v22919_v28  ;;  %v22952_v28 = vld [vmem:[%s30488_s1 + $0x74c] ss:$16 sps:$4 sm:$0xff]   ;;  %v22977_v3 = vld [vmem:[%s30488_s1 + $0xd08] ss:$16 sps:$4 sm:$0xff]   ;;  %v19857_v62 = vld [vmem:[%s24007_s11 + $0x980] sm:$0xff] }
 0x4e8   : > { %9741 = vmatpush1.bf16.msra.mxu1 %v22884_v40  ;;  %v20122_v40 = vcombine.high %v19865_v14, %v19869_v38 }
 0x4e9   : > { %9742 = vmatprep.subr.bf16.mxu1 %v22892_v54  ;;  %9870 = vmatpush1.bf16.msra.mxu0 %v22917_v5  ;;  %v19861_v54 = vld [vmem:[%s24007_s11 + $0x9a0] sm:$0xff]  ;;  %v22950_v5 = vld [vmem:[%s30488_s1 + $0x748] ss:$16 sps:$4 sm:$0xff]  }
 0x4ea   : > { %9871 = vmatprep.subr.bf16.mxu0 %v22925_v53  ;;  %v22958_v53 = vld [vmem:[%s30488_s1 + $0x72c] ss:$16 sps:$4 sm:$0xff]  }
 0x4ec   : > { %9743 = vmatpush1.bf16.msra.mxu1 %v22890_v12  ;;  %v20121_v12 = vcombine.low %v19865_v14, %v19869_v38  ;;  %v19809_v38 = vld [vmem:[%s24007_s11 + $0x800] sm:$0xff] }
 0x4ed   : > { %9744 = vmatprep.subr.bf16.mxu1 %v22898_v61  ;;  %9872 = vmatpush1.bf16.msra.mxu0 %v22923_v46  ;;  %v20114_v61 = vcombine.high %v19857_v62, %v19861_v54  ;;  %v19849_v46 = vld [vmem:[%s24007_s11 + $0x940] sm:$0xff] }
 0x4ee   : > { %9873 = vmatprep.subr.bf16.mxu0 %v22931_v1  ;;  %v19853_v1 = vld [vmem:[%s24007_s11 + $0x960] sm:$0xff] }
 0x4f0   : > { %9745 = vmatpush1.bf16.msra.mxu1 %v22896_v45  ;;  %v22956_v45 = vld [vmem:[%s30488_s1 + $0x728] ss:$16 sps:$4 sm:$0xff]  }
 0x4f1   : > { %9746 = vmatprep.subr.bf16.mxu1 %v22904_v13  ;;  %9874 = vmatpush1.bf16.msra.mxu0 %v22929_v15  ;;  %v22964_v13 = vld [vmem:[%s30488_s1 + $0x70c] ss:$16 sps:$4 sm:$0xff]   ;;  %v20113_v15 = vcombine.low %v19857_v62, %v19861_v54  ;;  %v19929_v54 = vld [vmem:[%s24007_s11 + $0xbc0] sm:$0xff] }
 0x4f2   : > { %9875 = vmatprep.subr.bf16.mxu0 %v22937_v0  ;;  %v20106_v0 = vcombine.high %v19849_v46, %v19853_v1 }
 0x4f4   : > { %9747 = vmatpush1.bf16.msra.mxu1 %v22902_v16 }
 0x4f5   : > { %9748 = vmatprep.subr.bf16.mxu1 %v22910_v23  ;;  %9876 = vmatpush2.bf16.msra.mxu0 %v22935_v59  ;;  %v19841_v23 = vld [vmem:[%s24007_s11 + $0x900] sm:$0xff] }
 0x4f6   : > { %9877 = vmatprep.subr.bf16.mxu0 %v22943_v49  ;;  %v19845_v59 = vld [vmem:[%s24007_s11 + $0x920] sm:$0xff]  ;;  %v22970_v49 = vld [vmem:[%s30488_s1 + $0xaec] ss:$16 sps:$4 sm:$0xff]  }
 0x4f8   : > { %9749 = vmatpush1.bf16.msra.mxu1 %v22908_v57  ;;  %v20105_v57 = vcombine.low %v19849_v46, %v19853_v1  ;;  %v19921_v1 = vld [vmem:[%s24007_s11 + $0xb80] sm:$0xff] }
 0x4f9   : > { %9750 = vmatprep.subr.bf16.mxu1 %v22916_v42  ;;  %9878 = vmatpush2.bf16.msra.mxu0 %v22941_v22  ;;  %v20098_v42 = vcombine.high %v19841_v23, %v19845_v59 }
 0x4fa   : > { %9879 = vmatprep.subr.bf16.mxu0 %v22949_v63  ;;  %v19833_v63 = vld [vmem:[%s24007_s11 + $0x8c0] sm:$0xff] }
 0x4fc   : > { %9751 = vmatpush1.bf16.msra.mxu1 %v22914_v51  ;;  %v19837_v51 = vld [vmem:[%s24007_s11 + $0x8e0] sm:$0xff] }
 0x4fd   : > { %9752 = vmatprep.subr.bf16.mxu1 %v22922_v30  ;;  %9880 = vmatpush2.bf16.msra.mxu0 %v22947_v2  ;;  %v22968_v30 = vld [vmem:[%s30488_s1 + $0xae8] ss:$16 sps:$4 sm:$0xff]  }
 0x4fe   : > { %9881 = vmatprep.subr.bf16.mxu0 %v22955_v18  ;;  %v22976_v18 = vld [vmem:[%s30488_s1 + $0xacc] ss:$16 sps:$4 sm:$0xff]  }
 0x500   : > { %9753 = vmatpush2.bf16.msra.mxu1 %v22920_v9  ;;  %v20097_v9 = vcombine.low %v19841_v23, %v19845_v59  ;;  %v19913_v59 = vld [vmem:[%s24007_s11 + $0xb40] sm:$0xff] }
 0x501   : > { %9754 = vmatprep.subr.bf16.mxu1 %v22928_v10  ;;  %9882 = vmatpush2.bf16.msra.mxu0 %v22953_v24  ;;  %v20090_v10 = vcombine.high %v19833_v63, %v19837_v51 }
 0x502   : > { %9883 = vmatprep.subr.bf16.mxu0 %v22961_v6 }
 0x504   : > { %9755 = vmatpush2.bf16.msra.mxu1 %v22926_v25  ;;  %v19825_v25 = vld [vmem:[%s24007_s11 + $0x880] sm:$0xff] }
 0x505   : > { %9756 = vmatprep.subr.bf16.mxu1 %v22934_v47  ;;  %9884 = vmatpush2.bf16.msra.mxu0 %v22959_v27  ;;  %v19829_v47 = vld [vmem:[%s24007_s11 + $0x8a0] sm:$0xff]  ;;  %v22974_v27 = vld [vmem:[%s30488_s1 + $0xac8] ss:$16 sps:$4 sm:$0xff]  }
 0x506   : > { %9885 = vmatprep.subr.bf16.mxu0 %v22967_v41 }
 0x508   : > { %9757 = vmatpush2.bf16.msra.mxu1 %v22932_v39  ;;  %v22982_v39 = vld [vmem:[%s30488_s1 + $0xaac] ss:$16 sps:$4 sm:$0xff]  }
 0x509   : > { %9758 = vmatprep.subr.bf16.mxu1 %v22940_v20  ;;  %9886 = vmatpush2.bf16.msra.mxu0 %v22965_v21  ;;  %v20089_v20 = vcombine.low %v19833_v63, %v19837_v51  ;;  %v19905_v51 = vld [vmem:[%s24007_s11 + $0xb00] sm:$0xff] }
 0x50a   : > { %9887 = vmatprep.subr.bf16.mxu0 %v22973_v48  ;;  %v19817_v48 = vld [vmem:[%s24007_s11 + $0x840] sm:$0xff] }
 0x50c   : > { %9759 = vmatpush2.bf16.msra.mxu1 %v22938_v32  ;;  %v19821_v32 = vld [vmem:[%s24007_s11 + $0x860] sm:$0xff] }
 0x50d   : > { %9760 = vmatprep.subr.bf16.mxu1 %v22946_v19  ;;  %9888 = vmatpush2.bf16.msra.mxu0 %v22971_v34  ;;  %v22985_v34 = vld [vmem:[%s30488_s1 + $0xa8c] ss:$16 sps:$4 sm:$0xff]   ;;  %v20074_v14 = vcombine.high %v19817_v48, %v19821_v32 }
 0x50e   : > { %9889 = vmatprep.subr.bf16.mxu0 %v22979_v43  ;;  %v20081_v43 = vcombine.low %v19825_v25, %v19829_v47 }
 0x510   : > { %9761 = vmatpush2.bf16.msra.mxu1 %v22944_v7  ;;  %v19813_v7 = vld [vmem:[%s24007_s11 + $0x820] sm:$0xff] }
 0x511   : > { %9762 = vmatprep.subr.bf16.mxu1 %v22952_v28  ;;  %9890 = vmatpush2.bf16.msra.mxu0 %v22977_v3  ;;  %v22983_v28 = vld [vmem:[%s30488_s1 + $0xa88] ss:$16 sps:$4 sm:$0xff]   ;;  %v22988_v3 = vld [vmem:[%s30488_s1 + $0xa6c] ss:$16 sps:$4 sm:$0xff]   ;;  %v20066_v62 = vcombine.high %v19809_v38, %v19813_v7 }
 0x512   : > { %11488 = vmatprep.subr.bf16.mxu0 %v20122_v40  ;;  %v20073_v40 = vcombine.low %v19817_v48, %v19821_v32  ;;  %v23001_v48 = vld [vmem:[%s30488_s1 + $0xbc8] ss:$16 sps:$4 sm:$0xff]   ;;  %v23006_v32 = vld [vmem:[%s30488_s1 + $0xbac] ss:$16 sps:$4 sm:$0xff]  }
 0x514   : > { %9763 = vmatpush2.bf16.msra.mxu1 %v22950_v5  ;;  %9892 = vmatmul.mubr.bf16.vlgmr.msra.gmra.mxu0 %v26712_v31  ;;  %v27591_v16 = vpop.f32.mrf.mxu0  ;;  %v22962_v31 = vld [vmem:[%s30488_s1 + $0x708] ss:$16 sps:$4 sm:$0xff]   ;;  %v19933_v5 = vld [vmem:[%s24007_s11 + $0xbe0] sm:$0xff] }
 0x515   : > { %9764 = vmatprep.subr.bf16.mxu1 %v22958_v53  ;;  %11489 = vmatpush1.bf16.msra.mxu0 %v20121_v12  ;;  %v22986_v53 = vld [vmem:[%s30488_s1 + $0xa68] ss:$16 sps:$4 sm:$0xff]   ;;  %v22991_v12 = vld [vmem:[%s30488_s1 + $0xa4c] ss:$16 sps:$4 sm:$0xff]   ;;  %v20186_v46 = vcombine.high %v19929_v54, %v19933_v5 }
 0x516   : > { %11490 = vmatprep.subr.bf16.mxu0 %v20114_v61  ;;  %v27601_v22 = vpop.f32.mrf.mxu0  ;;  %v20065_v61 = vcombine.low %v19809_v38, %v19813_v7  ;;  %v23009_v38 = vld [vmem:[%s30488_s1 + $0xb8c] ss:$16 sps:$4 sm:$0xff]  }
 0x518   : > { %9765 = vmatpush2.bf16.msra.mxu1 %v22956_v45  ;;  %v9651_v2 = vpop.f32.mrf.mxu0  ;;  %v19925_v45 = vld [vmem:[%s24007_s11 + $0xba0] sm:$0xff] }
 0x519   : > { %9766 = vmatprep.subr.bf16.mxu1 %v22964_v13  ;;  %11491 = vmatpush1.bf16.msra.mxu0 %v20113_v15  ;;  %v22989_v13 = vld [vmem:[%s30488_s1 + $0xa48] ss:$16 sps:$4 sm:$0xff]   ;;  %v22994_v15 = vld [vmem:[%s30488_s1 + $0xa2c] ss:$16 sps:$4 sm:$0xff]   ;;  %v20178_v23 = vcombine.high %v19921_v1, %v19925_v45 }
 0x51a   : > { %11492 = vmatprep.subr.bf16.mxu0 %v20106_v0  ;;  %v9652_v24 = vpop.f32.mrf.mxu0  ;;  %v20185_v0 = vcombine.low %v19929_v54, %v19933_v5  ;;  %v22995_v2 = vld [vmem:[%s30488_s1 + $0xa08] ss:$16 sps:$4 sm:$0xff]   ;;  %v23012_v54 = vld [vmem:[%s30488_s1 + $0xb6c] ss:$16 sps:$4 sm:$0xff]  }
 0x51b   : > { %v19897_v24 = vld [vmem:[%s24007_s11 + $0xac0] sm:$0xff] }
 0x51c   : > { %9767 = vmatpush2.bf16.msra.mxu1 %v22962_v31  ;;  %v19917_v31 = vld [vmem:[%s24007_s11 + $0xb60] sm:$0xff] }
 0x51d   : > { %9818 = vmatprep.subr.bf16.mxu1 %v22970_v49  ;;  %11493 = vmatpush1.bf16.msra.mxu0 %v20105_v57  ;;  %v22992_v49 = vld [vmem:[%s30488_s1 + $0xa28] ss:$16 sps:$4 sm:$0xff]   ;;  %v22997_v57 = vld [vmem:[%s30488_s1 + $0xa0c] ss:$16 sps:$4 sm:$0xff]   ;;  %v20170_v63 = vcombine.high %v19913_v59, %v19917_v31 }
 0x51e   : > { %11494 = vmatprep.subr.bf16.mxu0 %v20098_v42  ;;  %v20177_v42 = vcombine.low %v19921_v1, %v19925_v45  ;;  %v23015_v1 = vld [vmem:[%s30488_s1 + $0xb4c] ss:$16 sps:$4 sm:$0xff]  }
 0x51f   : > { %v27611_v6 = vpop.f32.mrf.mxu1  ;;  %9769 = vmatmul.mubr.bf16.vlgmr.msra.gmra.mxu1 %v26762_v60  ;;  %v20082_v60 = vcombine.high %v19825_v25, %v19829_v47  ;;  %v19901_v25 = vld [vmem:[%s24007_s11 + $0xae0] sm:$0xff]  ;;  %v22998_v47 = vld [vmem:[%s30488_s1 + $0xbe8] ss:$16 sps:$4 sm:$0xff]  }
 0x520   : > { %9819 = vmatpush1.bf16.msra.mxu1 %v22968_v30  ;;  %9850 = vmatprep.mubr.bf16.mxu1 %v26767_v11  ;;  %v22980_v11 = vld [vmem:[%s30488_s1 + $0xaa8] ss:$16 sps:$4 sm:$0xff]   ;;  %v19909_v30 = vld [vmem:[%s24007_s11 + $0xb20] sm:$0xff] }
 0x521   : > { %v27620_v41 = vpop.f32.mrf.mxu1  ;;  %9820 = vmatprep.subr.bf16.mxu1 %v22976_v18  ;;  %11495 = vmatpush1.bf16.msra.mxu0 %v20097_v9  ;;  %v23000_v18 = vld [vmem:[%s30488_s1 + $0xbec] ss:$16 sps:$4 sm:$0xff]   ;;  %v20169_v9 = vcombine.low %v19913_v59, %v19917_v31 }
 0x522   : > { %11496 = vmatprep.subr.bf16.mxu0 %v20090_v10  ;;  %v20162_v10 = vcombine.high %v19905_v51, %v19909_v30  ;;  %v23021_v31 = vld [vmem:[%s30488_s1 + $0xb0c] ss:$16 sps:$4 sm:$0xff]  }
 0x523   : > { %v9528_v21 = vpop.f32.mrf.mxu1 }
 0x524   : > { %9821 = vmatpush1.bf16.msra.mxu1 %v22974_v27  ;;  %v23003_v27 = vld [vmem:[%s30488_s1 + $0xbcc] ss:$16 sps:$4 sm:$0xff]   ;;  %v19893_v21 = vld [vmem:[%s24007_s11 + $0xaa0] sm:$0xff] }
 0x525   : > { %v9529_v19 = vpop.f32.mrf.mxu1  ;;  %9822 = vmatprep.subr.bf16.mxu1 %v22982_v39  ;;  %11497 = vmatpush1.bf16.msra.mxu0 %v20089_v20  ;;  %v20161_v39 = vcombine.low %v19905_v51, %v19909_v30  ;;  %v20154_v20 = vcombine.high %v19897_v24, %v19901_v25  ;;  %v23024_v51 = vld [vmem:[%s30488_s1 + $0xeec] ss:$16 sps:$4 sm:$0xff]   ;;  %v9486_v30 = vadd.f32 %v27182_v55, %v27438_v56 }
 0x526   : > { %11498 = vmatprep.subr.bf16.mxu0 %v20082_v60  ;;  %v19889_v60 = vld [vmem:[%s24007_s11 + $0xa80] sm:$0xff] }
 0x527   : > { %v20146_v19 = vcombine.high %v19889_v60, %v19893_v21  ;;  %v20145_v7 = vcombine.low %v19889_v60, %v19893_v21  ;;  %v23033_v60 = vld [vmem:[%s30488_s1 + $0xe8c] ss:$16 sps:$4 sm:$0xff]  }
 0x528   : > { %9823 = vmatpush1.bf16.msra.mxu1 %v22980_v11  ;;  %v20153_v11 = vcombine.low %v19897_v24, %v19901_v25 }
 0x529   : > { %9824 = vmatprep.subr.bf16.mxu1 %v22985_v34  ;;  %11499 = vmatpush1.bf16.msra.mxu0 %v20081_v43  ;;  %v19881_v34 = vld [vmem:[%s24007_s11 + $0xa40] sm:$0xff] }
 0x52a   : > { %11500 = vmatprep.subr.bf16.mxu0 %v20074_v14  ;;  %v19885_v43 = vld [vmem:[%s24007_s11 + $0xa60] sm:$0xff]  ;;  %v23004_v14 = vld [vmem:[%s30488_s1 + $0xba8] ss:$16 sps:$4 sm:$0xff]  }
 0x52b   : > { %v20137_v5 = vcombine.low %v19881_v34, %v19885_v43 }
 0x52c   : > { %9825 = vmatpush1.bf16.msra.mxu1 %v22983_v28  ;;  %v20138_v28 = vcombine.high %v19881_v34, %v19885_v43  ;;  %v19850_v34 = vld [vmem:[%s24007_s11 + $0x948] sm:$0xff] }
 0x52d   : > { %9826 = vmatprep.subr.bf16.mxu1 %v22988_v3  ;;  %11501 = vmatpush1.bf16.msra.mxu0 %v20073_v40  ;;  %v19873_v3 = vld [vmem:[%s24007_s11 + $0xa00] sm:$0xff]  ;;  %v19854_v43 = vld [vmem:[%s24007_s11 + $0x968] sm:$0xff] }
 0x52e   : > { %11502 = vmatprep.subr.bf16.mxu0 %v20066_v62  ;;  %v19877_v40 = vld [vmem:[%s24007_s11 + $0xa20] sm:$0xff]  ;;  %v23007_v62 = vld [vmem:[%s30488_s1 + $0xb88] ss:$16 sps:$4 sm:$0xff]  }
 0x52f   : > { %v20129_v45 = vcombine.low %v19873_v3, %v19877_v40 }
 0x530   : > { %9827 = vmatpush1.bf16.msra.mxu1 %v22986_v53  ;;  %v20130_v53 = vcombine.high %v19873_v3, %v19877_v40  ;;  %v19842_v3 = vld [vmem:[%s24007_s11 + $0x908] sm:$0xff] }
 0x531   : > { %9828 = vmatprep.subr.bf16.mxu1 %v22991_v12  ;;  %11503 = vmatpush1.bf16.msra.mxu0 %v20065_v61  ;;  %v27706_v12 = vld [vmem:[%s24007_s11 + $0x9c8] sm:$0xff] }
 0x532   : > { %11504 = vmatprep.subr.bf16.mxu0 %v20186_v46  ;;  %v27709_v61 = vld [vmem:[%s24007_s11 + $0x9e8] sm:$0xff] }
 0x533   : > { %v23010_v46 = vld [vmem:[%s30488_s1 + $0xb68] ss:$16 sps:$4 sm:$0xff]  }
 0x534   : > { %9829 = vmatpush1.bf16.msra.mxu1 %v22989_v13  ;;  %v20124_v13 = vcombine.high %v27706_v12, %v27709_v61  ;;  %v19846_v40 = vld [vmem:[%s24007_s11 + $0x928] sm:$0xff] }
 0x535   : > { %9830 = vmatprep.subr.bf16.mxu1 %v22994_v15  ;;  %11505 = vmatpush2.bf16.msra.mxu0 %v20185_v0  ;;  %v23013_v15 = vld [vmem:[%s30488_s1 + $0xb48] ss:$16 sps:$4 sm:$0xff]   ;;  %v23018_v0 = vld [vmem:[%s30488_s1 + $0xb2c] ss:$16 sps:$4 sm:$0xff]  }
 0x536   : > { %11506 = vmatprep.subr.bf16.mxu0 %v20178_v23  ;;  %v23016_v23 = vld [vmem:[%s30488_s1 + $0xb28] ss:$16 sps:$4 sm:$0xff]  }
 0x538   : > { %9831 = vmatpush1.bf16.msra.mxu1 %v22992_v49 }
 0x539   : > { %9832 = vmatprep.subr.bf16.mxu1 %v22997_v57  ;;  %11507 = vmatpush2.bf16.msra.mxu0 %v20177_v42  ;;  %v9484_v57 = vadd.f32 %v27168_v8, %v27426_v37  ;;  %v23019_v42 = vld [vmem:[%s30488_s1 + $0xb08] ss:$16 sps:$4 sm:$0xff]   ;;  %v23027_v37 = vld [vmem:[%s30488_s1 + $0xecc] ss:$16 sps:$4 sm:$0xff]  }
 0x53a   : > { %11508 = vmatprep.subr.bf16.mxu0 %v20170_v63  ;;  %v23022_v8 = vld [vmem:[%s30488_s1 + $0xee8] ss:$16 sps:$4 sm:$0xff]  }
 0x53c   : > { %9833 = vmatpush1.bf16.msra.mxu1 %v22995_v2  ;;  %v9525_v2 = vadd.f32 %v27611_v6, %v9484_v57  ;;  %v23025_v6 = vld [vmem:[%s30488_s1 + $0xec8] ss:$16 sps:$4 sm:$0xff]  }
 0x53d   : > { %9834 = vmatprep.subr.bf16.mxu1 %v23000_v18  ;;  %11509 = vmatpush2.bf16.msra.mxu0 %v20169_v9  ;;  %v9527_v9 = vadd.f32 %v27620_v41, %v9486_v30  ;;  %v23048_v30 = vld [vmem:[%s30488_s1 + $0xfec] ss:$16 sps:$4 sm:$0xff]  }
 0x53e   : > { %11510 = vmatprep.subr.bf16.mxu0 %v20162_v10  ;;  %v9566_v10 = vadd.f32 %v27383_v58, %v9525_v2  ;;  %v23030_v58 = vld [vmem:[%s30488_s1 + $0xeac] ss:$16 sps:$4 sm:$0xff]  }
 0x53f   : > { %v9568_v55 = vadd.f32 %v27394_v36, %v9527_v9  ;;  %v23028_v36 = vld [vmem:[%s30488_s1 + $0xea8] ss:$16 sps:$4 sm:$0xff]  }
 0x540   : > { %9835 = vmatpush2.bf16.msra.mxu1 %v22998_v47  ;;  %v23046_v9 = vld [vmem:[%s30488_s1 + $0xfe8] ss:$16 sps:$4 sm:$0xff]  }
 0x541   : > { %9836 = vmatprep.subr.bf16.mxu1 %v23003_v27  ;;  %11511 = vmatpush2.bf16.msra.mxu0 %v20161_v39  ;;  %v19858_v39 = vld [vmem:[%s24007_s11 + $0x988] sm:$0xff] }
 0x542   : > { %11512 = vmatprep.subr.bf16.mxu0 %v20154_v20  ;;  %v19862_v20 = vld [vmem:[%s24007_s11 + $0x9a8] sm:$0xff] }
 0x544   : > { %9837 = vmatpush2.bf16.msra.mxu1 %v23001_v48  ;;  %v20123_v48 = vcombine.low %v27706_v12, %v27709_v61  ;;  %v19834_v12 = vld [vmem:[%s24007_s11 + $0x8c8] sm:$0xff] }
 0x545   : > { %9838 = vmatprep.subr.bf16.mxu1 %v23006_v32  ;;  %11513 = vmatpush2.bf16.msra.mxu0 %v20153_v11  ;;  %v20116_v11 = vcombine.high %v19858_v39, %v19862_v20  ;;  %v19838_v61 = vld [vmem:[%s24007_s11 + $0x8e8] sm:$0xff] }
 0x546   : > { %11514 = vmatprep.subr.bf16.mxu0 %v20146_v19  ;;  %v23031_v19 = vld [vmem:[%s30488_s1 + $0xe88] ss:$16 sps:$4 sm:$0xff]  }
 0x548   : > { %9839 = vmatpush2.bf16.msra.mxu1 %v23004_v14  ;;  %v23036_v14 = vld [vmem:[%s30488_s1 + $0xe6c] ss:$16 sps:$4 sm:$0xff]  }
 0x549   : > { %9840 = vmatprep.subr.bf16.mxu1 %v23009_v38  ;;  %11515 = vmatpush2.bf16.msra.mxu0 %v20145_v7  ;;  %v20115_v38 = vcombine.low %v19858_v39, %v19862_v20  ;;  %v20108_v7 = vcombine.high %v19850_v34, %v19854_v43  ;;  %v23057_v39 = vld [vmem:[%s30488_s1 + $0xf8c] ss:$16 sps:$4 sm:$0xff]  }
 0x54a   : > { %11516 = vmatprep.subr.bf16.mxu0 %v20138_v28  ;;  %v23034_v28 = vld [vmem:[%s30488_s1 + $0xe68] ss:$16 sps:$4 sm:$0xff]  }
 0x54c   : > { %9841 = vmatpush2.bf16.msra.mxu1 %v23007_v62  ;;  %v23039_v62 = vld [vmem:[%s30488_s1 + $0xe4c] ss:$16 sps:$4 sm:$0xff]  }
 0x54d   : > { %9842 = vmatprep.subr.bf16.mxu1 %v23012_v54  ;;  %11517 = vmatpush2.bf16.msra.mxu0 %v20137_v5  ;;  %v20107_v54 = vcombine.low %v19850_v34, %v19854_v43  ;;  %v20100_v5 = vcombine.high %v19842_v3, %v19846_v40 }
 0x54e   : > { %11518 = vmatprep.subr.bf16.mxu0 %v20130_v53  ;;  %v23037_v53 = vld [vmem:[%s30488_s1 + $0xe48] ss:$16 sps:$4 sm:$0xff]  }
 0x550   : > { %9843 = vmatpush2.bf16.msra.mxu1 %v23010_v46  ;;  %v23042_v46 = vld [vmem:[%s30488_s1 + $0xe2c] ss:$16 sps:$4 sm:$0xff]  }
 0x551   : > { %9844 = vmatprep.subr.bf16.mxu1 %v23015_v1  ;;  %11519 = vmatpush2.bf16.msra.mxu0 %v20129_v45  ;;  %v20099_v1 = vcombine.low %v19842_v3, %v19846_v40  ;;  %v20092_v45 = vcombine.high %v19834_v12, %v19838_v61 }
 0x552   : > { %11570 = vmatprep.subr.bf16.mxu0 %v20124_v13  ;;  %v23040_v13 = vld [vmem:[%s30488_s1 + $0xe28] ss:$16 sps:$4 sm:$0xff]  }
 0x554   : > { %9845 = vmatpush2.bf16.msra.mxu1 %v23013_v15  ;;  %v27728_v59 = vpop.f32.mrf.mxu0  ;;  %v19826_v15 = vld [vmem:[%s24007_s11 + $0x888] sm:$0xff] }
 0x555   : > { %9846 = vmatprep.subr.bf16.mxu1 %v23018_v0  ;;  %v19830_v0 = vld [vmem:[%s24007_s11 + $0x8a8] sm:$0xff] }
 0x556   : > { %v27733_v49 = vpop.f32.mrf.mxu0  ;;  %v20084_v57 = vcombine.high %v19826_v15, %v19830_v0  ;;  %v20083_v2 = vcombine.low %v19826_v15, %v19830_v0  ;;  %v23069_v15 = vld [vmem:[%s30488_s1 + $0xf0c] ss:$16 sps:$4 sm:$0xff]  }
 0x558   : > { %9847 = vmatpush2.bf16.msra.mxu1 %v23016_v23  ;;  %v9733_v63 = vpop.f32.mrf.mxu0  ;;  %v23045_v23 = vld [vmem:[%s30488_s1 + $0xe0c] ss:$16 sps:$4 sm:$0xff]  }
 0x559   : > { %9848 = vmatprep.subr.bf16.mxu1 %v23021_v31  ;;  %v20091_v31 = vcombine.low %v19834_v12, %v19838_v61  ;;  %v19818_v63 = vld [vmem:[%s24007_s11 + $0x848] sm:$0xff] }
 0x55a   : > { %v9734_v18 = vpop.f32.mrf.mxu0 }
 0x55c   : > { %9849 = vmatpush2.bf16.msra.mxu1 %v23019_v42  ;;  %v23043_v42 = vld [vmem:[%s30488_s1 + $0xe08] ss:$16 sps:$4 sm:$0xff]  }
 0x55d   : > { %9900 = vmatprep.subr.bf16.mxu1 %v23024_v51  ;;  %v19822_v51 = vld [vmem:[%s24007_s11 + $0x868] sm:$0xff] }
 0x55e   : > { %v20076_v18 = vcombine.high %v19818_v63, %v19822_v51 }
 0x55f   : > { %v9606_v24 = vpop.f32.mrf.mxu1  ;;  %9851 = vmatmul.mubr.bf16.vlgmr.msra.gmra.mxu1 %v26983_v4 }
 0x560   : > { %v9607_v56 = vadd.f32 %v9606_v24, %v9566_v10  ;;  %9901 = vmatpush1.bf16.msra.mxu1 %v23022_v8  ;;  %9932 = vmatprep.mubr.bf16.mxu1 %v26988_v33  ;;  %v19810_v8 = vld [vmem:[%s24007_s11 + $0x808] sm:$0xff]  ;;  %v20075_v24 = vcombine.low %v19818_v63, %v19822_v51 }
 0x561   : > { %v9608_v41 = vpop.f32.mrf.mxu1  ;;  %9902 = vmatprep.subr.bf16.mxu1 %v23027_v37  ;;  %v19814_v37 = vld [vmem:[%s24007_s11 + $0x828] sm:$0xff] }
 0x562   : > { %v9609_v25 = vadd.f32 %v9608_v41, %v9568_v55  ;;  %v9941_v47 = vmax.f32 %v9607_v56, 0.0  ;;  %v23051_v10 = vld [vmem:[%s30488_s1 + $0xfcc] ss:$16 sps:$4 sm:$0xff]   ;;  %v20068_v55 = vcombine.high %v19810_v8, %v19814_v37  ;;  %v23049_v56 = vld [vmem:[%s30488_s1 + $0xfc8] ss:$16 sps:$4 sm:$0xff]  }
 0x563   : > { %v9610_v4 = vpop.f32.mrf.mxu1  ;;  %v19934_v41 = vld [vmem:[%s24007_s11 + $0xbe8] sm:$0xff] }
 0x564   : > { %v9942_v27 = vmax.f32 %v9609_v25, 0.0  ;;  %9903 = vmatpush1.bf16.msra.mxu1 %v23025_v6  ;;  %v27775_v32 = vpack.c.bf16 %v9941_v47, %v9941_v47  ;;  %v19930_v6 = vld [vmem:[%s24007_s11 + $0xbc8] sm:$0xff]  ;;  %v20067_v25 = vcombine.low %v19810_v8, %v19814_v37 }
 0x565   : > { %v9611_v33 = vpop.f32.mrf.mxu1  ;;  %9904 = vmatprep.subr.bf16.mxu1 %v23030_v58  ;;  %v23054_v58 = vld [vmem:[%s30488_s1 + $0xfac] ss:$16 sps:$4 sm:$0xff]   ;;  %v20188_v47 = vcombine.high %v19930_v6, %v19934_v41  ;;  %v23052_v4 = vld [vmem:[%s30488_s1 + $0xfa8] ss:$16 sps:$4 sm:$0xff]   ;;  %v20187_v20 = vcombine.low %v19930_v6, %v19934_v41 }
 0x566   : > { %v27771_v21 = vpack.c.bf16 %v9942_v27, %v9942_v27  ;;  %v19922_v27 = vld [vmem:[%s24007_s11 + $0xb88] sm:$0xff] }
 0x567   : > { %v23067_v63 = vld [vmem:[%s30488_s1 + $0xf08] ss:$16 sps:$4 sm:$0xff]  }
 0x568   : > { %9905 = vmatpush1.bf16.msra.mxu1 %v23028_v36  ;;  %11520 = vmatprep.mubr.bf16.mxu0 %v27771_v21  ;;  %v19926_v36 = vld [vmem:[%s24007_s11 + $0xba8] sm:$0xff] }
 0x569   : > { %11521 = vmatmul.mubr.bf16.vlgmr.msra.gmra.mxu0 %v27775_v32  ;;  %9906 = vmatprep.subr.bf16.mxu1 %v23033_v60  ;;  %v20180_v33 = vcombine.high %v19922_v27, %v19926_v36  ;;  %v23055_v60 = vld [vmem:[%s30488_s1 + $0xf88] ss:$16 sps:$4 sm:$0xff]   ;;  %v20179_v34 = vcombine.low %v19922_v27, %v19926_v36 }
 0x56a   : > { %11571 = vmatpush1.bf16.msra.mxu0 %v20123_v48  ;;  %11602 = vmatprep.mubr.bf16.mxu0 %v27771_v21  ;;  %v19914_v48 = vld [vmem:[%s24007_s11 + $0xb48] sm:$0xff] }
 0x56b   : > { %11572 = vmatprep.subr.bf16.mxu0 %v20116_v11  ;;  %v19918_v11 = vld [vmem:[%s24007_s11 + $0xb68] sm:$0xff] }
 0x56c   : > { %9907 = vmatpush1.bf16.msra.mxu1 %v23031_v19  ;;  %v23060_v19 = vld [vmem:[%s30488_s1 + $0xf6c] ss:$16 sps:$4 sm:$0xff]   ;;  %v20172_v43 = vcombine.high %v19914_v48, %v19918_v11  ;;  %v20171_v3 = vcombine.low %v19914_v48, %v19918_v11  ;;  %v19993_v48 = vld [vmem:[%s24007_s11 + $0xdc0] sm:$0xff] }
 0x56d   : > { %9908 = vmatprep.subr.bf16.mxu1 %v23036_v14  ;;  %v23058_v14 = vld [vmem:[%s30488_s1 + $0xf68] ss:$16 sps:$4 sm:$0xff]   ;;  %v19997_v11 = vld [vmem:[%s24007_s11 + $0xde0] sm:$0xff] }
 0x56e   : > { %11573 = vmatpush1.bf16.msra.mxu0 %v20115_v38  ;;  %v19906_v38 = vld [vmem:[%s24007_s11 + $0xb08] sm:$0xff] }
 0x56f   : > { %11574 = vmatprep.subr.bf16.mxu0 %v20108_v7  ;;  %v19910_v7 = vld [vmem:[%s24007_s11 + $0xb28] sm:$0xff] }
 0x570   : > { %9909 = vmatpush1.bf16.msra.mxu1 %v23034_v28  ;;  %v23063_v28 = vld [vmem:[%s30488_s1 + $0xf4c] ss:$16 sps:$4 sm:$0xff]   ;;  %v20164_v40 = vcombine.high %v19906_v38, %v19910_v7  ;;  %v20163_v12 = vcombine.low %v19906_v38, %v19910_v7  ;;  %v19855_v38 = vld [vmem:[%s24007_s11 + $0x970] sm:$0xff] }
 0x571   : > { %9910 = vmatprep.subr.bf16.mxu1 %v23039_v62  ;;  %v23061_v62 = vld [vmem:[%s30488_s1 + $0xf48] ss:$16 sps:$4 sm:$0xff]  }
 0x572   : > { %11575 = vmatpush1.bf16.msra.mxu0 %v20107_v54  ;;  %v19898_v54 = vld [vmem:[%s24007_s11 + $0xac8] sm:$0xff] }
 0x573   : > { %11576 = vmatprep.subr.bf16.mxu0 %v20100_v5  ;;  %v19902_v5 = vld [vmem:[%s24007_s11 + $0xae8] sm:$0xff] }
 0x574   : > { %9911 = vmatpush1.bf16.msra.mxu1 %v23037_v53  ;;  %v23066_v53 = vld [vmem:[%s30488_s1 + $0xf2c] ss:$16 sps:$4 sm:$0xff]   ;;  %v20156_v61 = vcombine.high %v19898_v54, %v19902_v5  ;;  %v20155_v0 = vcombine.low %v19898_v54, %v19902_v5  ;;  %v19843_v5 = vld [vmem:[%s24007_s11 + $0x910] sm:$0xff] }
 0x575   : > { %9912 = vmatprep.subr.bf16.mxu1 %v23042_v46  ;;  %v23064_v46 = vld [vmem:[%s30488_s1 + $0xf28] ss:$16 sps:$4 sm:$0xff]  }
 0x576   : > { %11577 = vmatpush1.bf16.msra.mxu0 %v20099_v1  ;;  %v19890_v1 = vld [vmem:[%s24007_s11 + $0xa88] sm:$0xff] }
 0x577   : > { %11578 = vmatprep.subr.bf16.mxu0 %v20092_v45  ;;  %v19894_v45 = vld [vmem:[%s24007_s11 + $0xaa8] sm:$0xff] }
 0x578   : > { %9913 = vmatpush1.bf16.msra.mxu1 %v23040_v13  ;;  %v19882_v51 = vld [vmem:[%s24007_s11 + $0xa48] sm:$0xff] }
 0x579   : > { %9914 = vmatprep.subr.bf16.mxu1 %v23045_v23 }
 0x57a   : > { %11579 = vmatpush1.bf16.msra.mxu0 %v20091_v31  ;;  %v20148_v31 = vcombine.high %v19890_v1, %v19894_v45 }
 0x57b   : > { %11580 = vmatprep.subr.bf16.mxu0 %v20084_v57  ;;  %v23843_v57 = vld [vmem:[%s30489_s2] sm:$0xf] }
 0x57c   : > { %9915 = vmatpush1.bf16.msra.mxu1 %v23043_v42  ;;  %v6716_v42 = vrot.slane %v23843_v57, %v25701_v17 }
 0x57d   : > { %9916 = vmatprep.subr.bf16.mxu1 %v23048_v30  ;;  %v19886_v30 = vld [vmem:[%s24007_s11 + $0xa68] sm:$0xff] }
 0x57e   : > { %11581 = vmatpush1.bf16.msra.mxu0 %v20083_v2  ;;  %v20140_v37 = vcombine.high %v19882_v51, %v19886_v30  ;;  %v20139_v6 = vcombine.low %v19882_v51, %v19886_v30  ;;  %v19961_v51 = vld [vmem:[%s24007_s11 + $0xcc0] sm:$0xff] }
 0x57f   : > { %11582 = vmatprep.subr.bf16.mxu0 %v20076_v18  ;;  %v6720_v18 = vrot.slane %v23843_v57, %v25706_v52  ;;  %v19835_v57 = vld [vmem:[%s24007_s11 + $0x8d0] sm:$0xff]  ;;  %v19965_v30 = vld [vmem:[%s24007_s11 + $0xce0] sm:$0xff] }
 0x580   : > { %9917 = vmatpush2.bf16.msra.mxu1 %v23046_v9  ;;  %v20147_v9 = vcombine.low %v19890_v1, %v19894_v45 }
 0x581   : > { %9918 = vmatprep.subr.bf16.mxu1 %v23051_v10  ;;  %v9648_v10 = vadd.f32 %v27591_v16, %v6716_v42  ;;  %v19871_v16 = vld [vmem:[%s24007_s11 + $0x9f0] sm:$0xff] }
 0x582   : > { %11583 = vmatpush1.bf16.msra.mxu0 %v20075_v24  ;;  %v19874_v24 = vld [vmem:[%s24007_s11 + $0xa08] sm:$0xff]  ;;  %v19839_v42 = vld [vmem:[%s24007_s11 + $0x8f0] sm:$0xff] }
 0x583   : > { %11584 = vmatprep.subr.bf16.mxu0 %v20068_v55  ;;  %v19878_v55 = vld [vmem:[%s24007_s11 + $0xa28] sm:$0xff] }
 0x584   : > { %9919 = vmatpush2.bf16.msra.mxu1 %v23049_v56  ;;  %v9650_v56 = vadd.f32 %v27601_v22, %v6720_v18  ;;  %v20131_v22 = vcombine.low %v19874_v24, %v19878_v55  ;;  %v20094_v18 = vcombine.high %v19835_v57, %v19839_v42 }
 0x585   : > { %9920 = vmatprep.subr.bf16.mxu1 %v23054_v58  ;;  %v20132_v58 = vcombine.high %v19874_v24, %v19878_v55  ;;  %v19953_v24 = vld [vmem:[%s24007_s11 + $0xc80] sm:$0xff] }
 0x586   : > { %11585 = vmatpush1.bf16.msra.mxu0 %v20067_v25  ;;  %v19957_v55 = vld [vmem:[%s24007_s11 + $0xca0] sm:$0xff] }
 0x587   : > { %11586 = vmatprep.subr.bf16.mxu0 %v20188_v47  ;;  %v19867_v47 = vld [vmem:[%s24007_s11 + $0x9d0] sm:$0xff] }
 0x588   : > { %9921 = vmatpush2.bf16.msra.mxu1 %v23052_v4 }
 0x589   : > { %9922 = vmatprep.subr.bf16.mxu1 %v23057_v39  ;;  %v20126_v39 = vcombine.high %v19867_v47, %v19871_v16 }
 0x58a   : > { %11587 = vmatpush2.bf16.msra.mxu0 %v20187_v20  ;;  %v19859_v20 = vld [vmem:[%s24007_s11 + $0x990] sm:$0xff] }
 0x58b   : > { %11588 = vmatprep.subr.bf16.mxu0 %v20180_v33 }
 0x58c   : > { %9923 = vmatpush2.bf16.msra.mxu1 %v23055_v60  ;;  %v20125_v60 = vcombine.low %v19867_v47, %v19871_v16  ;;  %v19823_v47 = vld [vmem:[%s24007_s11 + $0x870] sm:$0xff]  ;;  %v20210_v16 = vcombine.high %v19953_v24, %v19957_v55 }
 0x58d   : > { %9924 = vmatprep.subr.bf16.mxu1 %v23060_v19 }
 0x58e   : > { %11589 = vmatpush2.bf16.msra.mxu0 %v20179_v34  ;;  %v20249_v34 = vcombine.low %v19993_v48, %v19997_v11 }
 0x58f   : > { %11590 = vmatprep.subr.bf16.mxu0 %v20172_v43  ;;  %v20250_v43 = vcombine.high %v19993_v48, %v19997_v11  ;;  %v19937_v48 = vld [vmem:[%s24007_s11 + $0xc00] sm:$0xff] }
 0x590   : > { %9925 = vmatpush2.bf16.msra.mxu1 %v23058_v14  ;;  %v19851_v14 = vld [vmem:[%s24007_s11 + $0x950] sm:$0xff]  ;;  %v19941_v11 = vld [vmem:[%s24007_s11 + $0xc20] sm:$0xff] }
 0x591   : > { %9926 = vmatprep.subr.bf16.mxu1 %v23063_v28  ;;  %v19985_v28 = vld [vmem:[%s24007_s11 + $0xd80] sm:$0xff] }
 0x592   : > { %11591 = vmatpush2.bf16.msra.mxu0 %v20171_v3  ;;  %v19989_v3 = vld [vmem:[%s24007_s11 + $0xda0] sm:$0xff] }
 0x593   : > { %11592 = vmatprep.subr.bf16.mxu0 %v20164_v40  ;;  %v20110_v40 = vcombine.high %v19851_v14, %v19855_v38  ;;  %v20242_v54 = vcombine.high %v19985_v28, %v19989_v3 }
 0x594   : > { %9927 = vmatpush2.bf16.msra.mxu1 %v23061_v62  ;;  %v27873_v13 = vpop.f32.mrf.mxu0  ;;  %v20241_v62 = vcombine.low %v19985_v28, %v19989_v3  ;;  %v20057_v28 = vld [vmem:[%s24007_s11 + $0xfc0] sm:$0xff] }
 0x595   : > { %9928 = vmatprep.subr.bf16.mxu1 %v23066_v53  ;;  %v19847_v53 = vld [vmem:[%s24007_s11 + $0x930] sm:$0xff]  ;;  %v20061_v3 = vld [vmem:[%s24007_s11 + $0xfe0] sm:$0xff] }
 0x596   : > { %11593 = vmatpush2.bf16.msra.mxu0 %v20163_v12  ;;  %v27878_v23 = vpop.f32.mrf.mxu0  ;;  %v20109_v12 = vcombine.low %v19851_v14, %v19855_v38  ;;  %v20102_v1 = vcombine.high %v19843_v5, %v19847_v53  ;;  %v19931_v14 = vld [vmem:[%s24007_s11 + $0xbd0] sm:$0xff] }
 0x597   : > { %11594 = vmatprep.subr.bf16.mxu0 %v20156_v61  ;;  %v19977_v61 = vld [vmem:[%s24007_s11 + $0xd40] sm:$0xff]  ;;  %v19935_v38 = vld [vmem:[%s24007_s11 + $0xbf0] sm:$0xff] }
 0x598   : > { %9929 = vmatpush2.bf16.msra.mxu1 %v23064_v46  ;;  %v9815_v2 = vpop.f32.mrf.mxu0  ;;  %v19981_v46 = vld [vmem:[%s24007_s11 + $0xd60] sm:$0xff] }
 0x599   : > { %9930 = vmatprep.subr.bf16.mxu1 %v23069_v15  ;;  %v20233_v45 = vcombine.low %v19977_v61, %v19981_v46  ;;  %v20234_v15 = vcombine.high %v19977_v61, %v19981_v46  ;;  %v20101_v2 = vcombine.low %v19843_v5, %v19847_v53  ;;  %v19923_v5 = vld [vmem:[%s24007_s11 + $0xb90] sm:$0xff]  ;;  %v20049_v61 = vld [vmem:[%s24007_s11 + $0xf80] sm:$0xff] }
 0x59a   : > { %11595 = vmatpush2.bf16.msra.mxu0 %v20155_v0  ;;  %v9816_v8 = vpop.f32.mrf.mxu0  ;;  %v19969_v0 = vld [vmem:[%s24007_s11 + $0xd00] sm:$0xff]  ;;  %v19927_v53 = vld [vmem:[%s24007_s11 + $0xbb0] sm:$0xff] }
 0x59b   : > { %11596 = vmatprep.subr.bf16.mxu0 %v20148_v31  ;;  %v19973_v31 = vld [vmem:[%s24007_s11 + $0xd20] sm:$0xff]  ;;  %v19827_v8 = vld [vmem:[%s24007_s11 + $0x890] sm:$0xff] }
 0x59c   : > { %9931 = vmatpush2.bf16.msra.mxu1 %v23067_v63  ;;  %v20226_v63 = vcombine.high %v19969_v0, %v19973_v31  ;;  %v20053_v46 = vld [vmem:[%s24007_s11 + $0xfa0] sm:$0xff] }
 0x59d   : > { %11529 = vmatprep.subr.bf16.mxu1 %v20250_v43 }
 0x59e   : > { %11597 = vmatpush2.bf16.msra.mxu0 %v20147_v9  ;;  %v20225_v9 = vcombine.low %v19969_v0, %v19973_v31  ;;  %v19915_v0 = vld [vmem:[%s24007_s11 + $0xb50] sm:$0xff] }
 0x59f   : > { %v9688_v41 = vpop.f32.mrf.mxu1  ;;  %9933 = vmatmul.mubr.bf16.vlgmr.msra.gmra.mxu1 %v27201_v35  ;;  %11598 = vmatprep.subr.bf16.mxu0 %v20140_v37  ;;  %v19863_v35 = vld [vmem:[%s24007_s11 + $0x9b0] sm:$0xff] }
 0x5a0   : > { %v27895_v25 = vadd.f32 %v9688_v41, %v9648_v10  ;;  %v20118_v19 = vcombine.high %v19859_v20, %v19863_v35  ;;  %v20117_v7 = vcombine.low %v19859_v20, %v19863_v35  ;;  %11530 = vmatpush1.bf16.msra.mxu1 %v20249_v34  ;;  %v19831_v37 = vld [vmem:[%s24007_s11 + $0x8b0] sm:$0xff]  ;;  %v20218_v10 = vcombine.high %v19961_v51, %v19965_v30 }
 0x5a1   : > { %v9690_v4 = vpop.f32.mrf.mxu1  ;;  %11531 = vmatprep.subr.bf16.mxu1 %v20242_v54  ;;  %v20217_v41 = vcombine.low %v19961_v51, %v19965_v30  ;;  %v20209_v20 = vcombine.low %v19953_v24, %v19957_v55  ;;  %v19811_v35 = vld [vmem:[%s24007_s11 + $0x810] sm:$0xff]  ;;  %v20193_v54 = vcombine.low %v19937_v48, %v19941_v11  ;;  %v20181_v51 = vcombine.low %v19923_v5, %v19927_v53 }
 0x5a2   : > { %v27899_v27 = vadd.f32 %v9690_v4, %v9650_v56  ;;  %11599 = vmatpush2.bf16.msra.mxu0 %v20139_v6  ;;  %v20093_v56 = vcombine.low %v19835_v57, %v19839_v42  ;;  %v20086_v6 = vcombine.high %v19827_v8, %v19831_v37  ;;  %v19945_v4 = vld [vmem:[%s24007_s11 + $0xc40] sm:$0xff]  ;;  %v19919_v31 = vld [vmem:[%s24007_s11 + $0xb70] sm:$0xff]  ;;  %v20306_v57 = vcombine.high %v20049_v61, %v20053_v46 }
 0x5a3   : > { %v9692_v36 = vpop.f32.mrf.mxu1  ;;  %11600 = vmatprep.subr.bf16.mxu0 %v20132_v58  ;;  %v19819_v58 = vld [vmem:[%s24007_s11 + $0x850] sm:$0xff]  ;;  %v20041_v42 = vld [vmem:[%s24007_s11 + $0xf40] sm:$0xff]  ;;  %v20174_v30 = vcombine.high %v19915_v0, %v19919_v31  ;;  %v20173_v24 = vcombine.low %v19915_v0, %v19919_v31 }
 0x5a4   : > { %11532 = vmatpush1.bf16.msra.mxu1 %v20241_v62  ;;  %v20085_v36 = vcombine.low %v19827_v8, %v19831_v37  ;;  %v20190_v62 = vcombine.high %v19931_v14, %v19935_v38  ;;  %v20033_v37 = vld [vmem:[%s24007_s11 + $0xf00] sm:$0xff]  ;;  %v9732_v31 = vadd.f32 %v27733_v49, %v27899_v27 }
 0x5a5   : > { %v9693_v33 = vpop.f32.mrf.mxu1  ;;  %11533 = vmatprep.subr.bf16.mxu1 %v20234_v15  ;;  %v20313_v15 = vcombine.low %v20057_v28, %v20061_v3 }
 0x5a6   : > { %11601 = vmatpush2.bf16.msra.mxu0 %v20131_v22  ;;  %v19949_v22 = vld [vmem:[%s24007_s11 + $0xc60] sm:$0xff]  ;;  %v19815_v33 = vld [vmem:[%s24007_s11 + $0x830] sm:$0xff] }
 0x5a7   : > { %11652 = vmatprep.subr.bf16.mxu0 %v20126_v39  ;;  %v20078_v39 = vcombine.high %v19819_v58, %v19823_v47  ;;  %v20070_v34 = vcombine.high %v19811_v35, %v19815_v33  ;;  %v20201_v43 = vcombine.low %v19945_v4, %v19949_v22 }
 0x5a8   : > { %11534 = vmatpush1.bf16.msra.mxu1 %v20233_v45  ;;  %v20182_v45 = vcombine.high %v19923_v5, %v19927_v53  ;;  %v19875_v5 = vld [vmem:[%s24007_s11 + $0xa10] sm:$0xff] }
 0x5a9   : > { %11603 = vmatmul.mubr.bf16.vlgmr.msra.gmra.mxu0 %v27775_v32  ;;  %11535 = vmatprep.subr.bf16.mxu1 %v20226_v63  ;;  %v20045_v63 = vld [vmem:[%s24007_s11 + $0xf60] sm:$0xff]  ;;  %v19879_v53 = vld [vmem:[%s24007_s11 + $0xa30] sm:$0xff] }
 0x5aa   : > { %11653 = vmatpush1.bf16.msra.mxu0 %v20125_v60  ;;  %11684 = vmatprep.mubr.bf16.mxu0 %v27771_v21  ;;  %v20202_v60 = vcombine.high %v19945_v4, %v19949_v22  ;;  %v20298_v8 = vcombine.high %v20041_v42, %v20045_v63 }
 0x5ab   : > { %11654 = vmatprep.subr.bf16.mxu0 %v20118_v19  ;;  %v20077_v19 = vcombine.low %v19819_v58, %v19823_v47  ;;  %v20025_v47 = vld [vmem:[%s24007_s11 + $0xec0] sm:$0xff] }
 0x5ac   : > { %11536 = vmatpush1.bf16.msra.mxu1 %v20225_v9  ;;  %v19911_v9 = vld [vmem:[%s24007_s11 + $0xb30] sm:$0xff] }
 0x5ad   : > { %11537 = vmatprep.subr.bf16.mxu1 %v20218_v10  ;;  %v20037_v10 = vld [vmem:[%s24007_s11 + $0xf20] sm:$0xff] }
 0x5ae   : > { %11655 = vmatpush1.bf16.msra.mxu0 %v20117_v7  ;;  %v20194_v7 = vcombine.high %v19937_v48, %v19941_v11  ;;  %v20290_v58 = vcombine.high %v20033_v37, %v20037_v10  ;;  %v20021_v48 = vld [vmem:[%s24007_s11 + $0xea0] sm:$0xff] }
 0x5af   : > { %11656 = vmatprep.subr.bf16.mxu0 %v20110_v40  ;;  %v20069_v40 = vcombine.low %v19811_v35, %v19815_v33 }
 0x5b0   : > { %11538 = vmatpush1.bf16.msra.mxu1 %v20217_v41  ;;  %v19903_v41 = vld [vmem:[%s24007_s11 + $0xaf0] sm:$0xff] }
 0x5b1   : > { %11539 = vmatprep.subr.bf16.mxu1 %v20210_v16  ;;  %v20029_v16 = vld [vmem:[%s24007_s11 + $0xee0] sm:$0xff] }
 0x5b2   : > { %11657 = vmatpush1.bf16.msra.mxu0 %v20109_v12  ;;  %v20314_v12 = vcombine.high %v20057_v28, %v20061_v3  ;;  %v20282_v33 = vcombine.high %v20025_v47, %v20029_v16 }
 0x5b3   : > { %11658 = vmatprep.subr.bf16.mxu0 %v20102_v1  ;;  %v20189_v1 = vcombine.low %v19931_v14, %v19935_v38  ;;  %v19883_v14 = vld [vmem:[%s24007_s11 + $0xa50] sm:$0xff] }
 0x5b4   : > { %11540 = vmatpush1.bf16.msra.mxu1 %v20209_v20  ;;  %v19895_v20 = vld [vmem:[%s24007_s11 + $0xab0] sm:$0xff] }
 0x5b5   : > { %11541 = vmatprep.subr.bf16.mxu1 %v20202_v60  ;;  %v20017_v60 = vld [vmem:[%s24007_s11 + $0xe80] sm:$0xff]  ;;  %v19887_v38 = vld [vmem:[%s24007_s11 + $0xa70] sm:$0xff] }
 0x5b6   : > { %11659 = vmatpush1.bf16.msra.mxu0 %v20101_v2  ;;  %v20305_v2 = vcombine.low %v20049_v61, %v20053_v46  ;;  %v20274_v28 = vcombine.high %v20017_v60, %v20021_v48  ;;  %v20141_v61 = vcombine.low %v19883_v14, %v19887_v38  ;;  %v20009_v46 = vld [vmem:[%s24007_s11 + $0xe40] sm:$0xff] }
 0x5b7   : > { %11660 = vmatprep.subr.bf16.mxu0 %v20094_v18  ;;  %v19907_v18 = vld [vmem:[%s24007_s11 + $0xb10] sm:$0xff] }
 0x5b8   : > { %11542 = vmatpush1.bf16.msra.mxu1 %v20201_v43  ;;  %v20166_v55 = vcombine.high %v19907_v18, %v19911_v9  ;;  %v20165_v4 = vcombine.low %v19907_v18, %v19911_v9  ;;  %v20281_v43 = vcombine.low %v20025_v47, %v20029_v16  ;;  %v20005_v18 = vld [vmem:[%s24007_s11 + $0xe20] sm:$0xff]  ;;  %v19852_v47 = vld [vmem:[%s24007_s11 + $0x958] sm:$0xff] }
 0x5b9   : > { %11543 = vmatprep.subr.bf16.mxu1 %v20194_v7  ;;  %v19856_v16 = vld [vmem:[%s24007_s11 + $0x978] sm:$0xff] }
 0x5ba   : > { %11661 = vmatpush1.bf16.msra.mxu0 %v20093_v56  ;;  %v20297_v56 = vcombine.low %v20041_v42, %v20045_v63  ;;  %v19868_v42 = vld [vmem:[%s24007_s11 + $0x9d8] sm:$0xff] }
 0x5bb   : > { %11662 = vmatprep.subr.bf16.mxu0 %v20086_v6  ;;  %v19899_v6 = vld [vmem:[%s24007_s11 + $0xad0] sm:$0xff] }
 0x5bc   : > { %11544 = vmatpush1.bf16.msra.mxu1 %v20193_v54  ;;  %v20158_v22 = vcombine.high %v19899_v6, %v19903_v41  ;;  %v20157_v11 = vcombine.low %v19899_v6, %v19903_v41  ;;  %v20273_v54 = vcombine.low %v20017_v60, %v20021_v48  ;;  %v27985_v6 = vld [vmem:[%s24007_s11 + $0xde8] sm:$0xff]  ;;  %v19836_v48 = vld [vmem:[%s24007_s11 + $0x8d8] sm:$0xff] }
 0x5bd   : > { %11545 = vmatprep.subr.bf16.mxu1 %v20314_v12  ;;  %v9730_v12 = vadd.f32 %v27728_v59, %v27895_v25  ;;  %v19872_v59 = vld [vmem:[%s24007_s11 + $0x9f8] sm:$0xff] }
 0x5be   : > { %11663 = vmatpush1.bf16.msra.mxu0 %v20085_v36  ;;  %v20289_v36 = vcombine.low %v20033_v37, %v20037_v10  ;;  %v20128_v49 = vcombine.high %v19868_v42, %v19872_v59  ;;  %v19864_v37 = vld [vmem:[%s24007_s11 + $0x9b8] sm:$0xff] }
 0x5bf   : > { %11664 = vmatprep.subr.bf16.mxu0 %v20078_v39  ;;  %v19891_v39 = vld [vmem:[%s24007_s11 + $0xa90] sm:$0xff] }
 0x5c0   : > { %11546 = vmatpush2.bf16.msra.mxu1 %v20313_v15  ;;  %v20149_v3 = vcombine.low %v19891_v39, %v19895_v20  ;;  %v20134_v15 = vcombine.high %v19875_v5, %v19879_v53 }
 0x5c1   : > { %11547 = vmatprep.subr.bf16.mxu1 %v20306_v57 }
 0x5c2   : > { %11665 = vmatpush1.bf16.msra.mxu0 %v20077_v19 }
 0x5c3   : > { %11666 = vmatprep.subr.bf16.mxu0 %v20070_v34  ;;  %v20150_v34 = vcombine.high %v19891_v39, %v19895_v20  ;;  %v19844_v39 = vld [vmem:[%s24007_s11 + $0x918] sm:$0xff] }
 0x5c4   : > { %11548 = vmatpush2.bf16.msra.mxu1 %v20305_v2  ;;  %v20001_v2 = vld [vmem:[%s24007_s11 + $0xe00] sm:$0xff]  ;;  %v19848_v20 = vld [vmem:[%s24007_s11 + $0x938] sm:$0xff] }
 0x5c5   : > { %11549 = vmatprep.subr.bf16.mxu1 %v20298_v8  ;;  %v20258_v27 = vcombine.high %v20001_v2, %v20005_v18  ;;  %v19860_v8 = vld [vmem:[%s24007_s11 + $0x998] sm:$0xff]  ;;  %v20257_v10 = vcombine.low %v20001_v2, %v20005_v18  ;;  %v20104_v60 = vcombine.high %v19844_v39, %v19848_v20 }
 0x5c6   : > { %11667 = vmatpush1.bf16.msra.mxu0 %v20069_v40  ;;  %v20120_v41 = vcombine.high %v19860_v8, %v19864_v37  ;;  %v19908_v2 = vld [vmem:[%s24007_s11 + $0xb18] sm:$0xff] }
 0x5c7   : > { %11668 = vmatprep.subr.bf16.mxu0 %v20190_v62  ;;  %v20142_v62 = vcombine.high %v19883_v14, %v19887_v38  ;;  %v19832_v14 = vld [vmem:[%s24007_s11 + $0x8b8] sm:$0xff] }
 0x5c8   : > { %11550 = vmatpush2.bf16.msra.mxu1 %v20297_v56  ;;  %v27982_v56 = vld [vmem:[%s24007_s11 + $0xdc8] sm:$0xff]  ;;  %v19912_v18 = vld [vmem:[%s24007_s11 + $0xb38] sm:$0xff] }
 0x5c9   : > { %11551 = vmatprep.subr.bf16.mxu1 %v20290_v58  ;;  %v20252_v58 = vcombine.high %v27982_v56, %v27985_v6 }
 0x5ca   : > { %11669 = vmatpush2.bf16.msra.mxu0 %v20189_v1  ;;  %v20013_v1 = vld [vmem:[%s24007_s11 + $0xe60] sm:$0xff] }
 0x5cb   : > { %11670 = vmatprep.subr.bf16.mxu0 %v20182_v45  ;;  %v20266_v0 = vcombine.high %v20009_v46, %v20013_v1  ;;  %v20265_v25 = vcombine.low %v20009_v46, %v20013_v1  ;;  %v19936_v46 = vld [vmem:[%s24007_s11 + $0xbf8] sm:$0xff] }
 0x5cc   : > { %11552 = vmatpush2.bf16.msra.mxu1 %v20289_v36  ;;  %v20112_v36 = vcombine.high %v19852_v47, %v19856_v16 }
 0x5cd   : > { %11553 = vmatprep.subr.bf16.mxu1 %v20282_v33  ;;  %v20111_v33 = vcombine.low %v19852_v47, %v19856_v16  ;;  %v19884_v47 = vld [vmem:[%s24007_s11 + $0xa58] sm:$0xff] }
 0x5ce   : > { %11671 = vmatpush2.bf16.msra.mxu0 %v20181_v51  ;;  %v19888_v16 = vld [vmem:[%s24007_s11 + $0xa78] sm:$0xff] }
 0x5cf   : > { %11672 = vmatprep.subr.bf16.mxu0 %v20174_v30  ;;  %v20133_v30 = vcombine.low %v19875_v5, %v19879_v53  ;;  %v19816_v5 = vld [vmem:[%s24007_s11 + $0x838] sm:$0xff] }
 0x5d0   : > { %11554 = vmatpush2.bf16.msra.mxu1 %v20281_v43  ;;  %v19828_v43 = vld [vmem:[%s24007_s11 + $0x898] sm:$0xff] }
 0x5d1   : > { %11555 = vmatprep.subr.bf16.mxu1 %v20274_v28  ;;  %v19820_v28 = vld [vmem:[%s24007_s11 + $0x858] sm:$0xff] }
 0x5d2   : > { %11673 = vmatpush2.bf16.msra.mxu0 %v20173_v24 }
 0x5d3   : > { %11674 = vmatprep.subr.bf16.mxu0 %v20166_v55  ;;  %v20127_v55 = vcombine.low %v19868_v42, %v19872_v59  ;;  %v19916_v59 = vld [vmem:[%s24007_s11 + $0xb58] sm:$0xff] }
 0x5d4   : > { %v27955_v35 = vpop.f32.mrf.mxu0  ;;  %11556 = vmatpush2.bf16.msra.mxu1 %v20273_v54  ;;  %v19812_v54 = vld [vmem:[%s24007_s11 + $0x818] sm:$0xff] }
 0x5d5   : > { %11557 = vmatprep.subr.bf16.mxu1 %v20266_v0  ;;  %v20071_v1 = vcombine.low %v19812_v54, %v19816_v5  ;;  %v19928_v0 = vld [vmem:[%s24007_s11 + $0xbb8] sm:$0xff] }
 0x5d6   : > { %11675 = vmatpush2.bf16.msra.mxu0 %v20165_v4  ;;  %v27959_v19 = vpop.f32.mrf.mxu0  ;;  %v20251_v4 = vcombine.low %v27982_v56, %v27985_v6  ;;  %v23117_v56 = vld [vmem:[%s30488_s1 + $0x104] ss:$16 sps:$4 sm:$0xff]  }
 0x5d7   : > { %11676 = vmatprep.subr.bf16.mxu0 %v20158_v22  ;;  %v20119_v22 = vcombine.low %v19860_v8, %v19864_v37  ;;  %v19904_v8 = vld [vmem:[%s24007_s11 + $0xaf8] sm:$0xff]  ;;  %v20167_v37 = vcombine.low %v19908_v2, %v19912_v18 }
 0x5d8   : > { %v9897_v7 = vpop.f32.mrf.mxu0  ;;  %11558 = vmatpush2.bf16.msra.mxu1 %v20265_v25  ;;  %v19920_v25 = vld [vmem:[%s24007_s11 + $0xb78] sm:$0xff] }
 0x5d9   : > { %11559 = vmatprep.subr.bf16.mxu1 %v20258_v27  ;;  %v20088_v7 = vcombine.high %v19828_v43, %v19832_v14  ;;  %v19900_v27 = vld [vmem:[%s24007_s11 + $0xad8] sm:$0xff] }
 0x5da   : > { %11677 = vmatpush2.bf16.msra.mxu0 %v20157_v11  ;;  %v9898_v40 = vpop.f32.mrf.mxu0  ;;  %v19840_v11 = vld [vmem:[%s24007_s11 + $0x8f8] sm:$0xff] }
 0x5db   : > { %11678 = vmatprep.subr.bf16.mxu0 %v20150_v34  ;;  %v20103_v34 = vcombine.low %v19844_v39, %v19848_v20  ;;  %v20095_v38 = vcombine.low %v19836_v48, %v19840_v11  ;;  %v20087_v40 = vcombine.low %v19828_v43, %v19832_v14  ;;  %v19876_v39 = vld [vmem:[%s24007_s11 + $0xa18] sm:$0xff] }
 0x5dc   : > { %11560 = vmatpush2.bf16.msra.mxu1 %v20257_v10  ;;  %v20160_v10 = vcombine.high %v19900_v27, %v19904_v8  ;;  %v19880_v20 = vld [vmem:[%s24007_s11 + $0xa38] sm:$0xff] }
 0x5dd   : > { %11611 = vmatprep.subr.bf16.mxu1 %v20252_v58 }
 0x5de   : > { %11679 = vmatpush2.bf16.msra.mxu0 %v20149_v3  ;;  %v19824_v3 = vld [vmem:[%s24007_s11 + $0x878] sm:$0xff] }
 0x5df   : > { %v9770_v45 = vpop.f32.mrf.mxu1  ;;  %11680 = vmatprep.subr.bf16.mxu0 %v20142_v62  ;;  %v20080_v62 = vcombine.high %v19820_v28, %v19824_v3  ;;  %v20079_v53 = vcombine.low %v19820_v28, %v19824_v3  ;;  %v23072_v3 = vld [vmem:[%s30488_s1 + $0xe4] ss:$16 sps:$4 sm:$0xff]  }
 0x5e0   : > { %v27971_v57 = vadd.f32 %v9770_v45, %v9730_v12  ;;  %v20072_v12 = vcombine.high %v19812_v54, %v19816_v5  ;;  %v23078_v54 = vld [vmem:[%s30488_s1 + $0xa4] ss:$16 sps:$4 sm:$0xff]   ;;  %v23076_v5 = vld [vmem:[%s30488_s1 + $0xa0] ss:$16 sps:$4 sm:$0xff]  }
 0x5e1   : > { %v9772_v63 = vpop.f32.mrf.mxu1 }
 0x5e2   : > { %v27975_v51 = vadd.f32 %v9772_v63, %v9732_v31  ;;  %11681 = vmatpush2.bf16.msra.mxu0 %v20141_v61  ;;  %v19932_v61 = vld [vmem:[%s24007_s11 + $0xbd8] sm:$0xff] }
 0x5e3   : > { %v9774_v9 = vpop.f32.mrf.mxu1  ;;  %11682 = vmatprep.subr.bf16.mxu0 %v20134_v15  ;;  %v20192_v45 = vcombine.high %v19932_v61, %v19936_v46  ;;  %v19924_v15 = vld [vmem:[%s24007_s11 + $0xb98] sm:$0xff]  ;;  %v20191_v31 = vcombine.low %v19932_v61, %v19936_v46  ;;  %v23084_v61 = vld [vmem:[%s30488_s1 + $0x64] ss:$16 sps:$4 sm:$0xff]   ;;  %v23082_v46 = vld [vmem:[%s30488_s1 + $0x60] ss:$16 sps:$4 sm:$0xff]  }
 0x5e4   : > { %v20184_v42 = vcombine.high %v19924_v15, %v19928_v0  ;;  %v20183_v63 = vcombine.low %v19924_v15, %v19928_v0  ;;  %v20175_v9 = vcombine.low %v19916_v59, %v19920_v25  ;;  %v23090_v15 = vld [vmem:[%s30488_s1 + $0x24] ss:$16 sps:$4 sm:$0xff]   ;;  %v23088_v0 = vld [vmem:[%s30488_s1 + $0x20] ss:$16 sps:$4 sm:$0xff]  }
 0x5e5   : > { %v9775_v24 = vpop.f32.mrf.mxu1 }
 0x5e6   : > { %11683 = vmatpush2.bf16.msra.mxu0 %v20133_v30  ;;  %v20176_v30 = vcombine.high %v19916_v59, %v19920_v25  ;;  %v19892_v24 = vld [vmem:[%s24007_s11 + $0xa98] sm:$0xff]  ;;  %v23096_v59 = vld [vmem:[%s30488_s1 + $0x1e4] ss:$16 sps:$4 sm:$0xff]   ;;  %v23094_v25 = vld [vmem:[%s30488_s1 + $0x1e0] ss:$16 sps:$4 sm:$0xff]  }
 0x5e7   : > { %11734 = vmatprep.subr.bf16.mxu0 %v20128_v49  ;;  %v20168_v49 = vcombine.high %v19908_v2, %v19912_v18  ;;  %v9812_v2 = vadd.f32 %v27873_v13, %v27971_v57  ;;  %v23102_v18 = vld [vmem:[%s30488_s1 + $0x1a4] ss:$16 sps:$4 sm:$0xff]   ;;  %v23103_v13 = vld [vmem:[%s30488_s1 + $0x180] ss:$16 sps:$4 sm:$0xff]  }
 0x5e9   : > { %11685 = vmatmul.mubr.bf16.vlgmr.msra.gmra.mxu0 %v27775_v32 }
 0x5ea   : > { %11735 = vmatpush1.bf16.msra.mxu0 %v20127_v55  ;;  %11766 = vmatprep.mubr.bf16.mxu0 %v27771_v21  ;;  %v20096_v21 = vcombine.high %v19836_v48, %v19840_v11  ;;  %v19896_v55 = vld [vmem:[%s24007_s11 + $0xab8] sm:$0xff]  ;;  %v20136_v48 = vcombine.high %v19876_v39, %v19880_v20 }
 0x5eb   : > { %11736 = vmatprep.subr.bf16.mxu0 %v20120_v41  ;;  %v20159_v41 = vcombine.low %v19900_v27, %v19904_v8  ;;  %v20152_v58 = vcombine.high %v19892_v24, %v19896_v55 }
 0x5ee   : > { %11737 = vmatpush1.bf16.msra.mxu0 %v20119_v22  ;;  %v20151_v22 = vcombine.low %v19892_v24, %v19896_v55  ;;  %v23108_v24 = vld [vmem:[%s30488_s1 + $0x164] ss:$16 sps:$4 sm:$0xff]  }
 0x5ef   : > { %11738 = vmatprep.subr.bf16.mxu0 %v20112_v36  ;;  %v20144_v36 = vcombine.high %v19884_v47, %v19888_v16 }
 0x5f2   : > { %11739 = vmatpush1.bf16.msra.mxu0 %v20111_v33  ;;  %v20143_v33 = vcombine.low %v19884_v47, %v19888_v16 }
 0x5f3   : > { %11740 = vmatprep.subr.bf16.mxu0 %v20104_v60 }
 0x5f6   : > { %11741 = vmatpush1.bf16.msra.mxu0 %v20103_v34  ;;  %v20135_v34 = vcombine.low %v19876_v39, %v19880_v20  ;;  %v23109_v20 = vld [vmem:[%s30488_s1 + $0x140] ss:$16 sps:$4 sm:$0xff]  }
 0x5f7   : > { %11742 = vmatprep.subr.bf16.mxu0 %v20096_v21 }
 0x5fa   : > { %11743 = vmatpush1.bf16.msra.mxu0 %v20095_v38 }
 0x5fb   : > { %11744 = vmatprep.subr.bf16.mxu0 %v20088_v7 }
 0x5fe   : > { %11745 = vmatpush1.bf16.msra.mxu0 %v20087_v40  ;;  %v23070_v40 = vld [vmem:[%s30488_s1 + $0xe0] ss:$16 sps:$4 sm:$0xff]  }
 0x5ff   : > { %11746 = vmatprep.subr.bf16.mxu0 %v20080_v62  ;;  %v23073_v62 = vld [vmem:[%s30488_s1 + $0xc0] ss:$16 sps:$4 sm:$0xff]  }
 0x602   : > { %11747 = vmatpush1.bf16.msra.mxu0 %v20079_v53  ;;  %v23081_v53 = vld [vmem:[%s30488_s1 + $0x84] ss:$16 sps:$4 sm:$0xff]  }
 0x603   : > { %11748 = vmatprep.subr.bf16.mxu0 %v20072_v12  ;;  %v23079_v12 = vld [vmem:[%s30488_s1 + $0x80] ss:$16 sps:$4 sm:$0xff]  }
 0x606   : > { %11749 = vmatpush1.bf16.msra.mxu0 %v20071_v1  ;;  %v23087_v1 = vld [vmem:[%s30488_s1 + $0x44] ss:$16 sps:$4 sm:$0xff]  }
 0x607   : > { %11750 = vmatprep.subr.bf16.mxu0 %v20192_v45  ;;  %v23085_v45 = vld [vmem:[%s30488_s1 + $0x40] ss:$16 sps:$4 sm:$0xff]  }
 0x60a   : > { %11751 = vmatpush2.bf16.msra.mxu0 %v20191_v31  ;;  %v23093_v31 = vld [vmem:[%s30488_s1 + $0x4] ss:$16 sps:$4 sm:$0xff]  }
 0x60b   : > { %11752 = vmatprep.subr.bf16.mxu0 %v20184_v42  ;;  %v23091_v42 = vld [vmem:[%s30488_s1] ss:$16 sps:$4 sm:$0xff]  }
 0x60e   : > { %11753 = vmatpush2.bf16.msra.mxu0 %v20183_v63  ;;  %v23099_v63 = vld [vmem:[%s30488_s1 + $0x1c4] ss:$16 sps:$4 sm:$0xff]  }
 0x60f   : > { %11754 = vmatprep.subr.bf16.mxu0 %v20176_v30  ;;  %v23097_v30 = vld [vmem:[%s30488_s1 + $0x1c0] ss:$16 sps:$4 sm:$0xff]  }
 0x612   : > { %11755 = vmatpush2.bf16.msra.mxu0 %v20175_v9  ;;  %v23100_v9 = vld [vmem:[%s30488_s1 + $0x1a0] ss:$16 sps:$4 sm:$0xff]  }
 0x613   : > { %11756 = vmatprep.subr.bf16.mxu0 %v20168_v49  ;;  %v9814_v49 = vadd.f32 %v27878_v23, %v27975_v51 }
 0x616   : > { %11757 = vmatpush2.bf16.msra.mxu0 %v20167_v37  ;;  %v23105_v37 = vld [vmem:[%s30488_s1 + $0x184] ss:$16 sps:$4 sm:$0xff]  }
 0x617   : > { %11758 = vmatprep.subr.bf16.mxu0 %v20160_v10 }
 0x61a   : > { %11759 = vmatpush2.bf16.msra.mxu0 %v20159_v41  ;;  %v23106_v41 = vld [vmem:[%s30488_s1 + $0x160] ss:$16 sps:$4 sm:$0xff]  }
 0x61b   : > { %11760 = vmatprep.subr.bf16.mxu0 %v20152_v58 }
 0x61e   : > { %11761 = vmatpush2.bf16.msra.mxu0 %v20151_v22  ;;  %v19986_v22 = vld [vmem:[%s24007_s11 + $0xd88] sm:$0xff] }
 0x61f   : > { %v9852_v60 = vpop.f32.mrf.mxu1  ;;  %11762 = vmatprep.subr.bf16.mxu0 %v20144_v36  ;;  %v23111_v36 = vld [vmem:[%s30488_s1 + $0x144] ss:$16 sps:$4 sm:$0xff]  }
 0x620   : > { %v9853_v27 = vadd.f32 %v9852_v60, %v9812_v2  ;;  %v23123_v2 = vld [vmem:[%s30488_s1 + $0x4c4] ss:$16 sps:$4 sm:$0xff]  }
 0x621   : > { %v9854_v11 = vpop.f32.mrf.mxu1 }
 0x622   : > { %11763 = vmatpush2.bf16.msra.mxu0 %v20143_v33  ;;  %v9855_v8 = vadd.f32 %v9854_v11, %v9814_v49  ;;  %v9894_v57 = vadd.f32 %v27955_v35, %v9853_v27  ;;  %v19978_v11 = vld [vmem:[%s24007_s11 + $0xd48] sm:$0xff] }
 0x623   : > { %v9856_v21 = vpop.f32.mrf.mxu1  ;;  %11764 = vmatprep.subr.bf16.mxu0 %v20136_v48  ;;  %v19946_v27 = vld [vmem:[%s24007_s11 + $0xc48] sm:$0xff] }
 0x624   : > { %v9896_v23 = vadd.f32 %v27959_v19, %v9855_v8  ;;  %v19990_v19 = vld [vmem:[%s24007_s11 + $0xda8] sm:$0xff]  ;;  %v23114_v21 = vld [vmem:[%s30488_s1 + $0x124] ss:$16 sps:$4 sm:$0xff]  }
 0x625   : > { %v9857_v43 = vpop.f32.mrf.mxu1  ;;  %v20244_v48 = vcombine.high %v19986_v22, %v19990_v19  ;;  %v19950_v8 = vld [vmem:[%s24007_s11 + $0xc68] sm:$0xff] }
 0x626   : > { %11765 = vmatpush2.bf16.msra.mxu0 %v20135_v34  ;;  %v19982_v34 = vld [vmem:[%s24007_s11 + $0xd68] sm:$0xff] }
 0x627   : > { %15067 = vmatprep.subr.bf16.mxu0 %v23072_v3 }
 0x629   : > { %11767 = vmatmul.mubr.bf16.vlgmr.msra.gmra.mxu0 %v27775_v32  ;;  %v28022_v14 = vpop.f32.mrf.mxu0  ;;  %v23075_v32 = vld [vmem:[%s30488_s1 + $0xc4] ss:$16 sps:$4 sm:$0xff]  }
 0x62a   : > { %15068 = vmatpush1.bf16.msra.mxu0 %v23070_v40  ;;  %v20236_v40 = vcombine.high %v19978_v11, %v19982_v34 }
 0x62b   : > { %v28024_v38 = vpop.f32.mrf.mxu0  ;;  %15069 = vmatprep.subr.bf16.mxu0 %v23075_v32  ;;  %v28141_v32 = vld [vmem:[%s24002_s8 + $0x40] sm:$0xff] }
 0x62c   : > { %v11880_v6 = vrot.slane %v28141_v32, %v24145_v50 }
 0x62d   : > { %v11526_v7 = vpop.f32.mrf.mxu0 }
 0x62e   : > { %15070 = vmatpush1.bf16.msra.mxu0 %v23073_v62  ;;  %v23112_v7 = vld [vmem:[%s30488_s1 + $0x120] ss:$16 sps:$4 sm:$0xff]   ;;  %v19970_v62 = vld [vmem:[%s24007_s11 + $0xd08] sm:$0xff] }
 0x62f   : > { %v11527_v28 = vpop.f32.mrf.mxu0  ;;  %15071 = vmatprep.subr.bf16.mxu0 %v23078_v54  ;;  %v19974_v54 = vld [vmem:[%s24007_s11 + $0xd28] sm:$0xff] }
 0x630   : > { %v20243_v28 = vcombine.low %v19986_v22, %v19990_v19  ;;  %v23130_v22 = vld [vmem:[%s30488_s1 + $0x460] ss:$16 sps:$4 sm:$0xff]  }
 0x632   : > { %15072 = vmatpush1.bf16.msra.mxu0 %v23076_v5  ;;  %v23115_v5 = vld [vmem:[%s30488_s1 + $0x100] ss:$16 sps:$4 sm:$0xff]  }
 0x633   : > { %15073 = vmatprep.subr.bf16.mxu0 %v23081_v53  ;;  %v20235_v53 = vcombine.low %v19978_v11, %v19982_v34  ;;  %v23133_v11 = vld [vmem:[%s30488_s1 + $0x440] ss:$16 sps:$4 sm:$0xff]  }
 0x636   : > { %15074 = vmatpush1.bf16.msra.mxu0 %v23079_v12  ;;  %v11888_v12 = vcombine.high %v11880_v6, %v11880_v6 }
 0x637   : > { %15075 = vmatprep.subr.bf16.mxu0 %v23084_v61 }
 0x63a   : > { %15076 = vmatpush1.bf16.msra.mxu0 %v23082_v46  ;;  %v20228_v46 = vcombine.high %v19970_v62, %v19974_v54 }
 0x63b   : > { %15077 = vmatprep.subr.bf16.mxu0 %v23087_v1  ;;  %v19962_v1 = vld [vmem:[%s24007_s11 + $0xcc8] sm:$0xff] }
 0x63e   : > { %15078 = vmatpush1.bf16.msra.mxu0 %v23085_v45  ;;  %v19966_v45 = vld [vmem:[%s24007_s11 + $0xce8] sm:$0xff] }
 0x63f   : > { %15079 = vmatprep.subr.bf16.mxu0 %v23090_v15  ;;  %v28155_v15 = vpack.c.bf16 %v11888_v12, %v11888_v12 }
 0x641   : > { %15099 = vmatprep.mubr.bf16.mxu0 %v28155_v15 }
 0x642   : > { %15080 = vmatpush1.bf16.msra.mxu0 %v23088_v0  ;;  %v23120_v0 = vld [vmem:[%s30488_s1 + $0x4e4] ss:$16 sps:$4 sm:$0xff]  }
 0x643   : > { %15081 = vmatprep.subr.bf16.mxu0 %v23093_v31  ;;  %v23118_v31 = vld [vmem:[%s30488_s1 + $0x4e0] ss:$16 sps:$4 sm:$0xff]  }
 0x646   : > { %15082 = vmatpush1.bf16.msra.mxu0 %v23091_v42  ;;  %v28163_v42 = vpack.c.bf16 %v11880_v6, %v11880_v6  ;;  %v20034_v6 = vld [vmem:[%s24007_s11 + $0xf08] sm:$0xff] }
 0x647   : > { %15083 = vmatprep.subr.bf16.mxu0 %v23096_v59  ;;  %v20227_v59 = vcombine.low %v19970_v62, %v19974_v54  ;;  %v23136_v62 = vld [vmem:[%s30488_s1 + $0x420] ss:$16 sps:$4 sm:$0xff]  }
 0x64a   : > { %15084 = vmatpush2.bf16.msra.mxu0 %v23094_v25  ;;  %v20220_v25 = vcombine.high %v19962_v1, %v19966_v45 }
 0x64b   : > { %15085 = vmatprep.subr.bf16.mxu0 %v23099_v63  ;;  %v19954_v63 = vld [vmem:[%s24007_s11 + $0xc88] sm:$0xff] }
 0x64e   : > { %15086 = vmatpush2.bf16.msra.mxu0 %v23097_v30  ;;  %v19958_v30 = vld [vmem:[%s24007_s11 + $0xca8] sm:$0xff] }
 0x64f   : > { %15087 = vmatprep.subr.bf16.mxu0 %v23102_v18  ;;  %v23121_v18 = vld [vmem:[%s30488_s1 + $0x4c0] ss:$16 sps:$4 sm:$0xff]   ;;  %v20212_v49 = vcombine.high %v19954_v63, %v19958_v30 }
 0x652   : > { %15088 = vmatpush2.bf16.msra.mxu0 %v23100_v9  ;;  %v20219_v9 = vcombine.low %v19962_v1, %v19966_v45  ;;  %v20030_v1 = vld [vmem:[%s24007_s11 + $0xee8] sm:$0xff]  ;;  %v23144_v45 = vld [vmem:[%s30488_s1 + $0x5e4] ss:$16 sps:$4 sm:$0xff]  }
 0x653   : > { %15089 = vmatprep.subr.bf16.mxu0 %v23105_v37  ;;  %v23126_v37 = vld [vmem:[%s30488_s1 + $0x4a4] ss:$16 sps:$4 sm:$0xff]  }
 0x656   : > { %15090 = vmatpush2.bf16.msra.mxu0 %v23103_v13  ;;  %v23124_v13 = vld [vmem:[%s30488_s1 + $0x4a0] ss:$16 sps:$4 sm:$0xff]  }
 0x657   : > { %15091 = vmatprep.subr.bf16.mxu0 %v23108_v24  ;;  %v23129_v24 = vld [vmem:[%s30488_s1 + $0x484] ss:$16 sps:$4 sm:$0xff]  }
 0x65a   : > { %15092 = vmatpush2.bf16.msra.mxu0 %v23106_v41  ;;  %v20203_v41 = vcombine.low %v19946_v27, %v19950_v8 }
 0x65b   : > { %15093 = vmatprep.subr.bf16.mxu0 %v23111_v36 }
 0x65e   : > { %15094 = vmatpush2.bf16.msra.mxu0 %v23109_v20  ;;  %v20054_v20 = vld [vmem:[%s24007_s11 + $0xfa8] sm:$0xff] }
 0x65f   : > { %v9934_v10 = vpop.f32.mrf.mxu1  ;;  %15095 = vmatprep.subr.bf16.mxu0 %v23114_v21 }
 0x660   : > { %v9935_v51 = vadd.f32 %v9934_v10, %v9894_v57  ;;  %v20211_v57 = vcombine.low %v19954_v63, %v19958_v30  ;;  %v20204_v10 = vcombine.high %v19946_v27, %v19950_v8  ;;  %v20022_v63 = vld [vmem:[%s24007_s11 + $0xea8] sm:$0xff]  ;;  %v23147_v30 = vld [vmem:[%s30488_s1 + $0x5c4] ss:$16 sps:$4 sm:$0xff]  }
 0x661   : > { %v9936_v55 = vpop.f32.mrf.mxu1  ;;  %v20014_v27 = vld [vmem:[%s24007_s11 + $0xe68] sm:$0xff]  ;;  %v23150_v8 = vld [vmem:[%s30488_s1 + $0x5a4] ss:$16 sps:$4 sm:$0xff]  }
 0x662   : > { %v9937_v58 = vadd.f32 %v9936_v55, %v9896_v23  ;;  %v9943_v35 = vmax.f32 %v9935_v51, 0.0  ;;  %15096 = vmatpush2.bf16.msra.mxu0 %v23112_v7  ;;  %v19938_v23 = vld [vmem:[%s24007_s11 + $0xc08] sm:$0xff]  ;;  %v23127_v55 = vld [vmem:[%s30488_s1 + $0x480] ss:$16 sps:$4 sm:$0xff]  }
 0x663   : > { %v9938_v47 = vpop.f32.mrf.mxu1  ;;  %15097 = vmatprep.subr.bf16.mxu0 %v23117_v56  ;;  %v19942_v51 = vld [vmem:[%s24007_s11 + $0xc28] sm:$0xff] }
 0x664   : > { %v9944_v16 = vmax.f32 %v9937_v58, 0.0  ;;  %v28120_v60 = vpack.c.bf16 %v9943_v35, %v9943_v35  ;;  %v20196_v58 = vcombine.high %v19938_v23, %v19942_v51  ;;  %v20058_v35 = vld [vmem:[%s24007_s11 + $0xfc8] sm:$0xff]  ;;  %v20195_v19 = vcombine.low %v19938_v23, %v19942_v51  ;;  %v23153_v51 = vld [vmem:[%s30488_s1 + $0x584] ss:$16 sps:$4 sm:$0xff]  }
 0x665   : > { %v9939_v39 = vpop.f32.mrf.mxu1  ;;  %v20062_v47 = vld [vmem:[%s24007_s11 + $0xfe8] sm:$0xff] }
 0x666   : > { %v28118_v33 = vpack.c.bf16 %v9944_v16, %v9944_v16  ;;  %15098 = vmatpush2.bf16.msra.mxu0 %v23115_v5  ;;  %v23132_v16 = vld [vmem:[%s30488_s1 + $0x464] ss:$16 sps:$4 sm:$0xff]   ;;  %v20316_v36 = vcombine.high %v20058_v35, %v20062_v47  ;;  %v20050_v39 = vld [vmem:[%s24007_s11 + $0xf88] sm:$0xff]  ;;  %v20315_v34 = vcombine.low %v20058_v35, %v20062_v47 }
 0x667   : > { %15149 = vmatprep.subr.bf16.mxu0 %v23120_v0  ;;  %v20308_v21 = vcombine.high %v20050_v39, %v20054_v20  ;;  %v20042_v7 = vld [vmem:[%s24007_s11 + $0xf48] sm:$0xff]  ;;  %v20307_v54 = vcombine.low %v20050_v39, %v20054_v20  ;;  %v23141_v5 = vld [vmem:[%s30488_s1 + $0x404] ss:$16 sps:$4 sm:$0xff]   ;;  %v23142_v0 = vld [vmem:[%s30488_s1 + $0x5e0] ss:$16 sps:$4 sm:$0xff]  }
 0x668   : > { %11561 = vmatprep.mubr.bf16.mxu1 %v28118_v33  ;;  %v20006_v23 = vld [vmem:[%s24007_s11 + $0xe28] sm:$0xff]  ;;  %v19999_v35 = vld [vmem:[%s24007_s11 + $0xdf0] sm:$0xff] }
 0x669   : > { %v28128_v43 = vpop.f32.mrf.mxu0  ;;  %11562 = vmatmul.mubr.bf16.vlgmr.msra.gmra.mxu1 %v28120_v60  ;;  %15100 = vmatmul.mubr.bf16.vlgmr.msra.gmra.mxu0 %v28163_v42  ;;  %v23156_v47 = vld [vmem:[%s30488_s1 + $0x564] ss:$16 sps:$4 sm:$0xff]  }
 0x66a   : > { %11612 = vmatpush1.bf16.msra.mxu1 %v20251_v4  ;;  %11643 = vmatprep.mubr.bf16.mxu1 %v28118_v33  ;;  %v19991_v39 = vld [vmem:[%s24007_s11 + $0xdb0] sm:$0xff] }
 0x66b   : > { %v28138_v3 = vpop.f32.mrf.mxu0  ;;  %11613 = vmatprep.subr.bf16.mxu1 %v20244_v48  ;;  %15150 = vmatpush1.bf16.msra.mxu0 %v23118_v31  ;;  %v23135_v48 = vld [vmem:[%s30488_s1 + $0x444] ss:$16 sps:$4 sm:$0xff]  }
 0x66c   : > { %15151 = vmatprep.subr.bf16.mxu0 %v23123_v2  ;;  %v23145_v2 = vld [vmem:[%s30488_s1 + $0x5c0] ss:$16 sps:$4 sm:$0xff]   ;;  %v23159_v20 = vld [vmem:[%s30488_s1 + $0x544] ss:$16 sps:$4 sm:$0xff]  }
 0x66d   : > { %v11608_v4 = vpop.f32.mrf.mxu0 }
 0x66e   : > { %11614 = vmatpush1.bf16.msra.mxu1 %v20243_v28  ;;  %v20046_v28 = vld [vmem:[%s24007_s11 + $0xf68] sm:$0xff] }
 0x66f   : > { %v11609_v61 = vpop.f32.mrf.mxu0  ;;  %11615 = vmatprep.subr.bf16.mxu1 %v20236_v40  ;;  %15152 = vmatpush1.bf16.msra.mxu0 %v23121_v18  ;;  %v23138_v40 = vld [vmem:[%s30488_s1 + $0x424] ss:$16 sps:$4 sm:$0xff]   ;;  %v20300_v56 = vcombine.high %v20042_v7, %v20046_v28  ;;  %v20038_v4 = vld [vmem:[%s24007_s11 + $0xf28] sm:$0xff]  ;;  %v20299_v12 = vcombine.low %v20042_v7, %v20046_v28 }
 0x670   : > { %15153 = vmatprep.subr.bf16.mxu0 %v23126_v37  ;;  %v20292_v61 = vcombine.high %v20034_v6, %v20038_v4  ;;  %v20291_v31 = vcombine.low %v20034_v6, %v20038_v4  ;;  %v23148_v37 = vld [vmem:[%s30488_s1 + $0x5a0] ss:$16 sps:$4 sm:$0xff]   ;;  %v23165_v28 = vld [vmem:[%s30488_s1 + $0x524] ss:$16 sps:$4 sm:$0xff]   ;;  %v28286_v4 = vld [vmem:[%s24002_s8 + $0x48] sm:$0xff] }
 0x671   : > { %v19983_v7 = vld [vmem:[%s24007_s11 + $0xd70] sm:$0xff] }
 0x672   : > { %11616 = vmatpush1.bf16.msra.mxu1 %v20235_v53  ;;  %v23139_v53 = vld [vmem:[%s30488_s1 + $0x400] ss:$16 sps:$4 sm:$0xff]  }
 0x673   : > { %11617 = vmatprep.subr.bf16.mxu1 %v20228_v46  ;;  %15154 = vmatpush1.bf16.msra.mxu0 %v23124_v13  ;;  %v20026_v46 = vld [vmem:[%s24007_s11 + $0xec8] sm:$0xff] }
 0x674   : > { %15155 = vmatprep.subr.bf16.mxu0 %v23129_v24  ;;  %v20283_v18 = vcombine.low %v20026_v46, %v20030_v1  ;;  %v23151_v24 = vld [vmem:[%s30488_s1 + $0x580] ss:$16 sps:$4 sm:$0xff]  }
 0x676   : > { %11618 = vmatpush1.bf16.msra.mxu1 %v20227_v59  ;;  %v20284_v59 = vcombine.high %v20026_v46, %v20030_v1  ;;  %v23169_v1 = vld [vmem:[%s30488_s1 + $0x500] ss:$16 sps:$4 sm:$0xff]  }
 0x677   : > { %11619 = vmatprep.subr.bf16.mxu1 %v20220_v25  ;;  %15156 = vmatpush1.bf16.msra.mxu0 %v23127_v55  ;;  %v20018_v25 = vld [vmem:[%s24007_s11 + $0xe88] sm:$0xff] }
 0x678   : > { %15157 = vmatprep.subr.bf16.mxu0 %v23132_v16  ;;  %v20275_v13 = vcombine.low %v20018_v25, %v20022_v63  ;;  %v23154_v16 = vld [vmem:[%s30488_s1 + $0x560] ss:$16 sps:$4 sm:$0xff]  }
 0x67a   : > { %11620 = vmatpush1.bf16.msra.mxu1 %v20219_v9  ;;  %v20276_v9 = vcombine.high %v20018_v25, %v20022_v63  ;;  %v19963_v25 = vld [vmem:[%s24007_s11 + $0xcd0] sm:$0xff] }
 0x67b   : > { %11621 = vmatprep.subr.bf16.mxu1 %v20212_v49  ;;  %15158 = vmatpush1.bf16.msra.mxu0 %v23130_v22  ;;  %v20010_v49 = vld [vmem:[%s24007_s11 + $0xe48] sm:$0xff]  ;;  %v19967_v63 = vld [vmem:[%s24007_s11 + $0xcf0] sm:$0xff] }
 0x67c   : > { %15159 = vmatprep.subr.bf16.mxu0 %v23135_v48  ;;  %v20267_v55 = vcombine.low %v20010_v49, %v20014_v27  ;;  %v23157_v48 = vld [vmem:[%s30488_s1 + $0x540] ss:$16 sps:$4 sm:$0xff]  }
 0x67e   : > { %11622 = vmatpush1.bf16.msra.mxu1 %v20211_v57  ;;  %v20268_v57 = vcombine.high %v20010_v49, %v20014_v27  ;;  %v20222_v27 = vcombine.high %v19963_v25, %v19967_v63 }
 0x67f   : > { %11623 = vmatprep.subr.bf16.mxu1 %v20204_v10  ;;  %15160 = vmatpush1.bf16.msra.mxu0 %v23133_v11  ;;  %v20002_v10 = vld [vmem:[%s24007_s11 + $0xe08] sm:$0xff] }
 0x680   : > { %15161 = vmatprep.subr.bf16.mxu0 %v23138_v40  ;;  %v20259_v22 = vcombine.low %v20002_v10, %v20006_v23 }
 0x682   : > { %11624 = vmatpush1.bf16.msra.mxu1 %v20203_v41  ;;  %v20260_v41 = vcombine.high %v20002_v10, %v20006_v23  ;;  %v20221_v10 = vcombine.low %v19963_v25, %v19967_v63  ;;  %v23219_v25 = vld [vmem:[%s30488_s1 + $0x804] ss:$16 sps:$4 sm:$0xff]   ;;  %v23217_v63 = vld [vmem:[%s30488_s1 + $0x800] ss:$16 sps:$4 sm:$0xff]  }
 0x683   : > { %11625 = vmatprep.subr.bf16.mxu1 %v20196_v58  ;;  %15162 = vmatpush1.bf16.msra.mxu0 %v23136_v62  ;;  %v19995_v58 = vld [vmem:[%s24007_s11 + $0xdd0] sm:$0xff] }
 0x684   : > { %15163 = vmatprep.subr.bf16.mxu0 %v23141_v5  ;;  %v20253_v11 = vcombine.low %v19995_v58, %v19999_v35  ;;  %v23163_v62 = vld [vmem:[%s30488_s1 + $0x520] ss:$16 sps:$4 sm:$0xff]  }
 0x685   : > { %v19971_v5 = vld [vmem:[%s24007_s11 + $0xd10] sm:$0xff] }
 0x686   : > { %11626 = vmatpush1.bf16.msra.mxu1 %v20195_v19  ;;  %v20254_v19 = vcombine.high %v19995_v58, %v19999_v35 }
 0x687   : > { %11627 = vmatprep.subr.bf16.mxu1 %v20316_v36  ;;  %15164 = vmatpush1.bf16.msra.mxu0 %v23139_v53  ;;  %v19987_v36 = vld [vmem:[%s24007_s11 + $0xd90] sm:$0xff] }
 0x688   : > { %15165 = vmatprep.subr.bf16.mxu0 %v23144_v45  ;;  %v19975_v53 = vld [vmem:[%s24007_s11 + $0xd30] sm:$0xff] }
 0x689   : > { %v20229_v49 = vcombine.low %v19971_v5, %v19975_v53 }
 0x68a   : > { %11628 = vmatpush2.bf16.msra.mxu1 %v20315_v34  ;;  %v20246_v34 = vcombine.high %v19987_v36, %v19991_v39 }
 0x68b   : > { %11629 = vmatprep.subr.bf16.mxu1 %v20308_v21  ;;  %15166 = vmatpush2.bf16.msra.mxu0 %v23142_v0  ;;  %v19979_v21 = vld [vmem:[%s24007_s11 + $0xd50] sm:$0xff] }
 0x68c   : > { %15167 = vmatprep.subr.bf16.mxu0 %v23147_v30  ;;  %v20238_v6 = vcombine.high %v19979_v21, %v19983_v7  ;;  %v20237_v45 = vcombine.low %v19979_v21, %v19983_v7 }
 0x68e   : > { %11630 = vmatpush2.bf16.msra.mxu1 %v20307_v54  ;;  %v20245_v54 = vcombine.low %v19987_v36, %v19991_v39 }
 0x68f   : > { %11631 = vmatprep.subr.bf16.mxu1 %v20300_v56  ;;  %15168 = vmatpush2.bf16.msra.mxu0 %v23145_v2  ;;  %v23177_v2 = vld [vmem:[%s30488_s1 + $0x8e4] ss:$16 sps:$4 sm:$0xff]  }
 0x690   : > { %15169 = vmatprep.subr.bf16.mxu0 %v23150_v8  ;;  %v19955_v8 = vld [vmem:[%s24007_s11 + $0xc90] sm:$0xff] }
 0x692   : > { %11632 = vmatpush2.bf16.msra.mxu1 %v20299_v12  ;;  %v23171_v12 = vld [vmem:[%s30488_s1 + $0x504] ss:$16 sps:$4 sm:$0xff]  }
 0x693   : > { %11633 = vmatprep.subr.bf16.mxu1 %v20292_v61  ;;  %15170 = vmatpush2.bf16.msra.mxu0 %v23148_v37  ;;  %v11897_v61 = vrot.slane %v28286_v4, %v24145_v50  ;;  %v19959_v37 = vld [vmem:[%s24007_s11 + $0xcb0] sm:$0xff] }
 0x694   : > { %15171 = vmatprep.subr.bf16.mxu0 %v23153_v51  ;;  %v20214_v23 = vcombine.high %v19955_v8, %v19959_v37  ;;  %v19947_v51 = vld [vmem:[%s24007_s11 + $0xc50] sm:$0xff]  ;;  %v20213_v58 = vcombine.low %v19955_v8, %v19959_v37 }
 0x695   : > { %v11905_v0 = vcombine.high %v11897_v61, %v11897_v61  ;;  %v23225_v8 = vld [vmem:[%s30488_s1 + $0x9e4] ss:$16 sps:$4 sm:$0xff]   ;;  %v23223_v37 = vld [vmem:[%s30488_s1 + $0x9e0] ss:$16 sps:$4 sm:$0xff]  }
 0x696   : > { %11634 = vmatpush2.bf16.msra.mxu1 %v20291_v31 }
 0x697   : > { %11635 = vmatprep.subr.bf16.mxu1 %v20284_v59  ;;  %15172 = vmatpush2.bf16.msra.mxu0 %v23151_v24  ;;  %v20230_v59 = vcombine.high %v19971_v5, %v19975_v53  ;;  %v28300_v30 = vpack.c.bf16 %v11905_v0, %v11905_v0  ;;  %v19951_v24 = vld [vmem:[%s24007_s11 + $0xc70] sm:$0xff] }
 0x698   : > { %15173 = vmatprep.subr.bf16.mxu0 %v23156_v47  ;;  %v20206_v35 = vcombine.high %v19947_v51, %v19951_v24  ;;  %v19939_v47 = vld [vmem:[%s24007_s11 + $0xc10] sm:$0xff]  ;;  %v20205_v36 = vcombine.low %v19947_v51, %v19951_v24 }
 0x699   : > { %15181 = vmatprep.mubr.bf16.mxu0 %v28300_v30  ;;  %v23231_v51 = vld [vmem:[%s30488_s1 + $0x9c4] ss:$16 sps:$4 sm:$0xff]   ;;  %v23229_v24 = vld [vmem:[%s30488_s1 + $0x9c0] ss:$16 sps:$4 sm:$0xff]  }
 0x69a   : > { %11636 = vmatpush2.bf16.msra.mxu1 %v20283_v18  ;;  %v23175_v18 = vld [vmem:[%s30488_s1 + $0x8e0] ss:$16 sps:$4 sm:$0xff]  }
 0x69b   : > { %11637 = vmatprep.subr.bf16.mxu1 %v20276_v9  ;;  %15174 = vmatpush2.bf16.msra.mxu0 %v23154_v16  ;;  %v28308_v9 = vpack.c.bf16 %v11897_v61, %v11897_v61  ;;  %v19943_v16 = vld [vmem:[%s24007_s11 + $0xc30] sm:$0xff] }
 0x69c   : > { %15175 = vmatprep.subr.bf16.mxu0 %v23159_v20  ;;  %v20198_v39 = vcombine.high %v19939_v47, %v19943_v16  ;;  %v20059_v20 = vld [vmem:[%s24007_s11 + $0xfd0] sm:$0xff]  ;;  %v20197_v21 = vcombine.low %v19939_v47, %v19943_v16 }
 0x69d   : > { %v20047_v61 = vld [vmem:[%s24007_s11 + $0xf70] sm:$0xff] }
 0x69e   : > { %11638 = vmatpush2.bf16.msra.mxu1 %v20275_v13  ;;  %v23183_v13 = vld [vmem:[%s30488_s1 + $0x8c4] ss:$16 sps:$4 sm:$0xff]   ;;  %v23235_v16 = vld [vmem:[%s30488_s1 + $0x9a0] ss:$16 sps:$4 sm:$0xff]  }
 0x69f   : > { %11639 = vmatprep.subr.bf16.mxu1 %v20268_v57  ;;  %15176 = vmatpush2.bf16.msra.mxu0 %v23157_v48  ;;  %v23181_v57 = vld [vmem:[%s30488_s1 + $0x8c0] ss:$16 sps:$4 sm:$0xff]   ;;  %v23237_v47 = vld [vmem:[%s30488_s1 + $0x9a4] ss:$16 sps:$4 sm:$0xff]  }
 0x6a0   : > { %15177 = vmatprep.subr.bf16.mxu0 %v23165_v28  ;;  %v20063_v48 = vld [vmem:[%s24007_s11 + $0xff0] sm:$0xff] }
 0x6a1   : > { %v20318_v7 = vcombine.high %v20059_v20, %v20063_v48  ;;  %v20051_v28 = vld [vmem:[%s24007_s11 + $0xf90] sm:$0xff]  ;;  %v20317_v5 = vcombine.low %v20059_v20, %v20063_v48 }
 0x6a2   : > { %11640 = vmatpush2.bf16.msra.mxu1 %v20267_v55  ;;  %v23189_v55 = vld [vmem:[%s30488_s1 + $0x8a4] ss:$16 sps:$4 sm:$0xff]   ;;  %v23241_v48 = vld [vmem:[%s30488_s1 + $0x980] ss:$16 sps:$4 sm:$0xff]  }
 0x6a3   : > { %11641 = vmatprep.subr.bf16.mxu1 %v20260_v41  ;;  %15178 = vmatpush2.bf16.msra.mxu0 %v23163_v62  ;;  %v23187_v41 = vld [vmem:[%s30488_s1 + $0x8a0] ss:$16 sps:$4 sm:$0xff]   ;;  %v23243_v20 = vld [vmem:[%s30488_s1 + $0x984] ss:$16 sps:$4 sm:$0xff]  }
 0x6a4   : > { %15179 = vmatprep.subr.bf16.mxu0 %v23171_v12  ;;  %v20055_v62 = vld [vmem:[%s24007_s11 + $0xfb0] sm:$0xff] }
 0x6a5   : > { %v20310_v53 = vcombine.high %v20051_v28, %v20055_v62  ;;  %v20043_v12 = vld [vmem:[%s24007_s11 + $0xf50] sm:$0xff] }
 0x6a6   : > { %11642 = vmatpush2.bf16.msra.mxu1 %v20259_v22  ;;  %v23195_v22 = vld [vmem:[%s30488_s1 + $0x884] ss:$16 sps:$4 sm:$0xff]   ;;  %v20302_v0 = vcombine.high %v20043_v12, %v20047_v61 }
 0x6a7   : > { %11693 = vmatprep.subr.bf16.mxu1 %v20254_v19  ;;  %15180 = vmatpush2.bf16.msra.mxu0 %v23169_v1  ;;  %v23193_v19 = vld [vmem:[%s30488_s1 + $0x880] ss:$16 sps:$4 sm:$0xff]  }
 0x6a8   : > { %15231 = vmatprep.subr.bf16.mxu0 %v23177_v2  ;;  %v23211_v1 = vld [vmem:[%s30488_s1 + $0x820] ss:$16 sps:$4 sm:$0xff]   ;;  %v20301_v2 = vcombine.low %v20043_v12, %v20047_v61  ;;  %v23255_v12 = vld [vmem:[%s30488_s1 + $0x944] ss:$16 sps:$4 sm:$0xff]  }
 0x6a9   : > { %11644 = vmatmul.mubr.bf16.vlgmr.msra.gmra.mxu1 %v28120_v60  ;;  %v28277_v40 = vpop.f32.mrf.mxu0  ;;  %v23253_v61 = vld [vmem:[%s30488_s1 + $0x940] ss:$16 sps:$4 sm:$0xff]  }
 0x6aa   : > { %11694 = vmatpush1.bf16.msra.mxu1 %v20253_v11  ;;  %11725 = vmatprep.mubr.bf16.mxu1 %v28118_v33  ;;  %v23201_v11 = vld [vmem:[%s30488_s1 + $0x864] ss:$16 sps:$4 sm:$0xff]  }
 0x6ab   : > { %v28283_v56 = vpop.f32.mrf.mxu0  ;;  %11695 = vmatprep.subr.bf16.mxu1 %v20246_v34  ;;  %15182 = vmatmul.mubr.bf16.vlgmr.msra.gmra.mxu0 %v28308_v9  ;;  %v23199_v34 = vld [vmem:[%s30488_s1 + $0x860] ss:$16 sps:$4 sm:$0xff]  }
 0x6ac   : > { %15232 = vmatpush1.bf16.msra.mxu0 %v23175_v18 }
 0x6ad   : > { %v11690_v46 = vpop.f32.mrf.mxu0  ;;  %15233 = vmatprep.subr.bf16.mxu0 %v23183_v13 }
 0x6ae   : > { %11696 = vmatpush1.bf16.msra.mxu1 %v20245_v54  ;;  %v23207_v54 = vld [vmem:[%s30488_s1 + $0x844] ss:$16 sps:$4 sm:$0xff]  }
 0x6af   : > { %v11691_v31 = vpop.f32.mrf.mxu0  ;;  %11697 = vmatprep.subr.bf16.mxu1 %v20238_v6  ;;  %v23205_v6 = vld [vmem:[%s30488_s1 + $0x840] ss:$16 sps:$4 sm:$0xff]   ;;  %v23213_v46 = vld [vmem:[%s30488_s1 + $0x824] ss:$16 sps:$4 sm:$0xff]  }
 0x6b0   : > { %15234 = vmatpush1.bf16.msra.mxu0 %v23181_v57  ;;  %v20035_v31 = vld [vmem:[%s24007_s11 + $0xf10] sm:$0xff] }
 0x6b1   : > { %15235 = vmatprep.subr.bf16.mxu0 %v23189_v55 }
 0x6b2   : > { %11698 = vmatpush1.bf16.msra.mxu1 %v20237_v45  ;;  %v20309_v45 = vcombine.low %v20051_v28, %v20055_v62  ;;  %v23249_v28 = vld [vmem:[%s30488_s1 + $0x964] ss:$16 sps:$4 sm:$0xff]   ;;  %v23247_v62 = vld [vmem:[%s30488_s1 + $0x960] ss:$16 sps:$4 sm:$0xff]  }
 0x6b3   : > { %11699 = vmatprep.subr.bf16.mxu1 %v20230_v59  ;;  %v20039_v59 = vld [vmem:[%s24007_s11 + $0xf30] sm:$0xff] }
 0x6b4   : > { %15236 = vmatpush1.bf16.msra.mxu0 %v23187_v41  ;;  %v20294_v18 = vcombine.high %v20035_v31, %v20039_v59  ;;  %v20293_v13 = vcombine.low %v20035_v31, %v20039_v59  ;;  %v23262_v31 = vld [vmem:[%s30488_s1 + $0x924] ss:$16 sps:$4 sm:$0xff]  }
 0x6b5   : > { %15237 = vmatprep.subr.bf16.mxu0 %v23195_v22 }
 0x6b6   : > { %11700 = vmatpush1.bf16.msra.mxu1 %v20229_v49  ;;  %v20027_v49 = vld [vmem:[%s24007_s11 + $0xed0] sm:$0xff] }
 0x6b7   : > { %11701 = vmatprep.subr.bf16.mxu1 %v20222_v27  ;;  %v20031_v27 = vld [vmem:[%s24007_s11 + $0xef0] sm:$0xff] }
 0x6b8   : > { %15238 = vmatpush1.bf16.msra.mxu0 %v23193_v19  ;;  %v20286_v57 = vcombine.high %v20027_v49, %v20031_v27  ;;  %v20285_v55 = vcombine.low %v20027_v49, %v20031_v27  ;;  %v28431_v49 = vld [vmem:[%s24002_s8 + $0x50] sm:$0xff]  ;;  %v19972_v27 = vld [vmem:[%s24007_s11 + $0xd18] sm:$0xff] }
 0x6b9   : > { %15239 = vmatprep.subr.bf16.mxu0 %v23201_v11 }
 0x6ba   : > { %11702 = vmatpush1.bf16.msra.mxu1 %v20221_v10  ;;  %v20019_v10 = vld [vmem:[%s24007_s11 + $0xe90] sm:$0xff] }
 0x6bb   : > { %11703 = vmatprep.subr.bf16.mxu1 %v20214_v23  ;;  %v20023_v23 = vld [vmem:[%s24007_s11 + $0xeb0] sm:$0xff] }
 0x6bc   : > { %15240 = vmatpush1.bf16.msra.mxu0 %v23199_v34  ;;  %v20278_v41 = vcombine.high %v20019_v10, %v20023_v23  ;;  %v20277_v22 = vcombine.low %v20019_v10, %v20023_v23 }
 0x6bd   : > { %15241 = vmatprep.subr.bf16.mxu0 %v23207_v54 }
 0x6be   : > { %11704 = vmatpush1.bf16.msra.mxu1 %v20213_v58  ;;  %v20011_v58 = vld [vmem:[%s24007_s11 + $0xe50] sm:$0xff] }
 0x6bf   : > { %11705 = vmatprep.subr.bf16.mxu1 %v20206_v35  ;;  %v20015_v35 = vld [vmem:[%s24007_s11 + $0xe70] sm:$0xff] }
 0x6c0   : > { %15242 = vmatpush1.bf16.msra.mxu0 %v23205_v6  ;;  %v20270_v19 = vcombine.high %v20011_v58, %v20015_v35  ;;  %v20269_v11 = vcombine.low %v20011_v58, %v20015_v35  ;;  %v23274_v35 = vld [vmem:[%s30488_s1 + $0xce4] ss:$16 sps:$4 sm:$0xff]  }
 0x6c1   : > { %15243 = vmatprep.subr.bf16.mxu0 %v23213_v46 }
 0x6c2   : > { %11706 = vmatpush1.bf16.msra.mxu1 %v20205_v36  ;;  %v20003_v36 = vld [vmem:[%s24007_s11 + $0xe10] sm:$0xff] }
 0x6c3   : > { %11707 = vmatprep.subr.bf16.mxu1 %v20198_v39  ;;  %v20007_v39 = vld [vmem:[%s24007_s11 + $0xe30] sm:$0xff] }
 0x6c4   : > { %15244 = vmatpush1.bf16.msra.mxu0 %v23211_v1  ;;  %v20262_v34 = vcombine.high %v20003_v36, %v20007_v39  ;;  %v20261_v54 = vcombine.low %v20003_v36, %v20007_v39  ;;  %v19956_v36 = vld [vmem:[%s24007_s11 + $0xc98] sm:$0xff] }
 0x6c5   : > { %15245 = vmatprep.subr.bf16.mxu0 %v23219_v25  ;;  %v23260_v25 = vld [vmem:[%s30488_s1 + $0x920] ss:$16 sps:$4 sm:$0xff]   ;;  %v19960_v39 = vld [vmem:[%s24007_s11 + $0xcb8] sm:$0xff] }
 0x6c6   : > { %11708 = vmatpush1.bf16.msra.mxu1 %v20197_v21  ;;  %v19996_v21 = vld [vmem:[%s24007_s11 + $0xdd8] sm:$0xff] }
 0x6c7   : > { %11709 = vmatprep.subr.bf16.mxu1 %v20318_v7  ;;  %v20000_v7 = vld [vmem:[%s24007_s11 + $0xdf8] sm:$0xff] }
 0x6c8   : > { %15246 = vmatpush1.bf16.msra.mxu0 %v23217_v63  ;;  %v20256_v6 = vcombine.high %v19996_v21, %v20000_v7  ;;  %v20255_v46 = vcombine.low %v19996_v21, %v20000_v7  ;;  %v19948_v21 = vld [vmem:[%s24007_s11 + $0xc58] sm:$0xff] }
 0x6c9   : > { %15247 = vmatprep.subr.bf16.mxu0 %v23225_v8  ;;  %v19976_v8 = vld [vmem:[%s24007_s11 + $0xd38] sm:$0xff] }
 0x6ca   : > { %11710 = vmatpush2.bf16.msra.mxu1 %v20317_v5  ;;  %v19988_v5 = vld [vmem:[%s24007_s11 + $0xd98] sm:$0xff] }
 0x6cb   : > { %11711 = vmatprep.subr.bf16.mxu1 %v20310_v53  ;;  %v19992_v53 = vld [vmem:[%s24007_s11 + $0xdb8] sm:$0xff] }
 0x6cc   : > { %15248 = vmatpush2.bf16.msra.mxu0 %v23223_v37  ;;  %v20248_v1 = vcombine.high %v19988_v5, %v19992_v53  ;;  %v20247_v63 = vcombine.low %v19988_v5, %v19992_v53  ;;  %v23268_v37 = vld [vmem:[%s30488_s1 + $0x904] ss:$16 sps:$4 sm:$0xff]   ;;  %v19952_v7 = vld [vmem:[%s24007_s11 + $0xc78] sm:$0xff] }
 0x6cd   : > { %15249 = vmatprep.subr.bf16.mxu0 %v23231_v51  ;;  %v19940_v5 = vld [vmem:[%s24007_s11 + $0xc18] sm:$0xff] }
 0x6ce   : > { %11712 = vmatpush2.bf16.msra.mxu1 %v20309_v45  ;;  %v19980_v45 = vld [vmem:[%s24007_s11 + $0xd58] sm:$0xff] }
 0x6cf   : > { %11713 = vmatprep.subr.bf16.mxu1 %v20302_v0  ;;  %v19984_v0 = vld [vmem:[%s24007_s11 + $0xd78] sm:$0xff] }
 0x6d0   : > { %15250 = vmatpush2.bf16.msra.mxu0 %v23229_v24  ;;  %v20239_v10 = vcombine.low %v19980_v45, %v19984_v0  ;;  %v20232_v24 = vcombine.high %v19972_v27, %v19976_v8  ;;  %v19944_v53 = vld [vmem:[%s24007_s11 + $0xc38] sm:$0xff] }
 0x6d1   : > { %15251 = vmatprep.subr.bf16.mxu0 %v23237_v47  ;;  %v23272_v47 = vld [vmem:[%s30488_s1 + $0xce0] ss:$16 sps:$4 sm:$0xff]  }
 0x6d2   : > { %11714 = vmatpush2.bf16.msra.mxu1 %v20301_v2 }
 0x6d3   : > { %11715 = vmatprep.subr.bf16.mxu1 %v20294_v18  ;;  %v20240_v18 = vcombine.high %v19980_v45, %v19984_v0  ;;  %v20060_v45 = vld [vmem:[%s24007_s11 + $0xfd8] sm:$0xff] }
 0x6d4   : > { %15252 = vmatpush2.bf16.msra.mxu0 %v23235_v16  ;;  %v20064_v0 = vld [vmem:[%s24007_s11 + $0xff8] sm:$0xff] }
 0x6d5   : > { %15253 = vmatprep.subr.bf16.mxu0 %v23243_v20  ;;  %v23280_v20 = vld [vmem:[%s30488_s1 + $0xcc4] ss:$16 sps:$4 sm:$0xff]  }
 0x6d6   : > { %11716 = vmatpush2.bf16.msra.mxu1 %v20293_v13  ;;  %v11914_v13 = vrot.slane %v28431_v49, %v24145_v50 }
 0x6d7   : > { %11717 = vmatprep.subr.bf16.mxu1 %v20286_v57  ;;  %v23266_v57 = vld [vmem:[%s30488_s1 + $0x900] ss:$16 sps:$4 sm:$0xff]  }
 0x6d8   : > { %15254 = vmatpush2.bf16.msra.mxu0 %v23241_v48  ;;  %v11922_v23 = vcombine.high %v11914_v13, %v11914_v13  ;;  %v28453_v16 = vpack.c.bf16 %v11914_v13, %v11914_v13  ;;  %v23278_v48 = vld [vmem:[%s30488_s1 + $0xcc0] ss:$16 sps:$4 sm:$0xff]  }
 0x6d9   : > { %15255 = vmatprep.subr.bf16.mxu0 %v23249_v28  ;;  %v23286_v28 = vld [vmem:[%s30488_s1 + $0xca4] ss:$16 sps:$4 sm:$0xff]   ;;  %v23302_v13 = vld [vmem:[%s30488_s1 + $0xc40] ss:$16 sps:$4 sm:$0xff]  }
 0x6da   : > { %11718 = vmatpush2.bf16.msra.mxu1 %v20285_v55  ;;  %v19964_v55 = vld [vmem:[%s24007_s11 + $0xcd8] sm:$0xff]  ;;  %v28445_v58 = vpack.c.bf16 %v11922_v23, %v11922_v23 }
 0x6db   : > { %11719 = vmatprep.subr.bf16.mxu1 %v20278_v41  ;;  %v19968_v41 = vld [vmem:[%s24007_s11 + $0xcf8] sm:$0xff] }
 0x6dc   : > { %15256 = vmatpush2.bf16.msra.mxu0 %v23247_v62  ;;  %15263 = vmatprep.mubr.bf16.mxu0 %v28445_v58  ;;  %v23284_v62 = vld [vmem:[%s30488_s1 + $0xca0] ss:$16 sps:$4 sm:$0xff]   ;;  %v20048_v23 = vld [vmem:[%s24007_s11 + $0xf78] sm:$0xff] }
 0x6dd   : > { %15257 = vmatprep.subr.bf16.mxu0 %v23255_v12  ;;  %v23292_v12 = vld [vmem:[%s30488_s1 + $0xc84] ss:$16 sps:$4 sm:$0xff]  }
 0x6de   : > { %11720 = vmatpush2.bf16.msra.mxu1 %v20277_v22  ;;  %v20231_v22 = vcombine.low %v19972_v27, %v19976_v8  ;;  %v20052_v27 = vld [vmem:[%s24007_s11 + $0xf98] sm:$0xff] }
 0x6df   : > { %11721 = vmatprep.subr.bf16.mxu1 %v20270_v19  ;;  %v20224_v19 = vcombine.high %v19964_v55, %v19968_v41  ;;  %v20056_v8 = vld [vmem:[%s24007_s11 + $0xfb8] sm:$0xff] }
 0x6e0   : > { %15258 = vmatpush2.bf16.msra.mxu0 %v23253_v61  ;;  %v23290_v61 = vld [vmem:[%s30488_s1 + $0xc80] ss:$16 sps:$4 sm:$0xff]  }
 0x6e1   : > { %15259 = vmatprep.subr.bf16.mxu0 %v23262_v31  ;;  %v23298_v31 = vld [vmem:[%s30488_s1 + $0xc64] ss:$16 sps:$4 sm:$0xff]  }
 0x6e2   : > { %11722 = vmatpush2.bf16.msra.mxu1 %v20269_v11  ;;  %v20223_v11 = vcombine.low %v19964_v55, %v19968_v41  ;;  %v20311_v55 = vcombine.low %v20052_v27, %v20056_v8 }
 0x6e3   : > { %11723 = vmatprep.subr.bf16.mxu1 %v20262_v34  ;;  %v20216_v34 = vcombine.high %v19956_v36, %v19960_v39 }
 0x6e4   : > { %15260 = vmatpush2.bf16.msra.mxu0 %v23260_v25  ;;  %v23296_v25 = vld [vmem:[%s30488_s1 + $0xc60] ss:$16 sps:$4 sm:$0xff]  }
 0x6e5   : > { %15261 = vmatprep.subr.bf16.mxu0 %v23268_v37  ;;  %v23304_v37 = vld [vmem:[%s30488_s1 + $0xc44] ss:$16 sps:$4 sm:$0xff]  }
 0x6e6   : > { %11724 = vmatpush2.bf16.msra.mxu1 %v20261_v54  ;;  %v20215_v54 = vcombine.low %v19956_v36, %v19960_v39 }
 0x6e7   : > { %11775 = vmatprep.subr.bf16.mxu1 %v20256_v6  ;;  %v20208_v6 = vcombine.high %v19948_v21, %v19952_v7 }
 0x6e8   : > { %15262 = vmatpush2.bf16.msra.mxu0 %v23266_v57  ;;  %v20312_v57 = vcombine.high %v20052_v27, %v20056_v8  ;;  %v23338_v27 = vld [vmem:[%s30488_s1 + $0xd80] ss:$16 sps:$4 sm:$0xff]  }
 0x6e9   : > { %11726 = vmatmul.mubr.bf16.vlgmr.msra.gmra.mxu1 %v28120_v60  ;;  %v28422_v59 = vpop.f32.mrf.mxu0  ;;  %15313 = vmatprep.subr.bf16.mxu0 %v23274_v35  ;;  %v20036_v35 = vld [vmem:[%s24007_s11 + $0xf18] sm:$0xff] }
 0x6ea   : > { %11776 = vmatpush1.bf16.msra.mxu1 %v20255_v46  ;;  %11807 = vmatprep.mubr.bf16.mxu1 %v28118_v33  ;;  %v20207_v46 = vcombine.low %v19948_v21, %v19952_v7 }
 0x6eb   : > { %v28428_v2 = vpop.f32.mrf.mxu0  ;;  %11777 = vmatprep.subr.bf16.mxu1 %v20248_v1  ;;  %15264 = vmatmul.mubr.bf16.vlgmr.msra.gmra.mxu0 %v28453_v16  ;;  %v20200_v1 = vcombine.high %v19940_v5, %v19944_v53 }
 0x6ec   : > { %15314 = vmatpush1.bf16.msra.mxu0 %v23272_v47  ;;  %v20040_v47 = vld [vmem:[%s24007_s11 + $0xf38] sm:$0xff] }
 0x6ed   : > { %v11772_v33 = vpop.f32.mrf.mxu0  ;;  %15315 = vmatprep.subr.bf16.mxu0 %v23280_v20  ;;  %v20296_v39 = vcombine.high %v20036_v35, %v20040_v47  ;;  %v20028_v20 = vld [vmem:[%s24007_s11 + $0xed8] sm:$0xff]  ;;  %v20295_v21 = vcombine.low %v20036_v35, %v20040_v47  ;;  %v23168_v35 = vld [vmem:[%s30488_s1 + $0x2c4] ss:$16 sps:$4 sm:$0xff]  }
 0x6ee   : > { %11778 = vmatpush1.bf16.msra.mxu1 %v20247_v63  ;;  %v20199_v63 = vcombine.low %v19940_v5, %v19944_v53  ;;  %v20319_v33 = vcombine.low %v20060_v45, %v20064_v0  ;;  %v23359_v47 = vld [vmem:[%s30488_s1 + $0xd24] ss:$16 sps:$4 sm:$0xff]  }
 0x6ef   : > { %v11773_v51 = vpop.f32.mrf.mxu0  ;;  %11779 = vmatprep.subr.bf16.mxu1 %v20240_v18  ;;  %v20320_v18 = vcombine.high %v20060_v45, %v20064_v0  ;;  %v11873_v0 = vcombine.high %v28141_v32, %v28141_v32 }
 0x6f0   : > { %15316 = vmatpush1.bf16.msra.mxu0 %v23278_v48  ;;  %v23310_v51 = vld [vmem:[%s30488_s1 + $0xc24] ss:$16 sps:$4 sm:$0xff]   ;;  %v20032_v48 = vld [vmem:[%s24007_s11 + $0xef8] sm:$0xff] }
 0x6f1   : > { %15317 = vmatprep.subr.bf16.mxu0 %v23286_v28  ;;  %v20288_v7 = vcombine.high %v20028_v20, %v20032_v48  ;;  %v20020_v28 = vld [vmem:[%s24007_s11 + $0xe98] sm:$0xff]  ;;  %v20287_v5 = vcombine.low %v20028_v20, %v20032_v48  ;;  %v23174_v20 = vld [vmem:[%s30488_s1 + $0x2a4] ss:$16 sps:$4 sm:$0xff]  }
 0x6f2   : > { %11780 = vmatpush1.bf16.msra.mxu1 %v20239_v10  ;;  %v20044_v10 = vld [vmem:[%s24007_s11 + $0xf58] sm:$0xff] }
 0x6f3   : > { %11781 = vmatprep.subr.bf16.mxu1 %v20232_v24  ;;  %v23308_v24 = vld [vmem:[%s30488_s1 + $0xc20] ss:$16 sps:$4 sm:$0xff]   ;;  %v20304_v41 = vcombine.high %v20044_v10, %v20048_v23  ;;  %v20303_v36 = vcombine.low %v20044_v10, %v20048_v23  ;;  %v23162_v23 = vld [vmem:[%s30488_s1 + $0x2e4] ss:$16 sps:$4 sm:$0xff]  }
 0x6f4   : > { %15318 = vmatpush1.bf16.msra.mxu0 %v23284_v62  ;;  %v20024_v62 = vld [vmem:[%s24007_s11 + $0xeb8] sm:$0xff] }
 0x6f5   : > { %15319 = vmatprep.subr.bf16.mxu0 %v23292_v12  ;;  %v20280_v53 = vcombine.high %v20020_v28, %v20024_v62  ;;  %v20012_v12 = vld [vmem:[%s24007_s11 + $0xe58] sm:$0xff]  ;;  %v20279_v45 = vcombine.low %v20020_v28, %v20024_v62  ;;  %v23363_v28 = vld [vmem:[%s30488_s1 + $0xd00] ss:$16 sps:$4 sm:$0xff]  }
 0x6f6   : > { %11782 = vmatpush1.bf16.msra.mxu1 %v20231_v22  ;;  %v23316_v22 = vld [vmem:[%s30488_s1 + $0xc04] ss:$16 sps:$4 sm:$0xff]  }
 0x6f7   : > { %11783 = vmatprep.subr.bf16.mxu1 %v20224_v19  ;;  %v23314_v19 = vld [vmem:[%s30488_s1 + $0xc00] ss:$16 sps:$4 sm:$0xff]  }
 0x6f8   : > { %15320 = vmatpush1.bf16.msra.mxu0 %v23290_v61  ;;  %v20016_v61 = vld [vmem:[%s24007_s11 + $0xe78] sm:$0xff] }
 0x6f9   : > { %15321 = vmatprep.subr.bf16.mxu0 %v23298_v31  ;;  %v20272_v31 = vcombine.high %v20012_v12, %v20016_v61  ;;  %v20271_v8 = vcombine.low %v20012_v12, %v20016_v61  ;;  %v23369_v12 = vld [vmem:[%s30488_s1 + $0xe8] ss:$16 sps:$4 sm:$0xff]  }
 0x6fa   : > { %11784 = vmatpush1.bf16.msra.mxu1 %v20223_v11  ;;  %v23322_v11 = vld [vmem:[%s30488_s1 + $0xde4] ss:$16 sps:$4 sm:$0xff]  }
 0x6fb   : > { %11785 = vmatprep.subr.bf16.mxu1 %v20216_v34  ;;  %v23320_v34 = vld [vmem:[%s30488_s1 + $0xde0] ss:$16 sps:$4 sm:$0xff]  }
 0x6fc   : > { %15322 = vmatpush1.bf16.msra.mxu0 %v23296_v25  ;;  %v20004_v25 = vld [vmem:[%s24007_s11 + $0xe18] sm:$0xff] }
 0x6fd   : > { %15323 = vmatprep.subr.bf16.mxu0 %v23304_v37  ;;  %v28548_v37 = vrot.slane %v11873_v0, %v24145_v50  ;;  %v23375_v0 = vld [vmem:[%s30488_s1 + $0xc8] ss:$16 sps:$4 sm:$0xff]  }
 0x6fe   : > { %11786 = vmatpush1.bf16.msra.mxu1 %v20215_v54  ;;  %v23328_v54 = vld [vmem:[%s30488_s1 + $0xdc4] ss:$16 sps:$4 sm:$0xff]  }
 0x6ff   : > { %11787 = vmatprep.subr.bf16.mxu1 %v20208_v6  ;;  %v23326_v6 = vld [vmem:[%s30488_s1 + $0xdc0] ss:$16 sps:$4 sm:$0xff]   ;;  %v11889_v10 = vcombine.high %v28548_v37, %v28548_v37 }
 0x700   : > { %15324 = vmatpush1.bf16.msra.mxu0 %v23302_v13  ;;  %v23346_v13 = vld [vmem:[%s30488_s1 + $0xd64] ss:$16 sps:$4 sm:$0xff]  }
 0x701   : > { %15325 = vmatprep.subr.bf16.mxu0 %v23310_v51  ;;  %v23352_v51 = vld [vmem:[%s30488_s1 + $0xd44] ss:$16 sps:$4 sm:$0xff]  }
 0x702   : > { %11788 = vmatpush1.bf16.msra.mxu1 %v20207_v46  ;;  %v23334_v46 = vld [vmem:[%s30488_s1 + $0xda4] ss:$16 sps:$4 sm:$0xff]  }
 0x703   : > { %11789 = vmatprep.subr.bf16.mxu1 %v20200_v1  ;;  %v23332_v1 = vld [vmem:[%s30488_s1 + $0xda0] ss:$16 sps:$4 sm:$0xff]  }
 0x704   : > { %15326 = vmatpush1.bf16.msra.mxu0 %v23308_v24  ;;  %v23350_v24 = vld [vmem:[%s30488_s1 + $0xd40] ss:$16 sps:$4 sm:$0xff]  }
 0x705   : > { %15327 = vmatprep.subr.bf16.mxu0 %v23316_v22 }
 0x706   : > { %11790 = vmatpush1.bf16.msra.mxu1 %v20199_v63  ;;  %v20008_v63 = vld [vmem:[%s24007_s11 + $0xe38] sm:$0xff] }
 0x707   : > { %11791 = vmatprep.subr.bf16.mxu1 %v20320_v18  ;;  %v23340_v18 = vld [vmem:[%s30488_s1 + $0xd84] ss:$16 sps:$4 sm:$0xff]   ;;  %v20264_v32 = vcombine.high %v20004_v25, %v20008_v63 }
 0x708   : > { %15328 = vmatpush1.bf16.msra.mxu0 %v23314_v19  ;;  %v23357_v19 = vld [vmem:[%s30488_s1 + $0xd20] ss:$16 sps:$4 sm:$0xff]  }
 0x709   : > { %15329 = vmatprep.subr.bf16.mxu0 %v23322_v11 }
 0x70a   : > { %11792 = vmatpush2.bf16.msra.mxu1 %v20319_v33  ;;  %v23344_v33 = vld [vmem:[%s30488_s1 + $0xd60] ss:$16 sps:$4 sm:$0xff]  }
 0x70b   : > { %11793 = vmatprep.subr.bf16.mxu1 %v20312_v57  ;;  %v20263_v57 = vcombine.low %v20004_v25, %v20008_v63  ;;  %v23192_v25 = vld [vmem:[%s30488_s1 + $0x244] ss:$16 sps:$4 sm:$0xff]   ;;  %v23383_v63 = vld [vmem:[%s30488_s1 + $0xac] ss:$16 sps:$4 sm:$0xff]  }
 0x70c   : > { %15330 = vmatpush2.bf16.msra.mxu0 %v23320_v34  ;;  %v23365_v34 = vld [vmem:[%s30488_s1 + $0xd04] ss:$16 sps:$4 sm:$0xff]  }
 0x70d   : > { %15331 = vmatprep.subr.bf16.mxu0 %v23328_v54 }
 0x70e   : > { %11794 = vmatpush2.bf16.msra.mxu1 %v20311_v55  ;;  %v23160_v55 = vld [vmem:[%s30488_s1 + $0x2e0] ss:$16 sps:$4 sm:$0xff]  }
 0x70f   : > { %11795 = vmatprep.subr.bf16.mxu1 %v20304_v41  ;;  %v28570_v41 = vpack.c.bf16 %v11889_v10, %v11889_v10  ;;  %v23393_v10 = vld [vmem:[%s30488_s1 + $0x68] ss:$16 sps:$4 sm:$0xff]  }
 0x710   : > { %15332 = vmatpush2.bf16.msra.mxu0 %v23326_v6  ;;  %v23180_v6 = vld [vmem:[%s30488_s1 + $0x284] ss:$16 sps:$4 sm:$0xff]  }
 0x711   : > { %15333 = vmatprep.subr.bf16.mxu0 %v23334_v46  ;;  %v23178_v46 = vld [vmem:[%s30488_s1 + $0x280] ss:$16 sps:$4 sm:$0xff]  }
 0x712   : > { %11796 = vmatpush2.bf16.msra.mxu1 %v20303_v36  ;;  %v23166_v36 = vld [vmem:[%s30488_s1 + $0x2c0] ss:$16 sps:$4 sm:$0xff]  }
 0x713   : > { %11797 = vmatprep.subr.bf16.mxu1 %v20296_v39 }
 0x714   : > { %15334 = vmatpush2.bf16.msra.mxu0 %v23332_v1  ;;  %v23186_v1 = vld [vmem:[%s30488_s1 + $0x264] ss:$16 sps:$4 sm:$0xff]  }
 0x715   : > { %15335 = vmatprep.subr.bf16.mxu0 %v23340_v18  ;;  %v23190_v18 = vld [vmem:[%s30488_s1 + $0x240] ss:$16 sps:$4 sm:$0xff]  }
 0x716   : > { %11798 = vmatpush2.bf16.msra.mxu1 %v20295_v21 }
 0x717   : > { %11799 = vmatprep.subr.bf16.mxu1 %v20288_v7 }
 0x718   : > { %15336 = vmatpush2.bf16.msra.mxu0 %v23338_v27  ;;  %v23198_v27 = vld [vmem:[%s30488_s1 + $0x224] ss:$16 sps:$4 sm:$0xff]  }
 0x719   : > { %15337 = vmatprep.subr.bf16.mxu0 %v23346_v13  ;;  %v23196_v13 = vld [vmem:[%s30488_s1 + $0x220] ss:$16 sps:$4 sm:$0xff]  }
 0x71a   : > { %11800 = vmatpush2.bf16.msra.mxu1 %v20287_v5 }
 0x71b   : > { %11801 = vmatprep.subr.bf16.mxu1 %v20280_v53  ;;  %v23371_v53 = vld [vmem:[%s30488_s1 + $0xec] ss:$16 sps:$4 sm:$0xff]  }
 0x71c   : > { %15338 = vmatpush2.bf16.msra.mxu0 %v23344_v33  ;;  %v23204_v33 = vld [vmem:[%s30488_s1 + $0x204] ss:$16 sps:$4 sm:$0xff]  }
 0x71d   : > { %15339 = vmatprep.subr.bf16.mxu0 %v23352_v51  ;;  %v23210_v51 = vld [vmem:[%s30488_s1 + $0x3e4] ss:$16 sps:$4 sm:$0xff]  }
 0x71e   : > { %11802 = vmatpush2.bf16.msra.mxu1 %v20279_v45  ;;  %v23377_v45 = vld [vmem:[%s30488_s1 + $0xcc] ss:$16 sps:$4 sm:$0xff]  }
 0x71f   : > { %11803 = vmatprep.subr.bf16.mxu1 %v20272_v31  ;;  %v23184_v31 = vld [vmem:[%s30488_s1 + $0x260] ss:$16 sps:$4 sm:$0xff]  }
 0x720   : > { %15340 = vmatpush2.bf16.msra.mxu0 %v23350_v24  ;;  %v23401_v24 = vld [vmem:[%s30488_s1 + $0x4c] ss:$16 sps:$4 sm:$0xff]  }
 0x721   : > { %15341 = vmatprep.subr.bf16.mxu0 %v23359_v47  ;;  %v23216_v47 = vld [vmem:[%s30488_s1 + $0x3c4] ss:$16 sps:$4 sm:$0xff]  }
 0x722   : > { %11804 = vmatpush2.bf16.msra.mxu1 %v20271_v8  ;;  %v23389_v8 = vld [vmem:[%s30488_s1 + $0x8c] ss:$16 sps:$4 sm:$0xff]  }
 0x723   : > { %11805 = vmatprep.subr.bf16.mxu1 %v20264_v32  ;;  %v23387_v32 = vld [vmem:[%s30488_s1 + $0x88] ss:$16 sps:$4 sm:$0xff]  }
 0x724   : > { %15342 = vmatpush2.bf16.msra.mxu0 %v23357_v19  ;;  %v23405_v19 = vld [vmem:[%s30488_s1 + $0x28] ss:$16 sps:$4 sm:$0xff]  }
 0x725   : > { %15343 = vmatprep.subr.bf16.mxu0 %v23365_v34  ;;  %v23411_v34 = vld [vmem:[%s30488_s1 + $0x8] ss:$16 sps:$4 sm:$0xff]  }
 0x726   : > { %11806 = vmatpush2.bf16.msra.mxu1 %v20263_v57  ;;  %v23395_v57 = vld [vmem:[%s30488_s1 + $0x6c] ss:$16 sps:$4 sm:$0xff]  }
 0x727   : > { %15108 = vmatprep.subr.bf16.mxu1 %v23162_v23  ;;  %v23202_v23 = vld [vmem:[%s30488_s1 + $0x200] ss:$16 sps:$4 sm:$0xff]  }
 0x728   : > { %15344 = vmatpush2.bf16.msra.mxu0 %v23363_v28  ;;  %v23419_v28 = vld [vmem:[%s30488_s1 + $0x1ec] ss:$16 sps:$4 sm:$0xff]  }
 0x729   : > { %11808 = vmatmul.mubr.bf16.vlgmr.msra.gmra.mxu1 %v28120_v60  ;;  %v11563_v22 = vpop.f32.mrf.mxu1  ;;  %v28590_v60 = vld [vmem:[%s24002_s8 + $0x58] sm:$0xff]  ;;  %15395 = vmatprep.subr.bf16.mxu0 %v23371_v53 }
 0x72a   : > { %15109 = vmatpush1.bf16.msra.mxu1 %v23160_v55  ;;  %15140 = vmatprep.mubr.bf16.mxu1 %v28570_v41  ;;  %v28593_v48 = vadd.f32 %v11563_v22, %v28022_v14  ;;  %v11931_v21 = vrot.slane %v28590_v60, %v24145_v50  ;;  %v23399_v55 = vld [vmem:[%s30488_s1 + $0x48] ss:$16 sps:$4 sm:$0xff]   ;;  %v23407_v22 = vld [vmem:[%s30488_s1 + $0x2c] ss:$16 sps:$4 sm:$0xff]  }
 0x72b   : > { %v11565_v39 = vpop.f32.mrf.mxu1  ;;  %15110 = vmatprep.subr.bf16.mxu1 %v23168_v35  ;;  %v23208_v35 = vld [vmem:[%s30488_s1 + $0x3e0] ss:$16 sps:$4 sm:$0xff]   ;;  %v23423_v53 = vld [vmem:[%s30488_s1 + $0x1c8] ss:$16 sps:$4 sm:$0xff]  }
 0x72c   : > { %v28596_v11 = vadd.f32 %v11565_v39, %v28024_v38  ;;  %v23172_v38 = vld [vmem:[%s30488_s1 + $0x2a0] ss:$16 sps:$4 sm:$0xff]   ;;  %v11939_v62 = vcombine.high %v11931_v21, %v11931_v21  ;;  %v28622_v61 = vpack.c.bf16 %v11931_v21, %v11931_v21  ;;  %v23222_v39 = vld [vmem:[%s30488_s1 + $0x3a4] ss:$16 sps:$4 sm:$0xff]  }
 0x72d   : > { %v11567_v7 = vpop.f32.mrf.mxu1  ;;  %v23220_v21 = vld [vmem:[%s30488_s1 + $0x3a0] ss:$16 sps:$4 sm:$0xff]  }
 0x72e   : > { %v11824_v14 = vcombine.low %v28593_v48, %v28596_v11  ;;  %15111 = vmatpush1.bf16.msra.mxu1 %v23166_v36  ;;  %v28614_v5 = vpack.c.bf16 %v11939_v62, %v11939_v62  ;;  %v23214_v36 = vld [vmem:[%s30488_s1 + $0x3c0] ss:$16 sps:$4 sm:$0xff]   ;;  %v23228_v7 = vld [vmem:[%s30488_s1 + $0x384] ss:$16 sps:$4 sm:$0xff]  }
 0x72f   : > { %v11568_v54 = vpop.f32.mrf.mxu1  ;;  %15112 = vmatprep.subr.bf16.mxu1 %v23174_v20  ;;  %v23413_v20 = vld [vmem:[%s30488_s1 + $0xc] ss:$16 sps:$4 sm:$0xff]   ;;  %v23226_v62 = vld [vmem:[%s30488_s1 + $0x380] ss:$16 sps:$4 sm:$0xff]   ;;  %v23283_v11 = vld [vmem:[%s30488_s1 + $0x664] ss:$16 sps:$4 sm:$0xff]  }
 0x730   : > { %15345 = vmatprep.mubr.bf16.mxu0 %v28614_v5  ;;  %v23234_v54 = vld [vmem:[%s30488_s1 + $0x364] ss:$16 sps:$4 sm:$0xff]  }
 0x731   : > { %15346 = vmatmul.mubr.bf16.vlgmr.msra.gmra.mxu0 %v28622_v61  ;;  %v9949_v48 = vld [vmem:[#allocation2] sm:$0xff] }
 0x732   : > { %15113 = vmatpush1.bf16.msra.mxu1 %v23172_v38  ;;  %15396 = vmatpush1.bf16.msra.mxu0 %v23369_v12  ;;  %v23417_v38 = vld [vmem:[%s30488_s1 + $0x1e8] ss:$16 sps:$4 sm:$0xff]   ;;  %v23232_v12 = vld [vmem:[%s30488_s1 + $0x360] ss:$16 sps:$4 sm:$0xff]  }
 0x733   : > { %15114 = vmatprep.subr.bf16.mxu1 %v23180_v6  ;;  %15427 = vmatprep.mubr.bf16.mxu0 %v28155_v15  ;;  %v23381_v15 = vld [vmem:[%s30488_s1 + $0xa8] ss:$16 sps:$4 sm:$0xff]   ;;  %v23425_v6 = vld [vmem:[%s30488_s1 + $0x1cc] ss:$16 sps:$4 sm:$0xff]  }
 0x734   : > { %15397 = vmatprep.subr.bf16.mxu0 %v23377_v45  ;;  %v23429_v45 = vld [vmem:[%s30488_s1 + $0x1a8] ss:$16 sps:$4 sm:$0xff]  }
 0x736   : > { %15115 = vmatpush1.bf16.msra.mxu1 %v23178_v46  ;;  %15398 = vmatpush1.bf16.msra.mxu0 %v23375_v0  ;;  %v23240_v46 = vld [vmem:[%s30488_s1 + $0x344] ss:$16 sps:$4 sm:$0xff]   ;;  %v23238_v0 = vld [vmem:[%s30488_s1 + $0x340] ss:$16 sps:$4 sm:$0xff]  }
 0x737   : > { %15116 = vmatprep.subr.bf16.mxu1 %v23186_v1  ;;  %15399 = vmatprep.subr.bf16.mxu0 %v23383_v63  ;;  %v23431_v1 = vld [vmem:[%s30488_s1 + $0x1ac] ss:$16 sps:$4 sm:$0xff]  }
 0x738   : > { %v23437_v63 = vld [vmem:[%s30488_s1 + $0x18c] ss:$16 sps:$4 sm:$0xff]  }
 0x73a   : > { %15117 = vmatpush1.bf16.msra.mxu1 %v23184_v31  ;;  %15400 = vmatpush1.bf16.msra.mxu0 %v23381_v15  ;;  %v11890_v31 = vcombine.high %v28286_v4, %v28286_v4  ;;  %v23435_v15 = vld [vmem:[%s30488_s1 + $0x188] ss:$16 sps:$4 sm:$0xff]   ;;  %v23244_v4 = vld [vmem:[%s30488_s1 + $0x320] ss:$16 sps:$4 sm:$0xff]  }
 0x73b   : > { %15118 = vmatprep.subr.bf16.mxu1 %v23192_v25  ;;  %15401 = vmatprep.subr.bf16.mxu0 %v23389_v8  ;;  %v23246_v25 = vld [vmem:[%s30488_s1 + $0x324] ss:$16 sps:$4 sm:$0xff]   ;;  %v23443_v8 = vld [vmem:[%s30488_s1 + $0x16c] ss:$16 sps:$4 sm:$0xff]  }
 0x73e   : > { %15119 = vmatpush1.bf16.msra.mxu1 %v23190_v18  ;;  %15402 = vmatpush1.bf16.msra.mxu0 %v23387_v32  ;;  %v28765_v18 = vrot.slane %v11890_v31, %v24145_v50  ;;  %v23441_v32 = vld [vmem:[%s30488_s1 + $0x168] ss:$16 sps:$4 sm:$0xff]   ;;  %v23281_v31 = vld [vmem:[%s30488_s1 + $0x660] ss:$16 sps:$4 sm:$0xff]  }
 0x73f   : > { %15120 = vmatprep.subr.bf16.mxu1 %v23198_v27  ;;  %15403 = vmatprep.subr.bf16.mxu0 %v23395_v57  ;;  %v23252_v27 = vld [vmem:[%s30488_s1 + $0x304] ss:$16 sps:$4 sm:$0xff]  }
 0x740   : > { %v23259_v57 = vld [vmem:[%s30488_s1 + $0x6e4] ss:$16 sps:$4 sm:$0xff]  }
 0x742   : > { %15121 = vmatpush1.bf16.msra.mxu1 %v23196_v13  ;;  %15404 = vmatpush1.bf16.msra.mxu0 %v23393_v10  ;;  %v23250_v13 = vld [vmem:[%s30488_s1 + $0x300] ss:$16 sps:$4 sm:$0xff]   ;;  %v23449_v10 = vld [vmem:[%s30488_s1 + $0x14c] ss:$16 sps:$4 sm:$0xff]  }
 0x743   : > { %15122 = vmatprep.subr.bf16.mxu1 %v23204_v33  ;;  %15405 = vmatprep.subr.bf16.mxu0 %v23401_v24  ;;  %v11906_v33 = vcombine.high %v28765_v18, %v28765_v18  ;;  %v23257_v24 = vld [vmem:[%s30488_s1 + $0x6e0] ss:$16 sps:$4 sm:$0xff]  }
 0x746   : > { %15123 = vmatpush1.bf16.msra.mxu1 %v23202_v23  ;;  %15406 = vmatpush1.bf16.msra.mxu0 %v23399_v55  ;;  %v28789_v23 = vpack.c.bf16 %v28548_v37, %v28548_v37  ;;  %v28797_v55 = vpack.c.bf16 %v11906_v33, %v11906_v33  ;;  %v23456_v37 = vld [vmem:[%s30488_s1 + $0x12c] ss:$16 sps:$4 sm:$0xff]   ;;  %v23490_v33 = vld [vmem:[%s30488_s1 + $0x468] ss:$16 sps:$4 sm:$0xff]  }
 0x747   : > { %15124 = vmatprep.subr.bf16.mxu1 %v23210_v51  ;;  %15407 = vmatprep.subr.bf16.mxu0 %v23407_v22  ;;  %v23447_v51 = vld [vmem:[%s30488_s1 + $0x148] ss:$16 sps:$4 sm:$0xff]  }
 0x748   : > { %v23454_v22 = vld [vmem:[%s30488_s1 + $0x128] ss:$16 sps:$4 sm:$0xff]  }
 0x74a   : > { %15125 = vmatpush2.bf16.msra.mxu1 %v23208_v35  ;;  %15408 = vmatpush1.bf16.msra.mxu0 %v23405_v19  ;;  %v23265_v35 = vld [vmem:[%s30488_s1 + $0x6c4] ss:$16 sps:$4 sm:$0xff]   ;;  %v23263_v19 = vld [vmem:[%s30488_s1 + $0x6c0] ss:$16 sps:$4 sm:$0xff]  }
 0x74b   : > { %15126 = vmatprep.subr.bf16.mxu1 %v23216_v47  ;;  %15409 = vmatprep.subr.bf16.mxu0 %v23413_v20 }
 0x74e   : > { %15127 = vmatpush2.bf16.msra.mxu1 %v23214_v36  ;;  %15410 = vmatpush1.bf16.msra.mxu0 %v23411_v34 }
 0x74f   : > { %15128 = vmatprep.subr.bf16.mxu1 %v23222_v39  ;;  %15411 = vmatprep.subr.bf16.mxu0 %v23419_v28  ;;  %v23271_v39 = vld [vmem:[%s30488_s1 + $0x6a4] ss:$16 sps:$4 sm:$0xff]   ;;  %v23460_v28 = vld [vmem:[%s30488_s1 + $0x108] ss:$16 sps:$4 sm:$0xff]  }
 0x752   : > { %15129 = vmatpush2.bf16.msra.mxu1 %v23220_v21  ;;  %15412 = vmatpush2.bf16.msra.mxu0 %v23417_v38  ;;  %v23462_v21 = vld [vmem:[%s30488_s1 + $0x10c] ss:$16 sps:$4 sm:$0xff]  }
 0x753   : > { %15130 = vmatprep.subr.bf16.mxu1 %v23228_v7  ;;  %15413 = vmatprep.subr.bf16.mxu0 %v23425_v6 }
 0x756   : > { %15131 = vmatpush2.bf16.msra.mxu1 %v23226_v62  ;;  %15414 = vmatpush2.bf16.msra.mxu0 %v23423_v53  ;;  %v23269_v62 = vld [vmem:[%s30488_s1 + $0x6a0] ss:$16 sps:$4 sm:$0xff]   ;;  %v23468_v53 = vld [vmem:[%s30488_s1 + $0x4ec] ss:$16 sps:$4 sm:$0xff]  }
 0x757   : > { %15132 = vmatprep.subr.bf16.mxu1 %v23234_v54  ;;  %15415 = vmatprep.subr.bf16.mxu0 %v23431_v1  ;;  %v11832_v54 = vrot.slane %v11824_v14, %v24145_v50  ;;  %v23275_v1 = vld [vmem:[%s30488_s1 + $0x680] ss:$16 sps:$4 sm:$0xff]  }
 0x75a   : > { %15133 = vmatpush2.bf16.msra.mxu1 %v23232_v12  ;;  %15416 = vmatpush2.bf16.msra.mxu0 %v23429_v45  ;;  %v23466_v12 = vld [vmem:[%s30488_s1 + $0x4e8] ss:$16 sps:$4 sm:$0xff]   ;;  %v23474_v45 = vld [vmem:[%s30488_s1 + $0x4cc] ss:$16 sps:$4 sm:$0xff]  }
 0x75b   : > { %15134 = vmatprep.subr.bf16.mxu1 %v23240_v46  ;;  %15417 = vmatprep.subr.bf16.mxu0 %v23437_v63  ;;  %v23287_v63 = vld [vmem:[%s30488_s1 + $0x640] ss:$16 sps:$4 sm:$0xff]  }
 0x75e   : > { %15135 = vmatpush2.bf16.msra.mxu1 %v23238_v0  ;;  %15418 = vmatpush2.bf16.msra.mxu0 %v23435_v15  ;;  %v23472_v0 = vld [vmem:[%s30488_s1 + $0x4c8] ss:$16 sps:$4 sm:$0xff]   ;;  %v23295_v15 = vld [vmem:[%s30488_s1 + $0x624] ss:$16 sps:$4 sm:$0xff]  }
 0x75f   : > { %15136 = vmatprep.subr.bf16.mxu1 %v23246_v25  ;;  %15419 = vmatprep.subr.bf16.mxu0 %v23443_v8  ;;  %v23480_v25 = vld [vmem:[%s30488_s1 + $0x4ac] ss:$16 sps:$4 sm:$0xff]   ;;  %v23293_v8 = vld [vmem:[%s30488_s1 + $0x620] ss:$16 sps:$4 sm:$0xff]  }
 0x762   : > { %15137 = vmatpush2.bf16.msra.mxu1 %v23244_v4  ;;  %15420 = vmatpush2.bf16.msra.mxu0 %v23441_v32  ;;  %v23486_v4 = vld [vmem:[%s30488_s1 + $0x48c] ss:$16 sps:$4 sm:$0xff]   ;;  %v23301_v32 = vld [vmem:[%s30488_s1 + $0x604] ss:$16 sps:$4 sm:$0xff]  }
 0x763   : > { %15138 = vmatprep.subr.bf16.mxu1 %v23252_v27  ;;  %15421 = vmatprep.subr.bf16.mxu0 %v23449_v10  ;;  %v23484_v27 = vld [vmem:[%s30488_s1 + $0x488] ss:$16 sps:$4 sm:$0xff]   ;;  %v23307_v10 = vld [vmem:[%s30488_s1 + $0x7e4] ss:$16 sps:$4 sm:$0xff]  }
 0x766   : > { %15139 = vmatpush2.bf16.msra.mxu1 %v23250_v13  ;;  %15422 = vmatpush2.bf16.msra.mxu0 %v23447_v51  ;;  %v23492_v13 = vld [vmem:[%s30488_s1 + $0x46c] ss:$16 sps:$4 sm:$0xff]  }
 0x767   : > { %15190 = vmatprep.subr.bf16.mxu1 %v23259_v57  ;;  %15423 = vmatprep.subr.bf16.mxu0 %v23456_v37  ;;  %v23299_v57 = vld [vmem:[%s30488_s1 + $0x600] ss:$16 sps:$4 sm:$0xff]   ;;  %v23498_v51 = vld [vmem:[%s30488_s1 + $0x44c] ss:$16 sps:$4 sm:$0xff]   ;;  %v23313_v37 = vld [vmem:[%s30488_s1 + $0x7c4] ss:$16 sps:$4 sm:$0xff]  }
 0x769   : > { %v11645_v47 = vpop.f32.mrf.mxu1  ;;  %15141 = vmatmul.mubr.bf16.vlgmr.msra.gmra.mxu1 %v28789_v23 }
 0x76a   : > { %15191 = vmatpush1.bf16.msra.mxu1 %v23257_v24  ;;  %15222 = vmatprep.mubr.bf16.mxu1 %v28797_v55  ;;  %v11646_v20 = vadd.f32 %v11645_v47, %v28128_v43  ;;  %v23496_v24 = vld [vmem:[%s30488_s1 + $0x448] ss:$16 sps:$4 sm:$0xff]   ;;  %v23504_v47 = vld [vmem:[%s30488_s1 + $0x42c] ss:$16 sps:$4 sm:$0xff]  }
 0x76b   : > { %v11647_v36 = vpop.f32.mrf.mxu1  ;;  %15192 = vmatprep.subr.bf16.mxu1 %v23265_v35  ;;  %15424 = vmatpush2.bf16.msra.mxu0 %v23454_v22  ;;  %v23305_v35 = vld [vmem:[%s30488_s1 + $0x7e0] ss:$16 sps:$4 sm:$0xff]   ;;  %v23502_v22 = vld [vmem:[%s30488_s1 + $0x428] ss:$16 sps:$4 sm:$0xff]  }
 0x76c   : > { %v11648_v34 = vadd.f32 %v11647_v36, %v28138_v3  ;;  %15425 = vmatprep.subr.bf16.mxu0 %v23462_v21  ;;  %v23277_v3 = vld [vmem:[%s30488_s1 + $0x684] ss:$16 sps:$4 sm:$0xff]  }
 0x76d   : > { %v11649_v7 = vpop.f32.mrf.mxu1  ;;  %v23319_v36 = vld [vmem:[%s30488_s1 + $0x7a4] ss:$16 sps:$4 sm:$0xff]  }
 0x76e   : > { %v11825_v38 = vcombine.low %v11646_v20, %v11648_v34  ;;  %15193 = vmatpush1.bf16.msra.mxu1 %v23263_v19  ;;  %v23311_v19 = vld [vmem:[%s30488_s1 + $0x7c0] ss:$16 sps:$4 sm:$0xff]   ;;  %v23508_v20 = vld [vmem:[%s30488_s1 + $0x408] ss:$16 sps:$4 sm:$0xff]   ;;  %v23325_v21 = vld [vmem:[%s30488_s1 + $0x784] ss:$16 sps:$4 sm:$0xff]  }
 0x76f   : > { %v11650_v43 = vpop.f32.mrf.mxu1  ;;  %15194 = vmatprep.subr.bf16.mxu1 %v23271_v39  ;;  %15426 = vmatpush2.bf16.msra.mxu0 %v23460_v28  ;;  %v23510_v39 = vld [vmem:[%s30488_s1 + $0x40c] ss:$16 sps:$4 sm:$0xff]   ;;  %v23317_v34 = vld [vmem:[%s30488_s1 + $0x7a0] ss:$16 sps:$4 sm:$0xff]   ;;  %v23514_v28 = vld [vmem:[%s30488_s1 + $0x5e8] ss:$16 sps:$4 sm:$0xff]  }
 0x770   : > { %v11839_v6 = vrot.slane %v11825_v38, %v24145_v50  ;;  %15477 = vmatprep.subr.bf16.mxu0 %v23468_v53  ;;  %v23516_v7 = vld [vmem:[%s30488_s1 + $0x5ec] ss:$16 sps:$4 sm:$0xff]   ;;  %v23323_v38 = vld [vmem:[%s30488_s1 + $0x780] ss:$16 sps:$4 sm:$0xff]  }
 0x771   : > { %v23522_v43 = vld [vmem:[%s30488_s1 + $0x5cc] ss:$16 sps:$4 sm:$0xff]  }
 0x772   : > { %v11840_v46 = vcombine.low %v11832_v54, %v11839_v6  ;;  %15195 = vmatpush1.bf16.msra.mxu1 %v23269_v62  ;;  %15428 = vmatmul.mubr.bf16.vlgmr.msra.gmra.mxu0 %v28163_v42  ;;  %v23289_v42 = vld [vmem:[%s30488_s1 + $0x644] ss:$16 sps:$4 sm:$0xff]   ;;  %v23329_v54 = vld [vmem:[%s30488_s1 + $0x760] ss:$16 sps:$4 sm:$0xff]   ;;  %v23528_v53 = vld [vmem:[%s30488_s1 + $0x5ac] ss:$16 sps:$4 sm:$0xff]  }
 0x773   : > { %15196 = vmatprep.subr.bf16.mxu1 %v23277_v3  ;;  %15478 = vmatpush1.bf16.msra.mxu0 %v23466_v12  ;;  %v23331_v62 = vld [vmem:[%s30488_s1 + $0x764] ss:$16 sps:$4 sm:$0xff]   ;;  %v23520_v3 = vld [vmem:[%s30488_s1 + $0x5c8] ss:$16 sps:$4 sm:$0xff]  }
 0x774   : > { %v11860_v14 = vadd.f32 %v11840_v46, %v9949_v48  ;;  %15509 = vmatprep.mubr.bf16.mxu0 %v28300_v30  ;;  %15479 = vmatprep.subr.bf16.mxu0 %v23474_v45  ;;  %v23478_v30 = vld [vmem:[%s30488_s1 + $0x4a8] ss:$16 sps:$4 sm:$0xff]   ;;  %v23337_v6 = vld [vmem:[%s30488_s1 + $0x744] ss:$16 sps:$4 sm:$0xff]   ;;  %v23335_v46 = vld [vmem:[%s30488_s1 + $0x740] ss:$16 sps:$4 sm:$0xff]  }
 0x775   : > { %v23526_v12 = vld [vmem:[%s30488_s1 + $0x5a8] ss:$16 sps:$4 sm:$0xff]   ;;  %v23343_v48 = vld [vmem:[%s30488_s1 + $0x724] ss:$16 sps:$4 sm:$0xff]  }
 0x776   : > { %11862 = vst [vmem:[#allocation2] sm:$0xff] %v11860_v14  ;;  %15197 = vmatpush1.bf16.msra.mxu1 %v23275_v1  ;;  %v11907_v1 = vcombine.high %v28431_v49, %v28431_v49  ;;  %v23532_v14 = vld [vmem:[%s30488_s1 + $0x588] ss:$16 sps:$4 sm:$0xff]   ;;  %v23341_v49 = vld [vmem:[%s30488_s1 + $0x720] ss:$16 sps:$4 sm:$0xff]  }
 0x777   : > { %15198 = vmatprep.subr.bf16.mxu1 %v23283_v11  ;;  %15480 = vmatpush1.bf16.msra.mxu0 %v23472_v0  ;;  %v23534_v11 = vld [vmem:[%s30488_s1 + $0x58c] ss:$16 sps:$4 sm:$0xff]   ;;  %v23349_v0 = vld [vmem:[%s30488_s1 + $0x704] ss:$16 sps:$4 sm:$0xff]  }
 0x778   : > { %15481 = vmatprep.subr.bf16.mxu0 %v23480_v25  ;;  %v28981_v45 = vrot.slane %v11907_v1, %v24145_v50  ;;  %v23538_v25 = vld [vmem:[%s30488_s1 + $0x568] ss:$16 sps:$4 sm:$0xff]   ;;  %v23378_v1 = vld [vmem:[%s30488_s1 + $0xa60] ss:$16 sps:$4 sm:$0xff]  }
 0x77a   : > { %15199 = vmatpush1.bf16.msra.mxu1 %v23281_v31  ;;  %v28986_v31 = vpop.f32.mrf.mxu0 }
 0x77b   : > { %15200 = vmatprep.subr.bf16.mxu1 %v23289_v42  ;;  %15482 = vmatpush1.bf16.msra.mxu0 %v23478_v30  ;;  %v23540_v42 = vld [vmem:[%s30488_s1 + $0x56c] ss:$16 sps:$4 sm:$0xff]   ;;  %v23347_v30 = vld [vmem:[%s30488_s1 + $0x700] ss:$16 sps:$4 sm:$0xff]  }
 0x77c   : > { %15483 = vmatprep.subr.bf16.mxu0 %v23486_v4  ;;  %v23356_v4 = vld [vmem:[%s30488_s1 + $0xae4] ss:$16 sps:$4 sm:$0xff]  }
 0x77e   : > { %15201 = vmatpush1.bf16.msra.mxu1 %v23287_v63  ;;  %v11923_v63 = vcombine.high %v28981_v45, %v28981_v45 }
 0x77f   : > { %15202 = vmatprep.subr.bf16.mxu1 %v23295_v15  ;;  %15484 = vmatpush1.bf16.msra.mxu0 %v23484_v27  ;;  %v28999_v15 = vpop.f32.mrf.mxu0 }
 0x780   : > { %15485 = vmatprep.subr.bf16.mxu0 %v23492_v13  ;;  %v23544_v13 = vld [vmem:[%s30488_s1 + $0x548] ss:$16 sps:$4 sm:$0xff]  }
 0x781   : > { %v15105_v27 = vpop.f32.mrf.mxu0 }
 0x782   : > { %15203 = vmatpush1.bf16.msra.mxu1 %v23293_v8  ;;  %v23546_v8 = vld [vmem:[%s30488_s1 + $0x54c] ss:$16 sps:$4 sm:$0xff]   ;;  %v23404_v27 = vld [vmem:[%s30488_s1 + $0xbe4] ss:$16 sps:$4 sm:$0xff]  }
 0x783   : > { %15204 = vmatprep.subr.bf16.mxu1 %v23301_v32  ;;  %15486 = vmatpush1.bf16.msra.mxu0 %v23490_v33  ;;  %v29009_v32 = vpack.c.bf16 %v28765_v18, %v28765_v18  ;;  %v23354_v33 = vld [vmem:[%s30488_s1 + $0xae0] ss:$16 sps:$4 sm:$0xff]   ;;  %v23362_v18 = vld [vmem:[%s30488_s1 + $0xac4] ss:$16 sps:$4 sm:$0xff]  }
 0x784   : > { %15487 = vmatprep.subr.bf16.mxu0 %v23498_v51  ;;  %v23553_v51 = vld [vmem:[%s30488_s1 + $0x52c] ss:$16 sps:$4 sm:$0xff]  }
 0x786   : > { %15205 = vmatpush1.bf16.msra.mxu1 %v23299_v57  ;;  %v29017_v57 = vpack.c.bf16 %v11923_v63, %v11923_v63  ;;  %v23587_v63 = vld [vmem:[%s30488_s1 + $0x868] ss:$16 sps:$4 sm:$0xff]  }
 0x787   : > { %15206 = vmatprep.subr.bf16.mxu1 %v23307_v10  ;;  %15488 = vmatpush1.bf16.msra.mxu0 %v23496_v24  ;;  %v15106_v10 = vpop.f32.mrf.mxu0 }
 0x788   : > { %15489 = vmatprep.subr.bf16.mxu0 %v23504_v47  ;;  %v23410_v10 = vld [vmem:[%s30488_s1 + $0xbc4] ss:$16 sps:$4 sm:$0xff]  }
 0x78a   : > { %15207 = vmatpush2.bf16.msra.mxu1 %v23305_v35  ;;  %v23551_v35 = vld [vmem:[%s30488_s1 + $0x528] ss:$16 sps:$4 sm:$0xff]  }
 0x78b   : > { %15208 = vmatprep.subr.bf16.mxu1 %v23313_v37  ;;  %15490 = vmatpush1.bf16.msra.mxu0 %v23502_v22  ;;  %v23360_v37 = vld [vmem:[%s30488_s1 + $0xac0] ss:$16 sps:$4 sm:$0xff]   ;;  %v23368_v22 = vld [vmem:[%s30488_s1 + $0xaa4] ss:$16 sps:$4 sm:$0xff]  }
 0x78c   : > { %15491 = vmatprep.subr.bf16.mxu0 %v23510_v39 }
 0x78e   : > { %15209 = vmatpush2.bf16.msra.mxu1 %v23311_v19  ;;  %v29036_v19 = vpop.f32.mrf.mxu0 }
 0x78f   : > { %15210 = vmatprep.subr.bf16.mxu1 %v23319_v36  ;;  %15492 = vmatpush1.bf16.msra.mxu0 %v23508_v20  ;;  %v23559_v20 = vld [vmem:[%s30488_s1 + $0x50c] ss:$16 sps:$4 sm:$0xff]  }
 0x790   : > { %15493 = vmatprep.subr.bf16.mxu0 %v23516_v7  ;;  %v23557_v7 = vld [vmem:[%s30488_s1 + $0x508] ss:$16 sps:$4 sm:$0xff]  }
 0x792   : > { %15211 = vmatpush2.bf16.msra.mxu1 %v23317_v34 }
 0x793   : > { %15212 = vmatprep.subr.bf16.mxu1 %v23325_v21  ;;  %15494 = vmatpush2.bf16.msra.mxu0 %v23514_v28  ;;  %v29047_v21 = vpop.f32.mrf.mxu0 }
 0x794   : > { %15495 = vmatprep.subr.bf16.mxu0 %v23522_v43  ;;  %v23565_v43 = vld [vmem:[%s30488_s1 + $0x8ec] ss:$16 sps:$4 sm:$0xff]  }
 0x796   : > { %15213 = vmatpush2.bf16.msra.mxu1 %v23323_v38  ;;  %v23374_v38 = vld [vmem:[%s30488_s1 + $0xa84] ss:$16 sps:$4 sm:$0xff]  }
 0x797   : > { %15214 = vmatprep.subr.bf16.mxu1 %v23331_v62  ;;  %15496 = vmatpush2.bf16.msra.mxu0 %v23520_v3  ;;  %v15187_v62 = vpop.f32.mrf.mxu0  ;;  %v23563_v3 = vld [vmem:[%s30488_s1 + $0x8e8] ss:$16 sps:$4 sm:$0xff]  }
 0x798   : > { %15497 = vmatprep.subr.bf16.mxu0 %v23528_v53  ;;  %v23380_v53 = vld [vmem:[%s30488_s1 + $0xa64] ss:$16 sps:$4 sm:$0xff]   ;;  %v23617_v62 = vld [vmem:[%s30488_s1 + $0x9c8] ss:$16 sps:$4 sm:$0xff]  }
 0x79a   : > { %15215 = vmatpush2.bf16.msra.mxu1 %v23329_v54  ;;  %v15188_v54 = vpop.f32.mrf.mxu0 }
 0x79b   : > { %15216 = vmatprep.subr.bf16.mxu1 %v23337_v6  ;;  %15498 = vmatpush2.bf16.msra.mxu0 %v23526_v12  ;;  %v23372_v6 = vld [vmem:[%s30488_s1 + $0xa80] ss:$16 sps:$4 sm:$0xff]   ;;  %v23571_v12 = vld [vmem:[%s30488_s1 + $0x8cc] ss:$16 sps:$4 sm:$0xff]  }
 0x79c   : > { %15499 = vmatprep.subr.bf16.mxu0 %v23534_v11  ;;  %v23384_v11 = vld [vmem:[%s30488_s1 + $0xa40] ss:$16 sps:$4 sm:$0xff]   ;;  %v23625_v54 = vld [vmem:[%s30488_s1 + $0x9ac] ss:$16 sps:$4 sm:$0xff]  }
 0x79e   : > { %15217 = vmatpush2.bf16.msra.mxu1 %v23335_v46  ;;  %v23569_v46 = vld [vmem:[%s30488_s1 + $0x8c8] ss:$16 sps:$4 sm:$0xff]  }
 0x79f   : > { %15218 = vmatprep.subr.bf16.mxu1 %v23343_v48  ;;  %15500 = vmatpush2.bf16.msra.mxu0 %v23532_v14  ;;  %v23577_v48 = vld [vmem:[%s30488_s1 + $0x8ac] ss:$16 sps:$4 sm:$0xff]   ;;  %v23392_v14 = vld [vmem:[%s30488_s1 + $0xa24] ss:$16 sps:$4 sm:$0xff]  }
 0x7a0   : > { %15501 = vmatprep.subr.bf16.mxu0 %v23540_v42  ;;  %v23390_v42 = vld [vmem:[%s30488_s1 + $0xa20] ss:$16 sps:$4 sm:$0xff]  }
 0x7a2   : > { %15219 = vmatpush2.bf16.msra.mxu1 %v23341_v49  ;;  %v23583_v49 = vld [vmem:[%s30488_s1 + $0x88c] ss:$16 sps:$4 sm:$0xff]  }
 0x7a3   : > { %15220 = vmatprep.subr.bf16.mxu1 %v23349_v0  ;;  %15502 = vmatpush2.bf16.msra.mxu0 %v23538_v25  ;;  %v23581_v0 = vld [vmem:[%s30488_s1 + $0x888] ss:$16 sps:$4 sm:$0xff]   ;;  %v23398_v25 = vld [vmem:[%s30488_s1 + $0xa04] ss:$16 sps:$4 sm:$0xff]  }
 0x7a4   : > { %15503 = vmatprep.subr.bf16.mxu0 %v23546_v8  ;;  %v23595_v8 = vld [vmem:[%s30488_s1 + $0x84c] ss:$16 sps:$4 sm:$0xff]  }
 0x7a6   : > { %15221 = vmatpush2.bf16.msra.mxu1 %v23347_v30  ;;  %v23589_v30 = vld [vmem:[%s30488_s1 + $0x86c] ss:$16 sps:$4 sm:$0xff]  }
 0x7a7   : > { %15272 = vmatprep.subr.bf16.mxu1 %v23356_v4  ;;  %15504 = vmatpush2.bf16.msra.mxu0 %v23544_v13  ;;  %v23396_v4 = vld [vmem:[%s30488_s1 + $0xa00] ss:$16 sps:$4 sm:$0xff]   ;;  %v23593_v13 = vld [vmem:[%s30488_s1 + $0x848] ss:$16 sps:$4 sm:$0xff]  }
 0x7a8   : > { %15505 = vmatprep.subr.bf16.mxu0 %v23553_v51  ;;  %v23599_v51 = vld [vmem:[%s30488_s1 + $0x828] ss:$16 sps:$4 sm:$0xff]  }
 0x7a9   : > { %v11727_v24 = vpop.f32.mrf.mxu1  ;;  %15223 = vmatmul.mubr.bf16.vlgmr.msra.gmra.mxu1 %v29009_v32 }
 0x7aa   : > { %15273 = vmatpush1.bf16.msra.mxu1 %v23354_v33  ;;  %15304 = vmatprep.mubr.bf16.mxu1 %v29017_v57  ;;  %v29039_v36 = vadd.f32 %v11727_v24, %v28277_v40  ;;  %v23366_v40 = vld [vmem:[%s30488_s1 + $0xaa0] ss:$16 sps:$4 sm:$0xff]  }
 0x7ab   : > { %v11729_v47 = vpop.f32.mrf.mxu1  ;;  %15274 = vmatprep.subr.bf16.mxu1 %v23362_v18  ;;  %15506 = vmatpush2.bf16.msra.mxu0 %v23551_v35  ;;  %v23402_v33 = vld [vmem:[%s30488_s1 + $0xbe0] ss:$16 sps:$4 sm:$0xff]   ;;  %v23601_v18 = vld [vmem:[%s30488_s1 + $0x82c] ss:$16 sps:$4 sm:$0xff]   ;;  %v23416_v35 = vld [vmem:[%s30488_s1 + $0xba4] ss:$16 sps:$4 sm:$0xff]  }
 0x7ac   : > { %v29042_v39 = vadd.f32 %v11729_v47, %v28283_v56  ;;  %15507 = vmatprep.subr.bf16.mxu0 %v23559_v20  ;;  %v23408_v24 = vld [vmem:[%s30488_s1 + $0xbc0] ss:$16 sps:$4 sm:$0xff]   ;;  %v23605_v47 = vld [vmem:[%s30488_s1 + $0x808] ss:$16 sps:$4 sm:$0xff]   ;;  %v23422_v20 = vld [vmem:[%s30488_s1 + $0xb84] ss:$16 sps:$4 sm:$0xff]  }
 0x7ad   : > { %v11731_v34 = vpop.f32.mrf.mxu1 }
 0x7ae   : > { %v11841_v28 = vcombine.low %v29039_v36, %v29042_v39  ;;  %15275 = vmatpush1.bf16.msra.mxu1 %v23360_v37  ;;  %v23607_v37 = vld [vmem:[%s30488_s1 + $0x80c] ss:$16 sps:$4 sm:$0xff]   ;;  %v23477_v39 = vld [vmem:[%s30488_s1 + $0xe64] ss:$16 sps:$4 sm:$0xff]  }
 0x7af   : > { %v11732_v56 = vpop.f32.mrf.mxu1  ;;  %15276 = vmatprep.subr.bf16.mxu1 %v23368_v22  ;;  %15508 = vmatpush2.bf16.msra.mxu0 %v23557_v7  ;;  %v23414_v22 = vld [vmem:[%s30488_s1 + $0xba0] ss:$16 sps:$4 sm:$0xff]   ;;  %v23613_v34 = vld [vmem:[%s30488_s1 + $0x9ec] ss:$16 sps:$4 sm:$0xff]   ;;  %v23611_v7 = vld [vmem:[%s30488_s1 + $0x9e8] ss:$16 sps:$4 sm:$0xff]  }
 0x7b0   : > { %15559 = vmatprep.subr.bf16.mxu0 %v23565_v43  ;;  %v23428_v56 = vld [vmem:[%s30488_s1 + $0xb64] ss:$16 sps:$4 sm:$0xff]   ;;  %v23426_v43 = vld [vmem:[%s30488_s1 + $0xb60] ss:$16 sps:$4 sm:$0xff]   ;;  %v9950_v36 = vld [vmem:[#allocation2 + $0x8] sm:$0xff] }
 0x7b2   : > { %15277 = vmatpush1.bf16.msra.mxu1 %v23366_v40  ;;  %15510 = vmatmul.mubr.bf16.vlgmr.msra.gmra.mxu0 %v28308_v9  ;;  %v23386_v9 = vld [vmem:[%s30488_s1 + $0xa44] ss:$16 sps:$4 sm:$0xff]   ;;  %v23420_v40 = vld [vmem:[%s30488_s1 + $0xb80] ss:$16 sps:$4 sm:$0xff]  }
 0x7b3   : > { %15278 = vmatprep.subr.bf16.mxu1 %v23374_v38  ;;  %15560 = vmatpush1.bf16.msra.mxu0 %v23563_v3  ;;  %v23619_v38 = vld [vmem:[%s30488_s1 + $0x9cc] ss:$16 sps:$4 sm:$0xff]   ;;  %v23434_v3 = vld [vmem:[%s30488_s1 + $0xb44] ss:$16 sps:$4 sm:$0xff]  }
 0x7b4   : > { %15591 = vmatprep.mubr.bf16.mxu0 %v28445_v58  ;;  %15561 = vmatprep.subr.bf16.mxu0 %v23571_v12  ;;  %v23575_v58 = vld [vmem:[%s30488_s1 + $0x8a8] ss:$16 sps:$4 sm:$0xff]   ;;  %v11924_v12 = vcombine.high %v28590_v60, %v28590_v60  ;;  %v23438_v60 = vld [vmem:[%s30488_s1 + $0xb20] ss:$16 sps:$4 sm:$0xff]  }
 0x7b6   : > { %15279 = vmatpush1.bf16.msra.mxu1 %v23372_v6  ;;  %v23623_v6 = vld [vmem:[%s30488_s1 + $0x9a8] ss:$16 sps:$4 sm:$0xff]  }
 0x7b7   : > { %15280 = vmatprep.subr.bf16.mxu1 %v23380_v53  ;;  %15562 = vmatpush1.bf16.msra.mxu0 %v23569_v46  ;;  %v23432_v53 = vld [vmem:[%s30488_s1 + $0xb40] ss:$16 sps:$4 sm:$0xff]   ;;  %v23440_v46 = vld [vmem:[%s30488_s1 + $0xb24] ss:$16 sps:$4 sm:$0xff]  }
 0x7b8   : > { %15563 = vmatprep.subr.bf16.mxu0 %v23577_v48  ;;  %v29206_v48 = vrot.slane %v11924_v12, %v24145_v50  ;;  %v23667_v12 = vld [vmem:[%s30488_s1 + $0xccc] ss:$16 sps:$4 sm:$0xff]  }
 0x7ba   : > { %15281 = vmatpush1.bf16.msra.mxu1 %v23378_v1  ;;  %v23631_v1 = vld [vmem:[%s30488_s1 + $0x98c] ss:$16 sps:$4 sm:$0xff]  }
 0x7bb   : > { %15282 = vmatprep.subr.bf16.mxu1 %v23386_v9  ;;  %15564 = vmatpush1.bf16.msra.mxu0 %v23575_v58  ;;  %v23629_v9 = vld [vmem:[%s30488_s1 + $0x988] ss:$16 sps:$4 sm:$0xff]   ;;  %v23446_v58 = vld [vmem:[%s30488_s1 + $0xb04] ss:$16 sps:$4 sm:$0xff]  }
 0x7bc   : > { %15565 = vmatprep.subr.bf16.mxu0 %v23583_v49  ;;  %v23444_v49 = vld [vmem:[%s30488_s1 + $0xb00] ss:$16 sps:$4 sm:$0xff]  }
 0x7be   : > { %15283 = vmatpush1.bf16.msra.mxu1 %v23384_v11  ;;  %v23637_v11 = vld [vmem:[%s30488_s1 + $0x96c] ss:$16 sps:$4 sm:$0xff]  }
 0x7bf   : > { %15284 = vmatprep.subr.bf16.mxu1 %v23392_v14  ;;  %15566 = vmatpush1.bf16.msra.mxu0 %v23581_v0  ;;  %v23635_v14 = vld [vmem:[%s30488_s1 + $0x968] ss:$16 sps:$4 sm:$0xff]   ;;  %v11940_v0 = vcombine.high %v29206_v48, %v29206_v48 }
 0x7c0   : > { %15567 = vmatprep.subr.bf16.mxu0 %v23589_v30  ;;  %v29230_v30 = vpack.c.bf16 %v28981_v45, %v28981_v45  ;;  %v23649_v45 = vld [vmem:[%s30488_s1 + $0x92c] ss:$16 sps:$4 sm:$0xff]  }
 0x7c2   : > { %15285 = vmatpush1.bf16.msra.mxu1 %v23390_v42  ;;  %v23453_v42 = vld [vmem:[%s30488_s1 + $0xee4] ss:$16 sps:$4 sm:$0xff]  }
 0x7c3   : > { %15286 = vmatprep.subr.bf16.mxu1 %v23398_v25  ;;  %15568 = vmatpush1.bf16.msra.mxu0 %v23587_v63  ;;  %v23643_v25 = vld [vmem:[%s30488_s1 + $0x94c] ss:$16 sps:$4 sm:$0xff]   ;;  %v23641_v63 = vld [vmem:[%s30488_s1 + $0x948] ss:$16 sps:$4 sm:$0xff]  }
 0x7c4   : > { %15569 = vmatprep.subr.bf16.mxu0 %v23595_v8  ;;  %v23459_v8 = vld [vmem:[%s30488_s1 + $0xec4] ss:$16 sps:$4 sm:$0xff]  }
 0x7c6   : > { %15287 = vmatpush1.bf16.msra.mxu1 %v23396_v4  ;;  %v23451_v4 = vld [vmem:[%s30488_s1 + $0xee0] ss:$16 sps:$4 sm:$0xff]  }
 0x7c7   : > { %15288 = vmatprep.subr.bf16.mxu1 %v23404_v27  ;;  %15570 = vmatpush1.bf16.msra.mxu0 %v23593_v13  ;;  %v29238_v27 = vpack.c.bf16 %v11940_v0, %v11940_v0  ;;  %v23495_v0 = vld [vmem:[%s30488_s1 + $0xe04] ss:$16 sps:$4 sm:$0xff]  }
 0x7c8   : > { %15571 = vmatprep.subr.bf16.mxu0 %v23601_v18 }
 0x7ca   : > { %15289 = vmatpush2.bf16.msra.mxu1 %v23402_v33  ;;  %v23647_v33 = vld [vmem:[%s30488_s1 + $0x928] ss:$16 sps:$4 sm:$0xff]  }
 0x7cb   : > { %15290 = vmatprep.subr.bf16.mxu1 %v23410_v10  ;;  %15572 = vmatpush1.bf16.msra.mxu0 %v23599_v51  ;;  %v23457_v10 = vld [vmem:[%s30488_s1 + $0xec0] ss:$16 sps:$4 sm:$0xff]   ;;  %v23465_v51 = vld [vmem:[%s30488_s1 + $0xea4] ss:$16 sps:$4 sm:$0xff]  }
 0x7cc   : > { %15573 = vmatprep.subr.bf16.mxu0 %v23607_v37 }
 0x7ce   : > { %15291 = vmatpush2.bf16.msra.mxu1 %v23408_v24  ;;  %v29257_v24 = vpop.f32.mrf.mxu0 }
 0x7cf   : > { %15292 = vmatprep.subr.bf16.mxu1 %v23416_v35  ;;  %15574 = vmatpush1.bf16.msra.mxu0 %v23605_v47  ;;  %v23655_v47 = vld [vmem:[%s30488_s1 + $0x90c] ss:$16 sps:$4 sm:$0xff]  }
 0x7d0   : > { %15575 = vmatprep.subr.bf16.mxu0 %v23613_v34  ;;  %v23653_v34 = vld [vmem:[%s30488_s1 + $0x908] ss:$16 sps:$4 sm:$0xff]  }
 0x7d2   : > { %15293 = vmatpush2.bf16.msra.mxu1 %v23414_v22 }
 0x7d3   : > { %15294 = vmatprep.subr.bf16.mxu1 %v23422_v20  ;;  %15576 = vmatpush2.bf16.msra.mxu0 %v23611_v7  ;;  %v29264_v20 = vpop.f32.mrf.mxu0 }
 0x7d4   : > { %15577 = vmatprep.subr.bf16.mxu0 %v23619_v38  ;;  %v11849_v38 = vrot.slane %v11841_v28, %v24145_v50 }
 0x7d6   : > { %15295 = vmatpush2.bf16.msra.mxu1 %v23420_v40  ;;  %v23471_v40 = vld [vmem:[%s30488_s1 + $0xe84] ss:$16 sps:$4 sm:$0xff]  }
 0x7d7   : > { %15296 = vmatprep.subr.bf16.mxu1 %v23428_v56  ;;  %15578 = vmatpush2.bf16.msra.mxu0 %v23617_v62  ;;  %v15269_v56 = vpop.f32.mrf.mxu0 }
 0x7d8   : > { %15579 = vmatprep.subr.bf16.mxu0 %v23625_v54  ;;  %v23715_v56 = vld [vmem:[%s30488_s1 + $0xdcc] ss:$16 sps:$4 sm:$0xff]  }
 0x7d9   : > { %v15270_v54 = vpop.f32.mrf.mxu0 }
 0x7da   : > { %15297 = vmatpush2.bf16.msra.mxu1 %v23426_v43  ;;  %v23661_v43 = vld [vmem:[%s30488_s1 + $0xcec] ss:$16 sps:$4 sm:$0xff]   ;;  %v23719_v54 = vld [vmem:[%s30488_s1 + $0xda8] ss:$16 sps:$4 sm:$0xff]  }
 0x7db   : > { %15298 = vmatprep.subr.bf16.mxu1 %v23434_v3  ;;  %15580 = vmatpush2.bf16.msra.mxu0 %v23623_v6  ;;  %v23659_v3 = vld [vmem:[%s30488_s1 + $0xce8] ss:$16 sps:$4 sm:$0xff]  }
 0x7dc   : > { %15581 = vmatprep.subr.bf16.mxu0 %v23631_v1  ;;  %v23475_v1 = vld [vmem:[%s30488_s1 + $0xe60] ss:$16 sps:$4 sm:$0xff]  }
 0x7de   : > { %15299 = vmatpush2.bf16.msra.mxu1 %v23432_v53  ;;  %v23469_v53 = vld [vmem:[%s30488_s1 + $0xe80] ss:$16 sps:$4 sm:$0xff]  }
 0x7df   : > { %15300 = vmatprep.subr.bf16.mxu1 %v23440_v46  ;;  %15582 = vmatpush2.bf16.msra.mxu0 %v23629_v9  ;;  %v23665_v46 = vld [vmem:[%s30488_s1 + $0xcc8] ss:$16 sps:$4 sm:$0xff]   ;;  %v23673_v9 = vld [vmem:[%s30488_s1 + $0xcac] ss:$16 sps:$4 sm:$0xff]  }
 0x7e0   : > { %15583 = vmatprep.subr.bf16.mxu0 %v23637_v11  ;;  %v23679_v11 = vld [vmem:[%s30488_s1 + $0xc8c] ss:$16 sps:$4 sm:$0xff]  }
 0x7e2   : > { %15301 = vmatpush2.bf16.msra.mxu1 %v23438_v60  ;;  %v23481_v60 = vld [vmem:[%s30488_s1 + $0xe40] ss:$16 sps:$4 sm:$0xff]  }
 0x7e3   : > { %15302 = vmatprep.subr.bf16.mxu1 %v23446_v58  ;;  %15584 = vmatpush2.bf16.msra.mxu0 %v23635_v14  ;;  %v23489_v58 = vld [vmem:[%s30488_s1 + $0xe24] ss:$16 sps:$4 sm:$0xff]   ;;  %v23677_v14 = vld [vmem:[%s30488_s1 + $0xc88] ss:$16 sps:$4 sm:$0xff]  }
 0x7e4   : > { %15585 = vmatprep.subr.bf16.mxu0 %v23643_v25  ;;  %v23683_v25 = vld [vmem:[%s30488_s1 + $0xc68] ss:$16 sps:$4 sm:$0xff]  }
 0x7e6   : > { %15303 = vmatpush2.bf16.msra.mxu1 %v23444_v49  ;;  %v23487_v49 = vld [vmem:[%s30488_s1 + $0xe20] ss:$16 sps:$4 sm:$0xff]  }
 0x7e7   : > { %15354 = vmatprep.subr.bf16.mxu1 %v23453_v42  ;;  %15586 = vmatpush2.bf16.msra.mxu0 %v23641_v63  ;;  %v23685_v42 = vld [vmem:[%s30488_s1 + $0xc6c] ss:$16 sps:$4 sm:$0xff]   ;;  %v23493_v63 = vld [vmem:[%s30488_s1 + $0xe00] ss:$16 sps:$4 sm:$0xff]  }
 0x7e8   : > { %15587 = vmatprep.subr.bf16.mxu0 %v23649_v45  ;;  %v23689_v45 = vld [vmem:[%s30488_s1 + $0xc48] ss:$16 sps:$4 sm:$0xff]  }
 0x7e9   : > { %v11809_v13 = vpop.f32.mrf.mxu1  ;;  %15305 = vmatmul.mubr.bf16.vlgmr.msra.gmra.mxu1 %v29230_v30 }
 0x7ea   : > { %15355 = vmatpush1.bf16.msra.mxu1 %v23451_v4  ;;  %15386 = vmatprep.mubr.bf16.mxu1 %v29238_v27  ;;  %v11810_v35 = vadd.f32 %v11809_v13, %v28422_v59  ;;  %v23463_v59 = vld [vmem:[%s30488_s1 + $0xea0] ss:$16 sps:$4 sm:$0xff]   ;;  %v23501_v4 = vld [vmem:[%s30488_s1 + $0xfe4] ss:$16 sps:$4 sm:$0xff]  }
 0x7eb   : > { %v11811_v18 = vpop.f32.mrf.mxu1  ;;  %15356 = vmatprep.subr.bf16.mxu1 %v23459_v8  ;;  %15588 = vmatpush2.bf16.msra.mxu0 %v23647_v33  ;;  %v23691_v8 = vld [vmem:[%s30488_s1 + $0xc4c] ss:$16 sps:$4 sm:$0xff]   ;;  %v23499_v13 = vld [vmem:[%s30488_s1 + $0xfe0] ss:$16 sps:$4 sm:$0xff]   ;;  %v23507_v33 = vld [vmem:[%s30488_s1 + $0xfc4] ss:$16 sps:$4 sm:$0xff]  }
 0x7ec   : > { %v11812_v37 = vadd.f32 %v11811_v18, %v28428_v2  ;;  %15589 = vmatprep.subr.bf16.mxu0 %v23655_v47  ;;  %v23695_v18 = vld [vmem:[%s30488_s1 + $0xc28] ss:$16 sps:$4 sm:$0xff]  }
 0x7ed   : > { %v11813_v22 = vpop.f32.mrf.mxu1  ;;  %v23701_v47 = vld [vmem:[%s30488_s1 + $0xc08] ss:$16 sps:$4 sm:$0xff]  }
 0x7ee   : > { %v11842_v7 = vcombine.low %v11810_v35, %v11812_v37  ;;  %15357 = vmatpush1.bf16.msra.mxu1 %v23457_v10  ;;  %v23697_v10 = vld [vmem:[%s30488_s1 + $0xc2c] ss:$16 sps:$4 sm:$0xff]   ;;  %v23513_v35 = vld [vmem:[%s30488_s1 + $0xfa4] ss:$16 sps:$4 sm:$0xff]   ;;  %v23511_v22 = vld [vmem:[%s30488_s1 + $0xfa0] ss:$16 sps:$4 sm:$0xff]  }
 0x7ef   : > { %v11814_v2 = vpop.f32.mrf.mxu1  ;;  %15358 = vmatprep.subr.bf16.mxu1 %v23465_v51  ;;  %15590 = vmatpush2.bf16.msra.mxu0 %v23653_v34  ;;  %v23505_v51 = vld [vmem:[%s30488_s1 + $0xfc0] ss:$16 sps:$4 sm:$0xff]   ;;  %v23703_v37 = vld [vmem:[%s30488_s1 + $0xc0c] ss:$16 sps:$4 sm:$0xff]   ;;  %v23519_v34 = vld [vmem:[%s30488_s1 + $0xf84] ss:$16 sps:$4 sm:$0xff]  }
 0x7f0   : > { %v11856_v62 = vrot.slane %v11842_v7, %v24145_v50  ;;  %15641 = vmatprep.subr.bf16.mxu0 %v23661_v43  ;;  %v23709_v7 = vld [vmem:[%s30488_s1 + $0xdec] ss:$16 sps:$4 sm:$0xff]   ;;  %v23517_v2 = vld [vmem:[%s30488_s1 + $0xf80] ss:$16 sps:$4 sm:$0xff]   ;;  %v23531_v43 = vld [vmem:[%s30488_s1 + $0xf44] ss:$16 sps:$4 sm:$0xff]  }
 0x7f2   : > { %v11857_v6 = vcombine.low %v11849_v38, %v11856_v62  ;;  %15359 = vmatpush1.bf16.msra.mxu1 %v23463_v59  ;;  %15592 = vmatmul.mubr.bf16.vlgmr.msra.gmra.mxu0 %v28453_v16  ;;  %v23483_v16 = vld [vmem:[%s30488_s1 + $0xe44] ss:$16 sps:$4 sm:$0xff]   ;;  %v23707_v59 = vld [vmem:[%s30488_s1 + $0xde8] ss:$16 sps:$4 sm:$0xff]   ;;  %v23523_v62 = vld [vmem:[%s30488_s1 + $0xf60] ss:$16 sps:$4 sm:$0xff]  }
 0x7f3   : > { %15360 = vmatprep.subr.bf16.mxu1 %v23471_v40  ;;  %15642 = vmatpush1.bf16.msra.mxu0 %v23659_v3  ;;  %v23525_v40 = vld [vmem:[%s30488_s1 + $0xf64] ss:$16 sps:$4 sm:$0xff]   ;;  %v23713_v38 = vld [vmem:[%s30488_s1 + $0xdc8] ss:$16 sps:$4 sm:$0xff]   ;;  %v23721_v3 = vld [vmem:[%s30488_s1 + $0xdac] ss:$16 sps:$4 sm:$0xff]  }
 0x7f4   : > { %v11861_v28 = vadd.f32 %v11857_v6, %v9950_v36  ;;  %15673 = vmatprep.mubr.bf16.mxu0 %v28614_v5  ;;  %15643 = vmatprep.subr.bf16.mxu0 %v23667_v12  ;;  %v23671_v5 = vld [vmem:[%s30488_s1 + $0xca8] ss:$16 sps:$4 sm:$0xff]   ;;  %v23529_v6 = vld [vmem:[%s30488_s1 + $0xf40] ss:$16 sps:$4 sm:$0xff]   ;;  %v23727_v36 = vld [vmem:[%s30488_s1 + $0xd8c] ss:$16 sps:$4 sm:$0xff]  }
 0x7f5   : > { %v12485_v12 = vld [vmem:[%s30489_s2] sm:$0xf] }
 0x7f6   : > { %11863 = vst [vmem:[#allocation2 + $0x8] sm:$0xff] %v11861_v28  ;;  %15361 = vmatpush1.bf16.msra.mxu1 %v23469_v53  ;;  %v23537_v53 = vld [vmem:[%s30488_s1 + $0xf24] ss:$16 sps:$4 sm:$0xff]   ;;  %v23535_v28 = vld [vmem:[%s30488_s1 + $0xf20] ss:$16 sps:$4 sm:$0xff]  }
 0x7f7   : > { %15362 = vmatprep.subr.bf16.mxu1 %v23477_v39  ;;  %15644 = vmatpush1.bf16.msra.mxu0 %v23665_v46  ;;  %v23725_v39 = vld [vmem:[%s30488_s1 + $0xd88] ss:$16 sps:$4 sm:$0xff]   ;;  %v23543_v46 = vld [vmem:[%s30488_s1 + $0xf04] ss:$16 sps:$4 sm:$0xff]  }
 0x7f8   : > { %15645 = vmatprep.subr.bf16.mxu0 %v23673_v9  ;;  %v12490_v9 = vrot.slane %v12485_v12, %v24873_v26 }
 0x7fa   : > { %15363 = vmatpush1.bf16.msra.mxu1 %v23475_v1  ;;  %v23733_v1 = vld [vmem:[%s30488_s1 + $0xd6c] ss:$16 sps:$4 sm:$0xff]  }
 0x7fb   : > { %15364 = vmatprep.subr.bf16.mxu1 %v23483_v16  ;;  %15646 = vmatpush1.bf16.msra.mxu0 %v23671_v5  ;;  %v23731_v16 = vld [vmem:[%s30488_s1 + $0xd68] ss:$16 sps:$4 sm:$0xff]   ;;  %v23541_v5 = vld [vmem:[%s30488_s1 + $0xf00] ss:$16 sps:$4 sm:$0xff]  }
 0x7fc   : > { %15647 = vmatprep.subr.bf16.mxu0 %v23679_v11  ;;  %v23739_v11 = vld [vmem:[%s30488_s1 + $0xd4c] ss:$16 sps:$4 sm:$0xff]  }
 0x7fe   : > { %15365 = vmatpush1.bf16.msra.mxu1 %v23481_v60  ;;  %v23550_v60 = vld [vmem:[%s30488_s1 + $0x2ec] ss:$16 sps:$4 sm:$0xff]  }
 0x7ff   : > { %15366 = vmatprep.subr.bf16.mxu1 %v23489_v58  ;;  %15648 = vmatpush1.bf16.msra.mxu0 %v23677_v14  ;;  %v12494_v58 = vrot.slane %v12485_v12, %v24882_v29  ;;  %v29448_v14 = vpack.c.bf16 %v29206_v48, %v29206_v48 }
 0x800   : > { %15649 = vmatprep.subr.bf16.mxu0 %v23685_v42  ;;  %v23548_v42 = vld [vmem:[%s30488_s1 + $0x2e8] ss:$16 sps:$4 sm:$0xff]  }
 0x801   : > { %v15104_v48 = vadd.f32 %v28999_v15, %v12494_v58  ;;  %v23584_v58 = vld [vmem:[%s30488_s1 + $0x228] ss:$16 sps:$4 sm:$0xff]  }
 0x802   : > { %15367 = vmatpush1.bf16.msra.mxu1 %v23487_v49  ;;  %v23737_v49 = vld [vmem:[%s30488_s1 + $0xd48] ss:$16 sps:$4 sm:$0xff]  }
 0x803   : > { %15368 = vmatprep.subr.bf16.mxu1 %v23495_v0  ;;  %15650 = vmatpush1.bf16.msra.mxu0 %v23683_v25  ;;  %v15102_v0 = vadd.f32 %v28986_v31, %v12490_v9  ;;  %v23556_v25 = vld [vmem:[%s30488_s1 + $0x2cc] ss:$16 sps:$4 sm:$0xff]   ;;  %v23743_v31 = vld [vmem:[%s30488_s1 + $0xd28] ss:$16 sps:$4 sm:$0xff]   ;;  %v20873_v9 = vld [vmem:[%s24007_s11 + $0x1120] sm:$0xff] }
 0x804   : > { %15651 = vmatprep.subr.bf16.mxu0 %v23691_v8 }
 0x806   : > { %15369 = vmatpush1.bf16.msra.mxu1 %v23493_v63  ;;  %v23745_v63 = vld [vmem:[%s30488_s1 + $0xd2c] ss:$16 sps:$4 sm:$0xff]  }
 0x807   : > { %15370 = vmatprep.subr.bf16.mxu1 %v23501_v4  ;;  %15652 = vmatpush1.bf16.msra.mxu0 %v23689_v45  ;;  %v23554_v45 = vld [vmem:[%s30488_s1 + $0x2c8] ss:$16 sps:$4 sm:$0xff]  }
 0x808   : > { %15653 = vmatprep.subr.bf16.mxu0 %v23697_v10 }
 0x80a   : > { %15371 = vmatpush2.bf16.msra.mxu1 %v23499_v13  ;;  %v23562_v13 = vld [vmem:[%s30488_s1 + $0x2ac] ss:$16 sps:$4 sm:$0xff]  }
 0x80b   : > { %15372 = vmatprep.subr.bf16.mxu1 %v23507_v33  ;;  %15654 = vmatpush1.bf16.msra.mxu0 %v23695_v18  ;;  %v29477_v33 = vpop.f32.mrf.mxu0  ;;  %v23751_v18 = vld [vmem:[%s30488_s1 + $0xd0c] ss:$16 sps:$4 sm:$0xff]  }
 0x80c   : > { %15655 = vmatprep.subr.bf16.mxu0 %v23703_v37  ;;  %v23560_v37 = vld [vmem:[%s30488_s1 + $0x2a8] ss:$16 sps:$4 sm:$0xff]  }
 0x80e   : > { %15373 = vmatpush2.bf16.msra.mxu1 %v23505_v51 }
 0x80f   : > { %15374 = vmatprep.subr.bf16.mxu1 %v23513_v35  ;;  %15656 = vmatpush1.bf16.msra.mxu0 %v23701_v47  ;;  %v23749_v35 = vld [vmem:[%s30488_s1 + $0xd08] ss:$16 sps:$4 sm:$0xff]  }
 0x810   : > { %15657 = vmatprep.subr.bf16.mxu0 %v23709_v7 }
 0x812   : > { %15375 = vmatpush2.bf16.msra.mxu1 %v23511_v22  ;;  %v23568_v22 = vld [vmem:[%s30488_s1 + $0x28c] ss:$16 sps:$4 sm:$0xff]  }
 0x813   : > { %15376 = vmatprep.subr.bf16.mxu1 %v23519_v34  ;;  %15658 = vmatpush2.bf16.msra.mxu0 %v23707_v59  ;;  %v20893_v34 = vld [vmem:[%s24007_s11 + $0x11c0] sm:$0xff] }
 0x814   : > { %15659 = vmatprep.subr.bf16.mxu0 %v23715_v56  ;;  %v20897_v59 = vld [vmem:[%s24007_s11 + $0x11e0] sm:$0xff] }
 0x816   : > { %15377 = vmatpush2.bf16.msra.mxu1 %v23517_v2  ;;  %v21149_v2 = vcombine.low %v20893_v34, %v20897_v59 }
 0x817   : > { %15378 = vmatprep.subr.bf16.mxu1 %v23525_v40  ;;  %15660 = vmatpush2.bf16.msra.mxu0 %v23713_v38  ;;  %v21150_v40 = vcombine.high %v20893_v34, %v20897_v59  ;;  %v23566_v38 = vld [vmem:[%s30488_s1 + $0x288] ss:$16 sps:$4 sm:$0xff]   ;;  %v23610_v34 = vld [vmem:[%s30488_s1 + $0x3ac] ss:$16 sps:$4 sm:$0xff]   ;;  %v20841_v59 = vld [vmem:[%s24007_s11 + $0x1020] sm:$0xff] }
 0x818   : > { %15661 = vmatprep.subr.bf16.mxu0 %v23721_v3  ;;  %v20889_v3 = vld [vmem:[%s24007_s11 + $0x11a0] sm:$0xff] }
 0x81a   : > { %15379 = vmatpush2.bf16.msra.mxu1 %v23523_v62  ;;  %v23574_v62 = vld [vmem:[%s30488_s1 + $0x26c] ss:$16 sps:$4 sm:$0xff]  }
 0x81b   : > { %15380 = vmatprep.subr.bf16.mxu1 %v23531_v43  ;;  %15662 = vmatpush2.bf16.msra.mxu0 %v23719_v54  ;;  %v20885_v43 = vld [vmem:[%s24007_s11 + $0x1180] sm:$0xff] }
 0x81c   : > { %15663 = vmatprep.subr.bf16.mxu0 %v23727_v36  ;;  %v21142_v54 = vcombine.high %v20885_v43, %v20889_v3  ;;  %v23580_v36 = vld [vmem:[%s30488_s1 + $0x24c] ss:$16 sps:$4 sm:$0xff]  }
 0x81e   : > { %15381 = vmatpush2.bf16.msra.mxu1 %v23529_v6  ;;  %v21141_v6 = vcombine.low %v20885_v43, %v20889_v3  ;;  %v20961_v43 = vld [vmem:[%s24007_s11 + $0x13e0] sm:$0xff] }
 0x81f   : > { %15382 = vmatprep.subr.bf16.mxu1 %v23537_v53  ;;  %15664 = vmatpush2.bf16.msra.mxu0 %v23725_v39  ;;  %v23572_v53 = vld [vmem:[%s30488_s1 + $0x268] ss:$16 sps:$4 sm:$0xff]   ;;  %v20877_v39 = vld [vmem:[%s24007_s11 + $0x1140] sm:$0xff] }
 0x820   : > { %15665 = vmatprep.subr.bf16.mxu0 %v23733_v1  ;;  %v23586_v1 = vld [vmem:[%s30488_s1 + $0x22c] ss:$16 sps:$4 sm:$0xff]  }
 0x822   : > { %15383 = vmatpush2.bf16.msra.mxu1 %v23535_v28  ;;  %v20881_v28 = vld [vmem:[%s24007_s11 + $0x1160] sm:$0xff] }
 0x823   : > { %15384 = vmatprep.subr.bf16.mxu1 %v23543_v46  ;;  %15666 = vmatpush2.bf16.msra.mxu0 %v23731_v16  ;;  %v21134_v12 = vcombine.high %v20877_v39, %v20881_v28  ;;  %v23578_v46 = vld [vmem:[%s30488_s1 + $0x248] ss:$16 sps:$4 sm:$0xff]   ;;  %v20869_v16 = vld [vmem:[%s24007_s11 + $0x1100] sm:$0xff] }
 0x824   : > { %15667 = vmatprep.subr.bf16.mxu0 %v23739_v11  ;;  %v23592_v11 = vld [vmem:[%s30488_s1 + $0x20c] ss:$16 sps:$4 sm:$0xff]  }
 0x826   : > { %15385 = vmatpush2.bf16.msra.mxu1 %v23541_v5  ;;  %v21126_v5 = vcombine.high %v20869_v16, %v20873_v9 }
 0x827   : > { %15436 = vmatprep.subr.bf16.mxu1 %v23550_v60  ;;  %15668 = vmatpush2.bf16.msra.mxu0 %v23737_v49  ;;  %v21125_v60 = vcombine.low %v20869_v16, %v20873_v9  ;;  %v20861_v49 = vld [vmem:[%s24007_s11 + $0x10c0] sm:$0xff] }
 0x828   : > { %15669 = vmatprep.subr.bf16.mxu0 %v23745_v63  ;;  %v23598_v63 = vld [vmem:[%s30488_s1 + $0x3ec] ss:$16 sps:$4 sm:$0xff]   ;;  %v20945_v16 = vld [vmem:[%s24007_s11 + $0x1360] sm:$0xff] }
 0x829   : > { %v15142_v4 = vpop.f32.mrf.mxu1  ;;  %15387 = vmatmul.mubr.bf16.vlgmr.msra.gmra.mxu1 %v29448_v14 }
 0x82a   : > { %v29468_v8 = vadd.f32 %v15142_v4, %v15102_v0  ;;  %15437 = vmatpush1.bf16.msra.mxu1 %v23548_v42  ;;  %15468 = vmatprep.mubr.bf16.mxu1 %v28570_v41  ;;  %v29484_v41 = vpop.f32.mrf.mxu0  ;;  %v20865_v0 = vld [vmem:[%s24007_s11 + $0x10e0] sm:$0xff] }
 0x82b   : > { %v15144_v15 = vpop.f32.mrf.mxu1  ;;  %15438 = vmatprep.subr.bf16.mxu1 %v23556_v25  ;;  %15670 = vmatpush2.bf16.msra.mxu0 %v23743_v31  ;;  %v21118_v42 = vcombine.high %v20861_v49, %v20865_v0  ;;  %v21117_v25 = vcombine.low %v20861_v49, %v20865_v0  ;;  %v20853_v4 = vld [vmem:[%s24007_s11 + $0x1080] sm:$0xff] }
 0x82c   : > { %v29479_v10 = vadd.f32 %v15144_v15, %v15104_v48  ;;  %15671 = vmatprep.subr.bf16.mxu0 %v23751_v18  ;;  %v15351_v7 = vpop.f32.mrf.mxu0  ;;  %v23590_v48 = vld [vmem:[%s30488_s1 + $0x208] ss:$16 sps:$4 sm:$0xff]   ;;  %v20857_v31 = vld [vmem:[%s24007_s11 + $0x10a0] sm:$0xff]  ;;  %v23604_v18 = vld [vmem:[%s30488_s1 + $0x3cc] ss:$16 sps:$4 sm:$0xff]  }
 0x82d   : > { %v15146_v51 = vpop.f32.mrf.mxu1  ;;  %v21109_v15 = vcombine.low %v20853_v4, %v20857_v31  ;;  %v20837_v7 = vld [vmem:[%s24007_s11 + $0x1000] sm:$0xff] }
 0x82e   : > { %15439 = vmatpush1.bf16.msra.mxu1 %v23554_v45  ;;  %v15352_v56 = vpop.f32.mrf.mxu0  ;;  %v21110_v45 = vcombine.high %v20853_v4, %v20857_v31  ;;  %v20845_v51 = vld [vmem:[%s24007_s11 + $0x1040] sm:$0xff] }
 0x82f   : > { %v15147_v47 = vpop.f32.mrf.mxu1  ;;  %15440 = vmatprep.subr.bf16.mxu1 %v23562_v13  ;;  %15672 = vmatpush2.bf16.msra.mxu0 %v23749_v35  ;;  %v23596_v13 = vld [vmem:[%s30488_s1 + $0x3e8] ss:$16 sps:$4 sm:$0xff]   ;;  %v20849_v35 = vld [vmem:[%s24007_s11 + $0x1060] sm:$0xff] }
 0x830   : > { %17270 = vmatprep.subr.bf16.mxu0 %v21150_v40  ;;  %v21101_v47 = vcombine.low %v20845_v51, %v20849_v35  ;;  %v21093_v40 = vcombine.low %v20837_v7, %v20841_v59  ;;  %v23608_v56 = vld [vmem:[%s30488_s1 + $0x3a8] ss:$16 sps:$4 sm:$0xff]   ;;  %v20937_v49 = vld [vmem:[%s24007_s11 + $0x1320] sm:$0xff] }
 0x831   : > { %v20929_v4 = vld [vmem:[%s24007_s11 + $0x12e0] sm:$0xff] }
 0x832   : > { %15441 = vmatpush1.bf16.msra.mxu1 %v23560_v37  ;;  %15674 = vmatmul.mubr.bf16.vlgmr.msra.gmra.mxu0 %v28622_v61  ;;  %v21133_v61 = vcombine.low %v20877_v39, %v20881_v28  ;;  %v21102_v37 = vcombine.high %v20845_v51, %v20849_v35  ;;  %v20953_v39 = vld [vmem:[%s24007_s11 + $0x13a0] sm:$0xff] }
 0x833   : > { %15442 = vmatprep.subr.bf16.mxu1 %v23568_v22  ;;  %17271 = vmatpush1.bf16.msra.mxu0 %v21149_v2  ;;  %v23602_v22 = vld [vmem:[%s30488_s1 + $0x3c8] ss:$16 sps:$4 sm:$0xff]   ;;  %v21094_v2 = vcombine.high %v20837_v7, %v20841_v59  ;;  %v20921_v51 = vld [vmem:[%s24007_s11 + $0x12a0] sm:$0xff]  ;;  %v15184_v59 = vadd.f32 %v29036_v19, %v29468_v8 }
 0x834   : > { %17272 = vmatprep.subr.bf16.mxu0 %v21142_v54  ;;  %v20913_v7 = vld [vmem:[%s24007_s11 + $0x1260] sm:$0xff] }
 0x835   : > { %v20901_v8 = vld [vmem:[%s24007_s11 + $0x1200] sm:$0xff] }
 0x836   : > { %15443 = vmatpush1.bf16.msra.mxu1 %v23566_v38  ;;  %v23616_v38 = vld [vmem:[%s30488_s1 + $0x38c] ss:$16 sps:$4 sm:$0xff]  }
 0x837   : > { %15444 = vmatprep.subr.bf16.mxu1 %v23574_v62  ;;  %17273 = vmatpush1.bf16.msra.mxu0 %v21141_v6  ;;  %v20957_v62 = vld [vmem:[%s24007_s11 + $0x13c0] sm:$0xff]  ;;  %v23614_v6 = vld [vmem:[%s30488_s1 + $0x388] ss:$16 sps:$4 sm:$0xff]  }
 0x838   : > { %17274 = vmatprep.subr.bf16.mxu0 %v21134_v12  ;;  %v21214_v3 = vcombine.high %v20957_v62, %v20961_v43  ;;  %v21213_v54 = vcombine.low %v20957_v62, %v20961_v43  ;;  %v23650_v43 = vld [vmem:[%s30488_s1 + $0x6c8] ss:$16 sps:$4 sm:$0xff]  }
 0x83a   : > { %15445 = vmatpush1.bf16.msra.mxu1 %v23572_v53  ;;  %v23622_v53 = vld [vmem:[%s30488_s1 + $0x36c] ss:$16 sps:$4 sm:$0xff]  }
 0x83b   : > { %15446 = vmatprep.subr.bf16.mxu1 %v23580_v36  ;;  %17275 = vmatpush1.bf16.msra.mxu0 %v21133_v61  ;;  %v20949_v36 = vld [vmem:[%s24007_s11 + $0x1380] sm:$0xff]  ;;  %v23620_v61 = vld [vmem:[%s30488_s1 + $0x368] ss:$16 sps:$4 sm:$0xff]  }
 0x83c   : > { %17276 = vmatprep.subr.bf16.mxu0 %v21126_v5  ;;  %v21206_v28 = vcombine.high %v20949_v36, %v20953_v39  ;;  %v21205_v12 = vcombine.low %v20949_v36, %v20953_v39  ;;  %v23664_v36 = vld [vmem:[%s30488_s1 + $0x68c] ss:$16 sps:$4 sm:$0xff]  }
 0x83d   : > { %v29635_v39 = vld [vmem:[%s24007_s11 + $0x11c8] sm:$0xff] }
 0x83e   : > { %15447 = vmatpush1.bf16.msra.mxu1 %v23578_v46  ;;  %v23628_v46 = vld [vmem:[%s30488_s1 + $0x34c] ss:$16 sps:$4 sm:$0xff]  }
 0x83f   : > { %15448 = vmatprep.subr.bf16.mxu1 %v23586_v1  ;;  %17277 = vmatpush1.bf16.msra.mxu0 %v21125_v60  ;;  %v20941_v1 = vld [vmem:[%s24007_s11 + $0x1340] sm:$0xff]  ;;  %v23626_v60 = vld [vmem:[%s30488_s1 + $0x348] ss:$16 sps:$4 sm:$0xff]  }
 0x840   : > { %17278 = vmatprep.subr.bf16.mxu0 %v21118_v42  ;;  %v21198_v9 = vcombine.high %v20941_v1, %v20945_v16  ;;  %v21197_v5 = vcombine.low %v20941_v1, %v20945_v16  ;;  %v23670_v1 = vld [vmem:[%s30488_s1 + $0x66c] ss:$16 sps:$4 sm:$0xff]   ;;  %v23668_v16 = vld [vmem:[%s30488_s1 + $0x668] ss:$16 sps:$4 sm:$0xff]  }
 0x842   : > { %15449 = vmatpush1.bf16.msra.mxu1 %v23584_v58  ;;  %v23634_v58 = vld [vmem:[%s30488_s1 + $0x32c] ss:$16 sps:$4 sm:$0xff]  }
 0x843   : > { %15450 = vmatprep.subr.bf16.mxu1 %v23592_v11  ;;  %17279 = vmatpush1.bf16.msra.mxu0 %v21117_v25  ;;  %v20933_v11 = vld [vmem:[%s24007_s11 + $0x1300] sm:$0xff]  ;;  %v23632_v25 = vld [vmem:[%s30488_s1 + $0x328] ss:$16 sps:$4 sm:$0xff]  }
 0x844   : > { %17280 = vmatprep.subr.bf16.mxu0 %v21110_v45  ;;  %v21190_v0 = vcombine.high %v20933_v11, %v20937_v49  ;;  %v21189_v42 = vcombine.low %v20933_v11, %v20937_v49  ;;  %v23688_v11 = vld [vmem:[%s30488_s1 + $0x60c] ss:$16 sps:$4 sm:$0xff]   ;;  %v23686_v49 = vld [vmem:[%s30488_s1 + $0x608] ss:$16 sps:$4 sm:$0xff]  }
 0x846   : > { %15451 = vmatpush1.bf16.msra.mxu1 %v23590_v48  ;;  %v23640_v48 = vld [vmem:[%s30488_s1 + $0x30c] ss:$16 sps:$4 sm:$0xff]  }
 0x847   : > { %15452 = vmatprep.subr.bf16.mxu1 %v23598_v63  ;;  %17281 = vmatpush1.bf16.msra.mxu0 %v21109_v15  ;;  %v20925_v63 = vld [vmem:[%s24007_s11 + $0x12c0] sm:$0xff]  ;;  %v23638_v15 = vld [vmem:[%s30488_s1 + $0x308] ss:$16 sps:$4 sm:$0xff]  }
 0x848   : > { %17282 = vmatprep.subr.bf16.mxu0 %v21102_v37  ;;  %v21182_v31 = vcombine.high %v20925_v63, %v20929_v4  ;;  %v21181_v45 = vcombine.low %v20925_v63, %v20929_v4  ;;  %v23706_v63 = vld [vmem:[%s30488_s1 + $0x7ac] ss:$16 sps:$4 sm:$0xff]   ;;  %v23704_v4 = vld [vmem:[%s30488_s1 + $0x7a8] ss:$16 sps:$4 sm:$0xff]  }
 0x84a   : > { %15453 = vmatpush2.bf16.msra.mxu1 %v23596_v13  ;;  %v23646_v13 = vld [vmem:[%s30488_s1 + $0x6ec] ss:$16 sps:$4 sm:$0xff]  }
 0x84b   : > { %15454 = vmatprep.subr.bf16.mxu1 %v23604_v18  ;;  %17283 = vmatpush1.bf16.msra.mxu0 %v21101_v47  ;;  %v20917_v18 = vld [vmem:[%s24007_s11 + $0x1280] sm:$0xff]  ;;  %v23644_v47 = vld [vmem:[%s30488_s1 + $0x6e8] ss:$16 sps:$4 sm:$0xff]  }
 0x84c   : > { %17284 = vmatprep.subr.bf16.mxu0 %v21094_v2  ;;  %v21174_v35 = vcombine.high %v20917_v18, %v20921_v51  ;;  %v21173_v37 = vcombine.low %v20917_v18, %v20921_v51  ;;  %v23724_v18 = vld [vmem:[%s30488_s1 + $0x74c] ss:$16 sps:$4 sm:$0xff]   ;;  %v23722_v51 = vld [vmem:[%s30488_s1 + $0x748] ss:$16 sps:$4 sm:$0xff]  }
 0x84e   : > { %15455 = vmatpush2.bf16.msra.mxu1 %v23602_v22  ;;  %v23652_v22 = vld [vmem:[%s30488_s1 + $0x6cc] ss:$16 sps:$4 sm:$0xff]  }
 0x84f   : > { %15456 = vmatprep.subr.bf16.mxu1 %v23610_v34  ;;  %17285 = vmatpush1.bf16.msra.mxu0 %v21093_v40  ;;  %v20909_v34 = vld [vmem:[%s24007_s11 + $0x1240] sm:$0xff] }
 0x850   : > { %17286 = vmatprep.subr.bf16.mxu0 %v21214_v3  ;;  %v21166_v2 = vcombine.high %v20909_v34, %v20913_v7 }
 0x852   : > { %15457 = vmatpush2.bf16.msra.mxu1 %v23608_v56  ;;  %v21165_v56 = vcombine.low %v20909_v34, %v20913_v7  ;;  %v23734_v34 = vld [vmem:[%s30488_s1 + $0x708] ss:$16 sps:$4 sm:$0xff]   ;;  %v23742_v7 = vld [vmem:[%s30488_s1 + $0xaec] ss:$16 sps:$4 sm:$0xff]  }
 0x853   : > { %15458 = vmatprep.subr.bf16.mxu1 %v23616_v38  ;;  %17287 = vmatpush2.bf16.msra.mxu0 %v21213_v54  ;;  %v15186_v38 = vadd.f32 %v29047_v21, %v29479_v10  ;;  %v20905_v21 = vld [vmem:[%s24007_s11 + $0x1220] sm:$0xff] }
 0x854   : > { %17288 = vmatprep.subr.bf16.mxu0 %v21206_v28  ;;  %v21158_v3 = vcombine.high %v20901_v8, %v20905_v21  ;;  %v29638_v28 = vld [vmem:[%s24007_s11 + $0x11e8] sm:$0xff] }
 0x856   : > { %15459 = vmatpush2.bf16.msra.mxu1 %v23614_v6  ;;  %v21157_v6 = vcombine.low %v20901_v8, %v20905_v21  ;;  %v23754_v8 = vld [vmem:[%s30488_s1 + $0xaac] ss:$16 sps:$4 sm:$0xff]  }
 0x857   : > { %15460 = vmatprep.subr.bf16.mxu1 %v23622_v53  ;;  %17289 = vmatpush2.bf16.msra.mxu0 %v21205_v12  ;;  %v21152_v12 = vcombine.high %v29635_v39, %v29638_v28 }
 0x858   : > { %17290 = vmatprep.subr.bf16.mxu0 %v21198_v9  ;;  %v23676_v9 = vld [vmem:[%s30488_s1 + $0x64c] ss:$16 sps:$4 sm:$0xff]  }
 0x85a   : > { %15461 = vmatpush2.bf16.msra.mxu1 %v23620_v61  ;;  %v21151_v61 = vcombine.low %v29635_v39, %v29638_v28  ;;  %v23811_v39 = vld [vmem:[%s30488_s1 + $0xe4c] ss:$16 sps:$4 sm:$0xff]  }
 0x85b   : > { %15462 = vmatprep.subr.bf16.mxu1 %v23628_v46  ;;  %17291 = vmatpush2.bf16.msra.mxu0 %v21197_v5  ;;  %v23662_v46 = vld [vmem:[%s30488_s1 + $0x688] ss:$16 sps:$4 sm:$0xff]  }
 0x85c   : > { %17292 = vmatprep.subr.bf16.mxu0 %v21190_v0  ;;  %v23674_v5 = vld [vmem:[%s30488_s1 + $0x648] ss:$16 sps:$4 sm:$0xff]   ;;  %v23694_v0 = vld [vmem:[%s30488_s1 + $0x7ec] ss:$16 sps:$4 sm:$0xff]  }
 0x85e   : > { %15463 = vmatpush2.bf16.msra.mxu1 %v23626_v60  ;;  %v23682_v60 = vld [vmem:[%s30488_s1 + $0x62c] ss:$16 sps:$4 sm:$0xff]  }
 0x85f   : > { %15464 = vmatprep.subr.bf16.mxu1 %v23634_v58  ;;  %17293 = vmatpush2.bf16.msra.mxu0 %v21189_v42  ;;  %v23680_v58 = vld [vmem:[%s30488_s1 + $0x628] ss:$16 sps:$4 sm:$0xff]  }
 0x860   : > { %17294 = vmatprep.subr.bf16.mxu0 %v21182_v31  ;;  %v23692_v42 = vld [vmem:[%s30488_s1 + $0x7e8] ss:$16 sps:$4 sm:$0xff]   ;;  %v23712_v31 = vld [vmem:[%s30488_s1 + $0x78c] ss:$16 sps:$4 sm:$0xff]  }
 0x862   : > { %15465 = vmatpush2.bf16.msra.mxu1 %v23632_v25  ;;  %v23700_v25 = vld [vmem:[%s30488_s1 + $0x7cc] ss:$16 sps:$4 sm:$0xff]  }
 0x863   : > { %15466 = vmatprep.subr.bf16.mxu1 %v23640_v48  ;;  %17295 = vmatpush2.bf16.msra.mxu0 %v21181_v45  ;;  %v23698_v48 = vld [vmem:[%s30488_s1 + $0x7c8] ss:$16 sps:$4 sm:$0xff]  }
 0x864   : > { %17296 = vmatprep.subr.bf16.mxu0 %v21174_v35  ;;  %v23710_v45 = vld [vmem:[%s30488_s1 + $0x788] ss:$16 sps:$4 sm:$0xff]   ;;  %v23730_v35 = vld [vmem:[%s30488_s1 + $0x72c] ss:$16 sps:$4 sm:$0xff]  }
 0x866   : > { %15467 = vmatpush2.bf16.msra.mxu1 %v23638_v15  ;;  %v23718_v15 = vld [vmem:[%s30488_s1 + $0x76c] ss:$16 sps:$4 sm:$0xff]  }
 0x867   : > { %15518 = vmatprep.subr.bf16.mxu1 %v23646_v13  ;;  %17297 = vmatpush2.bf16.msra.mxu0 %v21173_v37  ;;  %v23716_v13 = vld [vmem:[%s30488_s1 + $0x768] ss:$16 sps:$4 sm:$0xff]  }
 0x868   : > { %17298 = vmatprep.subr.bf16.mxu0 %v21166_v2  ;;  %v23728_v37 = vld [vmem:[%s30488_s1 + $0x728] ss:$16 sps:$4 sm:$0xff]  }
 0x869   : > { %v15224_v40 = vpop.f32.mrf.mxu1  ;;  %15469 = vmatmul.mubr.bf16.vlgmr.msra.gmra.mxu1 %v28789_v23  ;;  %v23658_v23 = vld [vmem:[%s30488_s1 + $0x6ac] ss:$16 sps:$4 sm:$0xff]   ;;  %v23740_v2 = vld [vmem:[%s30488_s1 + $0xae8] ss:$16 sps:$4 sm:$0xff]  }
 0x86a   : > { %v29615_v62 = vadd.f32 %v15224_v40, %v15184_v59  ;;  %15519 = vmatpush1.bf16.msra.mxu1 %v23644_v47  ;;  %15550 = vmatprep.mubr.bf16.mxu1 %v28797_v55  ;;  %v23656_v55 = vld [vmem:[%s30488_s1 + $0x6a8] ss:$16 sps:$4 sm:$0xff]   ;;  %v23736_v47 = vld [vmem:[%s30488_s1 + $0x70c] ss:$16 sps:$4 sm:$0xff]  }
 0x86b   : > { %v15226_v19 = vpop.f32.mrf.mxu1  ;;  %15520 = vmatprep.subr.bf16.mxu1 %v23652_v22  ;;  %17299 = vmatpush2.bf16.msra.mxu0 %v21165_v56  ;;  %v29716_v22 = vpop.f32.mrf.mxu0  ;;  %v23748_v56 = vld [vmem:[%s30488_s1 + $0xacc] ss:$16 sps:$4 sm:$0xff]  }
 0x86c   : > { %v29626_v10 = vadd.f32 %v15226_v19, %v15186_v38  ;;  %17300 = vmatprep.subr.bf16.mxu0 %v21158_v3  ;;  %v23746_v19 = vld [vmem:[%s30488_s1 + $0xac8] ss:$16 sps:$4 sm:$0xff]  }
 0x86d   : > { %v15228_v54 = vpop.f32.mrf.mxu1  ;;  %v29724_v59 = vpop.f32.mrf.mxu0 }
 0x86e   : > { %15521 = vmatpush1.bf16.msra.mxu1 %v23650_v43 }
 0x86f   : > { %v15229_v53 = vpop.f32.mrf.mxu1  ;;  %15522 = vmatprep.subr.bf16.mxu1 %v23658_v23  ;;  %17301 = vmatpush2.bf16.msra.mxu0 %v21157_v6  ;;  %v15433_v40 = vpop.f32.mrf.mxu0 }
 0x870   : > { %17352 = vmatprep.subr.bf16.mxu0 %v21152_v12  ;;  %v23755_v53 = vld [vmem:[%s30488_s1 + $0xa88] ss:$16 sps:$4 sm:$0xff]   ;;  %v23760_v12 = vld [vmem:[%s30488_s1 + $0xa6c] ss:$16 sps:$4 sm:$0xff]  }
 0x871   : > { %v15434_v38 = vpop.f32.mrf.mxu0 }
 0x872   : > { %15523 = vmatpush1.bf16.msra.mxu1 %v23656_v55 }
 0x873   : > { %15524 = vmatprep.subr.bf16.mxu1 %v23664_v36  ;;  %v29744_v21 = vpop.f32.mrf.mxu0 }
 0x875   : > { %v29749_v54 = vpop.f32.mrf.mxu0 }
 0x876   : > { %15525 = vmatpush1.bf16.msra.mxu1 %v23662_v46  ;;  %v23758_v46 = vld [vmem:[%s30488_s1 + $0xa68] ss:$16 sps:$4 sm:$0xff]  }
 0x877   : > { %15526 = vmatprep.subr.bf16.mxu1 %v23670_v1  ;;  %v15515_v55 = vpop.f32.mrf.mxu0  ;;  %v23763_v1 = vld [vmem:[%s30488_s1 + $0xa4c] ss:$16 sps:$4 sm:$0xff]  }
 0x879   : > { %v15516_v36 = vpop.f32.mrf.mxu0 }
 0x87a   : > { %15527 = vmatpush1.bf16.msra.mxu1 %v23668_v16  ;;  %v23761_v16 = vld [vmem:[%s30488_s1 + $0xa48] ss:$16 sps:$4 sm:$0xff]  }
 0x87b   : > { %15528 = vmatprep.subr.bf16.mxu1 %v23676_v9  ;;  %v23766_v9 = vld [vmem:[%s30488_s1 + $0xa2c] ss:$16 sps:$4 sm:$0xff]  }
 0x87e   : > { %15529 = vmatpush1.bf16.msra.mxu1 %v23674_v5  ;;  %v23764_v5 = vld [vmem:[%s30488_s1 + $0xa28] ss:$16 sps:$4 sm:$0xff]  }
 0x87f   : > { %15530 = vmatprep.subr.bf16.mxu1 %v23682_v60  ;;  %v23769_v60 = vld [vmem:[%s30488_s1 + $0xa0c] ss:$16 sps:$4 sm:$0xff]  }
 0x882   : > { %15531 = vmatpush1.bf16.msra.mxu1 %v23680_v58  ;;  %v23767_v58 = vld [vmem:[%s30488_s1 + $0xa08] ss:$16 sps:$4 sm:$0xff]  }
 0x883   : > { %15532 = vmatprep.subr.bf16.mxu1 %v23688_v11  ;;  %v23772_v11 = vld [vmem:[%s30488_s1 + $0xbec] ss:$16 sps:$4 sm:$0xff]  }
 0x886   : > { %15533 = vmatpush1.bf16.msra.mxu1 %v23686_v49  ;;  %v23770_v49 = vld [vmem:[%s30488_s1 + $0xbe8] ss:$16 sps:$4 sm:$0xff]  }
 0x887   : > { %15534 = vmatprep.subr.bf16.mxu1 %v23694_v0  ;;  %v23775_v0 = vld [vmem:[%s30488_s1 + $0xbcc] ss:$16 sps:$4 sm:$0xff]  }
 0x88a   : > { %15535 = vmatpush2.bf16.msra.mxu1 %v23692_v42  ;;  %v23773_v42 = vld [vmem:[%s30488_s1 + $0xbc8] ss:$16 sps:$4 sm:$0xff]  }
 0x88b   : > { %15536 = vmatprep.subr.bf16.mxu1 %v23700_v25  ;;  %v23778_v25 = vld [vmem:[%s30488_s1 + $0xbac] ss:$16 sps:$4 sm:$0xff]  }
 0x88e   : > { %15537 = vmatpush2.bf16.msra.mxu1 %v23698_v48  ;;  %v23776_v48 = vld [vmem:[%s30488_s1 + $0xba8] ss:$16 sps:$4 sm:$0xff]  }
 0x88f   : > { %15538 = vmatprep.subr.bf16.mxu1 %v23706_v63  ;;  %v23781_v63 = vld [vmem:[%s30488_s1 + $0xb8c] ss:$16 sps:$4 sm:$0xff]  }
 0x892   : > { %15539 = vmatpush2.bf16.msra.mxu1 %v23704_v4  ;;  %v23779_v4 = vld [vmem:[%s30488_s1 + $0xb88] ss:$16 sps:$4 sm:$0xff]  }
 0x893   : > { %15540 = vmatprep.subr.bf16.mxu1 %v23712_v31  ;;  %v23784_v31 = vld [vmem:[%s30488_s1 + $0xb6c] ss:$16 sps:$4 sm:$0xff]  }
 0x896   : > { %15541 = vmatpush2.bf16.msra.mxu1 %v23710_v45  ;;  %v23782_v45 = vld [vmem:[%s30488_s1 + $0xb68] ss:$16 sps:$4 sm:$0xff]  }
 0x897   : > { %15542 = vmatprep.subr.bf16.mxu1 %v23718_v15  ;;  %v23787_v15 = vld [vmem:[%s30488_s1 + $0xb4c] ss:$16 sps:$4 sm:$0xff]  }
 0x89a   : > { %15543 = vmatpush2.bf16.msra.mxu1 %v23716_v13  ;;  %v23785_v13 = vld [vmem:[%s30488_s1 + $0xb48] ss:$16 sps:$4 sm:$0xff]  }
 0x89b   : > { %15544 = vmatprep.subr.bf16.mxu1 %v23724_v18  ;;  %v23790_v18 = vld [vmem:[%s30488_s1 + $0xb2c] ss:$16 sps:$4 sm:$0xff]  }
 0x89e   : > { %15545 = vmatpush2.bf16.msra.mxu1 %v23722_v51  ;;  %v23788_v51 = vld [vmem:[%s30488_s1 + $0xb28] ss:$16 sps:$4 sm:$0xff]  }
 0x89f   : > { %15546 = vmatprep.subr.bf16.mxu1 %v23730_v35  ;;  %v23793_v35 = vld [vmem:[%s30488_s1 + $0xb0c] ss:$16 sps:$4 sm:$0xff]  }
 0x8a2   : > { %15547 = vmatpush2.bf16.msra.mxu1 %v23728_v37  ;;  %v15266_v37 = vadd.f32 %v29257_v24, %v29615_v62  ;;  %v23794_v24 = vld [vmem:[%s30488_s1 + $0xee8] ss:$16 sps:$4 sm:$0xff]   ;;  %v23799_v62 = vld [vmem:[%s30488_s1 + $0xecc] ss:$16 sps:$4 sm:$0xff]  }
 0x8a3   : > { %15548 = vmatprep.subr.bf16.mxu1 %v23736_v47  ;;  %v23791_v47 = vld [vmem:[%s30488_s1 + $0xb08] ss:$16 sps:$4 sm:$0xff]  }
 0x8a6   : > { %15549 = vmatpush2.bf16.msra.mxu1 %v23734_v34  ;;  %v23796_v34 = vld [vmem:[%s30488_s1 + $0xeec] ss:$16 sps:$4 sm:$0xff]  }
 0x8a7   : > { %15600 = vmatprep.subr.bf16.mxu1 %v23742_v7  ;;  %v15268_v7 = vadd.f32 %v29264_v20, %v29626_v10 }
 0x8a9   : > { %v29732_v43 = vpop.f32.mrf.mxu1  ;;  %15551 = vmatmul.mubr.bf16.vlgmr.msra.gmra.mxu1 %v29009_v32  ;;  %v23752_v32 = vld [vmem:[%s30488_s1 + $0xaa8] ss:$16 sps:$4 sm:$0xff]  }
 0x8aa   : > { %15601 = vmatpush1.bf16.msra.mxu1 %v23740_v2  ;;  %15632 = vmatprep.mubr.bf16.mxu1 %v29017_v57  ;;  %v23757_v57 = vld [vmem:[%s30488_s1 + $0xa8c] ss:$16 sps:$4 sm:$0xff]   ;;  %v15307_v2 = vadd.f32 %v29732_v43, %v15266_v37  ;;  %v23797_v43 = vld [vmem:[%s30488_s1 + $0xec8] ss:$16 sps:$4 sm:$0xff]  }
 0x8ab   : > { %v29739_v23 = vpop.f32.mrf.mxu1  ;;  %15602 = vmatprep.subr.bf16.mxu1 %v23748_v56 }
 0x8ac   : > { %v15309_v40 = vadd.f32 %v29739_v23, %v15268_v7  ;;  %v15348_v56 = vadd.f32 %v29477_v33, %v15307_v2  ;;  %v23802_v33 = vld [vmem:[%s30488_s1 + $0xeac] ss:$16 sps:$4 sm:$0xff]  }
 0x8ad   : > { %v15310_v3 = vpop.f32.mrf.mxu1  ;;  %v20846_v7 = vld [vmem:[%s24007_s11 + $0x1048] sm:$0xff] }
 0x8ae   : > { %15603 = vmatpush1.bf16.msra.mxu1 %v23746_v19  ;;  %v15350_v20 = vadd.f32 %v29484_v41, %v15309_v40  ;;  %v20850_v2 = vld [vmem:[%s24007_s11 + $0x1068] sm:$0xff] }
 0x8af   : > { %v15311_v6 = vpop.f32.mrf.mxu1  ;;  %15604 = vmatprep.subr.bf16.mxu1 %v23754_v8  ;;  %v23820_v40 = vld [vmem:[%s30488_s1 + $0xfec] ss:$16 sps:$4 sm:$0xff]  }
 0x8b0   : > { %v20890_v6 = vld [vmem:[%s24007_s11 + $0x11a8] sm:$0xff] }
 0x8b2   : > { %15605 = vmatpush1.bf16.msra.mxu1 %v23752_v32  ;;  %v23800_v32 = vld [vmem:[%s30488_s1 + $0xea8] ss:$16 sps:$4 sm:$0xff]  }
 0x8b3   : > { %15606 = vmatprep.subr.bf16.mxu1 %v23757_v57 }
 0x8b6   : > { %15607 = vmatpush1.bf16.msra.mxu1 %v23755_v53  ;;  %v23805_v53 = vld [vmem:[%s30488_s1 + $0xe8c] ss:$16 sps:$4 sm:$0xff]  }
 0x8b7   : > { %15608 = vmatprep.subr.bf16.mxu1 %v23760_v12 }
 0x8ba   : > { %15609 = vmatpush1.bf16.msra.mxu1 %v23758_v46 }
 0x8bb   : > { %15610 = vmatprep.subr.bf16.mxu1 %v23763_v1 }
 0x8be   : > { %15611 = vmatpush1.bf16.msra.mxu1 %v23761_v16  ;;  %v23803_v16 = vld [vmem:[%s30488_s1 + $0xe88] ss:$16 sps:$4 sm:$0xff]  }
 0x8bf   : > { %15612 = vmatprep.subr.bf16.mxu1 %v23766_v9  ;;  %v20878_v9 = vld [vmem:[%s24007_s11 + $0x1148] sm:$0xff] }
 0x8c2   : > { %15613 = vmatpush1.bf16.msra.mxu1 %v23764_v5  ;;  %v20882_v5 = vld [vmem:[%s24007_s11 + $0x1168] sm:$0xff] }
 0x8c3   : > { %15614 = vmatprep.subr.bf16.mxu1 %v23769_v60  ;;  %v21135_v28 = vcombine.low %v20878_v9, %v20882_v5 }
 0x8c6   : > { %15615 = vmatpush1.bf16.msra.mxu1 %v23767_v58  ;;  %v23808_v58 = vld [vmem:[%s30488_s1 + $0xe6c] ss:$16 sps:$4 sm:$0xff]  }
 0x8c7   : > { %15616 = vmatprep.subr.bf16.mxu1 %v23772_v11 }
 0x8ca   : > { %15617 = vmatpush2.bf16.msra.mxu1 %v23770_v49  ;;  %v21136_v49 = vcombine.high %v20878_v9, %v20882_v5  ;;  %v20942_v9 = vld [vmem:[%s24007_s11 + $0x1348] sm:$0xff] }
 0x8cb   : > { %15618 = vmatprep.subr.bf16.mxu1 %v23775_v0  ;;  %v23806_v0 = vld [vmem:[%s30488_s1 + $0xe68] ss:$16 sps:$4 sm:$0xff]  }
 0x8cc   : > { %v20946_v5 = vld [vmem:[%s24007_s11 + $0x1368] sm:$0xff] }
 0x8ce   : > { %15619 = vmatpush2.bf16.msra.mxu1 %v23773_v42  ;;  %v20870_v42 = vld [vmem:[%s24007_s11 + $0x1108] sm:$0xff] }
 0x8cf   : > { %15620 = vmatprep.subr.bf16.mxu1 %v23778_v25  ;;  %v20874_v25 = vld [vmem:[%s24007_s11 + $0x1128] sm:$0xff] }
 0x8d2   : > { %15621 = vmatpush2.bf16.msra.mxu1 %v23776_v48  ;;  %v23809_v48 = vld [vmem:[%s30488_s1 + $0xe48] ss:$16 sps:$4 sm:$0xff]  }
 0x8d3   : > { %15622 = vmatprep.subr.bf16.mxu1 %v23781_v63  ;;  %v20862_v63 = vld [vmem:[%s24007_s11 + $0x10c8] sm:$0xff] }
 0x8d6   : > { %15623 = vmatpush2.bf16.msra.mxu1 %v23779_v4  ;;  %v20866_v4 = vld [vmem:[%s24007_s11 + $0x10e8] sm:$0xff] }
 0x8d7   : > { %15624 = vmatprep.subr.bf16.mxu1 %v23784_v31  ;;  %v23814_v31 = vld [vmem:[%s30488_s1 + $0xe2c] ss:$16 sps:$4 sm:$0xff]   ;;  %v21119_v37 = vcombine.low %v20862_v63, %v20866_v4 }
 0x8da   : > { %15625 = vmatpush2.bf16.msra.mxu1 %v23782_v45  ;;  %v21127_v45 = vcombine.low %v20870_v42, %v20874_v25 }
 0x8db   : > { %15626 = vmatprep.subr.bf16.mxu1 %v23787_v15  ;;  %v21120_v15 = vcombine.high %v20862_v63, %v20866_v4  ;;  %v20930_v63 = vld [vmem:[%s24007_s11 + $0x12e8] sm:$0xff] }
 0x8dc   : > { %v23838_v4 = vld [vmem:[%s30488_s1 + $0xf2c] ss:$16 sps:$4 sm:$0xff]  }
 0x8de   : > { %15627 = vmatpush2.bf16.msra.mxu1 %v23785_v13  ;;  %v23812_v13 = vld [vmem:[%s30488_s1 + $0xe28] ss:$16 sps:$4 sm:$0xff]  }
 0x8df   : > { %15628 = vmatprep.subr.bf16.mxu1 %v23790_v18  ;;  %v20854_v18 = vld [vmem:[%s24007_s11 + $0x1088] sm:$0xff] }
 0x8e2   : > { %15629 = vmatpush2.bf16.msra.mxu1 %v23788_v51  ;;  %v20858_v51 = vld [vmem:[%s24007_s11 + $0x10a8] sm:$0xff] }
 0x8e3   : > { %15630 = vmatprep.subr.bf16.mxu1 %v23793_v35  ;;  %v23817_v35 = vld [vmem:[%s30488_s1 + $0xe0c] ss:$16 sps:$4 sm:$0xff]  }
 0x8e6   : > { %15631 = vmatpush2.bf16.msra.mxu1 %v23791_v47  ;;  %v21112_v47 = vcombine.high %v20854_v18, %v20858_v51 }
 0x8e7   : > { %15682 = vmatprep.subr.bf16.mxu1 %v23796_v34  ;;  %v23815_v34 = vld [vmem:[%s30488_s1 + $0xe08] ss:$16 sps:$4 sm:$0xff]  }
 0x8e9   : > { %v15388_v38 = vpop.f32.mrf.mxu1  ;;  %15633 = vmatmul.mubr.bf16.vlgmr.msra.gmra.mxu1 %v29230_v30  ;;  %v29854_v30 = vpop.f32.mrf.mxu0 }
 0x8ea   : > { %v15389_v10 = vadd.f32 %v15388_v38, %v15348_v56  ;;  %15683 = vmatpush1.bf16.msra.mxu1 %v23794_v24  ;;  %15714 = vmatprep.mubr.bf16.mxu1 %v29238_v27  ;;  %v20886_v27 = vld [vmem:[%s24007_s11 + $0x1188] sm:$0xff]  ;;  %v21111_v24 = vcombine.low %v20854_v18, %v20858_v51 }
 0x8eb   : > { %v15390_v19 = vpop.f32.mrf.mxu1  ;;  %15684 = vmatprep.subr.bf16.mxu1 %v23799_v62  ;;  %v29861_v57 = vpop.f32.mrf.mxu0  ;;  %v21144_v1 = vcombine.high %v20886_v27, %v20890_v6  ;;  %v21143_v11 = vcombine.low %v20886_v27, %v20890_v6  ;;  %v21104_v62 = vcombine.high %v20846_v7, %v20850_v2  ;;  %v23818_v56 = vld [vmem:[%s30488_s1 + $0xfe8] ss:$16 sps:$4 sm:$0xff]   ;;  %v23841_v51 = vld [vmem:[%s30488_s1 + $0xf0c] ss:$16 sps:$4 sm:$0xff]  }
 0x8ec   : > { %v15391_v23 = vadd.f32 %v15390_v19, %v15350_v20  ;;  %v15723_v8 = vmax.f32 %v15389_v10, 0.0  ;;  %v20838_v38 = vld [vmem:[%s24007_s11 + $0x1008] sm:$0xff] }
 0x8ed   : > { %v15392_v41 = vpop.f32.mrf.mxu1  ;;  %v15597_v12 = vpop.f32.mrf.mxu0  ;;  %v20842_v20 = vld [vmem:[%s24007_s11 + $0x1028] sm:$0xff] }
 0x8ee   : > { %v15724_v3 = vmax.f32 %v15391_v23, 0.0  ;;  %15685 = vmatpush1.bf16.msra.mxu1 %v23797_v43  ;;  %v29868_v46 = vpack.c.bf16 %v15723_v8, %v15723_v8  ;;  %v23823_v10 = vld [vmem:[%s30488_s1 + $0xfcc] ss:$16 sps:$4 sm:$0xff]   ;;  %v21103_v43 = vcombine.low %v20846_v7, %v20850_v2  ;;  %v21096_v19 = vcombine.high %v20838_v38, %v20842_v20  ;;  %v23824_v27 = vld [vmem:[%s30488_s1 + $0xfa8] ss:$16 sps:$4 sm:$0xff]  }
 0x8ef   : > { %v15393_v55 = vpop.f32.mrf.mxu1  ;;  %15686 = vmatprep.subr.bf16.mxu1 %v23802_v33  ;;  %v15598_v60 = vpop.f32.mrf.mxu0  ;;  %v23821_v33 = vld [vmem:[%s30488_s1 + $0xfc8] ss:$16 sps:$4 sm:$0xff]   ;;  %v23826_v41 = vld [vmem:[%s30488_s1 + $0xfac] ss:$16 sps:$4 sm:$0xff]  }
 0x8f0   : > { %v29866_v36 = vpack.c.bf16 %v15724_v3, %v15724_v3  ;;  %v20958_v23 = vld [vmem:[%s24007_s11 + $0x13c8] sm:$0xff]  ;;  %v21095_v3 = vcombine.low %v20838_v38, %v20842_v20 }
 0x8f1   : > { %v20962_v8 = vld [vmem:[%s24007_s11 + $0x13e8] sm:$0xff] }
 0x8f2   : > { %15687 = vmatpush1.bf16.msra.mxu1 %v23800_v32  ;;  %17302 = vmatprep.mubr.bf16.mxu0 %v29866_v36  ;;  %v21216_v32 = vcombine.high %v20958_v23, %v20962_v8  ;;  %v20950_v6 = vld [vmem:[%s24007_s11 + $0x1388] sm:$0xff]  ;;  %v21215_v12 = vcombine.low %v20958_v23, %v20962_v8 }
 0x8f3   : > { %17303 = vmatmul.mubr.bf16.vlgmr.msra.gmra.mxu0 %v29868_v46  ;;  %15688 = vmatprep.subr.bf16.mxu1 %v23805_v53  ;;  %v20954_v55 = vld [vmem:[%s24007_s11 + $0x13a8] sm:$0xff] }
 0x8f4   : > { %17353 = vmatpush1.bf16.msra.mxu0 %v21151_v61  ;;  %17384 = vmatprep.mubr.bf16.mxu0 %v29866_v36  ;;  %v21128_v61 = vcombine.high %v20870_v42, %v20874_v25  ;;  %v23829_v53 = vld [vmem:[%s30488_s1 + $0xf8c] ss:$16 sps:$4 sm:$0xff]   ;;  %v23839_v7 = vld [vmem:[%s30488_s1 + $0xf08] ss:$16 sps:$4 sm:$0xff]  }
 0x8f5   : > { %17354 = vmatprep.subr.bf16.mxu0 %v21144_v1  ;;  %v21208_v1 = vcombine.high %v20950_v6, %v20954_v55  ;;  %v23832_v60 = vld [vmem:[%s30488_s1 + $0xf6c] ss:$16 sps:$4 sm:$0xff]  }
 0x8f6   : > { %15689 = vmatpush1.bf16.msra.mxu1 %v23803_v16  ;;  %v23827_v16 = vld [vmem:[%s30488_s1 + $0xf88] ss:$16 sps:$4 sm:$0xff]   ;;  %v23835_v25 = vld [vmem:[%s30488_s1 + $0xf4c] ss:$16 sps:$4 sm:$0xff]  }
 0x8f7   : > { %15690 = vmatprep.subr.bf16.mxu1 %v23808_v58  ;;  %v21207_v58 = vcombine.low %v20950_v6, %v20954_v55  ;;  %v20938_v42 = vld [vmem:[%s24007_s11 + $0x1328] sm:$0xff]  ;;  %v20887_v55 = vld [vmem:[%s24007_s11 + $0x1190] sm:$0xff] }
 0x8f8   : > { %17355 = vmatpush1.bf16.msra.mxu0 %v21143_v11  ;;  %v21200_v11 = vcombine.high %v20942_v9, %v20946_v5  ;;  %v20922_v18 = vld [vmem:[%s24007_s11 + $0x12a8] sm:$0xff] }
 0x8f9   : > { %17356 = vmatprep.subr.bf16.mxu0 %v21136_v49  ;;  %v23830_v49 = vld [vmem:[%s30488_s1 + $0xf68] ss:$16 sps:$4 sm:$0xff]  }
 0x8fa   : > { %15691 = vmatpush1.bf16.msra.mxu1 %v23806_v0  ;;  %v20934_v0 = vld [vmem:[%s24007_s11 + $0x1308] sm:$0xff] }
 0x8fb   : > { %15692 = vmatprep.subr.bf16.mxu1 %v23811_v39  ;;  %v21199_v39 = vcombine.low %v20942_v9, %v20946_v5  ;;  %v20910_v2 = vld [vmem:[%s24007_s11 + $0x1248] sm:$0xff]  ;;  %v21021_v5 = vld [vmem:[%s24007_s11 + $0x15c0] sm:$0xff] }
 0x8fc   : > { %17357 = vmatpush1.bf16.msra.mxu0 %v21135_v28  ;;  %v21192_v28 = vcombine.high %v20934_v0, %v20938_v42  ;;  %v20902_v20 = vld [vmem:[%s24007_s11 + $0x1208] sm:$0xff] }
 0x8fd   : > { %17358 = vmatprep.subr.bf16.mxu0 %v21128_v61  ;;  %v23833_v61 = vld [vmem:[%s30488_s1 + $0xf48] ss:$16 sps:$4 sm:$0xff]  }
 0x8fe   : > { %15693 = vmatpush1.bf16.msra.mxu1 %v23809_v48  ;;  %v20926_v48 = vld [vmem:[%s24007_s11 + $0x12c8] sm:$0xff] }
 0x8ff   : > { %15694 = vmatprep.subr.bf16.mxu1 %v23814_v31  ;;  %v21191_v31 = vcombine.low %v20934_v0, %v20938_v42  ;;  %v20879_v0 = vld [vmem:[%s24007_s11 + $0x1150] sm:$0xff] }
 0x900   : > { %17359 = vmatpush1.bf16.msra.mxu0 %v21127_v45  ;;  %v21184_v45 = vcombine.high %v20926_v48, %v20930_v63  ;;  %v20883_v42 = vld [vmem:[%s24007_s11 + $0x1170] sm:$0xff] }
 0x901   : > { %17360 = vmatprep.subr.bf16.mxu0 %v21120_v15  ;;  %v23836_v15 = vld [vmem:[%s30488_s1 + $0xf28] ss:$16 sps:$4 sm:$0xff]  }
 0x902   : > { %15695 = vmatpush1.bf16.msra.mxu1 %v23812_v13  ;;  %v20918_v13 = vld [vmem:[%s24007_s11 + $0x1288] sm:$0xff] }
 0x903   : > { %15696 = vmatprep.subr.bf16.mxu1 %v23817_v35  ;;  %v21183_v35 = vcombine.low %v20926_v48, %v20930_v63  ;;  %v21138_v48 = vcombine.high %v20879_v0, %v20883_v42 }
 0x904   : > { %17361 = vmatpush1.bf16.msra.mxu0 %v21119_v37  ;;  %v21176_v37 = vcombine.high %v20918_v13, %v20922_v18 }
 0x905   : > { %17362 = vmatprep.subr.bf16.mxu0 %v21112_v47  ;;  %v23844_v47 = vld [vmem:[%s30489_s2] sm:$0xf] }
 0x906   : > { %15697 = vmatpush1.bf16.msra.mxu1 %v23815_v34  ;;  %v12498_v34 = vrot.slane %v23844_v47, %v25701_v17 }
 0x907   : > { %15698 = vmatprep.subr.bf16.mxu1 %v23820_v40  ;;  %v20914_v40 = vld [vmem:[%s24007_s11 + $0x1268] sm:$0xff] }
 0x908   : > { %17363 = vmatpush1.bf16.msra.mxu0 %v21111_v24  ;;  %v12502_v24 = vrot.slane %v23844_v47, %v25706_v52  ;;  %v15430_v38 = vadd.f32 %v29716_v22, %v12498_v34  ;;  %v20997_v47 = vld [vmem:[%s24007_s11 + $0x1500] sm:$0xff] }
 0x909   : > { %17364 = vmatprep.subr.bf16.mxu0 %v21104_v62  ;;  %v21175_v62 = vcombine.low %v20918_v13, %v20922_v18  ;;  %v21005_v13 = vld [vmem:[%s24007_s11 + $0x1540] sm:$0xff] }
 0x90a   : > { %15699 = vmatpush2.bf16.msra.mxu1 %v23818_v56  ;;  %v21168_v56 = vcombine.high %v20910_v2, %v20914_v40  ;;  %v21009_v18 = vld [vmem:[%s24007_s11 + $0x1560] sm:$0xff] }
 0x90b   : > { %15700 = vmatprep.subr.bf16.mxu1 %v23823_v10  ;;  %v20906_v10 = vld [vmem:[%s24007_s11 + $0x1228] sm:$0xff]  ;;  %v21001_v34 = vld [vmem:[%s24007_s11 + $0x1520] sm:$0xff] }
 0x90c   : > { %17365 = vmatpush1.bf16.msra.mxu0 %v21103_v43  ;;  %v15432_v43 = vadd.f32 %v29724_v59, %v12502_v24  ;;  %v21160_v23 = vcombine.high %v20902_v20, %v20906_v10  ;;  %v21159_v59 = vcombine.low %v20902_v20, %v20906_v10  ;;  %v20989_v24 = vld [vmem:[%s24007_s11 + $0x14c0] sm:$0xff]  ;;  %v21253_v20 = vcombine.low %v20997_v47, %v21001_v34  ;;  %v20855_v10 = vld [vmem:[%s24007_s11 + $0x1090] sm:$0xff] }
 0x90d   : > { %17366 = vmatprep.subr.bf16.mxu0 %v21096_v19  ;;  %v21167_v19 = vcombine.low %v20910_v2, %v20914_v40  ;;  %v20867_v2 = vld [vmem:[%s24007_s11 + $0x10f0] sm:$0xff]  ;;  %v21254_v40 = vcombine.high %v20997_v47, %v21001_v34 }
 0x90e   : > { %15701 = vmatpush2.bf16.msra.mxu1 %v23821_v33 }
 0x90f   : > { %15702 = vmatprep.subr.bf16.mxu1 %v23826_v41  ;;  %v20895_v41 = vld [vmem:[%s24007_s11 + $0x11d0] sm:$0xff] }
 0x910   : > { %17367 = vmatpush1.bf16.msra.mxu0 %v21095_v3  ;;  %v20899_v3 = vld [vmem:[%s24007_s11 + $0x11f0] sm:$0xff] }
 0x911   : > { %17368 = vmatprep.subr.bf16.mxu0 %v21216_v32 }
 0x912   : > { %15703 = vmatpush2.bf16.msra.mxu1 %v23824_v27  ;;  %v29993_v27 = vpop.f32.mrf.mxu0 }
 0x913   : > { %15704 = vmatprep.subr.bf16.mxu1 %v23829_v53  ;;  %v20891_v53 = vld [vmem:[%s24007_s11 + $0x11b0] sm:$0xff] }
 0x914   : > { %17369 = vmatpush2.bf16.msra.mxu0 %v21215_v12  ;;  %v29997_v12 = vpop.f32.mrf.mxu0 }
 0x915   : > { %17370 = vmatprep.subr.bf16.mxu0 %v21208_v1 }
 0x916   : > { %15705 = vmatpush2.bf16.msra.mxu1 %v23827_v16  ;;  %v21153_v16 = vcombine.low %v20895_v41, %v20899_v3  ;;  %v15679_v9 = vpop.f32.mrf.mxu0 }
 0x917   : > { %15706 = vmatprep.subr.bf16.mxu1 %v23832_v60  ;;  %v21025_v60 = vld [vmem:[%s24007_s11 + $0x15e0] sm:$0xff] }
 0x918   : > { %17371 = vmatpush2.bf16.msra.mxu0 %v21207_v58  ;;  %v21146_v58 = vcombine.high %v20887_v55, %v20891_v53 }
 0x919   : > { %17372 = vmatprep.subr.bf16.mxu0 %v21200_v11  ;;  %v21277_v11 = vcombine.low %v21021_v5, %v21025_v60 }
 0x91a   : > { %15707 = vmatpush2.bf16.msra.mxu1 %v23830_v49  ;;  %v21278_v49 = vcombine.high %v21021_v5, %v21025_v60  ;;  %v20839_v5 = vld [vmem:[%s24007_s11 + $0x1010] sm:$0xff] }
 0x91b   : > { %15708 = vmatprep.subr.bf16.mxu1 %v23835_v25  ;;  %v15680_v25 = vpop.f32.mrf.mxu0  ;;  %v20843_v60 = vld [vmem:[%s24007_s11 + $0x1030] sm:$0xff] }
 0x91c   : > { %17373 = vmatpush2.bf16.msra.mxu0 %v21199_v39  ;;  %v21145_v39 = vcombine.low %v20887_v55, %v20891_v53  ;;  %v20973_v55 = vld [vmem:[%s24007_s11 + $0x1440] sm:$0xff] }
 0x91d   : > { %17374 = vmatprep.subr.bf16.mxu0 %v21192_v28  ;;  %v21013_v28 = vld [vmem:[%s24007_s11 + $0x1580] sm:$0xff] }
 0x91e   : > { %15709 = vmatpush2.bf16.msra.mxu1 %v23833_v61  ;;  %v21017_v61 = vld [vmem:[%s24007_s11 + $0x15a0] sm:$0xff] }
 0x91f   : > { %15710 = vmatprep.subr.bf16.mxu1 %v23838_v4  ;;  %v21269_v63 = vcombine.low %v21013_v28, %v21017_v61  ;;  %v21270_v4 = vcombine.high %v21013_v28, %v21017_v61  ;;  %v20977_v53 = vld [vmem:[%s24007_s11 + $0x1460] sm:$0xff]  ;;  %v20963_v28 = vld [vmem:[%s24007_s11 + $0x13f0] sm:$0xff] }
 0x920   : > { %17375 = vmatpush2.bf16.msra.mxu0 %v21191_v31  ;;  %v20871_v31 = vld [vmem:[%s24007_s11 + $0x1110] sm:$0xff]  ;;  %v21229_v25 = vcombine.low %v20973_v55, %v20977_v53 }
 0x921   : > { %17376 = vmatprep.subr.bf16.mxu0 %v21184_v45  ;;  %v20875_v45 = vld [vmem:[%s24007_s11 + $0x1130] sm:$0xff] }
 0x922   : > { %15711 = vmatpush2.bf16.msra.mxu1 %v23836_v15  ;;  %v21137_v15 = vcombine.low %v20879_v0, %v20883_v42  ;;  %v21098_v42 = vcombine.high %v20839_v5, %v20843_v60 }
 0x923   : > { %15712 = vmatprep.subr.bf16.mxu1 %v23841_v51  ;;  %v21130_v51 = vcombine.high %v20871_v31, %v20875_v45 }
 0x924   : > { %17377 = vmatpush2.bf16.msra.mxu0 %v21183_v35  ;;  %v21261_v35 = vcombine.low %v21005_v13, %v21009_v18 }
 0x925   : > { %17378 = vmatprep.subr.bf16.mxu0 %v21176_v37  ;;  %v21262_v37 = vcombine.high %v21005_v13, %v21009_v18  ;;  %v20955_v13 = vld [vmem:[%s24007_s11 + $0x13b0] sm:$0xff] }
 0x926   : > { %15713 = vmatpush2.bf16.msra.mxu1 %v23839_v7  ;;  %v20863_v7 = vld [vmem:[%s24007_s11 + $0x10d0] sm:$0xff] }
 0x927   : > { %17311 = vmatprep.subr.bf16.mxu1 %v21278_v49  ;;  %v20969_v49 = vld [vmem:[%s24007_s11 + $0x1420] sm:$0xff] }
 0x928   : > { %17379 = vmatpush2.bf16.msra.mxu0 %v21175_v62  ;;  %v20993_v62 = vld [vmem:[%s24007_s11 + $0x14e0] sm:$0xff] }
 0x929   : > { %v15470_v33 = vpop.f32.mrf.mxu1  ;;  %15715 = vmatmul.mubr.bf16.vlgmr.msra.gmra.mxu1 %v29448_v14  ;;  %17380 = vmatprep.subr.bf16.mxu0 %v21168_v56  ;;  %v21154_v14 = vcombine.high %v20895_v41, %v20899_v3  ;;  %v21129_v56 = vcombine.low %v20871_v31, %v20875_v45  ;;  %v21121_v41 = vcombine.low %v20863_v7, %v20867_v2 }
 0x92a   : > { %v29987_v8 = vadd.f32 %v15470_v33, %v15430_v38  ;;  %17312 = vmatpush1.bf16.msra.mxu1 %v21277_v11  ;;  %v21122_v38 = vcombine.high %v20863_v7, %v20867_v2  ;;  %v20981_v33 = vld [vmem:[%s24007_s11 + $0x1480] sm:$0xff]  ;;  %v20943_v7 = vld [vmem:[%s24007_s11 + $0x1350] sm:$0xff] }
 0x92b   : > { %v15472_v22 = vpop.f32.mrf.mxu1  ;;  %17313 = vmatprep.subr.bf16.mxu1 %v21270_v4  ;;  %v20965_v11 = vld [vmem:[%s24007_s11 + $0x1400] sm:$0xff]  ;;  %v21097_v4 = vcombine.low %v20839_v5, %v20843_v60  ;;  %v20947_v2 = vld [vmem:[%s24007_s11 + $0x1370] sm:$0xff] }
 0x92c   : > { %v29991_v32 = vadd.f32 %v15472_v22, %v15432_v43  ;;  %17381 = vmatpush2.bf16.msra.mxu0 %v21167_v19  ;;  %v20859_v43 = vld [vmem:[%s24007_s11 + $0x10b0] sm:$0xff]  ;;  %v21246_v19 = vcombine.high %v20989_v24, %v20993_v62  ;;  %v21245_v22 = vcombine.low %v20989_v24, %v20993_v62  ;;  %v21222_v61 = vcombine.high %v20965_v11, %v20969_v49  ;;  %v21069_v24 = vld [vmem:[%s24007_s11 + $0x1740] sm:$0xff] }
 0x92d   : > { %v15474_v6 = vpop.f32.mrf.mxu1  ;;  %17382 = vmatprep.subr.bf16.mxu0 %v21160_v23  ;;  %v20985_v23 = vld [vmem:[%s24007_s11 + $0x14a0] sm:$0xff]  ;;  %v21114_v3 = vcombine.high %v20855_v10, %v20859_v43  ;;  %v21221_v45 = vcombine.low %v20965_v11, %v20969_v49  ;;  %v20919_v5 = vld [vmem:[%s24007_s11 + $0x1290] sm:$0xff] }
 0x92e   : > { %17314 = vmatpush1.bf16.msra.mxu1 %v21269_v63  ;;  %v20851_v6 = vld [vmem:[%s24007_s11 + $0x1070] sm:$0xff]  ;;  %v21237_v9 = vcombine.low %v20981_v33, %v20985_v23  ;;  %v21089_v63 = vld [vmem:[%s24007_s11 + $0x17e0] sm:$0xff] }
 0x92f   : > { %v15475_v1 = vpop.f32.mrf.mxu1  ;;  %17315 = vmatprep.subr.bf16.mxu1 %v21262_v37  ;;  %v21073_v62 = vld [vmem:[%s24007_s11 + $0x1760] sm:$0xff]  ;;  %v20923_v60 = vld [vmem:[%s24007_s11 + $0x12b0] sm:$0xff] }
 0x930   : > { %17383 = vmatpush2.bf16.msra.mxu0 %v21159_v59  ;;  %v20847_v59 = vld [vmem:[%s24007_s11 + $0x1050] sm:$0xff]  ;;  %v21113_v1 = vcombine.low %v20855_v10, %v20859_v43  ;;  %v21045_v11 = vld [vmem:[%s24007_s11 + $0x1680] sm:$0xff] }
 0x931   : > { %17434 = vmatprep.subr.bf16.mxu0 %v21154_v14  ;;  %v21238_v14 = vcombine.high %v20981_v33, %v20985_v23  ;;  %v21105_v0 = vcombine.low %v20847_v59, %v20851_v6  ;;  %v20935_v10 = vld [vmem:[%s24007_s11 + $0x1310] sm:$0xff]  ;;  %v21061_v33 = vld [vmem:[%s24007_s11 + $0x1700] sm:$0xff] }
 0x932   : > { %17316 = vmatpush1.bf16.msra.mxu1 %v21261_v35  ;;  %v21081_v35 = vld [vmem:[%s24007_s11 + $0x17a0] sm:$0xff]  ;;  %v20939_v43 = vld [vmem:[%s24007_s11 + $0x1330] sm:$0xff] }
 0x933   : > { %17385 = vmatmul.mubr.bf16.vlgmr.msra.gmra.mxu0 %v29868_v46  ;;  %17317 = vmatprep.subr.bf16.mxu1 %v21254_v40  ;;  %v21065_v23 = vld [vmem:[%s24007_s11 + $0x1720] sm:$0xff] }
 0x934   : > { %17435 = vmatpush1.bf16.msra.mxu0 %v21153_v16  ;;  %17466 = vmatprep.mubr.bf16.mxu0 %v29866_v36  ;;  %v21106_v16 = vcombine.high %v20847_v59, %v20851_v6  ;;  %v20927_v59 = vld [vmem:[%s24007_s11 + $0x12d0] sm:$0xff]  ;;  %v21049_v49 = vld [vmem:[%s24007_s11 + $0x16a0] sm:$0xff] }
 0x935   : > { %17436 = vmatprep.subr.bf16.mxu0 %v21146_v58  ;;  %v21230_v58 = vcombine.high %v20973_v55, %v20977_v53  ;;  %v20931_v6 = vld [vmem:[%s24007_s11 + $0x12f0] sm:$0xff]  ;;  %v21053_v55 = vld [vmem:[%s24007_s11 + $0x16c0] sm:$0xff] }
 0x936   : > { %17318 = vmatpush1.bf16.msra.mxu1 %v21253_v20  ;;  %v21057_v53 = vld [vmem:[%s24007_s11 + $0x16e0] sm:$0xff] }
 0x937   : > { %17319 = vmatprep.subr.bf16.mxu1 %v21246_v19  ;;  %v21326_v19 = vcombine.high %v21069_v24, %v21073_v62 }
 0x938   : > { %17437 = vmatpush1.bf16.msra.mxu0 %v21145_v39  ;;  %v20959_v39 = vld [vmem:[%s24007_s11 + $0x13d0] sm:$0xff] }
 0x939   : > { %17438 = vmatprep.subr.bf16.mxu0 %v21138_v48  ;;  %v21085_v48 = vld [vmem:[%s24007_s11 + $0x17c0] sm:$0xff]  ;;  %v21218_v31 = vcombine.high %v20959_v39, %v20963_v28  ;;  %v21217_v37 = vcombine.low %v20959_v39, %v20963_v28  ;;  %v20911_v39 = vld [vmem:[%s24007_s11 + $0x1250] sm:$0xff] }
 0x93a   : > { %17320 = vmatpush1.bf16.msra.mxu1 %v21245_v22  ;;  %v21342_v18 = vcombine.high %v21085_v48, %v21089_v63  ;;  %v21341_v34 = vcombine.low %v21085_v48, %v21089_v63  ;;  %v21325_v22 = vcombine.low %v21069_v24, %v21073_v62  ;;  %v20915_v28 = vld [vmem:[%s24007_s11 + $0x1270] sm:$0xff]  ;;  %v21177_v48 = vcombine.low %v20919_v5, %v20923_v60 }
 0x93b   : > { %17321 = vmatprep.subr.bf16.mxu1 %v21238_v14  ;;  %v21318_v14 = vcombine.high %v21061_v33, %v21065_v23  ;;  %v21170_v63 = vcombine.high %v20911_v39, %v20915_v28 }
 0x93c   : > { %17439 = vmatpush1.bf16.msra.mxu0 %v21137_v15  ;;  %v20951_v15 = vld [vmem:[%s24007_s11 + $0x1390] sm:$0xff] }
 0x93d   : > { %17440 = vmatprep.subr.bf16.mxu0 %v21130_v51  ;;  %v21077_v51 = vld [vmem:[%s24007_s11 + $0x1780] sm:$0xff]  ;;  %v21210_v47 = vcombine.high %v20951_v15, %v20955_v13 }
 0x93e   : > { %17322 = vmatpush1.bf16.msra.mxu1 %v21237_v9  ;;  %v21334_v40 = vcombine.high %v21077_v51, %v21081_v35  ;;  %v21333_v20 = vcombine.low %v21077_v51, %v21081_v35  ;;  %v21317_v9 = vcombine.low %v21061_v33, %v21065_v23  ;;  %v21041_v51 = vld [vmem:[%s24007_s11 + $0x1660] sm:$0xff] }
 0x93f   : > { %17323 = vmatprep.subr.bf16.mxu1 %v21230_v58  ;;  %v21310_v58 = vcombine.high %v21053_v55, %v21057_v53 }
 0x940   : > { %17441 = vmatpush1.bf16.msra.mxu0 %v21129_v56  ;;  %v21209_v56 = vcombine.low %v20951_v15, %v20955_v13  ;;  %v15512_v15 = vadd.f32 %v29744_v21, %v29987_v8  ;;  %v21169_v13 = vcombine.low %v20911_v39, %v20915_v28  ;;  %v20900_v21 = vld [vmem:[%s24007_s11 + $0x11f8] sm:$0xff] }
 0x941   : > { %17442 = vmatprep.subr.bf16.mxu0 %v21122_v38  ;;  %v21202_v38 = vcombine.high %v20943_v7, %v20947_v2  ;;  %v20848_v28 = vld [vmem:[%s24007_s11 + $0x1058] sm:$0xff] }
 0x942   : > { %17324 = vmatpush1.bf16.msra.mxu1 %v21229_v25  ;;  %v21309_v25 = vcombine.low %v21053_v55, %v21057_v53 }
 0x943   : > { %17325 = vmatprep.subr.bf16.mxu1 %v21222_v61  ;;  %v21302_v61 = vcombine.high %v21045_v11, %v21049_v49 }
 0x944   : > { %17443 = vmatpush1.bf16.msra.mxu0 %v21121_v41  ;;  %v21201_v41 = vcombine.low %v20943_v7, %v20947_v2  ;;  %v20896_v2 = vld [vmem:[%s24007_s11 + $0x11d8] sm:$0xff] }
 0x945   : > { %17444 = vmatprep.subr.bf16.mxu0 %v21114_v3  ;;  %v21194_v3 = vcombine.high %v20935_v10, %v20939_v43  ;;  %v21155_v23 = vcombine.low %v20896_v2, %v20900_v21 }
 0x946   : > { %17326 = vmatpush1.bf16.msra.mxu1 %v21221_v45  ;;  %v20907_v45 = vld [vmem:[%s24007_s11 + $0x1230] sm:$0xff] }
 0x947   : > { %17327 = vmatprep.subr.bf16.mxu1 %v21342_v18  ;;  %v21037_v18 = vld [vmem:[%s24007_s11 + $0x1640] sm:$0xff] }
 0x948   : > { %17445 = vmatpush1.bf16.msra.mxu0 %v21113_v1  ;;  %v21193_v1 = vcombine.low %v20935_v10, %v20939_v43  ;;  %v21293_v8 = vcombine.low %v21037_v18, %v21041_v51  ;;  %v20888_v10 = vld [vmem:[%s24007_s11 + $0x1198] sm:$0xff] }
 0x949   : > { %17446 = vmatprep.subr.bf16.mxu0 %v21106_v16  ;;  %v21186_v16 = vcombine.high %v20927_v59, %v20931_v6  ;;  %v20892_v43 = vld [vmem:[%s24007_s11 + $0x11b8] sm:$0xff] }
 0x94a   : > { %17328 = vmatpush2.bf16.msra.mxu1 %v21341_v34  ;;  %v15514_v34 = vadd.f32 %v29749_v54, %v29991_v32  ;;  %v21156_v54 = vcombine.high %v20896_v2, %v20900_v21  ;;  %v21147_v53 = vcombine.low %v20888_v10, %v20892_v43  ;;  %v20944_v21 = vld [vmem:[%s24007_s11 + $0x1358] sm:$0xff] }
 0x94b   : > { %17329 = vmatprep.subr.bf16.mxu1 %v21334_v40 }
 0x94c   : > { %17447 = vmatpush1.bf16.msra.mxu0 %v21105_v0  ;;  %v21185_v0 = vcombine.low %v20927_v59, %v20931_v6  ;;  %v20880_v6 = vld [vmem:[%s24007_s11 + $0x1158] sm:$0xff] }
 0x94d   : > { %17448 = vmatprep.subr.bf16.mxu0 %v21098_v42  ;;  %v21178_v42 = vcombine.high %v20919_v5, %v20923_v60 }
 0x94e   : > { %17330 = vmatpush2.bf16.msra.mxu1 %v21333_v20 }
 0x94f   : > { %17331 = vmatprep.subr.bf16.mxu1 %v21326_v19 }
 0x950   : > { %17449 = vmatpush1.bf16.msra.mxu0 %v21097_v4  ;;  %v21301_v4 = vcombine.low %v21045_v11, %v21049_v49  ;;  %v20868_v11 = vld [vmem:[%s24007_s11 + $0x10f8] sm:$0xff] }
 0x951   : > { %17450 = vmatprep.subr.bf16.mxu0 %v21218_v31  ;;  %v20903_v31 = vld [vmem:[%s24007_s11 + $0x1210] sm:$0xff] }
 0x952   : > { %17332 = vmatpush2.bf16.msra.mxu1 %v21325_v22  ;;  %v21161_v62 = vcombine.low %v20903_v31, %v20907_v45  ;;  %v21148_v22 = vcombine.high %v20888_v10, %v20892_v43  ;;  %v20932_v10 = vld [vmem:[%s24007_s11 + $0x12f8] sm:$0xff] }
 0x953   : > { %17333 = vmatprep.subr.bf16.mxu1 %v21318_v14  ;;  %v20884_v14 = vld [vmem:[%s24007_s11 + $0x1178] sm:$0xff] }
 0x954   : > { %17451 = vmatpush2.bf16.msra.mxu0 %v21217_v37  ;;  %v21162_v37 = vcombine.high %v20903_v31, %v20907_v45  ;;  %v21139_v5 = vcombine.low %v20880_v6, %v20884_v14  ;;  %v20844_v31 = vld [vmem:[%s24007_s11 + $0x1038] sm:$0xff] }
 0x955   : > { %17452 = vmatprep.subr.bf16.mxu0 %v21210_v47  ;;  %v21294_v47 = vcombine.high %v21037_v18, %v21041_v51  ;;  %v20964_v18 = vld [vmem:[%s24007_s11 + $0x13f8] sm:$0xff] }
 0x956   : > { %17334 = vmatpush2.bf16.msra.mxu1 %v21317_v9  ;;  %v20876_v9 = vld [vmem:[%s24007_s11 + $0x1138] sm:$0xff] }
 0x957   : > { %17335 = vmatprep.subr.bf16.mxu1 %v21310_v58  ;;  %v20864_v58 = vld [vmem:[%s24007_s11 + $0x10d8] sm:$0xff] }
 0x958   : > { %17453 = vmatpush2.bf16.msra.mxu0 %v21209_v56  ;;  %v21029_v56 = vld [vmem:[%s24007_s11 + $0x1600] sm:$0xff] }
 0x959   : > { %17454 = vmatprep.subr.bf16.mxu0 %v21202_v38  ;;  %v21033_v38 = vld [vmem:[%s24007_s11 + $0x1620] sm:$0xff] }
 0x95a   : > { %17336 = vmatpush2.bf16.msra.mxu1 %v21309_v25  ;;  %v21286_v32 = vcombine.high %v21029_v56, %v21033_v38  ;;  %v21285_v19 = vcombine.low %v21029_v56, %v21033_v38  ;;  %v21123_v25 = vcombine.low %v20864_v58, %v20868_v11  ;;  %v20936_v56 = vld [vmem:[%s24007_s11 + $0x1318] sm:$0xff] }
 0x95b   : > { %17337 = vmatprep.subr.bf16.mxu1 %v21302_v61  ;;  %v20852_v61 = vld [vmem:[%s24007_s11 + $0x1078] sm:$0xff] }
 0x95c   : > { %17455 = vmatpush2.bf16.msra.mxu0 %v21201_v41  ;;  %v30074_v41 = vld [vmem:[%s24007_s11 + $0x15c8] sm:$0xff]  ;;  %v21107_v45 = vcombine.low %v20848_v28, %v20852_v61  ;;  %v20940_v38 = vld [vmem:[%s24007_s11 + $0x1338] sm:$0xff] }
 0x95d   : > { %17456 = vmatprep.subr.bf16.mxu0 %v21194_v3  ;;  %v30077_v3 = vld [vmem:[%s24007_s11 + $0x15e8] sm:$0xff]  ;;  %v21195_v43 = vcombine.low %v20936_v56, %v20940_v38 }
 0x95e   : > { %17338 = vmatpush2.bf16.msra.mxu1 %v21301_v4  ;;  %v21280_v59 = vcombine.high %v30074_v41, %v30077_v3  ;;  %v21279_v55 = vcombine.low %v30074_v41, %v30077_v3  ;;  %v20840_v4 = vld [vmem:[%s24007_s11 + $0x1018] sm:$0xff]  ;;  %v20990_v3 = vld [vmem:[%s24007_s11 + $0x14c8] sm:$0xff] }
 0x95f   : > { %17339 = vmatprep.subr.bf16.mxu1 %v21294_v47  ;;  %v21099_v51 = vcombine.low %v20840_v4, %v20844_v31  ;;  %v20956_v47 = vld [vmem:[%s24007_s11 + $0x13b8] sm:$0xff] }
 0x960   : > { %17457 = vmatpush2.bf16.msra.mxu0 %v21193_v1  ;;  %v21140_v1 = vcombine.high %v20880_v6, %v20884_v14  ;;  %v20912_v6 = vld [vmem:[%s24007_s11 + $0x1258] sm:$0xff] }
 0x961   : > { %17458 = vmatprep.subr.bf16.mxu0 %v21186_v16  ;;  %v20872_v16 = vld [vmem:[%s24007_s11 + $0x1118] sm:$0xff] }
 0x962   : > { %17340 = vmatpush2.bf16.msra.mxu1 %v21293_v8  ;;  %v21132_v60 = vcombine.high %v20872_v16, %v20876_v9  ;;  %v21131_v49 = vcombine.low %v20872_v16, %v20876_v9  ;;  %v20948_v8 = vld [vmem:[%s24007_s11 + $0x1378] sm:$0xff] }
 0x963   : > { %17341 = vmatprep.subr.bf16.mxu1 %v21286_v32  ;;  %v20928_v32 = vld [vmem:[%s24007_s11 + $0x12d8] sm:$0xff] }
 0x964   : > { %17459 = vmatpush2.bf16.msra.mxu0 %v21185_v0  ;;  %v20856_v0 = vld [vmem:[%s24007_s11 + $0x1098] sm:$0xff] }
 0x965   : > { %17460 = vmatprep.subr.bf16.mxu0 %v21178_v42  ;;  %v20860_v42 = vld [vmem:[%s24007_s11 + $0x10b8] sm:$0xff] }
 0x966   : > { %17342 = vmatpush2.bf16.msra.mxu1 %v21285_v19  ;;  %v21116_v39 = vcombine.high %v20856_v0, %v20860_v42  ;;  %v21188_v19 = vcombine.high %v20928_v32, %v20932_v10  ;;  %v20916_v14 = vld [vmem:[%s24007_s11 + $0x1278] sm:$0xff] }
 0x967   : > { %17393 = vmatprep.subr.bf16.mxu1 %v21280_v59  ;;  %v20904_v16 = vld [vmem:[%s24007_s11 + $0x1218] sm:$0xff] }
 0x968   : > { %17461 = vmatpush2.bf16.msra.mxu0 %v21177_v48  ;;  %v21115_v48 = vcombine.low %v20856_v0, %v20860_v42  ;;  %v20908_v9 = vld [vmem:[%s24007_s11 + $0x1238] sm:$0xff] }
 0x969   : > { %v15552_v35 = vpop.f32.mrf.mxu1  ;;  %17462 = vmatprep.subr.bf16.mxu0 %v21170_v63  ;;  %v21108_v63 = vcombine.high %v20848_v28, %v20852_v61 }
 0x96a   : > { %v30063_v7 = vadd.f32 %v15552_v35, %v15512_v15  ;;  %v21100_v15 = vcombine.high %v20840_v4, %v20844_v31 }
 0x96b   : > { %v15554_v40 = vpop.f32.mrf.mxu1 }
 0x96c   : > { %v30067_v24 = vadd.f32 %v15554_v40, %v15514_v34  ;;  %17463 = vmatpush2.bf16.msra.mxu0 %v21169_v13  ;;  %v20960_v13 = vld [vmem:[%s24007_s11 + $0x13d8] sm:$0xff]  ;;  %v15594_v61 = vadd.f32 %v29854_v30, %v30063_v7  ;;  %v21018_v30 = vld [vmem:[%s24007_s11 + $0x15a8] sm:$0xff] }
 0x96d   : > { %v15556_v20 = vpop.f32.mrf.mxu1  ;;  %17464 = vmatprep.subr.bf16.mxu0 %v21162_v37  ;;  %v21220_v35 = vcombine.high %v20960_v13, %v20964_v18  ;;  %v20952_v37 = vld [vmem:[%s24007_s11 + $0x1398] sm:$0xff]  ;;  %v21219_v34 = vcombine.low %v20960_v13, %v20964_v18 }
 0x96e   : > { %v21212_v2 = vcombine.high %v20952_v37, %v20956_v47  ;;  %v21211_v40 = vcombine.low %v20952_v37, %v20956_v47  ;;  %v21203_v20 = vcombine.low %v20944_v21, %v20948_v8  ;;  %v21014_v47 = vld [vmem:[%s24007_s11 + $0x1588] sm:$0xff] }
 0x96f   : > { %v15557_v33 = vpop.f32.mrf.mxu1 }
 0x970   : > { %17465 = vmatpush2.bf16.msra.mxu0 %v21161_v62  ;;  %v21204_v62 = vcombine.high %v20944_v21, %v20948_v8  ;;  %v20920_v33 = vld [vmem:[%s24007_s11 + $0x1298] sm:$0xff]  ;;  %v21271_v21 = vcombine.low %v21014_v47, %v21018_v30 }
 0x971   : > { %17516 = vmatprep.subr.bf16.mxu0 %v21156_v54  ;;  %v21196_v54 = vcombine.high %v20936_v56, %v20940_v38  ;;  %v21002_v56 = vld [vmem:[%s24007_s11 + $0x1528] sm:$0xff] }
 0x973   : > { %17467 = vmatmul.mubr.bf16.vlgmr.msra.gmra.mxu0 %v29868_v46 }
 0x974   : > { %17517 = vmatpush1.bf16.msra.mxu0 %v21155_v23  ;;  %17548 = vmatprep.mubr.bf16.mxu0 %v29866_v36  ;;  %v21124_v36 = vcombine.high %v20864_v58, %v20868_v11  ;;  %v20924_v23 = vld [vmem:[%s24007_s11 + $0x12b8] sm:$0xff]  ;;  %v21164_v58 = vcombine.high %v20904_v16, %v20908_v9 }
 0x975   : > { %17518 = vmatprep.subr.bf16.mxu0 %v21148_v22  ;;  %v21187_v22 = vcombine.low %v20928_v32, %v20932_v10  ;;  %v21180_v59 = vcombine.high %v20920_v33, %v20924_v23 }
 0x978   : > { %17519 = vmatpush1.bf16.msra.mxu0 %v21147_v53  ;;  %v21179_v53 = vcombine.low %v20920_v33, %v20924_v23 }
 0x979   : > { %17520 = vmatprep.subr.bf16.mxu0 %v21140_v1  ;;  %v21172_v1 = vcombine.high %v20912_v6, %v20916_v14 }
 0x97c   : > { %17521 = vmatpush1.bf16.msra.mxu0 %v21139_v5  ;;  %v21171_v5 = vcombine.low %v20912_v6, %v20916_v14 }
 0x97d   : > { %17522 = vmatprep.subr.bf16.mxu0 %v21132_v60 }
 0x980   : > { %17523 = vmatpush1.bf16.msra.mxu0 %v21131_v49  ;;  %v21163_v49 = vcombine.low %v20904_v16, %v20908_v9 }
 0x981   : > { %17524 = vmatprep.subr.bf16.mxu0 %v21124_v36 }
 0x984   : > { %17525 = vmatpush1.bf16.msra.mxu0 %v21123_v25 }
 0x985   : > { %17526 = vmatprep.subr.bf16.mxu0 %v21116_v39 }
 0x988   : > { %17527 = vmatpush1.bf16.msra.mxu0 %v21115_v48  ;;  %v15596_v48 = vadd.f32 %v29861_v57, %v30067_v24 }
 0x989   : > { %17528 = vmatprep.subr.bf16.mxu0 %v21108_v63 }
 0x98c   : > { %17529 = vmatpush1.bf16.msra.mxu0 %v21107_v45 }
 0x98d   : > { %17530 = vmatprep.subr.bf16.mxu0 %v21100_v15 }
 0x990   : > { %17531 = vmatpush1.bf16.msra.mxu0 %v21099_v51 }
 0x991   : > { %17532 = vmatprep.subr.bf16.mxu0 %v21220_v35 }
 0x994   : > { %17533 = vmatpush2.bf16.msra.mxu0 %v21219_v34  ;;  %v21006_v34 = vld [vmem:[%s24007_s11 + $0x1548] sm:$0xff] }
 0x995   : > { %17534 = vmatprep.subr.bf16.mxu0 %v21212_v2 }
 0x998   : > { %17535 = vmatpush2.bf16.msra.mxu0 %v21211_v40 }
 0x999   : > { %17536 = vmatprep.subr.bf16.mxu0 %v21204_v62  ;;  %v20998_v62 = vld [vmem:[%s24007_s11 + $0x1508] sm:$0xff] }
 0x99a   : > { %v21256_v41 = vcombine.high %v20998_v62, %v21002_v56  ;;  %v21255_v32 = vcombine.low %v20998_v62, %v21002_v56 }
 0x99c   : > { %17537 = vmatpush2.bf16.msra.mxu0 %v21203_v20 }
 0x99d   : > { %17538 = vmatprep.subr.bf16.mxu0 %v21196_v54 }
 0x9a0   : > { %17539 = vmatpush2.bf16.msra.mxu0 %v21195_v43  ;;  %v20982_v43 = vld [vmem:[%s24007_s11 + $0x1488] sm:$0xff] }
 0x9a1   : > { %17540 = vmatprep.subr.bf16.mxu0 %v21188_v19  ;;  %v20986_v19 = vld [vmem:[%s24007_s11 + $0x14a8] sm:$0xff] }
 0x9a2   : > { %v21240_v23 = vcombine.high %v20982_v43, %v20986_v19  ;;  %v21239_v6 = vcombine.low %v20982_v43, %v20986_v19  ;;  %v21007_v43 = vld [vmem:[%s24007_s11 + $0x1550] sm:$0xff] }
 0x9a3   : > { %v21011_v19 = vld [vmem:[%s24007_s11 + $0x1570] sm:$0xff] }
 0x9a4   : > { %17541 = vmatpush2.bf16.msra.mxu0 %v21187_v22  ;;  %v20974_v22 = vld [vmem:[%s24007_s11 + $0x1448] sm:$0xff] }
 0x9a5   : > { %17542 = vmatprep.subr.bf16.mxu0 %v21180_v59  ;;  %v20978_v59 = vld [vmem:[%s24007_s11 + $0x1468] sm:$0xff] }
 0x9a6   : > { %v21232_v14 = vcombine.high %v20974_v22, %v20978_v59  ;;  %v21231_v16 = vcombine.low %v20974_v22, %v20978_v59  ;;  %v21266_v59 = vcombine.high %v21007_v43, %v21011_v19 }
 0x9a8   : > { %17543 = vmatpush2.bf16.msra.mxu0 %v21179_v53  ;;  %v20966_v53 = vld [vmem:[%s24007_s11 + $0x1408] sm:$0xff] }
 0x9a9   : > { %v15634_v60 = vpop.f32.mrf.mxu1  ;;  %17544 = vmatprep.subr.bf16.mxu0 %v21172_v1  ;;  %v20970_v1 = vld [vmem:[%s24007_s11 + $0x1428] sm:$0xff] }
 0x9aa   : > { %v15635_v63 = vadd.f32 %v15634_v60, %v15594_v61  ;;  %v21224_v9 = vcombine.high %v20966_v53, %v20970_v1  ;;  %v21090_v60 = vld [vmem:[%s24007_s11 + $0x17e8] sm:$0xff] }
 0x9ab   : > { %v15636_v11 = vpop.f32.mrf.mxu1  ;;  %v21074_v61 = vld [vmem:[%s24007_s11 + $0x1768] sm:$0xff] }
 0x9ac   : > { %17545 = vmatpush2.bf16.msra.mxu0 %v21171_v5  ;;  %v15637_v4 = vadd.f32 %v15636_v11, %v15596_v48  ;;  %v15676_v31 = vadd.f32 %v29993_v27, %v15635_v63  ;;  %v21272_v27 = vcombine.high %v21014_v47, %v21018_v30  ;;  %v21086_v5 = vld [vmem:[%s24007_s11 + $0x17c8] sm:$0xff] }
 0x9ad   : > { %v15638_v36 = vpop.f32.mrf.mxu1  ;;  %17546 = vmatprep.subr.bf16.mxu0 %v21164_v58  ;;  %v21223_v58 = vcombine.low %v20966_v53, %v20970_v1  ;;  %v21344_v11 = vcombine.high %v21086_v5, %v21090_v60  ;;  %v21265_v1 = vcombine.low %v21007_v43, %v21011_v19  ;;  %v21039_v43 = vld [vmem:[%s24007_s11 + $0x1650] sm:$0xff] }
 0x9ae   : > { %v15678_v45 = vadd.f32 %v29997_v12, %v15637_v4  ;;  %v21010_v12 = vld [vmem:[%s24007_s11 + $0x1568] sm:$0xff]  ;;  %v21043_v19 = vld [vmem:[%s24007_s11 + $0x1670] sm:$0xff] }
 0x9af   : > { %v15639_v0 = vpop.f32.mrf.mxu1  ;;  %v21264_v40 = vcombine.high %v21006_v34, %v21010_v12  ;;  %v21263_v20 = vcombine.low %v21006_v34, %v21010_v12  ;;  %v21082_v36 = vld [vmem:[%s24007_s11 + $0x17a8] sm:$0xff] }
 0x9b0   : > { %17547 = vmatpush2.bf16.msra.mxu0 %v21163_v49  ;;  %v21078_v49 = vld [vmem:[%s24007_s11 + $0x1788] sm:$0xff]  ;;  %v21343_v0 = vcombine.low %v21086_v5, %v21090_v60  ;;  %v20991_v5 = vld [vmem:[%s24007_s11 + $0x14d0] sm:$0xff] }
 0x9b1   : > { %v21335_v48 = vcombine.low %v21078_v49, %v21082_v36  ;;  %v21062_v4 = vld [vmem:[%s24007_s11 + $0x1708] sm:$0xff]  ;;  %v20995_v60 = vld [vmem:[%s24007_s11 + $0x14f0] sm:$0xff] }
 0x9b3   : > { %17549 = vmatmul.mubr.bf16.vlgmr.msra.gmra.mxu0 %v29868_v46  ;;  %v30114_v42 = vpop.f32.mrf.mxu0 }
 0x9b5   : > { %v30116_v25 = vpop.f32.mrf.mxu0 }
 0x9b7   : > { %v17308_v39 = vpop.f32.mrf.mxu0 }
 0x9b8   : > { %v21336_v39 = vcombine.high %v21078_v49, %v21082_v36  ;;  %v20983_v49 = vld [vmem:[%s24007_s11 + $0x1490] sm:$0xff] }
 0x9b9   : > { %v17309_v28 = vpop.f32.mrf.mxu0  ;;  %v20987_v36 = vld [vmem:[%s24007_s11 + $0x14b0] sm:$0xff] }
 0x9ba   : > { %v21070_v28 = vld [vmem:[%s24007_s11 + $0x1748] sm:$0xff] }
 0x9bb   : > { %v21328_v63 = vcombine.high %v21070_v28, %v21074_v61 }
 0x9e9   : > { %v15716_v46 = vpop.f32.mrf.mxu1 }
 0x9ea   : > { %v15717_v15 = vadd.f32 %v15716_v46, %v15676_v31  ;;  %v21066_v31 = vld [vmem:[%s24007_s11 + $0x1728] sm:$0xff]  ;;  %v21327_v46 = vcombine.low %v21070_v28, %v21074_v61  ;;  %v20975_v28 = vld [vmem:[%s24007_s11 + $0x1450] sm:$0xff] }
 0x9eb   : > { %v15718_v13 = vpop.f32.mrf.mxu1  ;;  %v20979_v61 = vld [vmem:[%s24007_s11 + $0x1470] sm:$0xff] }
 0x9ec   : > { %v15719_v18 = vadd.f32 %v15718_v13, %v15678_v45  ;;  %v15725_v51 = vmax.f32 %v15717_v15, 0.0  ;;  %v21320_v45 = vcombine.high %v21062_v4, %v21066_v31  ;;  %v21054_v15 = vld [vmem:[%s24007_s11 + $0x16c8] sm:$0xff] }
 0x9ed   : > { %v15720_v35 = vpop.f32.mrf.mxu1  ;;  %v21058_v13 = vld [vmem:[%s24007_s11 + $0x16e8] sm:$0xff] }
 0x9ee   : > { %v15726_v37 = vmax.f32 %v15719_v18, 0.0  ;;  %v30128_v24 = vpack.c.bf16 %v15725_v51, %v15725_v51  ;;  %v21319_v18 = vcombine.low %v21062_v4, %v21066_v31  ;;  %v21312_v51 = vcombine.high %v21054_v15, %v21058_v13  ;;  %v21046_v35 = vld [vmem:[%s24007_s11 + $0x1688] sm:$0xff]  ;;  %v20967_v4 = vld [vmem:[%s24007_s11 + $0x1410] sm:$0xff] }
 0x9ef   : > { %v15721_v7 = vpop.f32.mrf.mxu1  ;;  %v21311_v47 = vcombine.low %v21054_v15, %v21058_v13  ;;  %v20971_v31 = vld [vmem:[%s24007_s11 + $0x1430] sm:$0xff] }
 0x9f0   : > { %v30126_v57 = vpack.c.bf16 %v15726_v37, %v15726_v37  ;;  %v21050_v37 = vld [vmem:[%s24007_s11 + $0x16a8] sm:$0xff]  ;;  %v21087_v15 = vld [vmem:[%s24007_s11 + $0x17d0] sm:$0xff] }
 0x9f1   : > { %v21304_v30 = vcombine.high %v21046_v35, %v21050_v37  ;;  %v21038_v7 = vld [vmem:[%s24007_s11 + $0x1648] sm:$0xff]  ;;  %v21303_v34 = vcombine.low %v21046_v35, %v21050_v37  ;;  %v21091_v13 = vld [vmem:[%s24007_s11 + $0x17f0] sm:$0xff] }
 0x9f2   : > { %17343 = vmatprep.mubr.bf16.mxu1 %v30126_v57  ;;  %v21079_v35 = vld [vmem:[%s24007_s11 + $0x1790] sm:$0xff] }
 0x9f3   : > { %v30133_v2 = vpop.f32.mrf.mxu0  ;;  %17344 = vmatmul.mubr.bf16.vlgmr.msra.gmra.mxu1 %v30128_v24  ;;  %v21083_v37 = vld [vmem:[%s24007_s11 + $0x17b0] sm:$0xff] }
 0x9f4   : > { %17394 = vmatpush1.bf16.msra.mxu1 %v21279_v55  ;;  %17425 = vmatprep.mubr.bf16.mxu1 %v30126_v57  ;;  %v20994_v55 = vld [vmem:[%s24007_s11 + $0x14e8] sm:$0xff] }
 0x9f5   : > { %v30140_v8 = vpop.f32.mrf.mxu0  ;;  %17395 = vmatprep.subr.bf16.mxu1 %v21272_v27  ;;  %v21248_v10 = vcombine.high %v20990_v3, %v20994_v55  ;;  %v21247_v33 = vcombine.low %v20990_v3, %v20994_v55  ;;  %v21042_v27 = vld [vmem:[%s24007_s11 + $0x1668] sm:$0xff]  ;;  %v21015_v3 = vld [vmem:[%s24007_s11 + $0x1590] sm:$0xff] }
 0x9f6   : > { %v21296_v12 = vcombine.high %v21038_v7, %v21042_v27  ;;  %v21295_v62 = vcombine.low %v21038_v7, %v21042_v27  ;;  %v21019_v55 = vld [vmem:[%s24007_s11 + $0x15b0] sm:$0xff] }
 0x9f7   : > { %v17390_v38 = vpop.f32.mrf.mxu0  ;;  %v21071_v7 = vld [vmem:[%s24007_s11 + $0x1750] sm:$0xff] }
 0x9f8   : > { %17396 = vmatpush1.bf16.msra.mxu1 %v21271_v21  ;;  %v21030_v21 = vld [vmem:[%s24007_s11 + $0x1608] sm:$0xff]  ;;  %v21023_v38 = vld [vmem:[%s24007_s11 + $0x15d0] sm:$0xff] }
 0x9f9   : > { %v17391_v54 = vpop.f32.mrf.mxu0  ;;  %17397 = vmatprep.subr.bf16.mxu1 %v21264_v40  ;;  %v21034_v40 = vld [vmem:[%s24007_s11 + $0x1628] sm:$0xff]  ;;  %v21075_v27 = vld [vmem:[%s24007_s11 + $0x1770] sm:$0xff] }
 0x9fa   : > { %v21288_v56 = vcombine.high %v21030_v21, %v21034_v40  ;;  %v21287_v54 = vcombine.low %v21030_v21, %v21034_v40  ;;  %v21063_v21 = vld [vmem:[%s24007_s11 + $0x1710] sm:$0xff] }
 0x9fb   : > { %v21067_v40 = vld [vmem:[%s24007_s11 + $0x1730] sm:$0xff] }
 0x9fc   : > { %17398 = vmatpush1.bf16.msra.mxu1 %v21263_v20  ;;  %v21027_v20 = vld [vmem:[%s24007_s11 + $0x15f0] sm:$0xff] }
 0x9fd   : > { %17399 = vmatprep.subr.bf16.mxu1 %v21256_v41  ;;  %v21282_v41 = vcombine.high %v21023_v38, %v21027_v20 }
 0xa00   : > { %17400 = vmatpush1.bf16.msra.mxu1 %v21255_v32  ;;  %v21281_v32 = vcombine.low %v21023_v38, %v21027_v20  ;;  %v21055_v38 = vld [vmem:[%s24007_s11 + $0x16d0] sm:$0xff] }
 0xa01   : > { %17401 = vmatprep.subr.bf16.mxu1 %v21248_v10  ;;  %v21274_v10 = vcombine.high %v21015_v3, %v21019_v55  ;;  %v21059_v20 = vld [vmem:[%s24007_s11 + $0x16f0] sm:$0xff] }
 0xa04   : > { %17402 = vmatpush1.bf16.msra.mxu1 %v21247_v33 }
 0xa05   : > { %17403 = vmatprep.subr.bf16.mxu1 %v21240_v23  ;;  %v21273_v23 = vcombine.low %v21015_v3, %v21019_v55  ;;  %v21047_v3 = vld [vmem:[%s24007_s11 + $0x1690] sm:$0xff] }
 0xa06   : > { %v21051_v55 = vld [vmem:[%s24007_s11 + $0x16b0] sm:$0xff] }
 0xa08   : > { %17404 = vmatpush1.bf16.msra.mxu1 %v21239_v6  ;;  %v20999_v6 = vld [vmem:[%s24007_s11 + $0x1510] sm:$0xff] }
 0xa09   : > { %17405 = vmatprep.subr.bf16.mxu1 %v21232_v14  ;;  %v21003_v14 = vld [vmem:[%s24007_s11 + $0x1530] sm:$0xff] }
 0xa0c   : > { %17406 = vmatpush1.bf16.msra.mxu1 %v21231_v16 }
 0xa0d   : > { %17407 = vmatprep.subr.bf16.mxu1 %v21224_v9  ;;  %v21258_v9 = vcombine.high %v20999_v6, %v21003_v14 }
 0xa10   : > { %17408 = vmatpush1.bf16.msra.mxu1 %v21223_v58  ;;  %v21257_v58 = vcombine.low %v20999_v6, %v21003_v14  ;;  %v21031_v6 = vld [vmem:[%s24007_s11 + $0x1610] sm:$0xff] }
 0xa11   : > { %17409 = vmatprep.subr.bf16.mxu1 %v21344_v11  ;;  %v21250_v11 = vcombine.high %v20991_v5, %v20995_v60  ;;  %v21035_v14 = vld [vmem:[%s24007_s11 + $0x1630] sm:$0xff] }
 0xa14   : > { %17410 = vmatpush2.bf16.msra.mxu1 %v21343_v0  ;;  %v21249_v0 = vcombine.low %v20991_v5, %v20995_v60  ;;  %v21289_v5 = vcombine.low %v21031_v6, %v21035_v14 }
 0xa15   : > { %17411 = vmatprep.subr.bf16.mxu1 %v21336_v39  ;;  %v21242_v39 = vcombine.high %v20983_v49, %v20987_v36 }
 0xa18   : > { %17412 = vmatpush2.bf16.msra.mxu1 %v21335_v48  ;;  %v21241_v48 = vcombine.low %v20983_v49, %v20987_v36 }
 0xa19   : > { %17413 = vmatprep.subr.bf16.mxu1 %v21328_v63  ;;  %v21234_v63 = vcombine.high %v20975_v28, %v20979_v61 }
 0xa1c   : > { %17414 = vmatpush2.bf16.msra.mxu1 %v21327_v46  ;;  %v21233_v46 = vcombine.low %v20975_v28, %v20979_v61 }
 0xa1d   : > { %17415 = vmatprep.subr.bf16.mxu1 %v21320_v45  ;;  %v21226_v45 = vcombine.high %v20967_v4, %v20971_v31 }
 0xa20   : > { %17416 = vmatpush2.bf16.msra.mxu1 %v21319_v18  ;;  %v21225_v18 = vcombine.low %v20967_v4, %v20971_v31  ;;  %v21000_v4 = vld [vmem:[%s24007_s11 + $0x1518] sm:$0xff] }
 0xa21   : > { %17417 = vmatprep.subr.bf16.mxu1 %v21312_v51  ;;  %v21346_v51 = vcombine.high %v21087_v15, %v21091_v13  ;;  %v21004_v31 = vld [vmem:[%s24007_s11 + $0x1538] sm:$0xff] }
 0xa24   : > { %17418 = vmatpush2.bf16.msra.mxu1 %v21311_v47  ;;  %v21345_v47 = vcombine.low %v21087_v15, %v21091_v13  ;;  %v21260_v13 = vcombine.high %v21000_v4, %v21004_v31 }
 0xa25   : > { %17419 = vmatprep.subr.bf16.mxu1 %v21304_v30  ;;  %v21338_v30 = vcombine.high %v21079_v35, %v21083_v37 }
 0xa28   : > { %17420 = vmatpush2.bf16.msra.mxu1 %v21303_v34  ;;  %v21337_v34 = vcombine.low %v21079_v35, %v21083_v37  ;;  %v20984_v37 = vld [vmem:[%s24007_s11 + $0x1498] sm:$0xff] }
 0xa29   : > { %17421 = vmatprep.subr.bf16.mxu1 %v21296_v12  ;;  %v21330_v12 = vcombine.high %v21071_v7, %v21075_v27 }
 0xa2c   : > { %17422 = vmatpush2.bf16.msra.mxu1 %v21295_v62  ;;  %v21329_v62 = vcombine.low %v21071_v7, %v21075_v27  ;;  %v20976_v27 = vld [vmem:[%s24007_s11 + $0x1458] sm:$0xff] }
 0xa2d   : > { %17423 = vmatprep.subr.bf16.mxu1 %v21288_v56  ;;  %v21322_v56 = vcombine.high %v21063_v21, %v21067_v40 }
 0xa30   : > { %17424 = vmatpush2.bf16.msra.mxu1 %v21287_v54  ;;  %v21321_v54 = vcombine.low %v21063_v21, %v21067_v40  ;;  %v20968_v40 = vld [vmem:[%s24007_s11 + $0x1418] sm:$0xff] }
 0xa31   : > { %17475 = vmatprep.subr.bf16.mxu1 %v21282_v41  ;;  %v21314_v41 = vcombine.high %v21055_v38, %v21059_v20 }
 0xa33   : > { %17426 = vmatmul.mubr.bf16.vlgmr.msra.gmra.mxu1 %v30128_v24  ;;  %v30175_v33 = vpop.f32.mrf.mxu0 }
 0xa34   : > { %17476 = vmatpush1.bf16.msra.mxu1 %v21281_v32  ;;  %17507 = vmatprep.mubr.bf16.mxu1 %v30126_v57  ;;  %v21313_v32 = vcombine.low %v21055_v38, %v21059_v20  ;;  %v21088_v20 = vld [vmem:[%s24007_s11 + $0x17d8] sm:$0xff] }
 0xa35   : > { %v30178_v22 = vpop.f32.mrf.mxu0  ;;  %17477 = vmatprep.subr.bf16.mxu1 %v21274_v10  ;;  %v21306_v10 = vcombine.high %v21047_v3, %v21051_v55 }
 0xa37   : > { %v17472_v53 = vpop.f32.mrf.mxu0 }
 0xa38   : > { %17478 = vmatpush1.bf16.msra.mxu1 %v21273_v23  ;;  %v21305_v23 = vcombine.low %v21047_v3, %v21051_v55  ;;  %v21297_v53 = vcombine.low %v21039_v43, %v21043_v19  ;;  %v21080_v55 = vld [vmem:[%s24007_s11 + $0x1798] sm:$0xff] }
 0xa39   : > { %v17473_v16 = vpop.f32.mrf.mxu0  ;;  %17479 = vmatprep.subr.bf16.mxu1 %v21266_v59  ;;  %v21298_v59 = vcombine.high %v21039_v43, %v21043_v19  ;;  %v21072_v19 = vld [vmem:[%s24007_s11 + $0x1758] sm:$0xff] }
 0xa3a   : > { %v21024_v16 = vld [vmem:[%s24007_s11 + $0x15d8] sm:$0xff] }
 0xa3c   : > { %17480 = vmatpush1.bf16.msra.mxu1 %v21265_v1  ;;  %v21290_v1 = vcombine.high %v21031_v6, %v21035_v14  ;;  %v21064_v14 = vld [vmem:[%s24007_s11 + $0x1718] sm:$0xff] }
 0xa3d   : > { %17481 = vmatprep.subr.bf16.mxu1 %v21258_v9  ;;  %v21028_v9 = vld [vmem:[%s24007_s11 + $0x15f8] sm:$0xff] }
 0xa3e   : > { %v21284_v60 = vcombine.high %v21024_v16, %v21028_v9  ;;  %v21283_v49 = vcombine.low %v21024_v16, %v21028_v9  ;;  %v21056_v9 = vld [vmem:[%s24007_s11 + $0x16d8] sm:$0xff] }
 0xa40   : > { %17482 = vmatpush1.bf16.msra.mxu1 %v21257_v58  ;;  %v21016_v58 = vld [vmem:[%s24007_s11 + $0x1598] sm:$0xff] }
 0xa41   : > { %17483 = vmatprep.subr.bf16.mxu1 %v21250_v11  ;;  %v21020_v11 = vld [vmem:[%s24007_s11 + $0x15b8] sm:$0xff] }
 0xa42   : > { %v21276_v36 = vcombine.high %v21016_v58, %v21020_v11  ;;  %v21275_v61 = vcombine.low %v21016_v58, %v21020_v11  ;;  %v21048_v11 = vld [vmem:[%s24007_s11 + $0x1698] sm:$0xff] }
 0xa44   : > { %17484 = vmatpush1.bf16.msra.mxu1 %v21249_v0  ;;  %v21008_v0 = vld [vmem:[%s24007_s11 + $0x1558] sm:$0xff] }
 0xa45   : > { %17485 = vmatprep.subr.bf16.mxu1 %v21242_v39  ;;  %v21012_v39 = vld [vmem:[%s24007_s11 + $0x1578] sm:$0xff] }
 0xa48   : > { %17486 = vmatpush1.bf16.msra.mxu1 %v21241_v48 }
 0xa49   : > { %17487 = vmatprep.subr.bf16.mxu1 %v21234_v63  ;;  %v21268_v63 = vcombine.high %v21008_v0, %v21012_v39 }
 0xa4c   : > { %17488 = vmatpush1.bf16.msra.mxu1 %v21233_v46 }
 0xa4d   : > { %17489 = vmatprep.subr.bf16.mxu1 %v21226_v45  ;;  %v21267_v45 = vcombine.low %v21008_v0, %v21012_v39  ;;  %v21040_v39 = vld [vmem:[%s24007_s11 + $0x1658] sm:$0xff] }
 0xa50   : > { %17490 = vmatpush1.bf16.msra.mxu1 %v21225_v18  ;;  %v20992_v18 = vld [vmem:[%s24007_s11 + $0x14d8] sm:$0xff] }
 0xa51   : > { %17491 = vmatprep.subr.bf16.mxu1 %v21346_v51  ;;  %v20996_v51 = vld [vmem:[%s24007_s11 + $0x14f8] sm:$0xff] }
 0xa52   : > { %v21252_v35 = vcombine.high %v20992_v18, %v20996_v51 }
 0xa54   : > { %17492 = vmatpush2.bf16.msra.mxu1 %v21345_v47  ;;  %v20988_v47 = vld [vmem:[%s24007_s11 + $0x14b8] sm:$0xff] }
 0xa55   : > { %17493 = vmatprep.subr.bf16.mxu1 %v21338_v30  ;;  %v21251_v30 = vcombine.low %v20992_v18, %v20996_v51  ;;  %v21244_v7 = vcombine.high %v20984_v37, %v20988_v47 }
 0xa58   : > { %17494 = vmatpush2.bf16.msra.mxu1 %v21337_v34  ;;  %v20980_v34 = vld [vmem:[%s24007_s11 + $0x1478] sm:$0xff] }
 0xa59   : > { %17495 = vmatprep.subr.bf16.mxu1 %v21330_v12  ;;  %v21243_v12 = vcombine.low %v20984_v37, %v20988_v47  ;;  %v21236_v21 = vcombine.high %v20976_v27, %v20980_v34 }
 0xa5c   : > { %17496 = vmatpush2.bf16.msra.mxu1 %v21329_v62  ;;  %v20972_v62 = vld [vmem:[%s24007_s11 + $0x1438] sm:$0xff] }
 0xa5d   : > { %17497 = vmatprep.subr.bf16.mxu1 %v21322_v56  ;;  %v21235_v56 = vcombine.low %v20976_v27, %v20980_v34  ;;  %v21228_v38 = vcombine.high %v20968_v40, %v20972_v62 }
 0xa60   : > { %17498 = vmatpush2.bf16.msra.mxu1 %v21321_v54  ;;  %v21092_v54 = vld [vmem:[%s24007_s11 + $0x17f8] sm:$0xff] }
 0xa61   : > { %17499 = vmatprep.subr.bf16.mxu1 %v21314_v41  ;;  %v21227_v41 = vcombine.low %v20968_v40, %v20972_v62  ;;  %v21348_v3 = vcombine.high %v21088_v20, %v21092_v54 }
 0xa64   : > { %17500 = vmatpush2.bf16.msra.mxu1 %v21313_v32  ;;  %v21084_v32 = vld [vmem:[%s24007_s11 + $0x17b8] sm:$0xff] }
 0xa65   : > { %17501 = vmatprep.subr.bf16.mxu1 %v21306_v10  ;;  %v21347_v10 = vcombine.low %v21088_v20, %v21092_v54  ;;  %v21340_v43 = vcombine.high %v21080_v55, %v21084_v32 }
 0xa68   : > { %17502 = vmatpush2.bf16.msra.mxu1 %v21305_v23  ;;  %v21076_v23 = vld [vmem:[%s24007_s11 + $0x1778] sm:$0xff] }
 0xa69   : > { %17503 = vmatprep.subr.bf16.mxu1 %v21298_v59  ;;  %v21339_v59 = vcombine.low %v21080_v55, %v21084_v32  ;;  %v21332_v6 = vcombine.high %v21072_v19, %v21076_v23 }
 0xa6c   : > { %17504 = vmatpush2.bf16.msra.mxu1 %v21297_v53  ;;  %v21068_v53 = vld [vmem:[%s24007_s11 + $0x1738] sm:$0xff] }
 0xa6d   : > { %17505 = vmatprep.subr.bf16.mxu1 %v21290_v1  ;;  %v21331_v1 = vcombine.low %v21072_v19, %v21076_v23  ;;  %v21324_v16 = vcombine.high %v21064_v14, %v21068_v53 }
 0xa70   : > { %17506 = vmatpush2.bf16.msra.mxu1 %v21289_v5  ;;  %v21060_v5 = vld [vmem:[%s24007_s11 + $0x16f8] sm:$0xff] }
 0xa71   : > { %17557 = vmatprep.subr.bf16.mxu1 %v21284_v60  ;;  %v21323_v60 = vcombine.low %v21064_v14, %v21068_v53  ;;  %v21316_v58 = vcombine.high %v21056_v9, %v21060_v5 }
 0xa73   : > { %17508 = vmatmul.mubr.bf16.vlgmr.msra.gmra.mxu1 %v30128_v24  ;;  %v30213_v28 = vpop.f32.mrf.mxu0 }
 0xa74   : > { %17558 = vmatpush1.bf16.msra.mxu1 %v21283_v49  ;;  %17589 = vmatprep.mubr.bf16.mxu1 %v30126_v57  ;;  %v21259_v57 = vcombine.low %v21000_v4, %v21004_v31  ;;  %v21052_v49 = vld [vmem:[%s24007_s11 + $0x16b8] sm:$0xff] }
 0xa75   : > { %v30216_v48 = vpop.f32.mrf.mxu0  ;;  %17559 = vmatprep.subr.bf16.mxu1 %v21276_v36  ;;  %v21315_v36 = vcombine.low %v21056_v9, %v21060_v5  ;;  %v21308_v0 = vcombine.high %v21048_v11, %v21052_v49  ;;  %v21032_v31 = vld [vmem:[%s24007_s11 + $0x1618] sm:$0xff] }
 0xa77   : > { %v17554_v46 = vpop.f32.mrf.mxu0 }
 0xa78   : > { %17560 = vmatpush1.bf16.msra.mxu1 %v21275_v61  ;;  %v21044_v61 = vld [vmem:[%s24007_s11 + $0x1678] sm:$0xff] }
 0xa79   : > { %v17555_v15 = vpop.f32.mrf.mxu0  ;;  %17561 = vmatprep.subr.bf16.mxu1 %v21268_v63  ;;  %v21307_v63 = vcombine.low %v21048_v11, %v21052_v49  ;;  %v21300_v4 = vcombine.high %v21040_v39, %v21044_v61  ;;  %v21036_v46 = vld [vmem:[%s24007_s11 + $0x1638] sm:$0xff] }
 0xa7a   : > { %v21292_v15 = vcombine.high %v21032_v31, %v21036_v46 }
 0xa7c   : > { %17562 = vmatpush1.bf16.msra.mxu1 %v21267_v45  ;;  %v21299_v45 = vcombine.low %v21040_v39, %v21044_v61 }
 0xa7d   : > { %17563 = vmatprep.subr.bf16.mxu1 %v21260_v13  ;;  %v21291_v13 = vcombine.low %v21032_v31, %v21036_v46 }
 0xa80   : > { %17564 = vmatpush1.bf16.msra.mxu1 %v21259_v57 }
 0xa81   : > { %17565 = vmatprep.subr.bf16.mxu1 %v21252_v35 }
 0xa84   : > { %17566 = vmatpush1.bf16.msra.mxu1 %v21251_v30 }
 0xa85   : > { %17567 = vmatprep.subr.bf16.mxu1 %v21244_v7 }
 0xa88   : > { %17568 = vmatpush1.bf16.msra.mxu1 %v21243_v12 }
 0xa89   : > { %17569 = vmatprep.subr.bf16.mxu1 %v21236_v21 }
 0xa8c   : > { %17570 = vmatpush1.bf16.msra.mxu1 %v21235_v56 }
 0xa8d   : > { %17571 = vmatprep.subr.bf16.mxu1 %v21228_v38 }
 0xa90   : > { %17572 = vmatpush1.bf16.msra.mxu1 %v21227_v41 }
 0xa91   : > { %17573 = vmatprep.subr.bf16.mxu1 %v21348_v3 }
 0xa94   : > { %17574 = vmatpush2.bf16.msra.mxu1 %v21347_v10 }
 0xa95   : > { %17575 = vmatprep.subr.bf16.mxu1 %v21340_v43 }
 0xa98   : > { %17576 = vmatpush2.bf16.msra.mxu1 %v21339_v59 }
 0xa99   : > { %17577 = vmatprep.subr.bf16.mxu1 %v21332_v6 }
 0xa9c   : > { %17578 = vmatpush2.bf16.msra.mxu1 %v21331_v1 }
 0xa9d   : > { %17579 = vmatprep.subr.bf16.mxu1 %v21324_v16 }
 0xaa0   : > { %17580 = vmatpush2.bf16.msra.mxu1 %v21323_v60 }
 0xaa1   : > { %17581 = vmatprep.subr.bf16.mxu1 %v21316_v58 }
 0xaa4   : > { %17582 = vmatpush2.bf16.msra.mxu1 %v21315_v36 }
 0xaa5   : > { %17583 = vmatprep.subr.bf16.mxu1 %v21308_v0 }
 0xaa8   : > { %17584 = vmatpush2.bf16.msra.mxu1 %v21307_v63 }
 0xaa9   : > { %17585 = vmatprep.subr.bf16.mxu1 %v21300_v4 }
 0xaac   : > { %17586 = vmatpush2.bf16.msra.mxu1 %v21299_v45 }
 0xaad   : > { %17587 = vmatprep.subr.bf16.mxu1 %v21292_v15 }
 0xab0   : > { %17588 = vmatpush2.bf16.msra.mxu1 %v21291_v13 }
 0xab3   : > { %17590 = vmatmul.mubr.bf16.vlgmr.msra.gmra.mxu1 %v30128_v24  ;;  %v17345_v18 = vpop.f32.mrf.mxu1 }
 0xab4   : > { %v17346_v57 = vadd.f32 %v17345_v18, %v30114_v42  ;;  %v15731_v42 = vld [vmem:[#allocation2] sm:$0xff] }
 0xab5   : > { %v17347_v51 = vpop.f32.mrf.mxu1 }
 0xab6   : > { %v17348_v35 = vadd.f32 %v17347_v51, %v30116_v25 }
 0xab7   : > { %v17349_v37 = vpop.f32.mrf.mxu1 }
 0xab8   : > { %v17606_v47 = vcombine.low %v17346_v57, %v17348_v35 }
 0xab9   : > { %v17350_v30 = vpop.f32.mrf.mxu1 }
 0xaba   : > { %v17614_v24 = vrot.slane %v17606_v47, %v24145_v50 }
 0xaf3   : > { %v17427_v7 = vpop.f32.mrf.mxu1 }
 0xaf4   : > { %v17428_v34 = vadd.f32 %v17427_v7, %v30133_v2 }
 0xaf5   : > { %v17429_v27 = vpop.f32.mrf.mxu1 }
 0xaf6   : > { %v17430_v12 = vadd.f32 %v17429_v27, %v30140_v8 }
 0xaf7   : > { %v17431_v21 = vpop.f32.mrf.mxu1 }
 0xaf8   : > { %v17607_v40 = vcombine.low %v17428_v34, %v17430_v12 }
 0xaf9   : > { %v17432_v62 = vpop.f32.mrf.mxu1 }
 0xafa   : > { %v17621_v56 = vrot.slane %v17607_v40, %v24145_v50 }
 0xafc   : > { %v17622_v38 = vcombine.low %v17614_v24, %v17621_v56 }
 0xafe   : > { %v17642_v20 = vadd.f32 %v17622_v38, %v15731_v42 }
 0xb00   : > { %17644 = vst [vmem:[#allocation2] sm:$0xff] %v17642_v20 }
 0xb33   : > { %v17509_v25 = vpop.f32.mrf.mxu1 }
 0xb34   : > { %v17510_v41 = vadd.f32 %v17509_v25, %v30175_v33  ;;  %v15732_v33 = vld [vmem:[#allocation2 + $0x8] sm:$0xff] }
 0xb35   : > { %v17511_v54 = vpop.f32.mrf.mxu1 }
 0xb36   : > { %v17512_v3 = vadd.f32 %v17511_v54, %v30178_v22 }
 0xb37   : > { %v17513_v2 = vpop.f32.mrf.mxu1 }
 0xb38   : > { %v17623_v55 = vcombine.low %v17510_v41, %v17512_v3 }
 0xb39   : > { %v17514_v8 = vpop.f32.mrf.mxu1 }
 0xb3a   : > { %v17631_v14 = vrot.slane %v17623_v55, %v24145_v50 }
 0xb73   : > { %v17591_v32 = vpop.f32.mrf.mxu1 }
 0xb74   : > { %v17592_v43 = vadd.f32 %v17591_v32, %v30213_v28 }
 0xb75   : > { %v17593_v10 = vpop.f32.mrf.mxu1 }
 0xb76   : > { %v17594_v19 = vadd.f32 %v17593_v10, %v30216_v48 }
 0xb77   : > { %v17595_v23 = vpop.f32.mrf.mxu1 }
 0xb78   : > { %v17624_v59 = vcombine.low %v17592_v43, %v17594_v19 }
 0xb79   : > { %v17596_v6 = vpop.f32.mrf.mxu1 }
 0xb7a   : > { %v17638_v53 = vrot.slane %v17624_v59, %v24145_v50 }
 0xb7c   : > { %v17639_v1 = vcombine.low %v17631_v14, %v17638_v53  ;;  %17649 = sbr.rel (%p21349_p5) target bundleno = 3213 (0xc8d), region = 56 }
 0xb7e   : > { %v17643_v16 = vadd.f32 %v17639_v1, %v15732_v33 }
 0xb80   : > { %17645 = vst [vmem:[#allocation2 + $0x8] sm:$0xff] %v17643_v16 }
 0xb81   : > { %v23845_v22 = vld [vmem:[%s30492_s5 + $0x78] sm:$0xff]   ;;  %v23849_v5 = vld [vmem:[%s30492_s5 + $0x70] sm:$0xff]   ;;  %v23853_v49 = vld [vmem:[%s30492_s5 + $0x68] sm:$0xff]   ;;  %v17672_v2 = vsub.s32 4, %v24127_v44  ;;  %v17676_v55 = vsub.s32 5, %v24127_v44  ;;  %v17680_v10 = vsub.s32 6, %v24127_v44 }
 0xb82   : > { %v23846_v28 = vld [vmem:[%s30492_s5 + $0xf8] sm:$0xff]   ;;  %21421 = vmatprep.subr.bf16.mxu0 %v23845_v22  ;;  %v23850_v60 = vld [vmem:[%s30492_s5 + $0xf0] sm:$0xff]   ;;  %v23854_v36 = vld [vmem:[%s30492_s5 + $0xe8] sm:$0xff]   ;;  %v17684_v43 = vsub.s32 7, %v24127_v44 }
 0xb83   : > { %v23847_v48 = vld [vmem:[%s30492_s5 + $0x38] sm:$0xff]   ;;  %21443 = vmatprep.subr.bf16.mxu1 %v23846_v28  ;;  %v23851_v58 = vld [vmem:[%s30492_s5 + $0x30] sm:$0xff]   ;;  %v23855_v0 = vld [vmem:[%s30492_s5 + $0x28] sm:$0xff]  }
 0xb84   : > { %v23848_v9 = vld [vmem:[%s30492_s5 + $0xb8] sm:$0xff]   ;;  %21422 = vmatpush3.bf16.msra.mxu0 %v23847_v48  ;;  %v23852_v11 = vld [vmem:[%s30492_s5 + $0xb0] sm:$0xff]   ;;  %v23856_v39 = vld [vmem:[%s30492_s5 + $0xa8] sm:$0xff]  }
 0xb85   : > { %21444 = vmatpush3.bf16.msra.mxu1 %v23848_v9  ;;  %21423 = vmatprep.subr.bf16.mxu0 %v23849_v5  ;;  %v23857_v61 = vld [vmem:[%s30492_s5 + $0x60] sm:$0xff]   ;;  %v23861_v46 = vld [vmem:[%s30492_s5 + $0x58] sm:$0xff]   ;;  %v23865_v18 = vld [vmem:[%s30492_s5 + $0x50] sm:$0xff]  }
 0xb86   : > { %21445 = vmatprep.subr.bf16.mxu1 %v23850_v60  ;;  %v23858_v63 = vld [vmem:[%s30492_s5 + $0xe0] sm:$0xff]   ;;  %v23862_v45 = vld [vmem:[%s30492_s5 + $0xd8] sm:$0xff]   ;;  %v23866_v51 = vld [vmem:[%s30492_s5 + $0xd0] sm:$0xff]  }
 0xb87   : > { %v23859_v4 = vld [vmem:[%s30492_s5 + $0x20] sm:$0xff]   ;;  %v23863_v15 = vld [vmem:[%s30492_s5 + $0x18] sm:$0xff]   ;;  %v23867_v57 = vld [vmem:[%s30492_s5 + $0x10] sm:$0xff]  }
 0xb88   : > { %21424 = vmatpush3.bf16.msra.mxu0 %v23851_v58  ;;  %v23860_v31 = vld [vmem:[%s30492_s5 + $0xa0] sm:$0xff]   ;;  %v23864_v13 = vld [vmem:[%s30492_s5 + $0x98] sm:$0xff]   ;;  %v23868_v35 = vld [vmem:[%s30492_s5 + $0x90] sm:$0xff]  }
 0xb89   : > { %21446 = vmatpush3.bf16.msra.mxu1 %v23852_v11  ;;  %21425 = vmatprep.subr.bf16.mxu0 %v23853_v49  ;;  %v23869_v37 = vld [vmem:[%s30492_s5 + $0x48] sm:$0xff]   ;;  %v23873_v27 = vld [vmem:[%s30492_s5 + $0x40] sm:$0xff]   ;;  %v23877_v42 = vld [vmem:[%s30492_s5 + $0x178] sm:$0xff]  }
 0xb8a   : > { %21447 = vmatprep.subr.bf16.mxu1 %v23854_v36  ;;  %v23870_v47 = vld [vmem:[%s30492_s5 + $0xc8] sm:$0xff]   ;;  %v23874_v34 = vld [vmem:[%s30492_s5 + $0xc0] sm:$0xff]   ;;  %v23878_v20 = vld [vmem:[%s30492_s5 + $0x1f8] sm:$0xff]  }
 0xb8b   : > { %v23871_v30 = vld [vmem:[%s30492_s5 + $0x8] sm:$0xff]   ;;  %v23875_v12 = vld [vmem:[%s30492_s5] sm:$0xff]   ;;  %v23879_v33 = vld [vmem:[%s30492_s5 + $0x138] sm:$0xff]  }
 0xb8c   : > { %21426 = vmatpush3.bf16.msra.mxu0 %v23855_v0  ;;  %v23872_v7 = vld [vmem:[%s30492_s5 + $0x88] sm:$0xff]   ;;  %v23876_v21 = vld [vmem:[%s30492_s5 + $0x80] sm:$0xff]   ;;  %v23881_v48 = vld [vmem:[%s30492_s5 + $0x170] sm:$0xff]  }
 0xb8d   : > { %21448 = vmatpush3.bf16.msra.mxu1 %v23856_v39  ;;  %21427 = vmatprep.subr.bf16.mxu0 %v23857_v61  ;;  %v17652_v40 = vld [vmem:[%s30491_s4] sm:$0xff]  ;;  %v23880_v9 = vld [vmem:[%s30492_s5 + $0x1b8] sm:$0xff]   ;;  %v23882_v5 = vld [vmem:[%s30492_s5 + $0x1f0] sm:$0xff]  }
 0xb8e   : > { %21449 = vmatprep.subr.bf16.mxu1 %v23858_v63  ;;  %v17657_v62 = vrot.slane %v17652_v40, %v24873_v26  ;;  %v17661_v24 = vrot.slane %v17652_v40, %v24882_v29  ;;  %v17665_v56 = vrot.slane %v17652_v40, %v25701_v17  ;;  %v17669_v38 = vrot.slane %v17652_v40, %v25706_v52  ;;  %v17650_v41 = vld [vmem:[#allocation2] sm:$0xff]  ;;  %v23883_v60 = vld [vmem:[%s30492_s5 + $0x130] sm:$0xff]   ;;  %v23885_v49 = vld [vmem:[%s30492_s5 + $0x168] sm:$0xff]  }
 0xb8f   : > { %v17673_v6 = vrot.slane %v17652_v40, %v17672_v2  ;;  %v17677_v14 = vrot.slane %v17652_v40, %v17676_v55  ;;  %v17681_v16 = vrot.slane %v17652_v40, %v17680_v10  ;;  %v17685_v22 = vrot.slane %v17652_v40, %v17684_v43  ;;  %v23884_v36 = vld [vmem:[%s30492_s5 + $0x1b0] sm:$0xff]   ;;  %v23886_v0 = vld [vmem:[%s30492_s5 + $0x1e8] sm:$0xff]  }
 0xb90   : > { %21428 = vmatpush3.bf16.msra.mxu0 %v23859_v4  ;;  %v17686_v25 = vcombine.low %v17657_v62, %v17661_v24  ;;  %v17687_v54 = vcombine.low %v17665_v56, %v17669_v38  ;;  %v23887_v39 = vld [vmem:[%s30492_s5 + $0x128] sm:$0xff]   ;;  %v23889_v4 = vld [vmem:[%s30492_s5 + $0x160] sm:$0xff]   ;;  %v23900_v62 = vld [vmem:[%s30492_s5 + $0x190] sm:$0xff]  }
 0xb91   : > { %21450 = vmatpush3.bf16.msra.mxu1 %v23860_v31  ;;  %21429 = vmatprep.subr.bf16.mxu0 %v23861_v46  ;;  %v17703_v58 = vcombine.low %v17673_v6, %v17677_v14  ;;  %v17704_v11 = vcombine.low %v17681_v16, %v17685_v22  ;;  %v23888_v31 = vld [vmem:[%s30492_s5 + $0x1a8] sm:$0xff]   ;;  %v23890_v46 = vld [vmem:[%s30492_s5 + $0x1e0] sm:$0xff]  }
 0xb92   : > { %21451 = vmatprep.subr.bf16.mxu1 %v23862_v45  ;;  %v17694_v26 = vrot.slane %v17686_v25, %v24145_v50  ;;  %v17701_v29 = vrot.slane %v17687_v54, %v24145_v50  ;;  %v23891_v45 = vld [vmem:[%s30492_s5 + $0x120] sm:$0xff]   ;;  %v23901_v40 = vld [vmem:[%s30492_s5 + $0x148] sm:$0xff]  }
 0xb93   : > { %v17711_v61 = vrot.slane %v17703_v58, %v24145_v50  ;;  %v17718_v63 = vrot.slane %v17704_v11, %v24145_v50  ;;  %v23902_v38 = vld [vmem:[%s30492_s5 + $0x1c8] sm:$0xff]   ;;  %v23905_v54 = vld [vmem:[%s30492_s5 + $0x140] sm:$0xff]  }
 0xb94   : > { %21430 = vmatpush3.bf16.msra.mxu0 %v23863_v15  ;;  %v17702_v17 = vcombine.low %v17694_v26, %v17701_v29  ;;  %v23906_v29 = vld [vmem:[%s30492_s5 + $0x1c0] sm:$0xff]  }
 0xb95   : > { %21452 = vmatpush3.bf16.msra.mxu1 %v23864_v13  ;;  %21431 = vmatprep.subr.bf16.mxu0 %v23865_v18  ;;  %v17719_v15 = vcombine.low %v17711_v61, %v17718_v63  ;;  %v23893_v13 = vld [vmem:[%s30492_s5 + $0x158] sm:$0xff]   ;;  %v23892_v18 = vld [vmem:[%s30492_s5 + $0x1a0] sm:$0xff]  }
 0xb96   : > { %21453 = vmatprep.subr.bf16.mxu1 %v23866_v51  ;;  %v17722_v3 = vadd.f32 %v17702_v17, %v17650_v41  ;;  %v23894_v51 = vld [vmem:[%s30492_s5 + $0x1d8] sm:$0xff]   ;;  %v23907_v41 = vld [vmem:[%s30492_s5 + $0x100] sm:$0xff]  }
 0xb97   : > { %v23908_v17 = vld [vmem:[%s30492_s5 + $0x180] sm:$0xff]  }
 0xb98   : > { %21432 = vmatpush3.bf16.msra.mxu0 %v23867_v57  ;;  %v17724_v52 = vmax.f32 %v17722_v3, 0.0  ;;  %v17651_v57 = vld [vmem:[#allocation2 + $0x8] sm:$0xff]  ;;  %v21350_v6 = vld [vmem:[%s30493_s6] ss:$0 sm:$0xff] }
 0xb99   : > { %21454 = vmatpush3.bf16.msra.mxu1 %v23868_v35  ;;  %21433 = vmatprep.subr.bf16.mxu0 %v23869_v37  ;;  %v23895_v35 = vld [vmem:[%s30492_s5 + $0x118] sm:$0xff]   ;;  %v17723_v37 = vadd.f32 %v17719_v15, %v17651_v57 }
 0xb9a   : > { %21455 = vmatprep.subr.bf16.mxu1 %v23870_v47  ;;  %v17735_v8 = vrot.slane %v17724_v52, %v24145_v50  ;;  %v17728_v32 = vcombine.high %v17724_v52, %v17724_v52  ;;  %v23897_v47 = vld [vmem:[%s30492_s5 + $0x150] sm:$0xff]  }
 0xb9c   : > { %21434 = vmatpush3.bf16.msra.mxu0 %v23871_v30  ;;  %v17743_v19 = vcombine.high %v17735_v8, %v17735_v8  ;;  %v17742_v23 = vrot.slane %v17728_v32, %v24145_v50  ;;  %v17770_v59 = vpack.c.bf16 %v17735_v8, %v17735_v8  ;;  %v23896_v30 = vld [vmem:[%s30492_s5 + $0x198] sm:$0xff]  }
 0xb9d   : > { %21456 = vmatpush3.bf16.msra.mxu1 %v23872_v7  ;;  %21435 = vmatprep.subr.bf16.mxu0 %v23873_v27  ;;  %v17725_v7 = vmax.f32 %v17723_v37, 0.0  ;;  %v23898_v27 = vld [vmem:[%s30492_s5 + $0x1d0] sm:$0xff]  }
 0xb9e   : > { %21457 = vmatprep.subr.bf16.mxu1 %v23874_v34  ;;  %v17771_v53 = vpack.c.bf16 %v17743_v19, %v17743_v19  ;;  %v17744_v1 = vcombine.high %v17742_v23, %v17742_v23  ;;  %v17772_v28 = vpack.c.bf16 %v17742_v23, %v17742_v23  ;;  %v23899_v34 = vld [vmem:[%s30492_s5 + $0x110] sm:$0xff]  }
 0xba0   : > { %21436 = vmatpush3.bf16.msra.mxu0 %v23875_v12  ;;  %18329 = vmatprep.mubr.bf16.mxu0 %v17771_v53  ;;  %v17773_v44 = vpack.c.bf16 %v17744_v1, %v17744_v1  ;;  %v17752_v12 = vrot.slane %v17725_v7, %v24145_v50 }
 0xba1   : > { %21458 = vmatpush3.bf16.msra.mxu1 %v23876_v21  ;;  %21465 = vmatprep.subr.bf16.mxu0 %v23877_v42  ;;  %v17745_v21 = vcombine.high %v17725_v7, %v17725_v7  ;;  %v23903_v42 = vld [vmem:[%s30492_s5 + $0x108] sm:$0xff]  }
 0xba2   : > { %21487 = vmatprep.subr.bf16.mxu1 %v23878_v20  ;;  %18369 = vmatprep.mubr.bf16.mxu1 %v17773_v44  ;;  %v17760_v24 = vcombine.high %v17752_v12, %v17752_v12  ;;  %v17774_v3 = vpack.c.bf16 %v17752_v12, %v17752_v12 }
 0xba3   : > { %18330 = vmatmul.mubr.bf16.vlgmr.msra.gmra.mxu0 %v17770_v59  ;;  %v17759_v56 = vrot.slane %v17745_v21, %v24145_v50  ;;  %v23904_v50 = vld [vmem:[%s30492_s5 + $0x188] sm:$0xff]  }
 0xba4   : > { %21466 = vmatpush3.bf16.msra.mxu0 %v23879_v33  ;;  %18370 = vmatmul.mubr.bf16.vlgmr.msra.gmra.mxu1 %v17772_v28  ;;  %v17775_v20 = vpack.c.bf16 %v17760_v24, %v17760_v24 }
 0xba5   : > { %21467 = vmatprep.subr.bf16.mxu0 %v23881_v48  ;;  %21488 = vmatpush3.bf16.msra.mxu1 %v23880_v9  ;;  %v17761_v25 = vcombine.high %v17759_v56, %v17759_v56  ;;  %v17776_v52 = vpack.c.bf16 %v17759_v56, %v17759_v56 }
 0xba6   : > { %21489 = vmatprep.subr.bf16.mxu1 %v23882_v5  ;;  %18409 = vmatprep.mubr.bf16.mxu0 %v17775_v20 }
 0xba7   : > { %v17777_v26 = vpack.c.bf16 %v17761_v25, %v17761_v25 }
 0xba8   : > { %21468 = vmatpush3.bf16.msra.mxu0 %v23883_v60 }
 0xba9   : > { %21469 = vmatprep.subr.bf16.mxu0 %v23885_v49  ;;  %21490 = vmatpush3.bf16.msra.mxu1 %v23884_v36 }
 0xbaa   : > { %21491 = vmatprep.subr.bf16.mxu1 %v23886_v0  ;;  %18449 = vmatprep.mubr.bf16.mxu1 %v17777_v26 }
 0xbac   : > { %21470 = vmatpush3.bf16.msra.mxu0 %v23887_v39 }
 0xbad   : > { %21471 = vmatprep.subr.bf16.mxu0 %v23889_v4  ;;  %21492 = vmatpush3.bf16.msra.mxu1 %v23888_v31 }
 0xbae   : > { %21493 = vmatprep.subr.bf16.mxu1 %v23890_v46 }
 0xbb0   : > { %21472 = vmatpush3.bf16.msra.mxu0 %v23891_v45 }
 0xbb1   : > { %21473 = vmatprep.subr.bf16.mxu0 %v23893_v13  ;;  %21494 = vmatpush3.bf16.msra.mxu1 %v23892_v18 }
 0xbb2   : > { %21495 = vmatprep.subr.bf16.mxu1 %v23894_v51 }
 0xbb4   : > { %21474 = vmatpush3.bf16.msra.mxu0 %v23895_v35 }
 0xbb5   : > { %21475 = vmatprep.subr.bf16.mxu0 %v23897_v47  ;;  %21496 = vmatpush3.bf16.msra.mxu1 %v23896_v30 }
 0xbb6   : > { %21497 = vmatprep.subr.bf16.mxu1 %v23898_v27 }
 0xbb8   : > { %21476 = vmatpush3.bf16.msra.mxu0 %v23899_v34 }
 0xbb9   : > { %21477 = vmatprep.subr.bf16.mxu0 %v23901_v40  ;;  %21498 = vmatpush3.bf16.msra.mxu1 %v23900_v62 }
 0xbba   : > { %21499 = vmatprep.subr.bf16.mxu1 %v23902_v38 }
 0xbbc   : > { %21478 = vmatpush3.bf16.msra.mxu0 %v23903_v42 }
 0xbbd   : > { %21479 = vmatprep.subr.bf16.mxu0 %v23905_v54  ;;  %21500 = vmatpush3.bf16.msra.mxu1 %v23904_v50 }
 0xbbe   : > { %21501 = vmatprep.subr.bf16.mxu1 %v23906_v29 }
 0xbc0   : > { %21480 = vmatpush3.bf16.msra.mxu0 %v23907_v41 }
 0xbc1   : > { %21502 = vmatpush3.bf16.msra.mxu1 %v23908_v17 }
 0xbc3   : > { %18410 = vmatmul.mubr.bf16.vlgmr.msra.gmra.mxu0 %v17774_v3 }
 0xbc4   : > { %18450 = vmatmul.mubr.bf16.vlgmr.msra.gmra.mxu1 %v17776_v52 }
 0xc63   : > { %v21437_v2 = vpop.f32.mrf.mxu0 }
 0xc64   : > { %v21459_v55 = vpop.f32.mrf.mxu1 }
 0xc65   : > { %v21438_v8 = vpop.f32.mrf.mxu0 }
 0xc66   : > { %v21460_v32 = vpop.f32.mrf.mxu1  ;;  %v21439_v59 = vadd.f32 %v21438_v8, %v21437_v2 }
 0xc67   : > { %v21440_v10 = vpop.f32.mrf.mxu0  ;;  %v21461_v53 = vadd.f32 %v21460_v32, %v21459_v55 }
 0xc68   : > { %v21462_v43 = vpop.f32.mrf.mxu1  ;;  %v18332_v14 = vadd.f32 %v21439_v59, %v21350_v6 }
 0xc69   : > { %v21441_v19 = vpop.f32.mrf.mxu0 }
 0xc6a   : > { %v21463_v23 = vpop.f32.mrf.mxu1  ;;  %v18372_v22 = vadd.f32 %v21461_v53, %v18332_v14 }
 0xc83   : > { %v21481_v1 = vpop.f32.mrf.mxu0 }
 0xc84   : > { %v21503_v33 = vpop.f32.mrf.mxu1 }
 0xc85   : > { %v21482_v16 = vpop.f32.mrf.mxu0 }
 0xc86   : > { %v21483_v28 = vadd.f32 %v21482_v16, %v21481_v1  ;;  %v21504_v48 = vpop.f32.mrf.mxu1 }
 0xc87   : > { %v21484_v44 = vpop.f32.mrf.mxu0  ;;  %v21505_v5 = vadd.f32 %v21504_v48, %v21503_v33 }
 0xc88   : > { %v18412_v9 = vadd.f32 %v21483_v28, %v18372_v22  ;;  %v21506_v60 = vpop.f32.mrf.mxu1 }
 0xc89   : > { %v21485_v58 = vpop.f32.mrf.mxu0 }
 0xc8a   : > { %v18452_v11 = vadd.f32 %v21505_v5, %v18412_v9  ;;  %v21507_v49 = vpop.f32.mrf.mxu1 }
 0xc8c   : > { %18457 = vst [vmem:[#allocation3] sm:$0x3] %v18452_v11 }
 0xc8d PF: > { %p21513_p6 = scmp.eq.s32.totalorder %s23994_s25, 2  ;;  %s23947_s22 = smov [#allocation3]  }
 0xc8e   : > { %s18465_s23 = sshll.u32 %s23947_s22, 4  ;;  %s18466_s23 = int_to_ptr.vmem [resolvable:$true] %s18465_s23 }
 0xc8f   : > { %s23909_s26 = scalar_lea.vmem %s18466_s23, 32  ;;  %p23916_p10 = scmp.lt.s32.totalorder %s18466_s23, %s18466_s23 }
 0xc90   : > { %p23910_p7 = scmp.ne.s32.totalorder %s18466_s23, %s23909_s26  ;;  %p23917_p11 = scmp.lt.s32.totalorder %s23909_s26, %s23909_s26 }
 0xc92   : > { %p23911_p8 = pnand %p23910_p7, %p21513_p6  ;;  %p23918_p12 = por %p23917_p11, %p23916_p10 }
 0xc94   : > { %p23912_p9 = pneg %p23911_p8 }
 0xc96   : > { %p23919_p13 = pnand %p23918_p12, %p23912_p9 }
 0xc98   : > { %23922 = shalt.err (!%p23919_p13)
}
 0xc99   : > { %21510 = dma.vmem_to_hbm [thread:$0]  (%p21513_p6), %s18466_s23, 32, %s30494_s7, [#allocation4]  }
 0xc9a   : > { %23938 = dma.done.wait (%p21513_p6), [#allocation4], 32  }
 0xc9b   : > { %23940 = vsyncadd (%p21513_p6), [#allocation4], 4294967264 }
 0xc9c PF: > { %s18_s24 = sadd.s32 1, %s23943_s24  }
 0xc9d   : > { %p15_p0 = scmp.ge.s32.totalorder %s18_s24, 5  }
 0xc9f   :  { %17 = sbr.rel (!%p15_p0) target bundleno = 1 (0x1), region = 90 }
 0xca4   :  { %18478 = vsyncpa [#allocation4], 1 }
 0xca5   :  { %18480 = vsyncpa [#allocation4 + $0x1], 1 }

</bundles_post_ra>
